<compile_context>
chip_gen: v5e
topology: v5e:2x2
jax: 0.10.0
libtpu: 0.0.40
codegen_flags: <defaults>
</compile_context>

<pallas_src>
import functools

import jax
import jax.numpy as jnp
import numpy as np
from jax.experimental import pallas as pl
from jax.experimental.pallas import tpu as pltpu

_VMEM_LIMIT = 32 * 1024 * 1024


def _cp(ndims):
    return pltpu.CompilerParams(
        dimension_semantics=("parallel",) * ndims,
        vmem_limit_bytes=_VMEM_LIMIT,
    )


# ----------------------------------------------------------------------------
# M-tiling helper: prefer a tile that divides M exactly (multiple of 8); fall
# back to zero/neutral row padding only if no reasonable divisor exists.
# ----------------------------------------------------------------------------

def _choose_tile(M, max_tile=4096, min_tile=256):
    if M <= max_tile:
        return M, 1, 0
    start = max(min_tile, (max_tile // 8) * 8)
    for d in range(start, min_tile - 1, -8):
        if M % d == 0:
            return d, M // d, 0
    tm = start
    Mp = -(-M // tm) * tm
    return tm, Mp // tm, Mp - M


# ----------------------------------------------------------------------------
# Pallas kernels
# ----------------------------------------------------------------------------

def _mm_bn_kernel(x_ref, ab_ref, w_ref, y_ref, ps_ref, *, relu_in):
    """y = (relu)(x * a + b) @ w  (bf16 MXU), plus per-tile BN partial sums."""
    x = x_ref[...] * ab_ref[0:1, :] + ab_ref[1:2, :]
    if relu_in:
        x = jnp.maximum(x, 0.0)
    y = jnp.dot(x.astype(jnp.bfloat16), w_ref[...],
                preferred_element_type=jnp.float32)
    y_ref[...] = y
    s1 = jnp.sum(y, axis=0, keepdims=True)
    s2 = jnp.sum(y * y, axis=0, keepdims=True)
    ps_ref[0] = jnp.concatenate([s1, s2], axis=0)


def _affine_kernel(y_ref, ab_ref, o_ref, *, relu):
    v = y_ref[...] * ab_ref[0:1, :] + ab_ref[1:2, :]
    if relu:
        v = jnp.maximum(v, 0.0)
    o_ref[...] = v


def _make_wsum_kernel(n):
    """DARTS mixture: out = sum_b (z_b * scale_b + offset_b) (per-channel)."""
    def kern(*refs):
        sc_ref, of_ref = refs[0], refs[1]
        o_ref = refs[2 + n]
        acc = refs[2][...] * sc_ref[0:1, :] + of_ref[0:1, :]
        for b in range(1, n):
            acc = acc + refs[2 + b][...] * sc_ref[b:b + 1, :] + of_ref[b:b + 1, :]
        o_ref[...] = acc
    return kern


def _dw_kernel(x_ref, ab_ref, w_ref, o_ref, *, k, dil, relu):
    """Depthwise kxk conv over a padded image; input BN-affine + ReLU fused.
    The k*k shifted windows are read in-kernel (no HBM tap materialization)."""
    Ho, Wo, C = o_ref.shape[1], o_ref.shape[2], o_ref.shape[3]
    a = ab_ref[0:1, :].reshape(1, 1, C)
    b = ab_ref[1:2, :].reshape(1, 1, C)
    acc = None
    for i in range(k):
        for j in range(k):
            win = x_ref[0, i * dil:i * dil + Ho, j * dil:j * dil + Wo, :]
            v = win * a + b
            if relu:
                v = jnp.maximum(v, 0.0)
            contrib = v * w_ref[i * k + j:i * k + j + 1, :].reshape(1, 1, C)
            acc = contrib if acc is None else acc + contrib
    o_ref[...] = acc[None]


def _maxpool_kernel(x_ref, o_ref, *, k):
    Ho, Wo = o_ref.shape[1], o_ref.shape[2]
    acc = x_ref[0, 0:Ho, 0:Wo, :]
    for i in range(k):
        for j in range(k):
            if i == 0 and j == 0:
                continue
            acc = jnp.maximum(acc, x_ref[0, i:i + Ho, j:j + Wo, :])
    o_ref[...] = acc[None]


def _avgpool_kernel(x_ref, rc_ref, o_ref, *, k):
    Ho, Wo = o_ref.shape[1], o_ref.shape[2]
    acc = x_ref[0, 0:Ho, 0:Wo, :]
    for i in range(k):
        for j in range(k):
            if i == 0 and j == 0:
                continue
            acc = acc + x_ref[0, i:i + Ho, j:j + Wo, :]
    o_ref[...] = acc[None] * rc_ref[...]


def _head_kernel(x_ref, w_ref, b_ref, o_ref):
    """Global AvgPool2d(7) + Linear classifier, fused."""
    pooled = jnp.mean(x_ref[...], axis=1)
    o_ref[...] = jnp.dot(pooled, w_ref[...],
                         preferred_element_type=jnp.float32) + b_ref[...]


# ----------------------------------------------------------------------------
# pallas_call wrappers (jitted per shape signature -> deduped compiles)
# ----------------------------------------------------------------------------

def _matmul_bn_stats(x2, ab_in, w, relu_in):
    """Tiled (M-grid) matmul with fused input affine/ReLU; returns raw output and
    the deferred BN affine (gamma=rstd, beta=-mean*rstd) of that output."""
    M, K = x2.shape
    Cout = w.shape[1]
    tm, ntiles, pad = _choose_tile(M)
    if pad:
        # pad rows with the per-column "neutral" value so affine(+relu) -> 0 and
        # the BN partial sums stay exact.
        neutral = -ab_in[1] / ab_in[0]
        fill = jnp.broadcast_to(neutral[None, :], (pad, K)).astype(x2.dtype)
        x2 = jnp.concatenate([x2, fill], axis=0)
    y, ps = pl.pallas_call(
        functools.partial(_mm_bn_kernel, relu_in=relu_in),
        grid=(ntiles,),
        in_specs=[pl.BlockSpec((tm, K), lambda i: (i, 0)),
                  pl.BlockSpec((2, K), lambda i: (0, 0)),
                  pl.BlockSpec((K, Cout), lambda i: (0, 0))],
        out_specs=(pl.BlockSpec((tm, Cout), lambda i: (i, 0)),
                   pl.BlockSpec((1, 2, Cout), lambda i: (i, 0, 0))),
        out_shape=(jax.ShapeDtypeStruct((M + pad, Cout), jnp.float32),
                   jax.ShapeDtypeStruct((ntiles, 2, Cout), jnp.float32)),
        compiler_params=_cp(1),
    )(x2, ab_in, w)
    ssum = jnp.sum(ps[:, 0, :], axis=0)
    ssq = jnp.sum(ps[:, 1, :], axis=0)
    mean = ssum / M
    var = ssq / M - mean * mean
    rstd = jax.lax.rsqrt(var + 1e-5)
    if pad:
        y = y[:M]
    return y, rstd, -mean * rstd


@functools.partial(jax.jit, static_argnames=("relu_in",))
def conv1x1_bn(x, w, relu_in=False):
    N, H, W, C = x.shape
    ab = jnp.concatenate([jnp.ones((1, C), jnp.float32),
                          jnp.zeros((1, C), jnp.float32)], axis=0)
    y, g, b = _matmul_bn_stats(x.reshape(N * H * W, C), ab, w, relu_in)
    return y.reshape(N, H, W, w.shape[1]), g, b


def _pad_hw_vec(x, p, vec):
    """Pad H/W with a per-channel value (so a fused affine maps the border to 0)."""
    N, H, W, C = x.shape
    full = jnp.broadcast_to(vec.astype(x.dtype).reshape(1, 1, 1, C),
                            (N, H + 2 * p, W + 2 * p, C))
    return jax.lax.dynamic_update_slice(full, x, (0, p, p, 0))


@functools.partial(jax.jit, static_argnames=("stride", "relu_in"))
def conv3x3_bn(x, gamma, beta, w, stride=1, relu_in=False):
    """Dense 3x3 conv (stems) with the previous BN/ReLU fused into the input affine.
    Returns the raw conv output plus its own deferred BN affine."""
    N, H, W, C = x.shape
    Cout = w.shape[1]
    xp = _pad_hw_vec(x, 1, -beta / gamma)
    Ho = (H - 1) // stride + 1
    Wo = (W - 1) // stride + 1
    # TODO(synk): read the 9 shifted windows inside the kernel instead of building
    # this (small-channel) im2col slab for the three stem convolutions.
    taps = []
    for i in range(3):
        for j in range(3):
            taps.append(xp[:, i:i + stride * (Ho - 1) + 1:stride,
                           j:j + stride * (Wo - 1) + 1:stride, :])
    x2 = jnp.concatenate(taps, axis=-1).reshape(N * Ho * Wo, 9 * C)
    ab = jnp.concatenate([jnp.tile(gamma, 9)[None, :],
                          jnp.tile(beta, 9)[None, :]], axis=0)
    y, g, b = _matmul_bn_stats(x2, ab, w, relu_in)
    return y.reshape(N, Ho, Wo, Cout), g, b


@functools.partial(jax.jit, static_argnames=("relu",))
def _affine_apply(z, gamma, beta, relu=False):
    """Apply BN normalize (+optional ReLU) as one tiled pass."""
    N, H, W, C = z.shape
    M = N * H * W
    tm, ntiles, pad = _choose_tile(M)
    z2 = z.reshape(M, C)
    if pad:
        z2 = jnp.pad(z2, ((0, pad), (0, 0)))
    ab = jnp.concatenate([gamma[None, :], beta[None, :]], axis=0)
    out = pl.pallas_call(
        functools.partial(_affine_kernel, relu=relu),
        grid=(ntiles,),
        in_specs=[pl.BlockSpec((tm, C), lambda i: (i, 0)),
                  pl.BlockSpec((2, C), lambda i: (0, 0))],
        out_specs=pl.BlockSpec((tm, C), lambda i: (i, 0)),
        out_shape=jax.ShapeDtypeStruct((M + pad, C), jnp.float32),
        compiler_params=_cp(1),
    )(z2, ab)
    if pad:
        out = out[:M]
    return out.reshape(N, H, W, C)


@jax.jit
def _weighted_sum(zs, scales, offsets):
    """One kernel for the whole DARTS mixture of a node (deferred BN + arch weight
    folded into per-branch per-channel scale/offset)."""
    n = len(zs)
    N, H, W, C = zs[0].shape
    M = N * H * W
    per_row = n * max(C, 128) * 4           # lane-padded VMEM bytes per row
    cap = max(256, ((8 * 1024 * 1024) // per_row) // 8 * 8)
    tm, ntiles, pad = _choose_tile(M, max_tile=min(4096, cap))
    z2s = []
    for z in zs:
        z2 = z.reshape(M, C)
        if pad:
            z2 = jnp.pad(z2, ((0, pad), (0, 0)))
        z2s.append(z2)
    S = jnp.stack(scales, axis=0)
    O = jnp.stack(offsets, axis=0)
    in_specs = ([pl.BlockSpec((n, C), lambda i: (0, 0)),
                 pl.BlockSpec((n, C), lambda i: (0, 0))] +
                [pl.BlockSpec((tm, C), lambda i: (i, 0)) for _ in range(n)])
    out = pl.pallas_call(
        _make_wsum_kernel(n),
        grid=(ntiles,),
        in_specs=in_specs,
        out_specs=pl.BlockSpec((tm, C), lambda i: (i, 0)),
        out_shape=jax.ShapeDtypeStruct((M + pad, C), jnp.float32),
        compiler_params=_cp(1),
    )(S, O, *z2s)
    if pad:
        out = out[:M]
    return out.reshape(N, H, W, C)


@functools.partial(jax.jit,
                   static_argnames=("k", "stride", "padding", "dilation", "relu"))
def depthwise(x, gamma, beta, w_dw, k=3, stride=1, padding=1, dilation=1, relu=True):
    """Depthwise kxk conv; preceding BN (input affine) and ReLU fused.  stride>1 is
    computed at stride 1 and subsampled (far cheaper than materializing k*k taps)."""
    N, H, W, C = x.shape
    xp = _pad_hw_vec(x, padding, -beta / gamma)
    Hp, Wp = H + 2 * padding, W + 2 * padding
    Ho = Hp - dilation * (k - 1)
    Wo = Wp - dilation * (k - 1)
    ab = jnp.concatenate([gamma[None, :], beta[None, :]], axis=0)
    out = pl.pallas_call(
        functools.partial(_dw_kernel, k=k, dil=dilation, relu=relu),
        grid=(N,),
        in_specs=[pl.BlockSpec((1, Hp, Wp, C), lambda n: (n, 0, 0, 0)),
                  pl.BlockSpec((2, C), lambda n: (0, 0)),
                  pl.BlockSpec((k * k, C), lambda n: (0, 0))],
        out_specs=pl.BlockSpec((1, Ho, Wo, C), lambda n: (n, 0, 0, 0)),
        out_shape=jax.ShapeDtypeStruct((N, Ho, Wo, C), jnp.float32),
        compiler_params=_cp(1),
    )(xp, ab, w_dw)
    if stride > 1:
        out = out[:, ::stride, ::stride, :]
    return out


@functools.partial(jax.jit, static_argnames=("stride",))
def max_pool3(x, stride=1):
    N, H, W, C = x.shape
    xp = jnp.pad(x, ((0, 0), (1, 1), (1, 1), (0, 0)), constant_values=-1e30)
    out = pl.pallas_call(
        functools.partial(_maxpool_kernel, k=3),
        grid=(N,),
        in_specs=[pl.BlockSpec((1, H + 2, W + 2, C), lambda n: (n, 0, 0, 0))],
        out_specs=pl.BlockSpec((1, H, W, C), lambda n: (n, 0, 0, 0)),
        out_shape=jax.ShapeDtypeStruct((N, H, W, C), jnp.float32),
        compiler_params=_cp(1),
    )(xp)
    if stride > 1:
        out = out[:, ::stride, ::stride, :]
    return out


@functools.partial(jax.jit, static_argnames=("stride",))
def avg_pool3(x, stride=1):
    # count_include_pad=False -> positional reciprocal counts (host-computed).
    N, H, W, C = x.shape
    xp = jnp.pad(x, ((0, 0), (1, 1), (1, 1), (0, 0)))
    ch = np.minimum(np.arange(H) + 2, H) - np.maximum(np.arange(H) - 1, 0)
    cw = np.minimum(np.arange(W) + 2, W) - np.maximum(np.arange(W) - 1, 0)
    rc = jnp.asarray((1.0 / (ch[:, None] * cw[None, :]))[None, :, :, None],
                     jnp.float32)
    out = pl.pallas_call(
        functools.partial(_avgpool_kernel, k=3),
        grid=(N,),
        in_specs=[pl.BlockSpec((1, H + 2, W + 2, C), lambda n: (n, 0, 0, 0)),
                  pl.BlockSpec((1, H, W, 1), lambda n: (0, 0, 0, 0))],
        out_specs=pl.BlockSpec((1, H, W, C), lambda n: (n, 0, 0, 0)),
        out_shape=jax.ShapeDtypeStruct((N, H, W, C), jnp.float32),
        compiler_params=_cp(1),
    )(xp, rc)
    if stride > 1:
        out = out[:, ::stride, ::stride, :]
    return out


@jax.jit
def _head(x_state, w, b):
    N, H, W, C = x_state.shape
    NC = w.shape[1]
    x3 = x_state.reshape(N, H * W, C)
    return pl.pallas_call(
        _head_kernel,
        grid=(1,),
        in_specs=[pl.BlockSpec((N, H * W, C), lambda i: (0, 0, 0)),
                  pl.BlockSpec((C, NC), lambda i: (0, 0)),
                  pl.BlockSpec((1, NC), lambda i: (0, 0))],
        out_specs=pl.BlockSpec((N, NC), lambda i: (0, 0)),
        out_shape=jax.ShapeDtypeStruct((N, NC), jnp.float32),
        compiler_params=_cp(1),
    )(x3, w, b)


# ----------------------------------------------------------------------------
# Parameter init
# ----------------------------------------------------------------------------

class KeyGen:
    def __init__(self, key):
        self._key = key

    def __call__(self):
        self._key, sk = jax.random.split(self._key)
        return sk


def _init(key, shape, scale=0.1):
    return scale * jax.random.normal(key, shape, dtype=jnp.float32)


def _id_affine(C):
    return jnp.ones((C,), jnp.float32), jnp.zeros((C,), jnp.float32)


# ----------------------------------------------------------------------------
# Search-space ops (standard DARTS subset).  Every branch op returns
# (raw_output, gamma, beta) where the true op output = raw * gamma + beta
# (gamma/beta = None means identity) so BN can be folded downstream.
# ----------------------------------------------------------------------------

PRIMITIVES = ('none', 'skip_connect', 'max_pool_3x3', 'avg_pool_3x3',
              'sep_conv_3x3', 'dil_conv_3x3')


class ZeroOp:
    def __init__(self, stride):
        self.stride = stride

    def branch(self, x):          # never invoked (skipped: contributes exact zero)
        z = x if self.stride == 1 else x[:, ::self.stride, ::self.stride, :]
        return jnp.zeros_like(z), None, None


class IdentityOp:
    def branch(self, x):
        return x, None, None


class PoolOp:
    def __init__(self, mode, stride):
        self.mode, self.stride = mode, stride

    def branch(self, x):
        if self.mode == 'max':
            return max_pool3(x, stride=self.stride), None, None
        return avg_pool3(x, stride=self.stride), None, None


class ReLUConvBN1x1:
    """ReLU -> 1x1 conv -> BN (cell preprocess)."""
    def __init__(self, kg, c_in, c_out):
        self.w = _init(kg(), (c_in, c_out)).astype(jnp.bfloat16)

    def __call__(self, x):
        z, g, b = conv1x1_bn(x, self.w, relu_in=True)
        return _affine_apply(z, g, b, relu=False)


class FactorizedReduceOp:
    """ReLU -> two strided 1x1 convs -> concat -> BN."""
    def __init__(self, kg, c_in, c_out):
        assert c_out % 2 == 0
        self.w1 = _init(kg(), (c_in, c_out // 2)).astype(jnp.bfloat16)
        self.w2 = _init(kg(), (c_in, c_out // 2)).astype(jnp.bfloat16)

    def branch(self, x):
        z1, g1, b1 = conv1x1_bn(x[:, ::2, ::2, :], self.w1, relu_in=True)
        z2, g2, b2 = conv1x1_bn(x[:, 1::2, 1::2, :], self.w2, relu_in=True)
        z = jnp.concatenate([z1, z2], axis=-1)
        return z, jnp.concatenate([g1, g2]), jnp.concatenate([b1, b2])

    def __call__(self, x):
        z, g, b = self.branch(x)
        return _affine_apply(z, g, b, relu=False)


class SepConvOp:
    def __init__(self, kg, C, k, stride, padding):
        self.k, self.stride, self.padding = k, stride, padding
        self.dw1 = _init(kg(), (k * k, C))
        self.pw1 = _init(kg(), (C, C)).astype(jnp.bfloat16)
        self.dw2 = _init(kg(), (k * k, C))
        self.pw2 = _init(kg(), (C, C)).astype(jnp.bfloat16)
        self.idg, self.idb = _id_affine(C)

    def branch(self, x):
        y = depthwise(x, self.idg, self.idb, self.dw1, k=self.k, stride=self.stride,
                      padding=self.padding, dilation=1, relu=True)
        z1, g1, b1 = conv1x1_bn(y, self.pw1, relu_in=False)
        # intermediate BN + ReLU fused into the second depthwise's input affine
        y2 = depthwise(z1, g1, b1, self.dw2, k=self.k, stride=1,
                       padding=self.padding, dilation=1, relu=True)
        return conv1x1_bn(y2, self.pw2, relu_in=False)    # final BN deferred


class DilConvOp:
    def __init__(self, kg, C, k, stride, padding, dilation):
        self.k, self.stride = k, stride
        self.padding, self.dilation = padding, dilation
        self.dw = _init(kg(), (k * k, C))
        self.pw = _init(kg(), (C, C)).astype(jnp.bfloat16)
        self.idg, self.idb = _id_affine(C)

    def branch(self, x):
        y = depthwise(x, self.idg, self.idb, self.dw, k=self.k, stride=self.stride,
                      padding=self.padding, dilation=self.dilation, relu=True)
        return conv1x1_bn(y, self.pw, relu_in=False)      # final BN deferred


def make_op(kg, name, C, stride):
    if name == 'none':
        return ZeroOp(stride)
    if name == 'skip_connect':
        return IdentityOp() if stride == 1 else FactorizedReduceOp(kg, C, C)
    if name == 'max_pool_3x3':
        return PoolOp('max', stride)
    if name == 'avg_pool_3x3':
        return PoolOp('avg', stride)
    if name == 'sep_conv_3x3':
        return SepConvOp(kg, C, 3, stride, 1)
    if name == 'dil_conv_3x3':
        return DilConvOp(kg, C, 3, stride, 2, 2)
    raise ValueError(name)


# ----------------------------------------------------------------------------
# Computing nodes / cells / network (mirrors the PyTorch module structure)
# ----------------------------------------------------------------------------

class ComputingNode:
    """Normal_Computing_Node / Reduction_Computing_Node (channel_shuffle=False)."""
    def __init__(self, kg, c_now, node_id, primitives, baseline, reduction):
        self.baseline = baseline
        self.reduction = reduction
        self.c_now = c_now
        self.ops, self.indicator, self.names = [], [], []
        for input_order in range(node_id):
            stride = 2 if (reduction and input_order < 2) else 1
            for name in primitives:
                self.indicator.append(input_order)
                self.names.append(name)
                self.ops.append(make_op(kg, name, c_now, stride))

    def __call__(self, states, weights):
        zs, scs, ofs = [], [], []
        for order, op in enumerate(self.ops):
            if self.names[order] == 'none':
                continue                       # exact-zero contribution
            w = float(weights[order])
            if w < self.baseline:
                continue                       # pruned (same rule as reference)
            z, g, b = op.branch(states[self.indicator[order]])
            C = z.shape[-1]
            if g is None:
                scs.append(jnp.full((C,), w, jnp.float32))
                ofs.append(jnp.zeros((C,), jnp.float32))
            else:
                scs.append(w * g)
                ofs.append(w * b)
            zs.append(z)
        if not zs:
            N, H, W, _ = states[0].shape
            if self.reduction:
                H, W = (H + 1) // 2, (W + 1) // 2
            return jnp.zeros((N, H, W, self.c_now), jnp.float32)
        return _weighted_sum(zs, scs, ofs)


class CellJ:
    def __init__(self, kg, c_now, reduction_now, c_prev_0, red_prev_0,
                 c_prev_1, red_prev_1, cell_id, primitives,
                 computing_node_num, concat_num, baseline):
        self.cell_id = cell_id
        self.concat_num = concat_num
        self.computing_node_num = computing_node_num
        self.preprocess_0 = ReLUConvBN1x1(kg, c_prev_0, c_now)
        if red_prev_0:
            self.preprocess_1 = FactorizedReduceOp(kg, c_prev_1, c_now)
        else:
            self.preprocess_1 = ReLUConvBN1x1(kg, c_prev_1, c_now)
        self.nodes = [
            ComputingNode(kg, c_now, node_order + 2, primitives, baseline, reduction_now)
            for node_order in range(computing_node_num)
        ]

    def __call__(self, input_prev_0, input_prev_1, architecture):
        s0 = self.preprocess_0(input_prev_0)
        s1 = self.preprocess_1(input_prev_1)
        states = [s0, s1]
        for node_order in range(self.computing_node_num):
            name = 'cell_{},node_{}'.format(self.cell_id, node_order + 2)
            w = architecture.get_weights(name, forward=True)
            states.append(self.nodes[node_order](states, w))
        return jnp.concatenate(states[-self.concat_num:], axis=-1)


class Architecture:
    """Supplies per-node softmax mixing weights (deterministic, near-uniform)."""
    def __init__(self, key, cell_num, computing_node_num, num_primitives):
        self._w = {}
        for cell in range(cell_num):
            for node in range(computing_node_num):
                node_id = node + 2
                key, sk = jax.random.split(key)
                logits = 0.1 * jax.random.normal(sk, (node_id * num_primitives,))
                self._w['cell_{},node_{}'.format(cell, node_id)] = np.asarray(
                    jax.nn.softmax(logits), dtype=np.float32)

    def get_weights(self, name, forward=True):
        return self._w[name]


class NetworkImageNetPallas:
    def __init__(self, key, initial_channel=8, computing_node_num=2, concat_num=2,
                 cell_num=3, primitives=PRIMITIVES, baseline=0.01, num_classes=10):
        kg = KeyGen(key)
        C0 = initial_channel
        self.cell_num = cell_num
        self.reduction_list = [cell_num // 3, 2 * cell_num // 3]
        self.features_location = [cell_num // 3 - 1, 2 * cell_num // 3 - 1, cell_num - 1]
        # stem_0: Conv3x3/s2 -> BN -> ReLU -> Conv3x3/s2 -> BN
        self.stem0_w1 = _init(kg(), (9 * 3, C0 // 2)).astype(jnp.bfloat16)
        self.stem0_w2 = _init(kg(), (9 * (C0 // 2), C0)).astype(jnp.bfloat16)
        # stem_1: ReLU -> Conv3x3/s2 -> BN
        self.stem1_w = _init(kg(), (9 * C0, C0)).astype(jnp.bfloat16)
        c_now = C0
        c_prev_0, c_prev_1 = c_now, c_now
        red_prev_0, red_prev_1 = True, False
        self.cells = []
        for cell_order in range(cell_num):
            reduction = cell_order in self.reduction_list
            if reduction:
                c_now = c_now * 2
            self.cells.append(CellJ(kg, c_now, reduction, c_prev_0, red_prev_0,
                                    c_prev_1, red_prev_1, cell_order, primitives,
                                    computing_node_num, concat_num, baseline))
            c_prev_0, c_prev_1 = concat_num * c_now, c_prev_0
            red_prev_1 = red_prev_0
            red_prev_0 = reduction
        self.cls_w = _init(kg(), (c_prev_0, num_classes))
        self.cls_b = _init(kg(), (1, num_classes))

    def __call__(self, inputs_nchw, architecture):
        x = jnp.transpose(inputs_nchw, (0, 2, 3, 1)).astype(jnp.float32)  # NCHW->NHWC
        g0, b0 = _id_affine(3)
        # stems with BN/ReLU fused forward into the next conv's input affine
        y1, g1, b1 = conv3x3_bn(x, g0, b0, self.stem0_w1, stride=2, relu_in=False)
        y2, g2, b2 = conv3x3_bn(y1, g1, b1, self.stem0_w2, stride=2, relu_in=True)
        input_prev_1 = _affine_apply(y2, g2, b2, relu=False)      # stem_0 output
        y3, g3, b3 = conv3x3_bn(y2, g2, b2, self.stem1_w, stride=2, relu_in=True)
        input_prev_0 = _affine_apply(y3, g3, b3, relu=False)      # stem_1 output

        features = []
        state_now = input_prev_0
        for cell_order in range(self.cell_num):
            state_now = self.cells[cell_order](input_prev_0, input_prev_1, architecture)
            input_prev_1, input_prev_0 = input_prev_0, state_now
            if cell_order in self.features_location:
                features.append(jnp.transpose(state_now, (0, 3, 1, 2)))  # back to NCHW
            # TODO(synk): AuxiliaryHeadImageNet only runs when auxiliary=True and
            # training; not exercised here (auxiliary=False).

        N, H, W, C = state_now.shape
        assert H == 7 and W == 7, "AvgPool2d(7) expects a 7x7 final feature map"
        logits = _head(state_now, self.cls_w, self.cls_b)         # GAP + classifier
        return logits, logits, features


# ----------------------------------------------------------------------------
# Main
# ----------------------------------------------------------------------------

if __name__ == "__main__":
    key = jax.random.PRNGKey(0)
    k_in, k_net, k_arch = jax.random.split(key, 3)

    CELL_NUM = 3          # reductions at cells 1, 2
    NODE_NUM = 2          # computing nodes per cell
    CONCAT = 2            # concat last 2 node outputs
    C0 = 8                # initial_channel (small)
    NUM_CLASSES = 10

    # ImageNet stems + two reductions downsample by 32x; AvgPool2d(7) at the end
    # requires a 7x7 final map, hence 224x224 spatial (channels kept tiny).
    x = jax.random.normal(k_in, (2, 3, 224, 224), dtype=jnp.float32)  # NCHW

    net = NetworkImageNetPallas(k_net, initial_channel=C0,
                                computing_node_num=NODE_NUM, concat_num=CONCAT,
                                cell_num=CELL_NUM, num_classes=NUM_CLASSES)
    arch = Architecture(k_arch, cell_num=CELL_NUM, computing_node_num=NODE_NUM,
                        num_primitives=len(PRIMITIVES))

    logits, logits2, features = net(x, arch)
    jax.block_until_ready(logits)
    jax.block_until_ready(logits2)
    for f in features:
        jax.block_until_ready(f)
    print("KERNEL_OK")
</pallas_src>

<mosaic_0001>
module attributes {stable_mosaic.version = 11 : i64} {
  func.func @_mm_bn_kernel(%arg0: i32, %arg1: memref<3584x27xf32, #tpu.memory_space<vmem>>, %arg2: memref<2x27xf32, #tpu.memory_space<vmem>>, %arg3: memref<27x4xbf16, #tpu.memory_space<vmem>>, %arg4: memref<3584x4xf32, #tpu.memory_space<vmem>>, %arg5: memref<1x2x4xf32, #tpu.memory_space<vmem>>) attributes {dimension_semantics = [#tpu.dimension_semantics<parallel>], iteration_bounds = array<i64: 7>, scalar_prefetch = 0 : i64, scratch_operands = 0 : i64, tpu.core_type = #tpu.core_type<tc>, window_params = [{transform_indices = @transform_0, window_bounds = array<i64: 3584, 27>}, {pipeline_mode = #tpu.pipeline_mode<synchronous>, transform_indices = @transform_1, window_bounds = array<i64: 2, 27>}, {pipeline_mode = #tpu.pipeline_mode<synchronous>, transform_indices = @transform_2, window_bounds = array<i64: 27, 4>}, {transform_indices = @transform_3, window_bounds = array<i64: 3584, 4>}, {transform_indices = @transform_4, window_bounds = array<i64: 1, 2, 4>}]} {
    %c0 = arith.constant 0 : index
    %c0_0 = arith.constant 0 : index
    %0 = vector.load %arg1[%c0, %c0_0] : memref<3584x27xf32, #tpu.memory_space<vmem>>, vector<3584x27xf32>
    %c0_1 = arith.constant 0 : index
    %c0_2 = arith.constant 0 : index
    %1 = vector.load %arg2[%c0_1, %c0_2] : memref<2x27xf32, #tpu.memory_space<vmem>>, vector<1x27xf32>
    %2 = vector.broadcast %1 : vector<1x27xf32> to vector<3584x27xf32>
    %3 = arith.mulf %0, %2 : vector<3584x27xf32>
    %c1 = arith.constant 1 : index
    %c0_3 = arith.constant 0 : index
    %4 = vector.load %arg2[%c1, %c0_3] : memref<2x27xf32, #tpu.memory_space<vmem>>, vector<1x27xf32>
    %5 = vector.broadcast %4 : vector<1x27xf32> to vector<3584x27xf32>
    %6 = arith.addf %3, %5 : vector<3584x27xf32>
    %7 = arith.truncf %6 : vector<3584x27xf32> to vector<3584x27xbf16>
    %c0_4 = arith.constant 0 : index
    %c0_5 = arith.constant 0 : index
    %8 = vector.load %arg3[%c0_4, %c0_5] : memref<27x4xbf16, #tpu.memory_space<vmem>>, vector<27x4xbf16>
    %cst = arith.constant dense<0.000000e+00> : vector<3584x4xf32>
    %9 = tpu.matmul %7, %8, %cst {dimension_numbers = #tpu.dot_dimension_numbers<[1], [0], [0], [1], [0, 0, 1, 1], [], []>} : vector<3584x27xbf16>, vector<27x4xbf16>, vector<3584x4xf32> -> vector<3584x4xf32>
    %c0_6 = arith.constant 0 : index
    %c0_7 = arith.constant 0 : index
    %10 = vector.load %arg4[%c0_6, %c0_7] : memref<3584x4xf32, #tpu.memory_space<vmem>>, vector<3584x4xf32>
    tpu.vector_store %arg4[%c0_6, %c0_7], %9 {strides = array<i32>} : memref<3584x4xf32, #tpu.memory_space<vmem>>, vector<3584x4xf32>,
    %cst_8 = arith.constant dense<0.000000e+00> : vector<4xf32>
    %11 = vector.multi_reduction <add>, %9, %cst_8 [0] : vector<3584x4xf32> to vector<4xf32>
    %12 = vector.shape_cast %11 : vector<4xf32> to vector<1x4xf32>
    %13 = arith.mulf %9, %9 : vector<3584x4xf32>
    %cst_9 = arith.constant dense<0.000000e+00> : vector<4xf32>
    %14 = vector.multi_reduction <add>, %13, %cst_9 [0] : vector<3584x4xf32> to vector<4xf32>
    %15 = vector.shape_cast %14 : vector<4xf32> to vector<1x4xf32>
    %16 = tpu.concatenate %12, %15 in 0 : vector<1x4xf32>, vector<1x4xf32> -> vector<2x4xf32>
    %c0_10 = arith.constant 0 : index
    %c0_11 = arith.constant 0 : index
    %c0_12 = arith.constant 0 : index
    %17 = vector.load %arg5[%c0_10, %c0_11, %c0_12] : memref<1x2x4xf32, #tpu.memory_space<vmem>>, vector<1x2x4xf32>
    %18 = vector.shape_cast %17 : vector<1x2x4xf32> to vector<2x4xf32>
    %19 = vector.shape_cast %16 : vector<2x4xf32> to vector<1x2x4xf32>
    tpu.vector_store %arg5[%c0_10, %c0_11, %c0_12], %19 {strides = array<i32>} : memref<1x2x4xf32, #tpu.memory_space<vmem>>, vector<1x2x4xf32>,
    return
  }
  func.func @transform_0(%arg0: i32) -> (i32, i32) {
    %c0_i32 = arith.constant 0 : i32
    %c0_i32_0 = arith.constant 0 : i32
    return %arg0, %c0_i32 : i32, i32
  }
  func.func @transform_1(%arg0: i32) -> (i32, i32) {
    %c0_i32 = arith.constant 0 : i32
    %c0_i32_0 = arith.constant 0 : i32
    %c0_i32_1 = arith.constant 0 : i32
    return %c0_i32, %c0_i32_0 : i32, i32
  }
  func.func @transform_2(%arg0: i32) -> (i32, i32) {
    %c0_i32 = arith.constant 0 : i32
    %c0_i32_0 = arith.constant 0 : i32
    %c0_i32_1 = arith.constant 0 : i32
    return %c0_i32, %c0_i32_0 : i32, i32
  }
  func.func @transform_3(%arg0: i32) -> (i32, i32) {
    %c0_i32 = arith.constant 0 : i32
    %c0_i32_0 = arith.constant 0 : i32
    return %arg0, %c0_i32 : i32, i32
  }
  func.func @transform_4(%arg0: i32) -> (i32, i32, i32) {
    %c0_i32 = arith.constant 0 : i32
    %c0_i32_0 = arith.constant 0 : i32
    %c0_i32_1 = arith.constant 0 : i32
    return %arg0, %c0_i32, %c0_i32_0 : i32, i32, i32
  }
}

</mosaic_0001>

<bundles_post_ra>
// kernel: tile.13
= control target key start
LH: loop header
LB: loop body
LE: loop exit
PB: predicated region body
PF: predicated region fallthrough
CT: control target
= control target key end

     0   :  { %2 = vsyncpa [#allocation1], 0  ;;  %s51_s8 = smov [#allocation0]   ;;  %s71_s0 = inlined_call_operand.hbm [shape: f32[3], index: 0, kind: input, shape index: {}]   ;;  %s72_s1 = inlined_call_operand.vmem [shape: f32[9,3], index: 1, kind: output, shape index: {}]  }
   0x1   :  { %s8_s0 = sshll.u32 %s71_s0, 4  ;;  %s10_s9 = sshll.u32 %s51_s8, 4  ;;  %s9_s0 = int_to_ptr.hbm [resolvable:$true] %s8_s0  ;;  %s11_s9 = int_to_ptr.vmem [resolvable:$true] %s10_s9 }
   0x2   :  { %13 = dma.hbm_to_vmem [thread:$0]  %s9_s0, 16, %s11_s9, [#allocation1]  }
   0x3   :  { %49 = dma.done.wait [#allocation1], 16  }
   0x4   :  { %50 = vsyncadd [#allocation1], 4294967280  ;;  %v18_v0 = vld [vmem:[#allocation0] ss:$0 sm:$0xff] }
   0x5   :  { %19 = vst [vmem:[%s72_s1] sm:$0xff] %v18_v0 }
   0x6   :  { %23 = vst [vmem:[%s72_s1 + $0x8] sm:$0xff] %v18_v0 }
   0x7   :  { %22 = vsyncpa [#allocation1], 1 }

// kernel: tile.14
= control target key start
LH: loop header
LB: loop body
LE: loop exit
PB: predicated region body
PF: predicated region fallthrough
CT: control target
= control target key end

     0   :  { %s75_s10 = smov 24   ;;  %s76_s11 = smov 18   ;;  %vm3_vm0 = vcmask 23552   ;;  %vm9_vm1 = vcmask 220352   ;;  %vm15_vm2 = vcmask 195752   ;;  %vm21_vm3 = vcmask 171152   ;;  %s123_s0 = inlined_call_operand.vmem [shape: f32[9,3], index: 0, kind: input, shape index: {}]   ;;  %s124_s1 = inlined_call_operand.vmem [shape: f32[1,27], index: 1, kind: output, shape index: {}]  }
   0x1   :  { %v59_v0 = vld [vmem:[%s123_s0 + $0x8] sm:$0x1]   ;;  %v61_v1 = vld [vmem:[%s123_s0 + $0x6] sm:$0x1]   ;;  %v63_v2 = vld [vmem:[%s123_s0 + $0x4] sm:$0x1]  }
   0x2   :  { %7 = vrot.lane.b32.xlu0 %v59_v0, %s75_s10  ;;  %19 = vrot.lane.b32.xlu1 %v61_v1, %s76_s11  ;;  %s77_s14 = smov 12   ;;  %v60_v3 = vld [vmem:[%s123_s0 + $0x7] sm:$0x1]   ;;  %v62_v4 = vld [vmem:[%s123_s0 + $0x5] sm:$0x1]   ;;  %s78_s19 = smov 21  }
   0x3   :  { %31 = vrot.lane.b32.xlu2 %v63_v2, %s77_s14  ;;  %s79_s20 = smov 15   ;;  %v64_v5 = vld [vmem:[%s123_s0 + $0x3] sm:$0x1]   ;;  %s80_s23 = smov 9   ;;  %v65_v6 = vld [vmem:[%s123_s0 + $0x2] sm:$0x1]  }
   0x4   :  { %v66_v7 = vld [vmem:[%s123_s0 + $0x1] sm:$0x1]   ;;  %s81_s28 = smov 6   ;;  %s82_s29 = smov 3   ;;  %v2_v8 = vld [vmem:[%s123_s0] sm:$0x1]  }
   0x5   :  { %4 = vst.msk [vmem:[#allocation0] sm:$0x1] %vm3_vm0, %v2_v8   ;;  %vm27_vm4 = vcmask 146552   ;;  %vm33_vm5 = vcmask 121952   ;;  %vm39_vm6 = vcmask 97352   ;;  %vm45_vm7 = vcmask 72752  }
   0x6   :  { %vm51_vm8 = vcmask 48152  }
   0xa   :  { %13 = vrot.lane.b32.xlu0 %v60_v3, %s78_s19  ;;  %25 = vrot.lane.b32.xlu1 %v62_v4, %s79_s20 }
   0xb   :  { %37 = vrot.lane.b32.xlu2 %v64_v5, %s80_s23 }
  0x12   :  { %43 = vrot.lane.b32.xlu0 %v65_v6, %s81_s28  ;;  %49 = vrot.lane.b32.xlu1 %v66_v7, %s82_s29 }
  0x5d   :  { %v32_v9 = vpop.permute.xlu2 %31  }
  0x65   :  { %v38_v10 = vpop.permute.xlu2 %37  }
  0x74   :  { %v8_v11 = vpop.permute.xlu0 %7   ;;  %v20_v12 = vpop.permute.xlu1 %19  }
  0x75   :  { %10 = vst.msk [vmem:[#allocation0] sm:$0x1] %vm9_vm1, %v8_v11  }
  0x7c   :  { %v14_v13 = vpop.permute.xlu0 %13   ;;  %v26_v14 = vpop.permute.xlu1 %25  }
  0x7d   :  { %16 = vst.msk [vmem:[#allocation0] sm:$0x1] %vm15_vm2, %v14_v13  }
  0x7e   :  { %22 = vst.msk [vmem:[#allocation0] sm:$0x1] %vm21_vm3, %v20_v12  }
  0x7f   :  { %28 = vst.msk [vmem:[#allocation0] sm:$0x1] %vm27_vm4, %v26_v14  }
  0x80   :  { %34 = vst.msk [vmem:[#allocation0] sm:$0x1] %vm33_vm5, %v32_v9  }
  0x81   :  { %40 = vst.msk [vmem:[#allocation0] sm:$0x1] %vm39_vm6, %v38_v10  }
  0x84   :  { %v44_v15 = vpop.permute.xlu0 %43   ;;  %v50_v16 = vpop.permute.xlu1 %49  }
  0x85   :  { %46 = vst.msk [vmem:[#allocation0] sm:$0x1] %vm45_vm7, %v44_v15  }
  0x86   :  { %52 = vst.msk [vmem:[#allocation0] sm:$0x1] %vm51_vm8, %v50_v16  }
  0x8d   :  { %v55_v17 = vld [vmem:[#allocation0] sm:$0x1] }
  0x8e   :  { %58 = vst [vmem:[%s124_s1] sm:$0x1] %v55_v17 }

// kernel: conv3x3_bn.1
= control target key start
LH: loop header
LB: loop body
LE: loop exit
PB: predicated region body
PF: predicated region fallthrough
CT: control target
= control target key end

     0   :  { %s6710_s15 = smov 0   ;;  %s12275_s0 = inlined_call_operand.vmem [shape: f32[25088,27], index: 0, kind: input, shape index: {}]   ;;  %s12276_s1 = inlined_call_operand.vmem [shape: f32[2,27], index: 1, kind: input, shape index: {}]   ;;  %s12277_s2 = inlined_call_operand.vmem [shape: bf16[27,4], index: 2, kind: input, shape index: {}]   ;;  %s12278_s3 = inlined_call_operand.vmem [shape: f32[25088,4], index: 3, kind: output, shape index: {0}]   ;;  %s12279_s4 = inlined_call_operand.vmem [shape: f32[7,2,4], index: 4, kind: output, shape index: {1}]  }
   0x1 LB: > { %s6716_s16 = sadd.s32 4294967295, %s6682_s15   ;;  %p6403_p0 = scmp.ge.s32.totalorder %s6682_s15, 1  ;;  %s6682_s15 = sphi %s6710_s15, %s15_s15  }
   0x2   : > { %p166_p1 = scmp.lt.s32.totalorder %s6682_s15, 8 }
   0x4   : > { %p167_p2 = pnand %p6403_p0, %p166_p1 }
   0x6   : > { %170 = sbr.rel (%p167_p2) target bundleno = 1731 (0x6c3), region = 32 }
   0xb   : > { %v6413_v0 = vld [vmem:[%s12277_s2 + $0x8] sm:$0xf]  ;;  %v6642_v1 = vld [vmem:[%s12277_s2 + $0x8] sm:$0x30]  ;;  %vm2473_vm0 = vcmask 1044480   ;;  %vm2474_vm1 = vcmask 1045504  }
   0xc   : > { %v6414_v2 = vor.u32 %v6642_v1, %v6413_v0  ;;  %s196_s21 = smul.u32 448, %s6716_s16  ;;  %v6684_v3 = vmov 65535   ;;  %v6641_v7 = vld [vmem:[%s12277_s2] sm:$0xff]  ;;  %vm1800_vm2 = vcmask 220160   ;;  %vm3609_vm3 = vcmask 31744   ;;  %p208_p4 = scmp.lt.s32.totalorder %s6716_s16, 6 }
   0xd   : > { %v2475_v4 = vsel %vm2473_vm0, 4294967295, %v6684_v3  ;;  %v6735_v8 = vld [vmem:[%s12276_s1] ss:$0 sm:$0xff]  ;;  %v6748_v9 = vld [vmem:[%s12276_s1 + $0x1] ss:$0 sm:$0xff]  ;;  %vm6308_vm4 = vcmask 1040384  }
   0xe   : > { %v2476_v5 = vsel %vm2474_vm1, %v2475_v4, 0  ;;  %p197_p3 = scmp.lt.s32.totalorder %s196_s21, 3135  ;;  %s13027_s16 = smov (!%p208_p4, %s6716_s16), 6  ;;  %vm6310_vm5 = vcmask 25600  }
   0xf   : > { %v2478_v6 = vand.u32 %v6414_v2, %v2476_v5 }
  0x10   : > { %s13025_s21 = smov (!%p197_p3, %s196_s21), 3135 }
  0x11   : > { %2486 = vmatpush.bf16.msra.mxu0 %v2478_v6  ;;  %6643 = vmatpush.bf16.msra.mxu1 %v2478_v6  ;;  %s6404_s26 = sshll.u32 %s13025_s21, 3 }
  0x12   : > { %6644 = vmatpush.bf16.msra.mxu2 %v2478_v6  ;;  %6645 = vmatpush.bf16.msra.mxu3 %v2478_v6  ;;  %s6743_s29 = scalar_lea.vmem %s12275_s0, %s6404_s26  ;;  %s6817_s8 = scalar_lea.vmem %s12278_s3, %s6404_s26 }
  0x13   : > { %v213_v10 = vld [vmem:[%s6743_s29] sm:$0xff]  ;;  %v214_v11 = vld [vmem:[%s6743_s29 + $0x8] sm:$0xff]  ;;  %v215_v17 = vld [vmem:[%s6743_s29 + $0x10] sm:$0xff] }
  0x14   : > { %v663_v12 = vmul.f32 %v6735_v8, %v213_v10  ;;  %v664_v13 = vmul.f32 %v6735_v8, %v214_v11  ;;  %v216_v18 = vld [vmem:[%s6743_s29 + $0x18] sm:$0xff]  ;;  %v665_v19 = vmul.f32 %v6735_v8, %v215_v17  ;;  %v217_v24 = vld [vmem:[%s6743_s29 + $0x20] sm:$0xff]  ;;  %v218_v25 = vld [vmem:[%s6743_s29 + $0x28] sm:$0xff] }
  0x15   : > { %2487 = vmatpush.bf16.msra.mxu0 %v6641_v7  ;;  %6646 = vmatpush.bf16.msra.mxu1 %v6641_v7  ;;  %v666_v20 = vmul.f32 %v6735_v8, %v216_v18  ;;  %v667_v26 = vmul.f32 %v6735_v8, %v217_v24  ;;  %v668_v27 = vmul.f32 %v6735_v8, %v218_v25  ;;  %v219_v31 = vld [vmem:[%s6743_s29 + $0x30] sm:$0xff]  ;;  %v220_v32 = vld [vmem:[%s6743_s29 + $0x38] sm:$0xff]  ;;  %v221_v38 = vld [vmem:[%s6743_s29 + $0x40] sm:$0xff] }
  0x16   : > { %6647 = vmatpush.bf16.msra.mxu2 %v6641_v7  ;;  %6648 = vmatpush.bf16.msra.mxu3 %v6641_v7  ;;  %v1113_v14 = vadd.f32 %v6748_v9, %v663_v12  ;;  %v1114_v15 = vadd.f32 %v6748_v9, %v664_v13  ;;  %v1115_v21 = vadd.f32 %v6748_v9, %v665_v19  ;;  %v222_v39 = vld [vmem:[%s6743_s29 + $0x48] sm:$0xff]  ;;  %v223_v45 = vld [vmem:[%s6743_s29 + $0x50] sm:$0xff]  ;;  %v224_v46 = vld [vmem:[%s6743_s29 + $0x58] sm:$0xff] }
  0x17   : > { %v1116_v22 = vadd.f32 %v6748_v9, %v666_v20  ;;  %v1117_v28 = vadd.f32 %v6748_v9, %v667_v26  ;;  %v1118_v29 = vadd.f32 %v6748_v9, %v668_v27  ;;  %v669_v33 = vmul.f32 %v6735_v8, %v219_v31  ;;  %v225_v52 = vld [vmem:[%s6743_s29 + $0x60] sm:$0xff]  ;;  %v226_v53 = vld [vmem:[%s6743_s29 + $0x68] sm:$0xff]  ;;  %v227_v59 = vld [vmem:[%s6743_s29 + $0x70] sm:$0xff] }
  0x18   : > { %v1561_v16 = vpack.c.bf16 %v1114_v15, %v1113_v14  ;;  %v670_v34 = vmul.f32 %v6735_v8, %v220_v32  ;;  %v671_v40 = vmul.f32 %v6735_v8, %v221_v38  ;;  %v672_v41 = vmul.f32 %v6735_v8, %v222_v39  ;;  %v228_v60 = vld [vmem:[%s6743_s29 + $0x78] sm:$0xff]  ;;  %v229_v2 = vld [vmem:[%s6743_s29 + $0x80] sm:$0xff]  ;;  %v230_v3 = vld [vmem:[%s6743_s29 + $0x88] sm:$0xff] }
  0x19   : > { %v1562_v23 = vpack.c.bf16 %v1116_v22, %v1115_v21  ;;  %v1563_v30 = vpack.c.bf16 %v1118_v29, %v1117_v28  ;;  %v1119_v35 = vadd.f32 %v6748_v9, %v669_v33  ;;  %v673_v47 = vmul.f32 %v6735_v8, %v223_v45  ;;  %v231_v12 = vld [vmem:[%s6743_s29 + $0x90] sm:$0xff]  ;;  %v232_v13 = vld [vmem:[%s6743_s29 + $0x98] sm:$0xff] }
  0x1a   : > { %6415 = vmatmul.msk.bf16.vlgmr.msra.gmra.mxu0 %vm1800_vm2, %v1561_v16  ;;  %v1120_v36 = vadd.f32 %v6748_v9, %v670_v34  ;;  %v1121_v42 = vadd.f32 %v6748_v9, %v671_v40  ;;  %v1122_v43 = vadd.f32 %v6748_v9, %v672_v41  ;;  %v674_v48 = vmul.f32 %v6735_v8, %v224_v46  ;;  %v233_v34 = vld [vmem:[%s6743_s29 + $0xa0] sm:$0xff] }
  0x1b   : > { %v1123_v49 = vadd.f32 %v6748_v9, %v673_v47  ;;  %v675_v54 = vmul.f32 %v6735_v8, %v225_v52  ;;  %v676_v55 = vmul.f32 %v6735_v8, %v226_v53  ;;  %v677_v61 = vmul.f32 %v6735_v8, %v227_v59  ;;  %v235_v53 = vld [vmem:[%s6743_s29 + $0xb0] sm:$0xff] }
  0x1c   : > { %v1564_v37 = vpack.c.bf16 %v1120_v36, %v1119_v35  ;;  %v1565_v44 = vpack.c.bf16 %v1122_v43, %v1121_v42  ;;  %v1124_v50 = vadd.f32 %v6748_v9, %v674_v48  ;;  %v678_v62 = vmul.f32 %v6735_v8, %v228_v60  ;;  %v234_v35 = vld [vmem:[%s6743_s29 + $0xa8] sm:$0xff] }
  0x1d   : > { %v1125_v56 = vadd.f32 %v6748_v9, %v675_v54  ;;  %v1126_v57 = vadd.f32 %v6748_v9, %v676_v55  ;;  %v1127_v63 = vadd.f32 %v6748_v9, %v677_v61  ;;  %v679_v4 = vmul.f32 %v6735_v8, %v229_v2  ;;  %v236_v54 = vld [vmem:[%s6743_s29 + $0xb8] sm:$0xff] }
  0x1e   : > { %v1566_v51 = vpack.c.bf16 %v1124_v50, %v1123_v49  ;;  %v1128_v0 = vadd.f32 %v6748_v9, %v678_v62  ;;  %v680_v5 = vmul.f32 %v6735_v8, %v230_v3  ;;  %v681_v15 = vmul.f32 %v6735_v8, %v231_v12  ;;  %v325_v12 = vld [vmem:[%s6743_s29 + $0x380] sm:$0xff] }
  0x1f   : > { %v1567_v58 = vpack.c.bf16 %v1126_v57, %v1125_v56  ;;  %v1129_v6 = vadd.f32 %v6748_v9, %v679_v4  ;;  %v682_v16 = vmul.f32 %v6735_v8, %v232_v13  ;;  %v683_v36 = vmul.f32 %v6735_v8, %v233_v34  ;;  %v326_v13 = vld [vmem:[%s6743_s29 + $0x388] sm:$0xff] }
  0x20   : > { %v1568_v1 = vpack.c.bf16 %v1128_v0, %v1127_v63  ;;  %v1130_v7 = vadd.f32 %v6748_v9, %v680_v5  ;;  %v1131_v24 = vadd.f32 %v6748_v9, %v681_v15  ;;  %v685_v55 = vmul.f32 %v6735_v8, %v235_v53 }
  0x21   : > { %v1132_v25 = vadd.f32 %v6748_v9, %v682_v16  ;;  %v1133_v43 = vadd.f32 %v6748_v9, %v683_v36  ;;  %v686_v56 = vmul.f32 %v6735_v8, %v236_v54  ;;  %v776_v15 = vmul.f32 %v6735_v8, %v326_v13 }
  0x22   : > { %v1569_v10 = vpack.c.bf16 %v1130_v7, %v1129_v6  ;;  %v1135_v62 = vadd.f32 %v6748_v9, %v685_v55  ;;  %v237_v7 = vld [vmem:[%s6743_s29 + $0xc0] sm:$0xff] }
  0x23   : > { %v1570_v27 = vpack.c.bf16 %v1132_v25, %v1131_v24  ;;  %v1136_v63 = vadd.f32 %v6748_v9, %v686_v56  ;;  %v687_v16 = vmul.f32 %v6735_v8, %v237_v7 }
  0x2a   : > { %6416 = vmatmul.msk.bf16.gmra.mxu0 %vm1800_vm2, %v1562_v23 }
  0x3a   : > { %6417 = vmatmul.msk.bf16.gmra.mxu0 %vm1800_vm2, %v1563_v30 }
  0x4a   : > { %6418 = vmatmul.msk.bf16.gmra.mxu0 %vm1800_vm2, %v1564_v37  ;;  %v684_v37 = vmul.f32 %v6735_v8, %v234_v35  ;;  %v239_v35 = vld [vmem:[%s6743_s29 + $0xd0] sm:$0xff] }
  0x5a   : > { %6419 = vmatmul.msk.bf16.gmra.mxu0 %vm1800_vm2, %v1565_v44  ;;  %v1134_v44 = vadd.f32 %v6748_v9, %v684_v37  ;;  %v240_v37 = vld [vmem:[%s6743_s29 + $0xd8] sm:$0xff] }
  0x5c   : > { %v1571_v46 = vpack.c.bf16 %v1134_v44, %v1133_v43  ;;  %v690_v43 = vmul.f32 %v6735_v8, %v240_v37 }
  0x5e   : > { %v1140_v53 = vadd.f32 %v6748_v9, %v690_v43 }
  0x6a   : > { %6420 = vmatmul.msk.bf16.gmra.mxu0 %vm1800_vm2, %v1566_v51 }
  0x7a   : > { %6421 = vmatmul.msk.bf16.gmra.mxu0 %vm1800_vm2, %v1567_v58 }
  0x8a   : > { %6422 = vmatmul.msk.bf16.gmra.mxu0 %vm1800_vm2, %v1568_v1  ;;  %v1572_v1 = vpack.c.bf16 %v1136_v63, %v1135_v62  ;;  %v242_v63 = vld [vmem:[%s6743_s29 + $0xe8] sm:$0xff] }
  0x97   : > { %v2489_v11 = vpop.f32.mrf.mxu0 }
  0x98   : > { %3610 = vst.msk [vmem:[%s6817_s8] sm:$0xff] %vm3609_vm3, %v2489_v11  ;;  %v4959_v14 = vmul.f32 %v2489_v11, %v2489_v11  ;;  %v4058_v18 = vsel %vm3609_vm3, %v2489_v11, 0.0  ;;  %v238_v11 = vld [vmem:[%s6743_s29 + $0xc8] sm:$0xff] }
  0x9a   : > { %6423 = vmatmul.msk.bf16.gmra.mxu0 %vm1800_vm2, %v1569_v10  ;;  %v5407_v22 = vsel %vm3609_vm3, %v4959_v14, 0.0  ;;  %v775_v14 = vmul.f32 %v6735_v8, %v325_v12 }
  0x9f   : > { %v2491_v17 = vpop.f32.mrf.mxu0 }
  0xa0   : > { %3611 = vst.msk [vmem:[%s6817_s8 + $0x8] sm:$0xff] %vm3609_vm3, %v2491_v17  ;;  %v4059_v19 = vsel %vm3609_vm3, %v2491_v17, 0.0  ;;  %v4960_v20 = vmul.f32 %v2491_v17, %v2491_v17  ;;  %v688_v17 = vmul.f32 %v6735_v8, %v238_v11 }
  0xa1   : > { %v4060_v21 = vadd.f32 %v4059_v19, %v4058_v18  ;;  %v1225_v18 = vadd.f32 %v6748_v9, %v775_v14  ;;  %v1226_v19 = vadd.f32 %v6748_v9, %v776_v15 }
  0xa2   : > { %v5408_v23 = vsel %vm3609_vm3, %v4960_v20, 0.0 }
  0xa3   : > { %v5409_v26 = vadd.f32 %v5408_v23, %v5407_v22  ;;  %v1617_v23 = vpack.c.bf16 %v1226_v19, %v1225_v18 }
  0xa5   : > { %6471 = vmatmul.msk.bf16.vlgmr.msra.gmra.mxu1 %vm1800_vm2, %v1617_v23 }
  0xa7   : > { %v2494_v28 = vpop.f32.mrf.mxu0 }
  0xa8   : > { %3612 = vst.msk [vmem:[%s6817_s8 + $0x10] sm:$0xff] %vm3609_vm3, %v2494_v28  ;;  %v4061_v29 = vsel %vm3609_vm3, %v2494_v28, 0.0  ;;  %v4961_v30 = vmul.f32 %v2494_v28, %v2494_v28 }
  0xa9   : > { %v4062_v31 = vadd.f32 %v4061_v29, %v4060_v21 }
  0xaa   : > { %v5410_v32 = vsel %vm3609_vm3, %v4961_v30, 0.0  ;;  %6424 = vmatmul.msk.bf16.gmra.mxu0 %vm1800_vm2, %v1570_v27  ;;  %v1138_v27 = vadd.f32 %v6748_v9, %v688_v17 }
  0xab   : > { %v5411_v33 = vadd.f32 %v5410_v32, %v5409_v26  ;;  %v1137_v26 = vadd.f32 %v6748_v9, %v687_v16 }
  0xad   : > { %v1573_v29 = vpack.c.bf16 %v1138_v27, %v1137_v26  ;;  %v244_v27 = vld [vmem:[%s6743_s29 + $0xf8] sm:$0xff] }
  0xaf   : > { %v2496_v38 = vpop.f32.mrf.mxu0 }
  0xb0   : > { %3613 = vst.msk [vmem:[%s6817_s8 + $0x18] sm:$0xff] %vm3609_vm3, %v2496_v38  ;;  %v4063_v39 = vsel %vm3609_vm3, %v2496_v38, 0.0  ;;  %v4962_v40 = vmul.f32 %v2496_v38, %v2496_v38  ;;  %v327_v38 = vld [vmem:[%s6743_s29 + $0x390] sm:$0xff] }
  0xb1   : > { %v4064_v41 = vadd.f32 %v4063_v39, %v4062_v31  ;;  %v328_v39 = vld [vmem:[%s6743_s29 + $0x398] sm:$0xff] }
  0xb2   : > { %v5412_v42 = vsel %vm3609_vm3, %v4962_v40, 0.0  ;;  %v777_v40 = vmul.f32 %v6735_v8, %v327_v38 }
  0xb3   : > { %v5413_v45 = vadd.f32 %v5412_v42, %v5411_v33  ;;  %v689_v42 = vmul.f32 %v6735_v8, %v239_v35 }
  0xb4   : > { %v1227_v44 = vadd.f32 %v6748_v9, %v777_v40 }
  0xb7   : > { %v2499_v47 = vpop.f32.mrf.mxu0 }
  0xb8   : > { %3614 = vst.msk [vmem:[%s6817_s8 + $0x20] sm:$0xff] %vm3609_vm3, %v2499_v47  ;;  %v4065_v48 = vsel %vm3609_vm3, %v2499_v47, 0.0  ;;  %v4963_v49 = vmul.f32 %v2499_v47, %v2499_v47 }
  0xb9   : > { %v4066_v50 = vadd.f32 %v4065_v48, %v4064_v41  ;;  %v778_v41 = vmul.f32 %v6735_v8, %v328_v39 }
  0xba   : > { %v5414_v51 = vsel %vm3609_vm3, %v4963_v49, 0.0  ;;  %6425 = vmatmul.msk.bf16.gmra.mxu0 %vm1800_vm2, %v1571_v46 }
  0xbb   : > { %v5415_v52 = vadd.f32 %v5414_v51, %v5413_v45  ;;  %v1228_v45 = vadd.f32 %v6748_v9, %v778_v41 }
  0xbd   : > { %v1618_v49 = vpack.c.bf16 %v1228_v45, %v1227_v44 }
  0xbf   : > { %v2501_v57 = vpop.f32.mrf.mxu0  ;;  %6472 = vmatmul.msk.bf16.gmra.mxu1 %vm1800_vm2, %v1618_v49 }
  0xc0   : > { %3615 = vst.msk [vmem:[%s6817_s8 + $0x28] sm:$0xff] %vm3609_vm3, %v2501_v57  ;;  %v4067_v58 = vsel %vm3609_vm3, %v2501_v57, 0.0  ;;  %v4964_v59 = vmul.f32 %v2501_v57, %v2501_v57 }
  0xc1   : > { %v4068_v60 = vadd.f32 %v4067_v58, %v4066_v50 }
  0xc2   : > { %v5416_v61 = vsel %vm3609_vm3, %v4964_v59, 0.0 }
  0xc3   : > { %v5417_v0 = vadd.f32 %v5416_v61, %v5415_v52  ;;  %v1139_v52 = vadd.f32 %v6748_v9, %v689_v42  ;;  %v241_v61 = vld [vmem:[%s6743_s29 + $0xe0] sm:$0xff] }
  0xc5   : > { %v1574_v55 = vpack.c.bf16 %v1140_v53, %v1139_v52  ;;  %v246_v53 = vld [vmem:[%s6743_s29 + $0x108] sm:$0xff] }
  0xc7   : > { %v2504_v2 = vpop.f32.mrf.mxu0 }
  0xc8   : > { %3616 = vst.msk [vmem:[%s6817_s8 + $0x30] sm:$0xff] %vm3609_vm3, %v2504_v2  ;;  %v4069_v3 = vsel %vm3609_vm3, %v2504_v2, 0.0  ;;  %v4965_v4 = vmul.f32 %v2504_v2, %v2504_v2 }
  0xc9   : > { %v4070_v5 = vadd.f32 %v4069_v3, %v4068_v60 }
  0xca   : > { %v5418_v6 = vsel %vm3609_vm3, %v4965_v4, 0.0  ;;  %6426 = vmatmul.msk.bf16.gmra.mxu0 %vm1800_vm2, %v1572_v1  ;;  %v330_v1 = vld [vmem:[%s6743_s29 + $0x3a8] sm:$0xff]  ;;  %v691_v4 = vmul.f32 %v6735_v8, %v241_v61 }
  0xcb   : > { %v5419_v10 = vadd.f32 %v5418_v6, %v5417_v0  ;;  %v329_v0 = vld [vmem:[%s6743_s29 + $0x3a0] sm:$0xff]  ;;  %v780_v3 = vmul.f32 %v6735_v8, %v330_v1 }
  0xcc   : > { %v779_v2 = vmul.f32 %v6735_v8, %v329_v0  ;;  %v1141_v16 = vadd.f32 %v6748_v9, %v691_v4 }
  0xcd   : > { %v1230_v7 = vadd.f32 %v6748_v9, %v780_v3 }
  0xce   : > { %v1229_v6 = vadd.f32 %v6748_v9, %v779_v2 }
  0xcf   : > { %v2506_v20 = vpop.f32.mrf.mxu0 }
  0xd0   : > { %3617 = vst.msk [vmem:[%s6817_s8 + $0x38] sm:$0xff] %vm3609_vm3, %v2506_v20  ;;  %v4071_v21 = vsel %vm3609_vm3, %v2506_v20, 0.0  ;;  %v4966_v22 = vmul.f32 %v2506_v20, %v2506_v20  ;;  %v1619_v13 = vpack.c.bf16 %v1230_v7, %v1229_v6 }
  0xd1   : > { %v4072_v24 = vadd.f32 %v4071_v21, %v4070_v5  ;;  %v692_v5 = vmul.f32 %v6735_v8, %v242_v63 }
  0xd2   : > { %v5420_v25 = vsel %vm3609_vm3, %v4966_v22, 0.0  ;;  %6473 = vmatmul.msk.bf16.gmra.mxu1 %vm1800_vm2, %v1619_v13 }
  0xd3   : > { %v5421_v28 = vadd.f32 %v5420_v25, %v5419_v10  ;;  %v1142_v17 = vadd.f32 %v6748_v9, %v692_v5  ;;  %v243_v25 = vld [vmem:[%s6743_s29 + $0xf0] sm:$0xff] }
  0xd5   : > { %v1575_v19 = vpack.c.bf16 %v1142_v17, %v1141_v16  ;;  %v248_v17 = vld [vmem:[%s6743_s29 + $0x118] sm:$0xff] }
  0xd7   : > { %v2509_v30 = vpop.f32.mrf.mxu0 }
  0xd8   : > { %3618 = vst.msk [vmem:[%s6817_s8 + $0x40] sm:$0xff] %vm3609_vm3, %v2509_v30  ;;  %v4073_v31 = vsel %vm3609_vm3, %v2509_v30, 0.0  ;;  %v4967_v32 = vmul.f32 %v2509_v30, %v2509_v30 }
  0xd9   : > { %v4074_v33 = vadd.f32 %v4073_v31, %v4072_v24 }
  0xda   : > { %v5422_v34 = vsel %vm3609_vm3, %v4967_v32, 0.0  ;;  %6427 = vmatmul.msk.bf16.gmra.mxu0 %vm1800_vm2, %v1573_v29  ;;  %v332_v29 = vld [vmem:[%s6743_s29 + $0x3b8] sm:$0xff]  ;;  %v693_v32 = vmul.f32 %v6735_v8, %v243_v25 }
  0xdb   : > { %v5423_v36 = vadd.f32 %v5422_v34, %v5421_v28  ;;  %v331_v28 = vld [vmem:[%s6743_s29 + $0x3b0] sm:$0xff]  ;;  %v782_v31 = vmul.f32 %v6735_v8, %v332_v29 }
  0xdc   : > { %v781_v30 = vmul.f32 %v6735_v8, %v331_v28  ;;  %v1143_v42 = vadd.f32 %v6748_v9, %v693_v32 }
  0xdd   : > { %v1232_v35 = vadd.f32 %v6748_v9, %v782_v31 }
  0xde   : > { %v1231_v34 = vadd.f32 %v6748_v9, %v781_v30 }
  0xdf   : > { %v2511_v46 = vpop.f32.mrf.mxu0 }
  0xe0   : > { %3619 = vst.msk [vmem:[%s6817_s8 + $0x48] sm:$0xff] %vm3609_vm3, %v2511_v46  ;;  %v4075_v47 = vsel %vm3609_vm3, %v2511_v46, 0.0  ;;  %v4968_v48 = vmul.f32 %v2511_v46, %v2511_v46  ;;  %v1620_v39 = vpack.c.bf16 %v1232_v35, %v1231_v34 }
  0xe1   : > { %v4076_v50 = vadd.f32 %v4075_v47, %v4074_v33  ;;  %v694_v33 = vmul.f32 %v6735_v8, %v244_v27 }
  0xe2   : > { %v5424_v51 = vsel %vm3609_vm3, %v4968_v48, 0.0  ;;  %6474 = vmatmul.msk.bf16.gmra.mxu1 %vm1800_vm2, %v1620_v39 }
  0xe3   : > { %v5425_v54 = vadd.f32 %v5424_v51, %v5423_v36  ;;  %v1144_v43 = vadd.f32 %v6748_v9, %v694_v33  ;;  %v245_v51 = vld [vmem:[%s6743_s29 + $0x100] sm:$0xff] }
  0xe5   : > { %v1576_v45 = vpack.c.bf16 %v1144_v43, %v1143_v42  ;;  %v250_v43 = vld [vmem:[%s6743_s29 + $0x128] sm:$0xff] }
  0xe7   : > { %v2514_v56 = vpop.f32.mrf.mxu0 }
  0xe8   : > { %3620 = vst.msk [vmem:[%s6817_s8 + $0x50] sm:$0xff] %vm3609_vm3, %v2514_v56  ;;  %v4077_v57 = vsel %vm3609_vm3, %v2514_v56, 0.0  ;;  %v4969_v58 = vmul.f32 %v2514_v56, %v2514_v56 }
  0xe9   : > { %v4078_v59 = vadd.f32 %v4077_v57, %v4076_v50 }
  0xea   : > { %v5426_v60 = vsel %vm3609_vm3, %v4969_v58, 0.0  ;;  %6428 = vmatmul.msk.bf16.gmra.mxu0 %vm1800_vm2, %v1574_v55  ;;  %v334_v55 = vld [vmem:[%s6743_s29 + $0x3c8] sm:$0xff]  ;;  %v695_v58 = vmul.f32 %v6735_v8, %v245_v51 }
  0xeb   : > { %v5427_v62 = vadd.f32 %v5426_v60, %v5425_v54  ;;  %v333_v54 = vld [vmem:[%s6743_s29 + $0x3c0] sm:$0xff]  ;;  %v784_v57 = vmul.f32 %v6735_v8, %v334_v55 }
  0xec   : > { %v783_v56 = vmul.f32 %v6735_v8, %v333_v54  ;;  %v1145_v4 = vadd.f32 %v6748_v9, %v695_v58 }
  0xed   : > { %v1234_v61 = vadd.f32 %v6748_v9, %v784_v57 }
  0xee   : > { %v1233_v60 = vadd.f32 %v6748_v9, %v783_v56 }
  0xef   : > { %v2516_v10 = vpop.f32.mrf.mxu0 }
  0xf0   : > { %3621 = vst.msk [vmem:[%s6817_s8 + $0x58] sm:$0xff] %vm3609_vm3, %v2516_v10  ;;  %v4079_v11 = vsel %vm3609_vm3, %v2516_v10, 0.0  ;;  %v4970_v12 = vmul.f32 %v2516_v10, %v2516_v10  ;;  %v1621_v1 = vpack.c.bf16 %v1234_v61, %v1233_v60 }
  0xf1   : > { %v4080_v14 = vadd.f32 %v4079_v11, %v4078_v59  ;;  %v696_v59 = vmul.f32 %v6735_v8, %v246_v53 }
  0xf2   : > { %v5428_v15 = vsel %vm3609_vm3, %v4970_v12, 0.0  ;;  %6475 = vmatmul.msk.bf16.gmra.mxu1 %vm1800_vm2, %v1621_v1 }
  0xf3   : > { %v5429_v18 = vadd.f32 %v5428_v15, %v5427_v62  ;;  %v1146_v5 = vadd.f32 %v6748_v9, %v696_v59  ;;  %v247_v15 = vld [vmem:[%s6743_s29 + $0x110] sm:$0xff] }
  0xf5   : > { %v1577_v7 = vpack.c.bf16 %v1146_v5, %v1145_v4  ;;  %v252_v5 = vld [vmem:[%s6743_s29 + $0x138] sm:$0xff] }
  0xf7   : > { %v2519_v20 = vpop.f32.mrf.mxu0 }
  0xf8   : > { %3622 = vst.msk [vmem:[%s6817_s8 + $0x60] sm:$0xff] %vm3609_vm3, %v2519_v20  ;;  %v4081_v21 = vsel %vm3609_vm3, %v2519_v20, 0.0  ;;  %v4971_v22 = vmul.f32 %v2519_v20, %v2519_v20 }
  0xf9   : > { %v4082_v23 = vadd.f32 %v4081_v21, %v4080_v14 }
  0xfa   : > { %v5430_v24 = vsel %vm3609_vm3, %v4971_v22, 0.0  ;;  %6429 = vmatmul.msk.bf16.gmra.mxu0 %vm1800_vm2, %v1575_v19  ;;  %v336_v19 = vld [vmem:[%s6743_s29 + $0x3d8] sm:$0xff]  ;;  %v697_v22 = vmul.f32 %v6735_v8, %v247_v15 }
  0xfb   : > { %v5431_v26 = vadd.f32 %v5430_v24, %v5429_v18  ;;  %v335_v18 = vld [vmem:[%s6743_s29 + $0x3d0] sm:$0xff]  ;;  %v786_v21 = vmul.f32 %v6735_v8, %v336_v19 }
  0xfc   : > { %v785_v20 = vmul.f32 %v6735_v8, %v335_v18  ;;  %v1147_v32 = vadd.f32 %v6748_v9, %v697_v22 }
  0xfd   : > { %v1236_v25 = vadd.f32 %v6748_v9, %v786_v21 }
  0xfe   : > { %v1235_v24 = vadd.f32 %v6748_v9, %v785_v20 }
  0xff   : > { %v2521_v36 = vpop.f32.mrf.mxu0 }
 0x100   : > { %3623 = vst.msk [vmem:[%s6817_s8 + $0x68] sm:$0xff] %vm3609_vm3, %v2521_v36  ;;  %v4083_v37 = vsel %vm3609_vm3, %v2521_v36, 0.0  ;;  %v4972_v38 = vmul.f32 %v2521_v36, %v2521_v36  ;;  %v1622_v29 = vpack.c.bf16 %v1236_v25, %v1235_v24 }
 0x101   : > { %v4084_v40 = vadd.f32 %v4083_v37, %v4082_v23  ;;  %v698_v23 = vmul.f32 %v6735_v8, %v248_v17 }
 0x102   : > { %v5432_v41 = vsel %vm3609_vm3, %v4972_v38, 0.0  ;;  %6476 = vmatmul.msk.bf16.gmra.mxu1 %vm1800_vm2, %v1622_v29 }
 0x103   : > { %v5433_v44 = vadd.f32 %v5432_v41, %v5431_v26  ;;  %v1148_v33 = vadd.f32 %v6748_v9, %v698_v23  ;;  %v249_v41 = vld [vmem:[%s6743_s29 + $0x120] sm:$0xff] }
 0x105   : > { %v1578_v35 = vpack.c.bf16 %v1148_v33, %v1147_v32  ;;  %v254_v33 = vld [vmem:[%s6743_s29 + $0x148] sm:$0xff] }
 0x107   : > { %v2524_v46 = vpop.f32.mrf.mxu0 }
 0x108   : > { %3624 = vst.msk [vmem:[%s6817_s8 + $0x70] sm:$0xff] %vm3609_vm3, %v2524_v46  ;;  %v4085_v47 = vsel %vm3609_vm3, %v2524_v46, 0.0  ;;  %v4973_v48 = vmul.f32 %v2524_v46, %v2524_v46 }
 0x109   : > { %v4086_v49 = vadd.f32 %v4085_v47, %v4084_v40 }
 0x10a   : > { %v5434_v50 = vsel %vm3609_vm3, %v4973_v48, 0.0  ;;  %6430 = vmatmul.msk.bf16.gmra.mxu0 %vm1800_vm2, %v1576_v45  ;;  %v338_v45 = vld [vmem:[%s6743_s29 + $0x3e8] sm:$0xff]  ;;  %v699_v48 = vmul.f32 %v6735_v8, %v249_v41 }
 0x10b   : > { %v5435_v52 = vadd.f32 %v5434_v50, %v5433_v44  ;;  %v337_v44 = vld [vmem:[%s6743_s29 + $0x3e0] sm:$0xff]  ;;  %v788_v47 = vmul.f32 %v6735_v8, %v338_v45 }
 0x10c   : > { %v787_v46 = vmul.f32 %v6735_v8, %v337_v44  ;;  %v1149_v58 = vadd.f32 %v6748_v9, %v699_v48 }
 0x10d   : > { %v1238_v51 = vadd.f32 %v6748_v9, %v788_v47 }
 0x10e   : > { %v1237_v50 = vadd.f32 %v6748_v9, %v787_v46 }
 0x10f   : > { %v2526_v62 = vpop.f32.mrf.mxu0 }
 0x110   : > { %3625 = vst.msk [vmem:[%s6817_s8 + $0x78] sm:$0xff] %vm3609_vm3, %v2526_v62  ;;  %v4087_v63 = vsel %vm3609_vm3, %v2526_v62, 0.0  ;;  %v4974_v0 = vmul.f32 %v2526_v62, %v2526_v62  ;;  %v1623_v55 = vpack.c.bf16 %v1238_v51, %v1237_v50 }
 0x111   : > { %v4088_v2 = vadd.f32 %v4087_v63, %v4086_v49  ;;  %v700_v49 = vmul.f32 %v6735_v8, %v250_v43 }
 0x112   : > { %v5436_v3 = vsel %vm3609_vm3, %v4974_v0, 0.0  ;;  %6477 = vmatmul.msk.bf16.gmra.mxu1 %vm1800_vm2, %v1623_v55 }
 0x113   : > { %v5437_v6 = vadd.f32 %v5436_v3, %v5435_v52  ;;  %v1150_v59 = vadd.f32 %v6748_v9, %v700_v49  ;;  %v251_v3 = vld [vmem:[%s6743_s29 + $0x130] sm:$0xff] }
 0x115   : > { %v1579_v61 = vpack.c.bf16 %v1150_v59, %v1149_v58  ;;  %v255_v59 = vld [vmem:[%s6743_s29 + $0x150] sm:$0xff] }
 0x117   : > { %v2529_v10 = vpop.f32.mrf.mxu0 }
 0x118   : > { %3626 = vst.msk [vmem:[%s6817_s8 + $0x80] sm:$0xff] %vm3609_vm3, %v2529_v10  ;;  %v4089_v11 = vsel %vm3609_vm3, %v2529_v10, 0.0  ;;  %v4975_v12 = vmul.f32 %v2529_v10, %v2529_v10 }
 0x119   : > { %v4090_v13 = vadd.f32 %v4089_v11, %v4088_v2 }
 0x11a   : > { %v5438_v14 = vsel %vm3609_vm3, %v4975_v12, 0.0  ;;  %6431 = vmatmul.msk.bf16.gmra.mxu0 %vm1800_vm2, %v1577_v7  ;;  %v340_v7 = vld [vmem:[%s6743_s29 + $0x3f8] sm:$0xff]  ;;  %v701_v12 = vmul.f32 %v6735_v8, %v251_v3 }
 0x11b   : > { %v5439_v16 = vadd.f32 %v5438_v14, %v5437_v6  ;;  %v339_v6 = vld [vmem:[%s6743_s29 + $0x3f0] sm:$0xff]  ;;  %v790_v11 = vmul.f32 %v6735_v8, %v340_v7 }
 0x11c   : > { %v789_v10 = vmul.f32 %v6735_v8, %v339_v6  ;;  %v1151_v22 = vadd.f32 %v6748_v9, %v701_v12 }
 0x11d   : > { %v1240_v15 = vadd.f32 %v6748_v9, %v790_v11 }
 0x11e   : > { %v1239_v14 = vadd.f32 %v6748_v9, %v789_v10 }
 0x11f   : > { %v2531_v26 = vpop.f32.mrf.mxu0 }
 0x120   : > { %3627 = vst.msk [vmem:[%s6817_s8 + $0x88] sm:$0xff] %vm3609_vm3, %v2531_v26  ;;  %v4091_v27 = vsel %vm3609_vm3, %v2531_v26, 0.0  ;;  %v4976_v28 = vmul.f32 %v2531_v26, %v2531_v26  ;;  %v1624_v19 = vpack.c.bf16 %v1240_v15, %v1239_v14 }
 0x121   : > { %v4092_v30 = vadd.f32 %v4091_v27, %v4090_v13  ;;  %v702_v13 = vmul.f32 %v6735_v8, %v252_v5 }
 0x122   : > { %v5440_v31 = vsel %vm3609_vm3, %v4976_v28, 0.0  ;;  %6478 = vmatmul.msk.bf16.gmra.mxu1 %vm1800_vm2, %v1624_v19  ;;  %v7055_v43 = vpop.f32.mrf.mxu1 }
 0x123   : > { %v5441_v34 = vadd.f32 %v5440_v31, %v5439_v16  ;;  %v1152_v23 = vadd.f32 %v6748_v9, %v702_v13  ;;  %v253_v31 = vld [vmem:[%s6743_s29 + $0x140] sm:$0xff]  ;;  %3722 = vst.msk [vmem:[%s6817_s8 + $0x380] sm:$0xff] %vm3609_vm3, %v7055_v43 }
 0x125   : > { %v1580_v25 = vpack.c.bf16 %v1152_v23, %v1151_v22 }
 0x127   : > { %v2534_v36 = vpop.f32.mrf.mxu0 }
 0x128   : > { %3628 = vst.msk [vmem:[%s6817_s8 + $0x90] sm:$0xff] %vm3609_vm3, %v2534_v36  ;;  %v4093_v37 = vsel %vm3609_vm3, %v2534_v36, 0.0  ;;  %v4977_v38 = vmul.f32 %v2534_v36, %v2534_v36 }
 0x129   : > { %v4094_v39 = vadd.f32 %v4093_v37, %v4092_v30 }
 0x12a   : > { %v5442_v40 = vsel %vm3609_vm3, %v4977_v38, 0.0  ;;  %6432 = vmatmul.msk.bf16.gmra.mxu0 %vm1800_vm2, %v1578_v35  ;;  %v342_v35 = vld [vmem:[%s6743_s29 + $0x408] sm:$0xff]  ;;  %v703_v38 = vmul.f32 %v6735_v8, %v253_v31 }
 0x12b   : > { %v5443_v42 = vadd.f32 %v5442_v40, %v5441_v34  ;;  %v341_v34 = vld [vmem:[%s6743_s29 + $0x400] sm:$0xff]  ;;  %v792_v37 = vmul.f32 %v6735_v8, %v342_v35 }
 0x12c   : > { %v791_v36 = vmul.f32 %v6735_v8, %v341_v34  ;;  %v1153_v49 = vadd.f32 %v6748_v9, %v703_v38 }
 0x12d   : > { %v1242_v41 = vadd.f32 %v6748_v9, %v792_v37 }
 0x12e   : > { %v1241_v40 = vadd.f32 %v6748_v9, %v791_v36 }
 0x12f   : > { %v2536_v52 = vpop.f32.mrf.mxu0 }
 0x130   : > { %3629 = vst.msk [vmem:[%s6817_s8 + $0x98] sm:$0xff] %vm3609_vm3, %v2536_v52  ;;  %v4095_v53 = vsel %vm3609_vm3, %v2536_v52, 0.0  ;;  %v4978_v54 = vmul.f32 %v2536_v52, %v2536_v52  ;;  %v1625_v46 = vpack.c.bf16 %v1242_v41, %v1241_v40 }
 0x131   : > { %v4096_v56 = vadd.f32 %v4095_v53, %v4094_v39  ;;  %v704_v39 = vmul.f32 %v6735_v8, %v254_v33 }
 0x132   : > { %v5444_v57 = vsel %vm3609_vm3, %v4978_v54, 0.0  ;;  %6479 = vmatmul.msk.bf16.gmra.mxu1 %vm1800_vm2, %v1625_v46  ;;  %v7067_v54 = vpop.f32.mrf.mxu1 }
 0x133   : > { %v5445_v60 = vadd.f32 %v5444_v57, %v5443_v42  ;;  %v1154_v50 = vadd.f32 %v6748_v9, %v704_v39  ;;  %3723 = vst.msk [vmem:[%s6817_s8 + $0x388] sm:$0xff] %vm3609_vm3, %v7067_v54 }
 0x135   : > { %v1581_v52 = vpack.c.bf16 %v1154_v50, %v1153_v49 }
 0x137   : > { %v2539_v62 = vpop.f32.mrf.mxu0 }
 0x138   : > { %3630 = vst.msk [vmem:[%s6817_s8 + $0xa0] sm:$0xff] %vm3609_vm3, %v2539_v62  ;;  %v4097_v63 = vsel %vm3609_vm3, %v2539_v62, 0.0  ;;  %v4979_v0 = vmul.f32 %v2539_v62, %v2539_v62  ;;  %v343_v62 = vld [vmem:[%s6743_s29 + $0x410] sm:$0xff] }
 0x139   : > { %v4098_v1 = vadd.f32 %v4097_v63, %v4096_v56  ;;  %v344_v63 = vld [vmem:[%s6743_s29 + $0x418] sm:$0xff] }
 0x13a   : > { %v5446_v2 = vsel %vm3609_vm3, %v4979_v0, 0.0  ;;  %6433 = vmatmul.msk.bf16.gmra.mxu0 %vm1800_vm2, %v1579_v61  ;;  %v256_v61 = vld [vmem:[%s6743_s29 + $0x158] sm:$0xff]  ;;  %v793_v0 = vmul.f32 %v6735_v8, %v343_v62 }
 0x13b   : > { %v5447_v4 = vadd.f32 %v5446_v2, %v5445_v60  ;;  %v705_v2 = vmul.f32 %v6735_v8, %v255_v59  ;;  %v706_v3 = vmul.f32 %v6735_v8, %v256_v61  ;;  %v348_v59 = vld [vmem:[%s6743_s29 + $0x438] sm:$0xff] }
 0x13c   : > { %v7087_v7 = vpop.f32.mrf.mxu1  ;;  %v798_v61 = vmul.f32 %v6735_v8, %v348_v59  ;;  %v352_v59 = vld [vmem:[%s6743_s29 + $0x458] sm:$0xff] }
 0x13d   : > { %3724 = vst.msk [vmem:[%s6817_s8 + $0x390] sm:$0xff] %vm3609_vm3, %v7087_v7  ;;  %v1155_v15 = vadd.f32 %v6748_v9, %v705_v2 }
 0x13f   : > { %v2541_v16 = vpop.f32.mrf.mxu0 }
 0x140   : > { %3631 = vst.msk [vmem:[%s6817_s8 + $0xa8] sm:$0xff] %vm3609_vm3, %v2541_v16  ;;  %v4099_v17 = vsel %vm3609_vm3, %v2541_v16, 0.0  ;;  %v4980_v18 = vmul.f32 %v2541_v16, %v2541_v16  ;;  %v1156_v16 = vadd.f32 %v6748_v9, %v706_v3 }
 0x141   : > { %v4100_v20 = vadd.f32 %v4099_v17, %v4098_v1  ;;  %v794_v1 = vmul.f32 %v6735_v8, %v344_v63 }
 0x142   : > { %v5448_v21 = vsel %vm3609_vm3, %v4980_v18, 0.0  ;;  %v1582_v18 = vpack.c.bf16 %v1156_v16, %v1155_v15 }
 0x143   : > { %v5449_v24 = vadd.f32 %v5448_v21, %v5447_v4  ;;  %v1243_v4 = vadd.f32 %v6748_v9, %v793_v0  ;;  %v1244_v5 = vadd.f32 %v6748_v9, %v794_v1  ;;  %v1248_v1 = vadd.f32 %v6748_v9, %v798_v61 }
 0x145   : > { %v1626_v12 = vpack.c.bf16 %v1244_v5, %v1243_v4 }
 0x147   : > { %v2544_v26 = vpop.f32.mrf.mxu0  ;;  %6480 = vmatmul.msk.bf16.gmra.mxu1 %vm1800_vm2, %v1626_v12 }
 0x148   : > { %3632 = vst.msk [vmem:[%s6817_s8 + $0xb0] sm:$0xff] %vm3609_vm3, %v2544_v26  ;;  %v4101_v27 = vsel %vm3609_vm3, %v2544_v26, 0.0  ;;  %v4981_v28 = vmul.f32 %v2544_v26, %v2544_v26 }
 0x149   : > { %v4102_v29 = vadd.f32 %v4101_v27, %v4100_v20  ;;  %v7099_v20 = vpop.f32.mrf.mxu1  ;;  %v258_v27 = vld [vmem:[%s6743_s29 + $0x168] sm:$0xff] }
 0x14a   : > { %v5450_v30 = vsel %vm3609_vm3, %v4981_v28, 0.0  ;;  %6434 = vmatmul.msk.bf16.gmra.mxu0 %vm1800_vm2, %v1580_v25  ;;  %3725 = vst.msk [vmem:[%s6817_s8 + $0x398] sm:$0xff] %vm3609_vm3, %v7099_v20  ;;  %v257_v25 = vld [vmem:[%s6743_s29 + $0x160] sm:$0xff]  ;;  %v708_v33 = vmul.f32 %v6735_v8, %v258_v27 }
 0x14b   : > { %v5451_v32 = vadd.f32 %v5450_v30, %v5449_v24  ;;  %v345_v28 = vld [vmem:[%s6743_s29 + $0x420] sm:$0xff] }
 0x14c   : > { %v795_v30 = vmul.f32 %v6735_v8, %v345_v28  ;;  %v7185_v27 = vld [vmem:[%s12276_s1] ss:$0 sm:$0xff] }
 0x14d   : > { %v802_v61 = vmul.f32 %v7185_v27, %v352_v59  ;;  %v439_v59 = vld [vmem:[%s6743_s29 + $0x710] sm:$0xff] }
 0x14e   : > { %v1245_v34 = vadd.f32 %v6748_v9, %v795_v30 }
 0x14f   : > { %v2546_v42 = vpop.f32.mrf.mxu0 }
 0x150   : > { %3633 = vst.msk [vmem:[%s6817_s8 + $0xb8] sm:$0xff] %vm3609_vm3, %v2546_v42  ;;  %v4103_v44 = vsel %vm3609_vm3, %v2546_v42, 0.0  ;;  %v4982_v45 = vmul.f32 %v2546_v42, %v2546_v42 }
 0x151   : > { %v4104_v47 = vadd.f32 %v4103_v44, %v4102_v29  ;;  %v346_v29 = vld [vmem:[%s6743_s29 + $0x428] sm:$0xff]  ;;  %v7119_v37 = vpop.f32.mrf.mxu1 }
 0x152   : > { %v5452_v48 = vsel %vm3609_vm3, %v4982_v45, 0.0  ;;  %v796_v31 = vmul.f32 %v6735_v8, %v346_v29  ;;  %3726 = vst.msk [vmem:[%s6817_s8 + $0x3a0] sm:$0xff] %vm3609_vm3, %v7119_v37  ;;  %v1158_v45 = vadd.f32 %v6748_v9, %v708_v33 }
 0x153   : > { %v5453_v51 = vadd.f32 %v5452_v48, %v5451_v32  ;;  %v707_v32 = vmul.f32 %v6735_v8, %v257_v25  ;;  %v349_v25 = vld [vmem:[%s6743_s29 + $0x440] sm:$0xff] }
 0x154   : > { %v1246_v35 = vadd.f32 %v6748_v9, %v796_v31  ;;  %v799_v28 = vmul.f32 %v7185_v27, %v349_v25 }
 0x155   : > { %v1157_v44 = vadd.f32 %v6748_v9, %v707_v32 }
 0x156   : > { %v1627_v40 = vpack.c.bf16 %v1246_v35, %v1245_v34 }
 0x157   : > { %v2549_v53 = vpop.f32.mrf.mxu0 }
 0x158   : > { %3634 = vst.msk [vmem:[%s6817_s8 + $0xc0] sm:$0xff] %vm3609_vm3, %v2549_v53  ;;  %v4105_v55 = vsel %vm3609_vm3, %v2549_v53, 0.0  ;;  %v4983_v56 = vmul.f32 %v2549_v53, %v2549_v53  ;;  %6481 = vmatmul.msk.bf16.gmra.mxu1 %vm1800_vm2, %v1627_v40 }
 0x159   : > { %v4106_v57 = vadd.f32 %v4105_v55, %v4104_v47  ;;  %v1583_v47 = vpack.c.bf16 %v1158_v45, %v1157_v44  ;;  %v7131_v49 = vpop.f32.mrf.mxu1  ;;  %v259_v55 = vld [vmem:[%s6743_s29 + $0x170] sm:$0xff] }
 0x15a   : > { %v5454_v58 = vsel %vm3609_vm3, %v4983_v56, 0.0  ;;  %6435 = vmatmul.msk.bf16.gmra.mxu0 %vm1800_vm2, %v1581_v52  ;;  %3727 = vst.msk [vmem:[%s6817_s8 + $0x3a8] sm:$0xff] %vm3609_vm3, %v7131_v49  ;;  %v709_v62 = vmul.f32 %v6735_v8, %v259_v55  ;;  %v263_v55 = vld [vmem:[%s6743_s29 + $0x190] sm:$0xff] }
 0x15b   : > { %v5455_v60 = vadd.f32 %v5454_v58, %v5453_v51  ;;  %v347_v58 = vld [vmem:[%s6743_s29 + $0x430] sm:$0xff] }
 0x15f   : > { %v2551_v6 = vpop.f32.mrf.mxu0 }
 0x160   : > { %3635 = vst.msk [vmem:[%s6817_s8 + $0xc8] sm:$0xff] %vm3609_vm3, %v2551_v6  ;;  %v4107_v10 = vsel %vm3609_vm3, %v2551_v6, 0.0  ;;  %v4984_v11 = vmul.f32 %v2551_v6, %v2551_v6 }
 0x161   : > { %v4108_v13 = vadd.f32 %v4107_v10, %v4106_v57  ;;  %v260_v57 = vld [vmem:[%s6743_s29 + $0x178] sm:$0xff]  ;;  %v7151_v3 = vpop.f32.mrf.mxu1 }
 0x162   : > { %v5456_v14 = vsel %vm3609_vm3, %v4984_v11, 0.0  ;;  %v710_v63 = vmul.f32 %v6735_v8, %v260_v57  ;;  %3728 = vst.msk [vmem:[%s6817_s8 + $0x3b0] sm:$0xff] %vm3609_vm3, %v7151_v3  ;;  %v264_v57 = vld [vmem:[%s6743_s29 + $0x198] sm:$0xff] }
 0x163   : > { %v5457_v17 = vadd.f32 %v5456_v14, %v5455_v60  ;;  %v797_v60 = vmul.f32 %v6735_v8, %v347_v58  ;;  %v351_v58 = vld [vmem:[%s6743_s29 + $0x450] sm:$0xff] }
 0x165   : > { %v1247_v0 = vadd.f32 %v6748_v9, %v797_v60  ;;  %v7163_v9 = vld [vmem:[%s12276_s1 + $0x1] ss:$0 sm:$0xff]  ;;  %v801_v60 = vmul.f32 %v7185_v27, %v351_v58 }
 0x166   : > { %v1159_v11 = vadd.f32 %v7163_v9, %v709_v62  ;;  %v1160_v12 = vadd.f32 %v7163_v9, %v710_v63  ;;  %v1249_v32 = vadd.f32 %v7163_v9, %v799_v28  ;;  %v713_v62 = vmul.f32 %v7185_v27, %v263_v55 }
 0x167   : > { %v2554_v19 = vpop.f32.mrf.mxu0  ;;  %v1628_v6 = vpack.c.bf16 %v1248_v1, %v1247_v0  ;;  %v714_v63 = vmul.f32 %v7185_v27, %v264_v57  ;;  %v1251_v0 = vadd.f32 %v7163_v9, %v801_v60  ;;  %v1252_v1 = vadd.f32 %v7163_v9, %v802_v61  ;;  %v440_v60 = vld [vmem:[%s6743_s29 + $0x718] sm:$0xff] }
 0x168   : > { %3636 = vst.msk [vmem:[%s6817_s8 + $0xd0] sm:$0xff] %vm3609_vm3, %v2554_v19  ;;  %v4109_v21 = vsel %vm3609_vm3, %v2554_v19, 0.0  ;;  %v4985_v22 = vmul.f32 %v2554_v19, %v2554_v19  ;;  %v1584_v14 = vpack.c.bf16 %v1160_v12, %v1159_v11  ;;  %v1163_v12 = vadd.f32 %v7163_v9, %v713_v62 }
 0x169   : > { %v4110_v23 = vadd.f32 %v4109_v21, %v4108_v13  ;;  %6482 = vmatmul.msk.bf16.gmra.mxu1 %vm1800_vm2, %v1628_v6  ;;  %v7168_v16 = vpop.f32.mrf.mxu1  ;;  %v889_v62 = vmul.f32 %v7185_v27, %v439_v59 }
 0x16a   : > { %v5458_v24 = vsel %vm3609_vm3, %v4985_v22, 0.0  ;;  %6436 = vmatmul.msk.bf16.gmra.mxu0 %vm1800_vm2, %v1582_v18  ;;  %3729 = vst.msk [vmem:[%s6817_s8 + $0x3b8] sm:$0xff] %vm3609_vm3, %v7168_v16  ;;  %v261_v22 = vld [vmem:[%s6743_s29 + $0x180] sm:$0xff] }
 0x16b   : > { %v5459_v26 = vadd.f32 %v5458_v24, %v5457_v17  ;;  %v262_v24 = vld [vmem:[%s6743_s29 + $0x188] sm:$0xff]  ;;  %v711_v30 = vmul.f32 %v7185_v27, %v261_v22 }
 0x16c   : > { %v712_v31 = vmul.f32 %v7185_v27, %v262_v24 }
 0x16e   : > { %v1162_v44 = vadd.f32 %v7163_v9, %v712_v31  ;;  %v265_v31 = vld [vmem:[%s6743_s29 + $0x1a0] sm:$0xff] }
 0x16f   : > { %v2556_v36 = vpop.f32.mrf.mxu0 }
 0x170   : > { %3637 = vst.msk [vmem:[%s6817_s8 + $0xd8] sm:$0xff] %vm3609_vm3, %v2556_v36  ;;  %v4111_v38 = vsel %vm3609_vm3, %v2556_v36, 0.0  ;;  %v4986_v39 = vmul.f32 %v2556_v36, %v2556_v36 }
 0x171   : > { %v4112_v41 = vadd.f32 %v4111_v38, %v4110_v23  ;;  %v7193_v35 = vpop.f32.mrf.mxu1 }
 0x172   : > { %v5460_v42 = vsel %vm3609_vm3, %v4986_v39, 0.0  ;;  %3730 = vst.msk [vmem:[%s6817_s8 + $0x3c0] sm:$0xff] %vm3609_vm3, %v7193_v35 }
 0x173   : > { %v5461_v46 = vadd.f32 %v5460_v42, %v5459_v26  ;;  %v350_v26 = vld [vmem:[%s6743_s29 + $0x448] sm:$0xff]  ;;  %v1161_v42 = vadd.f32 %v7163_v9, %v711_v30 }
 0x174   : > { %v800_v29 = vmul.f32 %v7185_v27, %v350_v26 }
 0x176   : > { %v1250_v33 = vadd.f32 %v7163_v9, %v800_v29 }
 0x177   : > { %v2559_v48 = vpop.f32.mrf.mxu0 }
 0x178   : > { %3638 = vst.msk [vmem:[%s6817_s8 + $0xe0] sm:$0xff] %vm3609_vm3, %v2559_v48  ;;  %v4113_v50 = vsel %vm3609_vm3, %v2559_v48, 0.0  ;;  %v4987_v51 = vmul.f32 %v2559_v48, %v2559_v48  ;;  %v1629_v39 = vpack.c.bf16 %v1250_v33, %v1249_v32  ;;  %v266_v33 = vld [vmem:[%s6743_s29 + $0x1a8] sm:$0xff] }
 0x179   : > { %v4114_v52 = vadd.f32 %v4113_v50, %v4112_v41  ;;  %v7205_v48 = vpop.f32.mrf.mxu1 }
 0x17a   : > { %v5462_v53 = vsel %vm3609_vm3, %v4987_v51, 0.0  ;;  %6437 = vmatmul.msk.bf16.gmra.mxu0 %vm1800_vm2, %v1583_v47  ;;  %6483 = vmatmul.msk.bf16.gmra.mxu1 %vm1800_vm2, %v1629_v39  ;;  %3731 = vst.msk [vmem:[%s6817_s8 + $0x3c8] sm:$0xff] %vm3609_vm3, %v7205_v48 }
 0x17b   : > { %v5463_v56 = vadd.f32 %v5462_v53, %v5461_v46  ;;  %v1585_v46 = vpack.c.bf16 %v1162_v44, %v1161_v42  ;;  %v716_v42 = vmul.f32 %v7185_v27, %v266_v33 }
 0x17d   : > { %v1166_v57 = vadd.f32 %v7163_v9, %v716_v42 }
 0x17f   : > { %v2561_v2 = vpop.f32.mrf.mxu0 }
 0x180   : > { %3639 = vst.msk [vmem:[%s6817_s8 + $0xe8] sm:$0xff] %vm3609_vm3, %v2561_v2  ;;  %v4115_v4 = vsel %vm3609_vm3, %v2561_v2, 0.0  ;;  %v4988_v5 = vmul.f32 %v2561_v2, %v2561_v2 }
 0x181   : > { %v4116_v10 = vadd.f32 %v4115_v4, %v4114_v52  ;;  %v7225_v4 = vpop.f32.mrf.mxu1 }
 0x182   : > { %v5464_v8 = vsel %vm3609_vm3, %v4988_v5, 0.0  ;;  %3732 = vst.msk [vmem:[%s6817_s8 + $0x3d0] sm:$0xff] %vm3609_vm3, %v7225_v4 }
 0x183   : > { %v5465_v13 = vadd.f32 %v5464_v8, %v5463_v56 }
 0x187   : > { %v2564_v15 = vpop.f32.mrf.mxu0 }
 0x188   : > { %3640 = vst.msk [vmem:[%s6817_s8 + $0xf0] sm:$0xff] %vm3609_vm3, %v2564_v15  ;;  %v4117_v17 = vsel %vm3609_vm3, %v2564_v15, 0.0  ;;  %v4989_v18 = vmul.f32 %v2564_v15, %v2564_v15  ;;  %v437_v15 = vld [vmem:[%s6743_s29 + $0x700] sm:$0xff] }
 0x189   : > { %v4118_v19 = vadd.f32 %v4117_v17, %v4116_v10  ;;  %v1630_v10 = vpack.c.bf16 %v1252_v1, %v1251_v0  ;;  %v438_v17 = vld [vmem:[%s6743_s29 + $0x708] sm:$0xff] }
 0x18a   : > { %v5466_v21 = vsel %vm3609_vm3, %v4989_v18, 0.0  ;;  %6438 = vmatmul.msk.bf16.gmra.mxu0 %vm1800_vm2, %v1584_v14 }
 0x18b   : > { %v5467_v23 = vadd.f32 %v5466_v21, %v5465_v13  ;;  %v1164_v13 = vadd.f32 %v7163_v9, %v714_v63  ;;  %6484 = vmatmul.msk.bf16.gmra.mxu1 %vm1800_vm2, %v1630_v10  ;;  %v888_v21 = vmul.f32 %v7185_v27, %v438_v17  ;;  %v890_v63 = vmul.f32 %v7185_v27, %v440_v60  ;;  %v355_v17 = vld [vmem:[%s6743_s29 + $0x470] sm:$0xff]  ;;  %v270_v60 = vld [vmem:[%s6743_s29 + $0x1c8] sm:$0xff] }
 0x18c   : > { %v1339_v10 = vadd.f32 %v7163_v9, %v889_v62  ;;  %v357_v62 = vld [vmem:[%s6743_s29 + $0x480] sm:$0xff] }
 0x18d   : > { %v1586_v18 = vpack.c.bf16 %v1164_v13, %v1163_v12  ;;  %v1338_v29 = vadd.f32 %v7163_v9, %v888_v21  ;;  %v267_v12 = vld [vmem:[%s6743_s29 + $0x1b0] sm:$0xff] }
 0x18f   : > { %v2566_v34 = vpop.f32.mrf.mxu0 }
 0x190   : > { %3641 = vst.msk [vmem:[%s6817_s8 + $0xf8] sm:$0xff] %vm3609_vm3, %v2566_v34  ;;  %v4119_v36 = vsel %vm3609_vm3, %v2566_v34, 0.0  ;;  %v4990_v38 = vmul.f32 %v2566_v34, %v2566_v34 }
 0x191   : > { %v4120_v40 = vadd.f32 %v4119_v36, %v4118_v19  ;;  %v887_v19 = vmul.f32 %v7185_v27, %v437_v15  ;;  %v353_v36 = vld [vmem:[%s6743_s29 + $0x460] sm:$0xff] }
 0x192   : > { %v5468_v41 = vsel %vm3609_vm3, %v4990_v38, 0.0  ;;  %v354_v38 = vld [vmem:[%s6743_s29 + $0x468] sm:$0xff]  ;;  %v803_v39 = vmul.f32 %v7185_v27, %v353_v36 }
 0x193   : > { %v5469_v45 = vadd.f32 %v5468_v41, %v5467_v23  ;;  %v7241_v23 = vpop.f32.mrf.mxu1  ;;  %v1337_v28 = vadd.f32 %v7163_v9, %v887_v19  ;;  %v715_v41 = vmul.f32 %v7185_v27, %v265_v31  ;;  %v805_v19 = vmul.f32 %v7185_v27, %v355_v17 }
 0x194   : > { %3733 = vst.msk [vmem:[%s6817_s8 + $0x3d8] sm:$0xff] %vm3609_vm3, %v7241_v23  ;;  %v1253_v44 = vadd.f32 %v7163_v9, %v803_v39 }
 0x195   : > { %v1673_v34 = vpack.c.bf16 %v1338_v29, %v1337_v28 }
 0x197   : > { %v2569_v47 = vpop.f32.mrf.mxu0  ;;  %6527 = vmatmul.msk.bf16.vlgmr.msra.gmra.mxu2 %vm1800_vm2, %v1673_v34 }
 0x198   : > { %3642 = vst.msk [vmem:[%s6817_s8 + $0x100] sm:$0xff] %vm3609_vm3, %v2569_v47  ;;  %v4121_v50 = vsel %vm3609_vm3, %v2569_v47, 0.0  ;;  %v4991_v51 = vmul.f32 %v2569_v47, %v2569_v47 }
 0x199   : > { %v4122_v52 = vadd.f32 %v4121_v50, %v4120_v40  ;;  %v804_v40 = vmul.f32 %v7185_v27, %v354_v38 }
 0x19a   : > { %v5470_v53 = vsel %vm3609_vm3, %v4991_v51, 0.0  ;;  %6439 = vmatmul.msk.bf16.gmra.mxu0 %vm1800_vm2, %v1585_v46 }
 0x19b   : > { %v5471_v56 = vadd.f32 %v5470_v53, %v5469_v45  ;;  %v1254_v45 = vadd.f32 %v7163_v9, %v804_v40  ;;  %v7264_v47 = vpop.f32.mrf.mxu1  ;;  %v441_v40 = vld [vmem:[%s6743_s29 + $0x720] sm:$0xff] }
 0x19c   : > { %3734 = vst.msk [vmem:[%s6817_s8 + $0x3e0] sm:$0xff] %vm3609_vm3, %v7264_v47 }
 0x19f   : > { %v2571_v2 = vpop.f32.mrf.mxu0 }
 0x1a0   : > { %3643 = vst.msk [vmem:[%s6817_s8 + $0x108] sm:$0xff] %vm3609_vm3, %v2571_v2  ;;  %v4123_v5 = vsel %vm3609_vm3, %v2571_v2, 0.0  ;;  %v4992_v6 = vmul.f32 %v2571_v2, %v2571_v2 }
 0x1a1   : > { %v4124_v8 = vadd.f32 %v4123_v5, %v4122_v52  ;;  %v1631_v52 = vpack.c.bf16 %v1254_v45, %v1253_v44  ;;  %v891_v44 = vmul.f32 %v7185_v27, %v441_v40 }
 0x1a2   : > { %v5472_v11 = vsel %vm3609_vm3, %v4992_v6, 0.0 }
 0x1a3   : > { %v5473_v14 = vadd.f32 %v5472_v11, %v5471_v56  ;;  %v1165_v56 = vadd.f32 %v7163_v9, %v715_v41  ;;  %6485 = vmatmul.msk.bf16.gmra.mxu1 %vm1800_vm2, %v1631_v52  ;;  %v7280_v1 = vpop.f32.mrf.mxu1  ;;  %v442_v41 = vld [vmem:[%s6743_s29 + $0x728] sm:$0xff] }
 0x1a4   : > { %3735 = vst.msk [vmem:[%s6817_s8 + $0x3e8] sm:$0xff] %vm3609_vm3, %v7280_v1  ;;  %v892_v45 = vmul.f32 %v7185_v27, %v442_v41  ;;  %v271_v41 = vld [vmem:[%s6743_s29 + $0x1d0] sm:$0xff] }
 0x1a5   : > { %v1587_v61 = vpack.c.bf16 %v1166_v57, %v1165_v56 }
 0x1a6   : > { %v1342_v56 = vadd.f32 %v7163_v9, %v892_v45 }
 0x1a7   : > { %v2574_v22 = vpop.f32.mrf.mxu0 }
 0x1a8   : > { %3644 = vst.msk [vmem:[%s6817_s8 + $0x110] sm:$0xff] %vm3609_vm3, %v2574_v22  ;;  %v4125_v24 = vsel %vm3609_vm3, %v2574_v22, 0.0  ;;  %v4993_v25 = vmul.f32 %v2574_v22, %v2574_v22  ;;  %v717_v22 = vmul.f32 %v7185_v27, %v267_v12 }
 0x1a9   : > { %v4126_v26 = vadd.f32 %v4125_v24, %v4124_v8  ;;  %v1340_v8 = vadd.f32 %v7163_v9, %v890_v63  ;;  %v358_v63 = vld [vmem:[%s6743_s29 + $0x488] sm:$0xff] }
 0x1aa   : > { %v5474_v30 = vsel %vm3609_vm3, %v4993_v25, 0.0  ;;  %6440 = vmatmul.msk.bf16.gmra.mxu0 %vm1800_vm2, %v1586_v18  ;;  %v356_v18 = vld [vmem:[%s6743_s29 + $0x478] sm:$0xff]  ;;  %v1255_v25 = vadd.f32 %v7163_v9, %v805_v19  ;;  %v1167_v36 = vadd.f32 %v7163_v9, %v717_v22 }
 0x1ab   : > { %v5475_v32 = vadd.f32 %v5474_v30, %v5473_v14  ;;  %v268_v14 = vld [vmem:[%s6743_s29 + $0x1b8] sm:$0xff]  ;;  %v1674_v15 = vpack.c.bf16 %v1340_v8, %v1339_v10  ;;  %v806_v21 = vmul.f32 %v7185_v27, %v356_v18  ;;  %v7303_v29 = vpop.f32.mrf.mxu1 }
 0x1ac   : > { %v718_v24 = vmul.f32 %v7185_v27, %v268_v14  ;;  %3736 = vst.msk [vmem:[%s6817_s8 + $0x3f0] sm:$0xff] %vm3609_vm3, %v7303_v29 }
 0x1ad   : > { %6528 = vmatmul.msk.bf16.gmra.mxu2 %vm1800_vm2, %v1674_v15 }
 0x1ae   : > { %v1168_v38 = vadd.f32 %v7163_v9, %v718_v24  ;;  %v443_v24 = vld [vmem:[%s6743_s29 + $0x730] sm:$0xff] }
 0x1af   : > { %v2576_v46 = vpop.f32.mrf.mxu0 }
 0x1b0   : > { %3645 = vst.msk [vmem:[%s6817_s8 + $0x118] sm:$0xff] %vm3609_vm3, %v2576_v46  ;;  %v4127_v50 = vsel %vm3609_vm3, %v2576_v46, 0.0  ;;  %v4994_v51 = vmul.f32 %v2576_v46, %v2576_v46  ;;  %v1588_v42 = vpack.c.bf16 %v1168_v38, %v1167_v36 }
 0x1b1   : > { %v4128_v53 = vadd.f32 %v4127_v50, %v4126_v26  ;;  %v1256_v26 = vadd.f32 %v7163_v9, %v806_v21 }
 0x1b2   : > { %v5476_v55 = vsel %vm3609_vm3, %v4994_v51, 0.0 }
 0x1b3   : > { %v5477_v58 = vadd.f32 %v5476_v55, %v5475_v32  ;;  %v1632_v32 = vpack.c.bf16 %v1256_v26, %v1255_v25  ;;  %v7319_v50 = vpop.f32.mrf.mxu1  ;;  %v1341_v55 = vadd.f32 %v7163_v9, %v891_v44  ;;  %v444_v25 = vld [vmem:[%s6743_s29 + $0x738] sm:$0xff] }
 0x1b4   : > { %3737 = vst.msk [vmem:[%s6817_s8 + $0x3f8] sm:$0xff] %vm3609_vm3, %v7319_v50  ;;  %v272_v44 = vld [vmem:[%s6743_s29 + $0x1d8] sm:$0xff] }
 0x1b5   : > { %6486 = vmatmul.msk.bf16.gmra.mxu1 %vm1800_vm2, %v1632_v32 }
 0x1b7   : > { %v2579_v0 = vpop.f32.mrf.mxu0 }
 0x1b8   : > { %3646 = vst.msk [vmem:[%s6817_s8 + $0x120] sm:$0xff] %vm3609_vm3, %v2579_v0  ;;  %v4129_v2 = vsel %vm3609_vm3, %v2579_v0, 0.0  ;;  %v4995_v5 = vmul.f32 %v2579_v0, %v2579_v0  ;;  %v807_v0 = vmul.f32 %v7185_v27, %v357_v62 }
 0x1b9   : > { %v4130_v6 = vadd.f32 %v4129_v2, %v4128_v53  ;;  %v808_v2 = vmul.f32 %v7185_v27, %v358_v63 }
 0x1ba   : > { %v5478_v11 = vsel %vm3609_vm3, %v4995_v5, 0.0  ;;  %6441 = vmatmul.msk.bf16.gmra.mxu0 %vm1800_vm2, %v1587_v61  ;;  %v1675_v61 = vpack.c.bf16 %v1342_v56, %v1341_v55  ;;  %v1257_v10 = vadd.f32 %v7163_v9, %v807_v0  ;;  %v721_v55 = vmul.f32 %v7185_v27, %v271_v41 }
 0x1bb   : > { %v5479_v13 = vadd.f32 %v5478_v11, %v5477_v58  ;;  %v269_v58 = vld [vmem:[%s6743_s29 + $0x1c0] sm:$0xff]  ;;  %v1258_v8 = vadd.f32 %v7163_v9, %v808_v2  ;;  %v7342_v12 = vpop.f32.mrf.mxu1  ;;  %v722_v56 = vmul.f32 %v7185_v27, %v272_v44 }
 0x1bc   : > { %v719_v5 = vmul.f32 %v7185_v27, %v269_v58  ;;  %3738 = vst.msk [vmem:[%s6817_s8 + $0x400] sm:$0xff] %vm3609_vm3, %v7342_v12 }
 0x1bd   : > { %6529 = vmatmul.msk.bf16.gmra.mxu2 %vm1800_vm2, %v1675_v61  ;;  %v1633_v15 = vpack.c.bf16 %v1258_v8, %v1257_v10  ;;  %v445_v8 = vld [vmem:[%s6743_s29 + $0x740] sm:$0xff] }
 0x1be   : > { %v1169_v19 = vadd.f32 %v7163_v9, %v719_v5  ;;  %v1171_v5 = vadd.f32 %v7163_v9, %v721_v55 }
 0x1bf   : > { %v2581_v28 = vpop.f32.mrf.mxu0 }
 0x1c0   : > { %3647 = vst.msk [vmem:[%s6817_s8 + $0x128] sm:$0xff] %vm3609_vm3, %v2581_v28  ;;  %v4131_v30 = vsel %vm3609_vm3, %v2581_v28, 0.0  ;;  %v4996_v31 = vmul.f32 %v2581_v28, %v2581_v28  ;;  %v893_v28 = vmul.f32 %v7185_v27, %v443_v24 }
 0x1c1   : > { %v4132_v33 = vadd.f32 %v4131_v30, %v4130_v6  ;;  %v720_v6 = vmul.f32 %v7185_v27, %v270_v60  ;;  %v894_v30 = vmul.f32 %v7185_v27, %v444_v25 }
 0x1c2   : > { %v5480_v34 = vsel %vm3609_vm3, %v4996_v31, 0.0  ;;  %v1343_v38 = vadd.f32 %v7163_v9, %v893_v28  ;;  %v273_v28 = vld [vmem:[%s6743_s29 + $0x1e0] sm:$0xff] }
 0x1c3   : > { %v5481_v39 = vadd.f32 %v5480_v34, %v5479_v13  ;;  %v1170_v21 = vadd.f32 %v7163_v9, %v720_v6  ;;  %v7358_v32 = vpop.f32.mrf.mxu1  ;;  %v1172_v6 = vadd.f32 %v7163_v9, %v722_v56 }
 0x1c4   : > { %3739 = vst.msk [vmem:[%s6817_s8 + $0x408] sm:$0xff] %vm3609_vm3, %v7358_v32 }
 0x1c5   : > { %6487 = vmatmul.msk.bf16.gmra.mxu1 %vm1800_vm2, %v1633_v15  ;;  %v1589_v26 = vpack.c.bf16 %v1170_v21, %v1169_v19 }
 0x1c7   : > { %v2584_v46 = vpop.f32.mrf.mxu0 }
 0x1c8   : > { %3648 = vst.msk [vmem:[%s6817_s8 + $0x130] sm:$0xff] %vm3609_vm3, %v2584_v46  ;;  %v4133_v51 = vsel %vm3609_vm3, %v2584_v46, 0.0  ;;  %v4997_v52 = vmul.f32 %v2584_v46, %v2584_v46  ;;  %v359_v46 = vld [vmem:[%s6743_s29 + $0x490] sm:$0xff] }
 0x1c9   : > { %v4134_v53 = vadd.f32 %v4133_v51, %v4132_v33  ;;  %v360_v51 = vld [vmem:[%s6743_s29 + $0x498] sm:$0xff] }
 0x1ca   : > { %v5482_v57 = vsel %vm3609_vm3, %v4997_v52, 0.0  ;;  %6442 = vmatmul.msk.bf16.gmra.mxu0 %vm1800_vm2, %v1588_v42  ;;  %v809_v52 = vmul.f32 %v7185_v27, %v359_v46 }
 0x1cb   : > { %v5483_v59 = vadd.f32 %v5482_v57, %v5481_v39  ;;  %v1344_v39 = vadd.f32 %v7163_v9, %v894_v30  ;;  %v7381_v60 = vpop.f32.mrf.mxu1 }
 0x1cc   : > { %v1259_v57 = vadd.f32 %v7163_v9, %v809_v52  ;;  %3740 = vst.msk [vmem:[%s6817_s8 + $0x410] sm:$0xff] %vm3609_vm3, %v7381_v60 }
 0x1cd   : > { %v1676_v45 = vpack.c.bf16 %v1344_v39, %v1343_v38 }
 0x1cf   : > { %v2586_v11 = vpop.f32.mrf.mxu0  ;;  %6530 = vmatmul.msk.bf16.gmra.mxu2 %vm1800_vm2, %v1676_v45 }
 0x1d0   : > { %3649 = vst.msk [vmem:[%s6817_s8 + $0x138] sm:$0xff] %vm3609_vm3, %v2586_v11  ;;  %v4135_v13 = vsel %vm3609_vm3, %v2586_v11, 0.0  ;;  %v4998_v14 = vmul.f32 %v2586_v11, %v2586_v11  ;;  %v446_v11 = vld [vmem:[%s6743_s29 + $0x748] sm:$0xff] }
 0x1d1   : > { %v4136_v17 = vadd.f32 %v4135_v13, %v4134_v53  ;;  %v810_v53 = vmul.f32 %v7185_v27, %v360_v51  ;;  %v1590_v13 = vpack.c.bf16 %v1172_v6, %v1171_v5  ;;  %v896_v15 = vmul.f32 %v7185_v27, %v446_v11 }
 0x1d2   : > { %v5484_v18 = vsel %vm3609_vm3, %v4998_v14, 0.0  ;;  %v895_v14 = vmul.f32 %v7185_v27, %v445_v8 }
 0x1d3   : > { %v5485_v22 = vadd.f32 %v5484_v18, %v5483_v59  ;;  %v1260_v58 = vadd.f32 %v7163_v9, %v810_v53  ;;  %v7397_v18 = vpop.f32.mrf.mxu1  ;;  %v1346_v25 = vadd.f32 %v7163_v9, %v896_v15 }
 0x1d4   : > { %3741 = vst.msk [vmem:[%s6817_s8 + $0x418] sm:$0xff] %vm3609_vm3, %v7397_v18  ;;  %v1345_v24 = vadd.f32 %v7163_v9, %v895_v14 }
 0x1d5   : > { %v1634_v63 = vpack.c.bf16 %v1260_v58, %v1259_v57 }
 0x1d7   : > { %v2589_v31 = vpop.f32.mrf.mxu0  ;;  %6488 = vmatmul.msk.bf16.gmra.mxu1 %vm1800_vm2, %v1634_v63 }
 0x1d8   : > { %3650 = vst.msk [vmem:[%s6817_s8 + $0x140] sm:$0xff] %vm3609_vm3, %v2589_v31  ;;  %v4137_v33 = vsel %vm3609_vm3, %v2589_v31, 0.0  ;;  %v4999_v34 = vmul.f32 %v2589_v31, %v2589_v31  ;;  %v274_v31 = vld [vmem:[%s6743_s29 + $0x1e8] sm:$0xff] }
 0x1d9   : > { %v4138_v36 = vadd.f32 %v4137_v33, %v4136_v17  ;;  %v1677_v33 = vpack.c.bf16 %v1346_v25, %v1345_v24  ;;  %v724_v41 = vmul.f32 %v7185_v27, %v274_v31  ;;  %v363_v24 = vld [vmem:[%s6743_s29 + $0x4b0] sm:$0xff]  ;;  %v364_v25 = vld [vmem:[%s6743_s29 + $0x4b8] sm:$0xff] }
 0x1da   : > { %v5486_v40 = vsel %vm3609_vm3, %v4999_v34, 0.0  ;;  %6443 = vmatmul.msk.bf16.gmra.mxu0 %vm1800_vm2, %v1589_v26  ;;  %v361_v34 = vld [vmem:[%s6743_s29 + $0x4a0] sm:$0xff] }
 0x1db   : > { %v5487_v42 = vadd.f32 %v5486_v40, %v5485_v22  ;;  %v811_v38 = vmul.f32 %v7185_v27, %v361_v34  ;;  %v723_v40 = vmul.f32 %v7185_v27, %v273_v28  ;;  %v7420_v46 = vpop.f32.mrf.mxu1  ;;  %v1174_v58 = vadd.f32 %v7163_v9, %v724_v41 }
 0x1dc   : > { %3742 = vst.msk [vmem:[%s6817_s8 + $0x420] sm:$0xff] %vm3609_vm3, %v7420_v46  ;;  %v814_v28 = vmul.f32 %v7185_v27, %v364_v25 }
 0x1dd   : > { %v1173_v57 = vadd.f32 %v7163_v9, %v723_v40 }
 0x1de   : > { %v1264_v34 = vadd.f32 %v7163_v9, %v814_v28 }
 0x1df   : > { %v2591_v59 = vpop.f32.mrf.mxu0  ;;  %6531 = vmatmul.msk.bf16.gmra.mxu2 %vm1800_vm2, %v1677_v33  ;;  %v1591_v63 = vpack.c.bf16 %v1174_v58, %v1173_v57 }
 0x1e0   : > { %3651 = vst.msk [vmem:[%s6817_s8 + $0x148] sm:$0xff] %vm3609_vm3, %v2591_v59  ;;  %v4139_v61 = vsel %vm3609_vm3, %v2591_v59, 0.0  ;;  %v5000_v62 = vmul.f32 %v2591_v59, %v2591_v59 }
 0x1e1   : > { %v4140_v0 = vadd.f32 %v4139_v61, %v4138_v36  ;;  %v362_v36 = vld [vmem:[%s6743_s29 + $0x4a8] sm:$0xff]  ;;  %v447_v61 = vld [vmem:[%s6743_s29 + $0x750] sm:$0xff] }
 0x1e2   : > { %v5488_v2 = vsel %vm3609_vm3, %v5000_v62, 0.0  ;;  %v812_v39 = vmul.f32 %v7185_v27, %v362_v36  ;;  %v448_v62 = vld [vmem:[%s6743_s29 + $0x758] sm:$0xff] }
 0x1e3   : > { %v5489_v10 = vadd.f32 %v5488_v2, %v5487_v42  ;;  %v1261_v42 = vadd.f32 %v7163_v9, %v811_v38  ;;  %v898_v2 = vmul.f32 %v7185_v27, %v448_v62  ;;  %v7436_v6 = vpop.f32.mrf.mxu1 }
 0x1e4   : > { %v1262_v44 = vadd.f32 %v7163_v9, %v812_v39  ;;  %3743 = vst.msk [vmem:[%s6817_s8 + $0x428] sm:$0xff] %vm3609_vm3, %v7436_v6 }
 0x1e5   : > { %v1348_v14 = vadd.f32 %v7163_v9, %v898_v2 }
 0x1e6   : > { %v1635_v53 = vpack.c.bf16 %v1262_v44, %v1261_v42 }
 0x1e7   : > { %v2594_v17 = vpop.f32.mrf.mxu0 }
 0x1e8   : > { %3652 = vst.msk [vmem:[%s6817_s8 + $0x150] sm:$0xff] %vm3609_vm3, %v2594_v17  ;;  %v4141_v19 = vsel %vm3609_vm3, %v2594_v17, 0.0  ;;  %v5001_v21 = vmul.f32 %v2594_v17, %v2594_v17  ;;  %6489 = vmatmul.msk.bf16.gmra.mxu1 %vm1800_vm2, %v1635_v53  ;;  %v275_v17 = vld [vmem:[%s6743_s29 + $0x1f0] sm:$0xff]  ;;  %v449_v53 = vld [vmem:[%s6743_s29 + $0x760] sm:$0xff] }
 0x1e9   : > { %v4142_v22 = vadd.f32 %v4141_v19, %v4140_v0  ;;  %v897_v0 = vmul.f32 %v7185_v27, %v447_v61  ;;  %v899_v57 = vmul.f32 %v7185_v27, %v449_v53 }
 0x1ea   : > { %v5490_v26 = vsel %vm3609_vm3, %v5001_v21, 0.0  ;;  %6444 = vmatmul.msk.bf16.gmra.mxu0 %vm1800_vm2, %v1590_v13  ;;  %v276_v21 = vld [vmem:[%s6743_s29 + $0x1f8] sm:$0xff] }
 0x1eb   : > { %v5491_v30 = vadd.f32 %v5490_v26, %v5489_v10  ;;  %v1347_v13 = vadd.f32 %v7163_v9, %v897_v0  ;;  %v813_v26 = vmul.f32 %v7185_v27, %v363_v24  ;;  %v726_v31 = vmul.f32 %v7185_v27, %v276_v21  ;;  %v7459_v38 = vpop.f32.mrf.mxu1 }
 0x1ec   : > { %3744 = vst.msk [vmem:[%s6817_s8 + $0x430] sm:$0xff] %vm3609_vm3, %v7459_v38  ;;  %v1349_v2 = vadd.f32 %v7163_v9, %v899_v57 }
 0x1ed   : > { %v1263_v33 = vadd.f32 %v7163_v9, %v813_v26 }
 0x1ef   : > { %v2596_v45 = vpop.f32.mrf.mxu0  ;;  %v1636_v41 = vpack.c.bf16 %v1264_v34, %v1263_v33 }
 0x1f0   : > { %3653 = vst.msk [vmem:[%s6817_s8 + $0x158] sm:$0xff] %vm3609_vm3, %v2596_v45  ;;  %v4143_v51 = vsel %vm3609_vm3, %v2596_v45, 0.0  ;;  %v5002_v52 = vmul.f32 %v2596_v45, %v2596_v45 }
 0x1f1   : > { %v4144_v55 = vadd.f32 %v4143_v51, %v4142_v22  ;;  %v1678_v22 = vpack.c.bf16 %v1348_v14, %v1347_v13  ;;  %v1176_v51 = vadd.f32 %v7163_v9, %v726_v31  ;;  %v278_v13 = vld [vmem:[%s6743_s29 + $0x208] sm:$0xff] }
 0x1f2   : > { %v5492_v56 = vsel %vm3609_vm3, %v5002_v52, 0.0  ;;  %v728_v24 = vmul.f32 %v7185_v27, %v278_v13  ;;  %v368_v13 = vld [vmem:[%s6743_s29 + $0x4d8] sm:$0xff] }
 0x1f3   : > { %v5493_v59 = vadd.f32 %v5492_v56, %v5491_v30  ;;  %6532 = vmatmul.msk.bf16.gmra.mxu2 %vm1800_vm2, %v1678_v22  ;;  %v725_v30 = vmul.f32 %v7185_v27, %v275_v17  ;;  %v7475_v61 = vpop.f32.mrf.mxu1  ;;  %v366_v17 = vld [vmem:[%s6743_s29 + $0x4c8] sm:$0xff] }
 0x1f4   : > { %3745 = vst.msk [vmem:[%s6817_s8 + $0x438] sm:$0xff] %vm3609_vm3, %v7475_v61  ;;  %v816_v21 = vmul.f32 %v7185_v27, %v366_v17 }
 0x1f5   : > { %v1175_v45 = vadd.f32 %v7163_v9, %v725_v30 }
 0x1f6   : > { %v1266_v26 = vadd.f32 %v7163_v9, %v816_v21 }
 0x1f7   : > { %v2599_v5 = vpop.f32.mrf.mxu0  ;;  %v1592_v56 = vpack.c.bf16 %v1176_v51, %v1175_v45  ;;  %v452_v45 = vld [vmem:[%s6743_s29 + $0x778] sm:$0xff] }
 0x1f8   : > { %3654 = vst.msk [vmem:[%s6817_s8 + $0x160] sm:$0xff] %vm3609_vm3, %v2599_v5  ;;  %v4145_v10 = vsel %vm3609_vm3, %v2599_v5, 0.0  ;;  %v5003_v8 = vmul.f32 %v2599_v5, %v2599_v5  ;;  %6490 = vmatmul.msk.bf16.gmra.mxu1 %vm1800_vm2, %v1636_v41  ;;  %v1178_v41 = vadd.f32 %v7163_v9, %v728_v24  ;;  %v902_v53 = vmul.f32 %v7185_v27, %v452_v45 }
 0x1f9   : > { %v4146_v11 = vadd.f32 %v4145_v10, %v4144_v55  ;;  %v450_v55 = vld [vmem:[%s6743_s29 + $0x768] sm:$0xff] }
 0x1fa   : > { %v5494_v15 = vsel %vm3609_vm3, %v5003_v8, 0.0  ;;  %6445 = vmatmul.msk.bf16.gmra.mxu0 %vm1800_vm2, %v1591_v63  ;;  %v900_v58 = vmul.f32 %v7185_v27, %v450_v55  ;;  %v277_v8 = vld [vmem:[%s6743_s29 + $0x200] sm:$0xff] }
 0x1fb   : > { %v5495_v19 = vadd.f32 %v5494_v15, %v5493_v59  ;;  %v365_v15 = vld [vmem:[%s6743_s29 + $0x4c0] sm:$0xff]  ;;  %v727_v22 = vmul.f32 %v7185_v27, %v277_v8  ;;  %v7498_v30 = vpop.f32.mrf.mxu1 }
 0x1fc   : > { %v1350_v5 = vadd.f32 %v7163_v9, %v900_v58  ;;  %3746 = vst.msk [vmem:[%s6817_s8 + $0x440] sm:$0xff] %vm3609_vm3, %v7498_v30 }
 0x1fe   : > { %v1679_v14 = vpack.c.bf16 %v1350_v5, %v1349_v2  ;;  %v279_v2 = vld [vmem:[%s6743_s29 + $0x210] sm:$0xff] }
 0x1ff   : > { %v2601_v36 = vpop.f32.mrf.mxu0  ;;  %v729_v17 = vmul.f32 %v7185_v27, %v279_v2 }
 0x200   : > { %3655 = vst.msk [vmem:[%s6817_s8 + $0x168] sm:$0xff] %vm3609_vm3, %v2601_v36  ;;  %v4147_v39 = vsel %vm3609_vm3, %v2601_v36, 0.0  ;;  %v5004_v40 = vmul.f32 %v2601_v36, %v2601_v36 }
 0x201   : > { %v4148_v42 = vadd.f32 %v4147_v39, %v4146_v11 }
 0x202   : > { %v5496_v44 = vsel %vm3609_vm3, %v5004_v40, 0.0  ;;  %v1177_v40 = vadd.f32 %v7163_v9, %v727_v22 }
 0x203   : > { %v5497_v52 = vadd.f32 %v5496_v44, %v5495_v19  ;;  %v815_v19 = vmul.f32 %v7185_v27, %v365_v15  ;;  %6533 = vmatmul.msk.bf16.gmra.mxu2 %vm1800_vm2, %v1679_v14  ;;  %v451_v44 = vld [vmem:[%s6743_s29 + $0x770] sm:$0xff]  ;;  %v818_v15 = vmul.f32 %v7185_v27, %v368_v13 }
 0x204   : > { %v1593_v51 = vpack.c.bf16 %v1178_v41, %v1177_v40  ;;  %v453_v41 = vld [vmem:[%s6743_s29 + $0x780] sm:$0xff] }
 0x205   : > { %v1265_v25 = vadd.f32 %v7163_v9, %v815_v19  ;;  %v1268_v22 = vadd.f32 %v7163_v9, %v818_v15  ;;  %v903_v45 = vmul.f32 %v7185_v27, %v453_v41 }
 0x207   : > { %v2604_v59 = vpop.f32.mrf.mxu0  ;;  %v1637_v34 = vpack.c.bf16 %v1266_v26, %v1265_v25 }
 0x208   : > { %3656 = vst.msk [vmem:[%s6817_s8 + $0x170] sm:$0xff] %vm3609_vm3, %v2604_v59  ;;  %v4149_v62 = vsel %vm3609_vm3, %v2604_v59, 0.0  ;;  %v5005_v63 = vmul.f32 %v2604_v59, %v2604_v59 }
 0x209   : > { %v4150_v0 = vadd.f32 %v4149_v62, %v4148_v42  ;;  %6491 = vmatmul.msk.bf16.gmra.mxu1 %vm1800_vm2, %v1637_v34 }
 0x20a   : > { %v5498_v10 = vsel %vm3609_vm3, %v5005_v63, 0.0  ;;  %6446 = vmatmul.msk.bf16.gmra.mxu0 %vm1800_vm2, %v1592_v56  ;;  %v7514_v56 = vpop.f32.mrf.mxu1  ;;  %v1352_v63 = vadd.f32 %v7163_v9, %v902_v53 }
 0x20b   : > { %v5499_v11 = vadd.f32 %v5498_v10, %v5497_v52  ;;  %v901_v52 = vmul.f32 %v7185_v27, %v451_v44  ;;  %3747 = vst.msk [vmem:[%s6817_s8 + $0x448] sm:$0xff] %vm3609_vm3, %v7514_v56  ;;  %v280_v10 = vld [vmem:[%s6743_s29 + $0x218] sm:$0xff] }
 0x20c   : > { %v730_v19 = vmul.f32 %v7185_v27, %v280_v10 }
 0x20d   : > { %v1351_v62 = vadd.f32 %v7163_v9, %v901_v52 }
 0x20f   : > { %v2606_v28 = vpop.f32.mrf.mxu0  ;;  %v1680_v8 = vpack.c.bf16 %v1352_v63, %v1351_v62 }
 0x210   : > { %3657 = vst.msk [vmem:[%s6817_s8 + $0x178] sm:$0xff] %vm3609_vm3, %v2606_v28  ;;  %v4151_v31 = vsel %vm3609_vm3, %v2606_v28, 0.0  ;;  %v5006_v33 = vmul.f32 %v2606_v28, %v2606_v28 }
 0x211   : > { %v4152_v36 = vadd.f32 %v4151_v31, %v4150_v0 }
 0x212   : > { %v5500_v39 = vsel %vm3609_vm3, %v5006_v33, 0.0  ;;  %v7537_v25 = vpop.f32.mrf.mxu1 }
 0x213   : > { %v5501_v42 = vadd.f32 %v5500_v39, %v5499_v11  ;;  %v367_v11 = vld [vmem:[%s6743_s29 + $0x4d0] sm:$0xff]  ;;  %6534 = vmatmul.msk.bf16.gmra.mxu2 %vm1800_vm2, %v1680_v8  ;;  %3748 = vst.msk [vmem:[%s6817_s8 + $0x450] sm:$0xff] %vm3609_vm3, %v7537_v25  ;;  %v1180_v39 = vadd.f32 %v7163_v9, %v730_v19  ;;  %v369_v8 = vld [vmem:[%s6743_s29 + $0x4e0] sm:$0xff] }
 0x214   : > { %v817_v14 = vmul.f32 %v7185_v27, %v367_v11  ;;  %v370_v11 = vld [vmem:[%s6743_s29 + $0x4e8] sm:$0xff]  ;;  %v819_v13 = vmul.f32 %v7185_v27, %v369_v8 }
 0x216   : > { %v1267_v21 = vadd.f32 %v7163_v9, %v817_v14  ;;  %v820_v14 = vmul.f32 %v7185_v27, %v370_v11  ;;  %v1269_v19 = vadd.f32 %v7163_v9, %v819_v13  ;;  %v284_v11 = vld [vmem:[%s6743_s29 + $0x238] sm:$0xff]  ;;  %v371_v13 = vld [vmem:[%s6743_s29 + $0x4f0] sm:$0xff] }
 0x217   : > { %v2609_v55 = vpop.f32.mrf.mxu0 }
 0x218   : > { %3658 = vst.msk [vmem:[%s6817_s8 + $0x180] sm:$0xff] %vm3609_vm3, %v2609_v55  ;;  %v4153_v57 = vsel %vm3609_vm3, %v2609_v55, 0.0  ;;  %v5007_v58 = vmul.f32 %v2609_v55, %v2609_v55  ;;  %v1638_v31 = vpack.c.bf16 %v1268_v22, %v1267_v21  ;;  %v1270_v21 = vadd.f32 %v7163_v9, %v820_v14  ;;  %v372_v14 = vld [vmem:[%s6743_s29 + $0x4f8] sm:$0xff] }
 0x219   : > { %v4154_v59 = vadd.f32 %v4153_v57, %v4152_v36  ;;  %v1179_v36 = vadd.f32 %v7163_v9, %v729_v17 }
 0x21a   : > { %v5502_v0 = vsel %vm3609_vm3, %v5007_v58, 0.0  ;;  %6447 = vmatmul.msk.bf16.gmra.mxu0 %vm1800_vm2, %v1593_v51  ;;  %6492 = vmatmul.msk.bf16.gmra.mxu1 %vm1800_vm2, %v1638_v31  ;;  %v7553_v53 = vpop.f32.mrf.mxu1  ;;  %v7581_v31 = vpop.f32.mrf.mxu2 }
 0x21b   : > { %v5503_v5 = vadd.f32 %v5502_v0, %v5501_v42  ;;  %v454_v42 = vld [vmem:[%s6743_s29 + $0x788] sm:$0xff]  ;;  %v1594_v44 = vpack.c.bf16 %v1180_v39, %v1179_v36  ;;  %3749 = vst.msk [vmem:[%s6817_s8 + $0x458] sm:$0xff] %vm3609_vm3, %v7553_v53  ;;  %v281_v0 = vld [vmem:[%s6743_s29 + $0x220] sm:$0xff] }
 0x21c   : > { %v904_v51 = vmul.f32 %v7185_v27, %v454_v42  ;;  %v731_v15 = vmul.f32 %v7185_v27, %v281_v0  ;;  %12652 = vst [vmem:[#allocation2_spill] sm:$0xff] %v7581_v31  ;;  %v455_v42 = vld [vmem:[%s6743_s29 + $0x790] sm:$0xff] }
 0x21d   : > { %3834 = vst.msk [vmem:[%s6817_s8 + $0x700] sm:$0xff] %vm3609_vm3, %v7581_v31 }
 0x21e   : > { %v1354_v62 = vadd.f32 %v7163_v9, %v904_v51  ;;  %v1181_v39 = vadd.f32 %v7163_v9, %v731_v15  ;;  %v905_v51 = vmul.f32 %v7185_v27, %v455_v42 }
 0x21f   : > { %v2611_v24 = vpop.f32.mrf.mxu0 }
 0x220   : > { %3659 = vst.msk [vmem:[%s6817_s8 + $0x188] sm:$0xff] %vm3609_vm3, %v2611_v24  ;;  %v4155_v26 = vsel %vm3609_vm3, %v2611_v24, 0.0  ;;  %v5008_v28 = vmul.f32 %v2611_v24, %v2611_v24 }
 0x221   : > { %v4156_v33 = vadd.f32 %v4155_v26, %v4154_v59  ;;  %v1353_v59 = vadd.f32 %v7163_v9, %v903_v45 }
 0x222   : > { %v5504_v34 = vsel %vm3609_vm3, %v5008_v28, 0.0  ;;  %v7576_v24 = vpop.f32.mrf.mxu1 }
 0x223   : > { %v5505_v40 = vadd.f32 %v5504_v34, %v5503_v5  ;;  %v282_v5 = vld [vmem:[%s6743_s29 + $0x228] sm:$0xff]  ;;  %v1681_v10 = vpack.c.bf16 %v1354_v62, %v1353_v59  ;;  %3750 = vst.msk [vmem:[%s6817_s8 + $0x460] sm:$0xff] %vm3609_vm3, %v7576_v24  ;;  %v7602_v62 = vpop.f32.mrf.mxu2 }
 0x224   : > { %v732_v17 = vmul.f32 %v7185_v27, %v282_v5  ;;  %12653 = vst [vmem:[#allocation3_spill] sm:$0xff] %v7602_v62  ;;  %v1355_v5 = vadd.f32 %v7163_v9, %v905_v51 }
 0x225   : > { %6535 = vmatmul.msk.bf16.gmra.mxu2 %vm1800_vm2, %v1681_v10  ;;  %3835 = vst.msk [vmem:[%s6817_s8 + $0x708] sm:$0xff] %vm3609_vm3, %v7602_v62  ;;  %v384_v62 = vld [vmem:[%s6743_s29 + $0x558] sm:$0xff] }
 0x227   : > { %v2614_v52 = vpop.f32.mrf.mxu0 }
 0x228   : > { %3660 = vst.msk [vmem:[%s6817_s8 + $0x190] sm:$0xff] %vm3609_vm3, %v2614_v52  ;;  %v4157_v55 = vsel %vm3609_vm3, %v2614_v52, 0.0  ;;  %v5009_v57 = vmul.f32 %v2614_v52, %v2614_v52 }
 0x229   : > { %v4158_v58 = vadd.f32 %v4157_v55, %v4156_v33  ;;  %v1639_v33 = vpack.c.bf16 %v1270_v21, %v1269_v19  ;;  %v822_v19 = vmul.f32 %v7185_v27, %v372_v14  ;;  %v285_v14 = vld [vmem:[%s6743_s29 + $0x240] sm:$0xff] }
 0x22a   : > { %v5506_v63 = vsel %vm3609_vm3, %v5009_v57, 0.0  ;;  %6448 = vmatmul.msk.bf16.gmra.mxu0 %vm1800_vm2, %v1594_v44  ;;  %v456_v44 = vld [vmem:[%s6743_s29 + $0x798] sm:$0xff]  ;;  %v7596_v55 = vpop.f32.mrf.mxu1 }
 0x22b   : > { %v5507_v2 = vadd.f32 %v5506_v63, %v5505_v40  ;;  %v1182_v40 = vadd.f32 %v7163_v9, %v732_v17  ;;  %6493 = vmatmul.msk.bf16.gmra.mxu1 %vm1800_vm2, %v1639_v33  ;;  %v906_v57 = vmul.f32 %v7185_v27, %v456_v44  ;;  %3751 = vst.msk [vmem:[%s6817_s8 + $0x468] sm:$0xff] %vm3609_vm3, %v7596_v55 }
 0x22c   : > { %v821_v17 = vmul.f32 %v7185_v27, %v371_v13 }
 0x22d   : > { %v1595_v45 = vpack.c.bf16 %v1182_v40, %v1181_v39  ;;  %v1356_v10 = vadd.f32 %v7163_v9, %v906_v57  ;;  %v457_v57 = vld [vmem:[%s6743_s29 + $0x7a0] sm:$0xff] }
 0x22f   : > { %v2616_v22 = vpop.f32.mrf.mxu0  ;;  %v1682_v15 = vpack.c.bf16 %v1356_v10, %v1355_v5 }
 0x230   : > { %3661 = vst.msk [vmem:[%s6817_s8 + $0x198] sm:$0xff] %vm3609_vm3, %v2616_v22  ;;  %v4159_v26 = vsel %vm3609_vm3, %v2616_v22, 0.0  ;;  %v5010_v28 = vmul.f32 %v2616_v22, %v2616_v22  ;;  %v734_v22 = vmul.f32 %v7185_v27, %v284_v11  ;;  %v7630_v40 = vpop.f32.mrf.mxu2 }
 0x231   : > { %v4160_v34 = vadd.f32 %v4159_v26, %v4158_v58  ;;  %v1271_v26 = vadd.f32 %v7163_v9, %v821_v17  ;;  %12654 = vst [vmem:[#allocation4_spill] sm:$0xff] %v7630_v40 }
 0x232   : > { %v5508_v36 = vsel %vm3609_vm3, %v5010_v28, 0.0  ;;  %v1272_v28 = vadd.f32 %v7163_v9, %v822_v19  ;;  %v1184_v51 = vadd.f32 %v7163_v9, %v734_v22  ;;  %3836 = vst.msk [vmem:[%s6817_s8 + $0x710] sm:$0xff] %vm3609_vm3, %v7630_v40  ;;  %v286_v22 = vld [vmem:[%s6743_s29 + $0x248] sm:$0xff] }
 0x233   : > { %v5509_v41 = vadd.f32 %v5508_v36, %v5507_v2  ;;  %v283_v2 = vld [vmem:[%s6743_s29 + $0x230] sm:$0xff] }
 0x234   : > { %v733_v21 = vmul.f32 %v7185_v27, %v283_v2 }
 0x235   : > { %6536 = vmatmul.msk.bf16.gmra.mxu2 %vm1800_vm2, %v1682_v15  ;;  %v7665_v15 = vld [vmem:[%s12276_s1 + $0x1] ss:$0 sm:$0xff] }
 0x237   : > { %v2619_v52 = vpop.f32.mrf.mxu0 }
 0x238   : > { %3662 = vst.msk [vmem:[%s6817_s8 + $0x1a0] sm:$0xff] %vm3609_vm3, %v2619_v52  ;;  %v4161_v58 = vsel %vm3609_vm3, %v2619_v52, 0.0  ;;  %v5011_v59 = vmul.f32 %v2619_v52, %v2619_v52 }
 0x239   : > { %v4162_v63 = vadd.f32 %v4161_v58, %v4160_v34  ;;  %v7625_v34 = vpop.f32.mrf.mxu1  ;;  %v458_v58 = vld [vmem:[%s6743_s29 + $0x7a8] sm:$0xff] }
 0x23a   : > { %v5510_v0 = vsel %vm3609_vm3, %v5011_v59, 0.0  ;;  %6449 = vmatmul.msk.bf16.gmra.mxu0 %vm1800_vm2, %v1595_v45  ;;  %3752 = vst.msk [vmem:[%s6817_s8 + $0x470] sm:$0xff] %vm3609_vm3, %v7625_v34  ;;  %v1183_v45 = vadd.f32 %v7163_v9, %v733_v21  ;;  %v908_v9 = vmul.f32 %v7185_v27, %v458_v58 }
 0x23b   : > { %v5511_v8 = vadd.f32 %v5510_v0, %v5509_v41  ;;  %v1640_v41 = vpack.c.bf16 %v1272_v28, %v1271_v26  ;;  %v373_v26 = vld [vmem:[%s6743_s29 + $0x500] sm:$0xff]  ;;  %v374_v28 = vld [vmem:[%s6743_s29 + $0x508] sm:$0xff] }
 0x23c   : > { %v1596_v59 = vpack.c.bf16 %v1184_v51, %v1183_v45  ;;  %v1358_v19 = vadd.f32 %v7665_v15, %v908_v9 }
 0x23d   : > { %6494 = vmatmul.msk.bf16.gmra.mxu1 %vm1800_vm2, %v1640_v41  ;;  %v735_v41 = vmul.f32 %v7185_v27, %v285_v14 }
 0x23f   : > { %v2621_v33 = vpop.f32.mrf.mxu0  ;;  %v1185_v9 = vadd.f32 %v7665_v15, %v735_v41 }
 0x240   : > { %3663 = vst.msk [vmem:[%s6817_s8 + $0x1a8] sm:$0xff] %vm3609_vm3, %v2621_v33  ;;  %v4163_v36 = vsel %vm3609_vm3, %v2621_v33, 0.0  ;;  %v5012_v39 = vmul.f32 %v2621_v33, %v2621_v33 }
 0x241   : > { %v4164_v42 = vadd.f32 %v4163_v36, %v4162_v63  ;;  %v907_v63 = vmul.f32 %v7185_v27, %v457_v57  ;;  %v7645_v2 = vpop.f32.mrf.mxu1  ;;  %v823_v36 = vmul.f32 %v7185_v27, %v373_v26 }
 0x242   : > { %v5512_v44 = vsel %vm3609_vm3, %v5012_v39, 0.0  ;;  %3753 = vst.msk [vmem:[%s6817_s8 + $0x478] sm:$0xff] %vm3609_vm3, %v7645_v2  ;;  %v824_v39 = vmul.f32 %v7185_v27, %v374_v28 }
 0x243   : > { %v5513_v52 = vadd.f32 %v5512_v44, %v5511_v8  ;;  %v7651_v8 = vpop.f32.mrf.mxu2  ;;  %v1357_v17 = vadd.f32 %v7665_v15, %v907_v63  ;;  %v1273_v44 = vadd.f32 %v7665_v15, %v823_v36 }
 0x244   : > { %12655 = vst [vmem:[#allocation5_spill] sm:$0xff] %v7651_v8  ;;  %v1274_v45 = vadd.f32 %v7665_v15, %v824_v39 }
 0x245   : > { %3837 = vst.msk [vmem:[%s6817_s8 + $0x718] sm:$0xff] %vm3609_vm3, %v7651_v8  ;;  %v1683_v33 = vpack.c.bf16 %v1358_v19, %v1357_v17  ;;  %v7701_v17 = vld [vmem:[%s12276_s1] ss:$0 sm:$0xff]  ;;  %v382_v8 = vld [vmem:[%s6743_s29 + $0x548] sm:$0xff] }
 0x246   : > { %v832_v40 = vmul.f32 %v7701_v17, %v382_v8  ;;  %v834_v31 = vmul.f32 %v7701_v17, %v384_v62 }
 0x247   : > { %v2624_v0 = vpop.f32.mrf.mxu0  ;;  %6537 = vmatmul.msk.bf16.gmra.mxu2 %vm1800_vm2, %v1683_v33 }
 0x248   : > { %3664 = vst.msk [vmem:[%s6817_s8 + $0x1b0] sm:$0xff] %vm3609_vm3, %v2624_v0  ;;  %v4165_v5 = vsel %vm3609_vm3, %v2624_v0, 0.0  ;;  %v5013_v10 = vmul.f32 %v2624_v0, %v2624_v0 }
 0x249   : > { %v4166_v11 = vadd.f32 %v4165_v5, %v4164_v42  ;;  %v736_v42 = vmul.f32 %v7185_v27, %v286_v22  ;;  %v1641_v27 = vpack.c.bf16 %v1274_v45, %v1273_v44 }
 0x24a   : > { %v5514_v13 = vsel %vm3609_vm3, %v5013_v10, 0.0  ;;  %6450 = vmatmul.msk.bf16.gmra.mxu0 %vm1800_vm2, %v1596_v59 }
 0x24b   : > { %v5515_v21 = vadd.f32 %v5514_v13, %v5513_v52  ;;  %v7679_v52 = vpop.f32.mrf.mxu1  ;;  %v7684_v59 = vpop.f32.mrf.mxu2  ;;  %v1186_v5 = vadd.f32 %v7665_v15, %v736_v42  ;;  %v459_v13 = vld [vmem:[%s6743_s29 + $0x7b0] sm:$0xff] }
 0x24c   : > { %12656 = vst [vmem:[#allocation6_spill] sm:$0xff] %v7684_v59  ;;  %v909_v19 = vmul.f32 %v7701_v17, %v459_v13  ;;  %v287_v42 = vld [vmem:[%s6743_s29 + $0x250] sm:$0xff] }
 0x24d   : > { %3754 = vst.msk [vmem:[%s6817_s8 + $0x480] sm:$0xff] %vm3609_vm3, %v7679_v52  ;;  %6495 = vmatmul.msk.bf16.gmra.mxu1 %vm1800_vm2, %v1641_v27  ;;  %v1597_v14 = vpack.c.bf16 %v1186_v5, %v1185_v9  ;;  %v376_v27 = vld [vmem:[%s6743_s29 + $0x518] sm:$0xff]  ;;  %v737_v5 = vmul.f32 %v7701_v17, %v287_v42 }
 0x24e   : > { %3838 = vst.msk [vmem:[%s6817_s8 + $0x720] sm:$0xff] %vm3609_vm3, %v7684_v59  ;;  %v1359_v44 = vadd.f32 %v7665_v15, %v909_v19  ;;  %v826_v9 = vmul.f32 %v7701_v17, %v376_v27 }
 0x24f   : > { %v2626_v51 = vpop.f32.mrf.mxu0 }
 0x250   : > { %3665 = vst.msk [vmem:[%s6817_s8 + $0x1b8] sm:$0xff] %vm3609_vm3, %v2626_v51  ;;  %v4167_v57 = vsel %vm3609_vm3, %v2626_v51, 0.0  ;;  %v5014_v58 = vmul.f32 %v2626_v51, %v2626_v51 }
 0x251   : > { %v4168_v63 = vadd.f32 %v4167_v57, %v4166_v11  ;;  %v460_v11 = vld [vmem:[%s6743_s29 + $0x7b8] sm:$0xff] }
 0x252   : > { %v5516_v0 = vsel %vm3609_vm3, %v5014_v58, 0.0  ;;  %v910_v28 = vmul.f32 %v7701_v17, %v460_v11  ;;  %v288_v57 = vld [vmem:[%s6743_s29 + $0x258] sm:$0xff]  ;;  %v375_v58 = vld [vmem:[%s6743_s29 + $0x510] sm:$0xff] }
 0x253   : > { %v5517_v10 = vadd.f32 %v5516_v0, %v5515_v21  ;;  %v7704_v26 = vpop.f32.mrf.mxu1  ;;  %v7710_v36 = vpop.f32.mrf.mxu2  ;;  %v825_v0 = vmul.f32 %v7701_v17, %v375_v58  ;;  %v738_v13 = vmul.f32 %v7701_v17, %v288_v57  ;;  %v461_v58 = vld [vmem:[%s6743_s29 + $0x7c0] sm:$0xff] }
 0x254   : > { %12657 = vst [vmem:[#allocation7_spill] sm:$0xff] %v7704_v26  ;;  %v1360_v45 = vadd.f32 %v7665_v15, %v910_v28 }
 0x255   : > { %12658 = vst [vmem:[#allocation8_spill] sm:$0xff] %v7710_v36  ;;  %v1275_v11 = vadd.f32 %v7665_v15, %v825_v0 }
 0x256   : > { %3755 = vst.msk [vmem:[%s6817_s8 + $0x488] sm:$0xff] %vm3609_vm3, %v7704_v26 }
 0x257   : > { %v2629_v22 = vpop.f32.mrf.mxu0  ;;  %3839 = vst.msk [vmem:[%s6817_s8 + $0x728] sm:$0xff] %vm3609_vm3, %v7710_v36 }
 0x258   : > { %3666 = vst.msk [vmem:[%s6817_s8 + $0x1c0] sm:$0xff] %vm3609_vm3, %v2629_v22  ;;  %v4169_v21 = vsel %vm3609_vm3, %v2629_v22, 0.0  ;;  %v5015_v33 = vmul.f32 %v2629_v22, %v2629_v22 }
 0x259   : > { %v4170_v39 = vadd.f32 %v4169_v21, %v4168_v63  ;;  %v1684_v63 = vpack.c.bf16 %v1360_v45, %v1359_v44  ;;  %v1187_v44 = vadd.f32 %v7665_v15, %v737_v5  ;;  %v1188_v45 = vadd.f32 %v7665_v15, %v738_v13 }
 0x25a   : > { %v5518_v41 = vsel %vm3609_vm3, %v5015_v33, 0.0  ;;  %6451 = vmatmul.msk.bf16.gmra.mxu0 %vm1800_vm2, %v1597_v14 }
 0x25b   : > { %v5519_v51 = vadd.f32 %v5518_v41, %v5517_v10  ;;  %6538 = vmatmul.msk.bf16.gmra.mxu2 %vm1800_vm2, %v1684_v63  ;;  %v1276_v10 = vadd.f32 %v7665_v15, %v826_v9  ;;  %v7733_v19 = vpop.f32.mrf.mxu1  ;;  %v7738_v21 = vpop.f32.mrf.mxu2  ;;  %v1598_v27 = vpack.c.bf16 %v1188_v45, %v1187_v44  ;;  %v911_v63 = vmul.f32 %v7701_v17, %v461_v58  ;;  %v290_v44 = vld [vmem:[%s6743_s29 + $0x268] sm:$0xff]  ;;  %v377_v45 = vld [vmem:[%s6743_s29 + $0x520] sm:$0xff] }
 0x25c   : > { %12659 = vst [vmem:[#allocation9_spill] sm:$0xff] %v7733_v19 }
 0x25d   : > { %12660 = vst [vmem:[#allocation10_spill] sm:$0xff] %v7738_v21  ;;  %v1642_v33 = vpack.c.bf16 %v1276_v10, %v1275_v11 }
 0x25e   : > { %3756 = vst.msk [vmem:[%s6817_s8 + $0x490] sm:$0xff] %vm3609_vm3, %v7733_v19 }
 0x25f   : > { %v2631_v14 = vpop.f32.mrf.mxu0  ;;  %3840 = vst.msk [vmem:[%s6817_s8 + $0x730] sm:$0xff] %vm3609_vm3, %v7738_v21  ;;  %6496 = vmatmul.msk.bf16.gmra.mxu1 %vm1800_vm2, %v1642_v33 }
 0x260   : > { %3667 = vst.msk [vmem:[%s6817_s8 + $0x1c8] sm:$0xff] %vm3609_vm3, %v2631_v14  ;;  %v4171_v22 = vsel %vm3609_vm3, %v2631_v14, 0.0  ;;  %v5016_v28 = vmul.f32 %v2631_v14, %v2631_v14 }
 0x261   : > { %v4172_v41 = vadd.f32 %v4171_v22, %v4170_v39  ;;  %v462_v39 = vld [vmem:[%s6743_s29 + $0x7c8] sm:$0xff]  ;;  %v289_v22 = vld [vmem:[%s6743_s29 + $0x260] sm:$0xff] }
 0x262   : > { %v5520_v42 = vsel %vm3609_vm3, %v5016_v28, 0.0  ;;  %v912_v5 = vmul.f32 %v7701_v17, %v462_v39  ;;  %v1361_v28 = vadd.f32 %v7665_v15, %v911_v63  ;;  %v827_v39 = vmul.f32 %v7701_v17, %v377_v45 }
 0x263   : > { %v5521_v57 = vadd.f32 %v5520_v42, %v5519_v51  ;;  %v7753_v9 = vpop.f32.mrf.mxu1  ;;  %v7759_v11 = vpop.f32.mrf.mxu2 }
 0x264   : > { %12661 = vst [vmem:[#allocation11_spill] sm:$0xff] %v7753_v9  ;;  %v1362_v33 = vadd.f32 %v7665_v15, %v912_v5  ;;  %v1277_v63 = vadd.f32 %v7665_v15, %v827_v39 }
 0x265   : > { %12662 = vst [vmem:[#allocation12_spill] sm:$0xff] %v7759_v11 }
 0x266   : > { %3757 = vst.msk [vmem:[%s6817_s8 + $0x498] sm:$0xff] %vm3609_vm3, %v7753_v9  ;;  %v1685_v58 = vpack.c.bf16 %v1362_v33, %v1361_v28 }
 0x267   : > { %v2634_v0 = vpop.f32.mrf.mxu0  ;;  %3841 = vst.msk [vmem:[%s6817_s8 + $0x738] sm:$0xff] %vm3609_vm3, %v7759_v11 }
 0x268   : > { %3668 = vst.msk [vmem:[%s6817_s8 + $0x1d0] sm:$0xff] %vm3609_vm3, %v2634_v0  ;;  %v4173_v13 = vsel %vm3609_vm3, %v2634_v0, 0.0  ;;  %v5017_v51 = vmul.f32 %v2634_v0, %v2634_v0 }
 0x269   : > { %v4174_v10 = vadd.f32 %v4173_v13, %v4172_v41  ;;  %v378_v41 = vld [vmem:[%s6743_s29 + $0x528] sm:$0xff]  ;;  %v740_v13 = vmul.f32 %v7701_v17, %v290_v44 }
 0x26a   : > { %v5522_v14 = vsel %vm3609_vm3, %v5017_v51, 0.0  ;;  %6452 = vmatmul.msk.bf16.gmra.mxu0 %vm1800_vm2, %v1598_v27  ;;  %v828_v0 = vmul.f32 %v7701_v17, %v378_v41  ;;  %v739_v27 = vmul.f32 %v7701_v17, %v289_v22 }
 0x26b   : > { %v5523_v42 = vadd.f32 %v5522_v14, %v5521_v57  ;;  %6539 = vmatmul.msk.bf16.gmra.mxu2 %vm1800_vm2, %v1685_v58  ;;  %v7782_v51 = vpop.f32.mrf.mxu1  ;;  %v7787_v22 = vpop.f32.mrf.mxu2  ;;  %v1190_v58 = vadd.f32 %v7665_v15, %v740_v13 }
 0x26c   : > { %v1278_v57 = vadd.f32 %v7665_v15, %v828_v0  ;;  %12663 = vst [vmem:[#allocation13_spill] sm:$0xff] %v7782_v51  ;;  %v1189_v41 = vadd.f32 %v7665_v15, %v739_v27  ;;  %v463_v0 = vld [vmem:[%s6743_s29 + $0x7d0] sm:$0xff] }
 0x26d   : > { %12664 = vst [vmem:[#allocation14_spill] sm:$0xff] %v7787_v22 }
 0x26e   : > { %v1643_v33 = vpack.c.bf16 %v1278_v57, %v1277_v63  ;;  %3758 = vst.msk [vmem:[%s6817_s8 + $0x4a0] sm:$0xff] %vm3609_vm3, %v7782_v51  ;;  %v1599_v63 = vpack.c.bf16 %v1190_v58, %v1189_v41  ;;  %v913_v57 = vmul.f32 %v7701_v17, %v463_v0  ;;  %v291_v41 = vld [vmem:[%s6743_s29 + $0x270] sm:$0xff] }
 0x26f   : > { %v2636_v5 = vpop.f32.mrf.mxu0  ;;  %3842 = vst.msk [vmem:[%s6817_s8 + $0x740] sm:$0xff] %vm3609_vm3, %v7787_v22  ;;  %v379_v22 = vld [vmem:[%s6743_s29 + $0x530] sm:$0xff] }
 0x270   : > { %3669 = vst.msk [vmem:[%s6817_s8 + $0x1d8] sm:$0xff] %vm3609_vm3, %v2636_v5  ;;  %v4175_v14 = vsel %vm3609_vm3, %v2636_v5, 0.0  ;;  %v5018_v28 = vmul.f32 %v2636_v5, %v2636_v5  ;;  %6497 = vmatmul.msk.bf16.gmra.mxu1 %vm1800_vm2, %v1643_v33  ;;  %v1363_v58 = vadd.f32 %v7665_v15, %v913_v57  ;;  %v829_v11 = vmul.f32 %v7701_v17, %v379_v22 }
 0x271   : > { %v4176_v44 = vadd.f32 %v4175_v14, %v4174_v10  ;;  %v464_v10 = vld [vmem:[%s6743_s29 + $0x7d8] sm:$0xff] }
 0x272   : > { %v5524_v45 = vsel %vm3609_vm3, %v5018_v28, 0.0  ;;  %v914_v27 = vmul.f32 %v7701_v17, %v464_v10  ;;  %v1279_v57 = vadd.f32 %v7665_v15, %v829_v11 }
 0x273   : > { %v5525_v39 = vadd.f32 %v5524_v45, %v5523_v42  ;;  %v7802_v14 = vpop.f32.mrf.mxu1  ;;  %v7808_v28 = vpop.f32.mrf.mxu2 }
 0x274   : > { %12665 = vst [vmem:[#allocation15_spill] sm:$0xff] %v7802_v14  ;;  %v1364_v0 = vadd.f32 %v7665_v15, %v914_v27 }
 0x275   : > { %12666 = vst [vmem:[#allocation16_spill] sm:$0xff] %v7808_v28 }
 0x276   : > { %3759 = vst.msk [vmem:[%s6817_s8 + $0x4a8] sm:$0xff] %vm3609_vm3, %v7802_v14  ;;  %v427_v14 = vld [vmem:[%s6743_s29 + $0x6b0] sm:$0xff] }
 0x277   : > { %v2639_v5 = vpop.f32.mrf.mxu0  ;;  %3843 = vst.msk [vmem:[%s6817_s8 + $0x748] sm:$0xff] %vm3609_vm3, %v7808_v28 }
 0x278   : > { %3670 = vst.msk [vmem:[%s6817_s8 + $0x1e0] sm:$0xff] %vm3609_vm3, %v2639_v5  ;;  %v4177_v13 = vsel %vm3609_vm3, %v2639_v5, 0.0  ;;  %v5019_v42 = vmul.f32 %v2639_v5, %v2639_v5  ;;  %v292_v5 = vld [vmem:[%s6743_s29 + $0x278] sm:$0xff] }
 0x279   : > { %v4178_v33 = vadd.f32 %v4177_v13, %v4176_v44  ;;  %v380_v44 = vld [vmem:[%s6743_s29 + $0x538] sm:$0xff]  ;;  %v1686_v13 = vpack.c.bf16 %v1364_v0, %v1363_v58  ;;  %v742_v21 = vmul.f32 %v7701_v17, %v292_v5 }
 0x27a   : > { %v5526_v45 = vsel %vm3609_vm3, %v5019_v42, 0.0  ;;  %6453 = vmatmul.msk.bf16.gmra.mxu0 %vm1800_vm2, %v1599_v63  ;;  %v830_v42 = vmul.f32 %v7701_v17, %v380_v44  ;;  %v741_v63 = vmul.f32 %v7701_v17, %v291_v41 }
 0x27b   : > { %v5527_v10 = vadd.f32 %v5526_v45, %v5525_v39  ;;  %6540 = vmatmul.msk.bf16.gmra.mxu2 %vm1800_vm2, %v1686_v13  ;;  %v7831_v45 = vpop.f32.mrf.mxu1  ;;  %v7836_v58 = vpop.f32.mrf.mxu2  ;;  %v1192_v13 = vadd.f32 %v7665_v15, %v742_v21 }
 0x27c   : > { %v1280_v39 = vadd.f32 %v7665_v15, %v830_v42  ;;  %12667 = vst [vmem:[#allocation17_spill] sm:$0xff] %v7831_v45  ;;  %v1191_v44 = vadd.f32 %v7665_v15, %v741_v63 }
 0x27d   : > { %12668 = vst [vmem:[#allocation18_spill] sm:$0xff] %v7836_v58 }
 0x27e   : > { %v1644_v0 = vpack.c.bf16 %v1280_v39, %v1279_v57  ;;  %3760 = vst.msk [vmem:[%s6817_s8 + $0x4b0] sm:$0xff] %vm3609_vm3, %v7831_v45  ;;  %v466_v57 = vld [vmem:[%s6743_s29 + $0x7e8] sm:$0xff]  ;;  %v1600_v39 = vpack.c.bf16 %v1192_v13, %v1191_v44 }
 0x27f   : > { %v2641_v27 = vpop.f32.mrf.mxu0  ;;  %3844 = vst.msk [vmem:[%s6817_s8 + $0x750] sm:$0xff] %vm3609_vm3, %v7836_v58  ;;  %v916_v21 = vmul.f32 %v7701_v17, %v466_v57  ;;  %v293_v57 = vld [vmem:[%s6743_s29 + $0x280] sm:$0xff] }
 0x280   : > { %3671 = vst.msk [vmem:[%s6817_s8 + $0x1e8] sm:$0xff] %vm3609_vm3, %v2641_v27  ;;  %v4179_v22 = vsel %vm3609_vm3, %v2641_v27, 0.0  ;;  %v5020_v41 = vmul.f32 %v2641_v27, %v2641_v27  ;;  %6498 = vmatmul.msk.bf16.gmra.mxu1 %vm1800_vm2, %v1644_v0  ;;  %v465_v27 = vld [vmem:[%s6743_s29 + $0x7e0] sm:$0xff] }
 0x281   : > { %v4180_v5 = vadd.f32 %v4179_v22, %v4178_v33  ;;  %v549_v33 = vld [vmem:[%s6743_s29 + $0xa80] sm:$0xff]  ;;  %v915_v22 = vmul.f32 %v7701_v17, %v465_v27 }
 0x282   : > { %v5528_v11 = vsel %vm3609_vm3, %v5020_v41, 0.0  ;;  %v550_v41 = vld [vmem:[%s6743_s29 + $0xa88] sm:$0xff]  ;;  %v999_v58 = vmul.f32 %v7701_v17, %v549_v33 }
 0x283   : > { %v5529_v42 = vadd.f32 %v5528_v11, %v5527_v10  ;;  %v7853_v28 = vpop.f32.mrf.mxu1  ;;  %v1000_v10 = vmul.f32 %v7701_v17, %v550_v41  ;;  %v7861_v44 = vpop.f32.mrf.mxu2  ;;  %v1365_v33 = vadd.f32 %v7665_v15, %v915_v22  ;;  %v1366_v41 = vadd.f32 %v7665_v15, %v916_v21 }
 0x284   : > { %12669 = vst [vmem:[#allocation19_spill] sm:$0xff] %v7853_v28  ;;  %v1449_v59 = vadd.f32 %v7665_v15, %v999_v58  ;;  %v743_v22 = vmul.f32 %v7701_v17, %v293_v57 }
 0x285   : > { %12670 = vst [vmem:[#allocation20_spill] sm:$0xff] %v7861_v44 }
 0x286   : > { %3761 = vst.msk [vmem:[%s6817_s8 + $0x4b8] sm:$0xff] %vm3609_vm3, %v7853_v28 }
 0x287   : > { %v2644_v63 = vpop.f32.mrf.mxu0  ;;  %3845 = vst.msk [vmem:[%s6817_s8 + $0x758] sm:$0xff] %vm3609_vm3, %v7861_v44 }
 0x288   : > { %3672 = vst.msk [vmem:[%s6817_s8 + $0x1f0] sm:$0xff] %vm3609_vm3, %v2644_v63  ;;  %v4181_v0 = vsel %vm3609_vm3, %v2644_v63, 0.0  ;;  %v5021_v11 = vmul.f32 %v2644_v63, %v2644_v63  ;;  %v294_v63 = vld [vmem:[%s6743_s29 + $0x288] sm:$0xff] }
 0x289   : > { %v4182_v13 = vadd.f32 %v4181_v0, %v4180_v5  ;;  %v1450_v5 = vadd.f32 %v7665_v15, %v1000_v10  ;;  %v381_v0 = vld [vmem:[%s6743_s29 + $0x540] sm:$0xff]  ;;  %v744_v21 = vmul.f32 %v7701_v17, %v294_v63 }
 0x28a   : > { %v5530_v27 = vsel %vm3609_vm3, %v5021_v11, 0.0  ;;  %6454 = vmatmul.msk.bf16.gmra.mxu0 %vm1800_vm2, %v1600_v39  ;;  %v1687_v11 = vpack.c.bf16 %v1366_v41, %v1365_v33  ;;  %v831_v39 = vmul.f32 %v7701_v17, %v381_v0  ;;  %v467_v0 = vld [vmem:[%s6743_s29 + $0x7f0] sm:$0xff] }
 0x28b   : > { %v5531_v36 = vadd.f32 %v5530_v27, %v5529_v42  ;;  %v1729_v44 = vpack.c.bf16 %v1450_v5, %v1449_v59  ;;  %v1282_v42 = vadd.f32 %v7665_v15, %v832_v40  ;;  %v7887_v27 = vpop.f32.mrf.mxu1  ;;  %v7892_v57 = vpop.f32.mrf.mxu2  ;;  %v1194_v63 = vadd.f32 %v7665_v15, %v744_v21 }
 0x28c   : > { %6541 = vmatmul.msk.bf16.gmra.mxu2 %vm1800_vm2, %v1687_v11  ;;  %v1281_v58 = vadd.f32 %v7665_v15, %v831_v39  ;;  %12671 = vst [vmem:[#allocation21_spill] sm:$0xff] %v7887_v27  ;;  %v468_v11 = vld [vmem:[%s6743_s29 + $0x7f8] sm:$0xff] }
 0x28d   : > { %6583 = vmatmul.msk.bf16.vlgmr.msra.gmra.mxu3 %vm1800_vm2, %v1729_v44  ;;  %12672 = vst [vmem:[#allocation22_spill] sm:$0xff] %v7892_v57  ;;  %v1193_v44 = vadd.f32 %v7665_v15, %v743_v22  ;;  %v918_v21 = vmul.f32 %v7701_v17, %v468_v11 }
 0x28e   : > { %v1645_v33 = vpack.c.bf16 %v1282_v42, %v1281_v58  ;;  %3762 = vst.msk [vmem:[%s6817_s8 + $0x4c0] sm:$0xff] %vm3609_vm3, %v7887_v27  ;;  %v917_v58 = vmul.f32 %v7701_v17, %v467_v0  ;;  %v552_v42 = vld [vmem:[%s6743_s29 + $0xa98] sm:$0xff]  ;;  %v295_v0 = vld [vmem:[%s6743_s29 + $0x290] sm:$0xff] }
 0x28f   : > { %v2646_v10 = vpop.f32.mrf.mxu0  ;;  %3846 = vst.msk [vmem:[%s6817_s8 + $0x760] sm:$0xff] %vm3609_vm3, %v7892_v57  ;;  %v1601_v39 = vpack.c.bf16 %v1194_v63, %v1193_v44 }
 0x290   : > { %3673 = vst.msk [vmem:[%s6817_s8 + $0x1f8] sm:$0xff] %vm3609_vm3, %v2646_v10  ;;  %v4183_v8 = vsel %vm3609_vm3, %v2646_v10, 0.0  ;;  %v5022_v59 = vmul.f32 %v2646_v10, %v2646_v10  ;;  %6499 = vmatmul.msk.bf16.gmra.mxu1 %vm1800_vm2, %v1645_v33  ;;  %v1367_v11 = vadd.f32 %v7665_v15, %v917_v58  ;;  %v745_v58 = vmul.f32 %v7701_v17, %v295_v0 }
 0x291   : > { %v4184_v41 = vadd.f32 %v4183_v8, %v4182_v13  ;;  %v551_v13 = vld [vmem:[%s6743_s29 + $0xa90] sm:$0xff] }
 0x292   : > { %v5532_v40 = vsel %vm3609_vm3, %v5022_v59, 0.0  ;;  %v1001_v8 = vmul.f32 %v7701_v17, %v551_v13  ;;  %v1368_v13 = vadd.f32 %v7665_v15, %v918_v21 }
 0x293   : > { %v5533_v5 = vadd.f32 %v5532_v40, %v5531_v36  ;;  %v7909_v10 = vpop.f32.mrf.mxu1  ;;  %v1002_v36 = vmul.f32 %v7701_v17, %v552_v42  ;;  %v7917_v40 = vpop.f32.mrf.mxu2 }
 0x294   : > { %12673 = vst [vmem:[#allocation23_spill] sm:$0xff] %v7909_v10  ;;  %v1451_v57 = vadd.f32 %v7665_v15, %v1001_v8  ;;  %v1284_v8 = vadd.f32 %v7665_v15, %v834_v31 }
 0x295   : > { %12674 = vst [vmem:[#allocation24_spill] sm:$0xff] %v7917_v40 }
 0x296   : > { %3763 = vst.msk [vmem:[%s6817_s8 + $0x4c8] sm:$0xff] %vm3609_vm3, %v7909_v10 }
 0x297   : > { %v2649_v22 = vpop.f32.mrf.mxu0  ;;  %3847 = vst.msk [vmem:[%s6817_s8 + $0x768] sm:$0xff] %vm3609_vm3, %v7917_v40 }
 0x298   : > { %3674 = vst.msk [vmem:[%s6817_s8 + $0x200] sm:$0xff] %vm3609_vm3, %v2649_v22  ;;  %v4185_v59 = vsel %vm3609_vm3, %v2649_v22, 0.0  ;;  %v5023_v33 = vmul.f32 %v2649_v22, %v2649_v22  ;;  %v296_v22 = vld [vmem:[%s6743_s29 + $0x298] sm:$0xff] }
 0x299   : > { %v4186_v44 = vadd.f32 %v4185_v59, %v4184_v41  ;;  %v1452_v41 = vadd.f32 %v7665_v15, %v1002_v36  ;;  %v383_v59 = vld [vmem:[%s6743_s29 + $0x550] sm:$0xff]  ;;  %v746_v21 = vmul.f32 %v7701_v17, %v296_v22 }
 0x29a   : > { %v5534_v63 = vsel %vm3609_vm3, %v5023_v33, 0.0  ;;  %6455 = vmatmul.msk.bf16.gmra.mxu0 %vm1800_vm2, %v1601_v39  ;;  %v1688_v33 = vpack.c.bf16 %v1368_v13, %v1367_v11  ;;  %v833_v39 = vmul.f32 %v7701_v17, %v383_v59  ;;  %v469_v59 = vld [vmem:[%s6743_s29 + $0x800] sm:$0xff] }
 0x29b   : > { %v5535_v42 = vadd.f32 %v5534_v63, %v5533_v5  ;;  %v1730_v40 = vpack.c.bf16 %v1452_v41, %v1451_v57  ;;  %v7943_v63 = vpop.f32.mrf.mxu1  ;;  %v7948_v0 = vpop.f32.mrf.mxu2  ;;  %v1196_v22 = vadd.f32 %v7665_v15, %v746_v21 }
 0x29c   : > { %6542 = vmatmul.msk.bf16.gmra.mxu2 %vm1800_vm2, %v1688_v33  ;;  %v1283_v5 = vadd.f32 %v7665_v15, %v833_v39  ;;  %12675 = vst [vmem:[#allocation25_spill] sm:$0xff] %v7943_v63  ;;  %v470_v33 = vld [vmem:[%s6743_s29 + $0x808] sm:$0xff] }
 0x29d   : > { %6584 = vmatmul.msk.bf16.gmra.mxu3 %vm1800_vm2, %v1730_v40  ;;  %12676 = vst [vmem:[#allocation26_spill] sm:$0xff] %v7948_v0  ;;  %v1195_v40 = vadd.f32 %v7665_v15, %v745_v58  ;;  %v920_v21 = vmul.f32 %v7701_v17, %v470_v33 }
 0x29e   : > { %v1646_v11 = vpack.c.bf16 %v1284_v8, %v1283_v5  ;;  %3764 = vst.msk [vmem:[%s6817_s8 + $0x4d0] sm:$0xff] %vm3609_vm3, %v7943_v63  ;;  %v919_v5 = vmul.f32 %v7701_v17, %v469_v59  ;;  %v554_v8 = vld [vmem:[%s6743_s29 + $0xaa8] sm:$0xff]  ;;  %v297_v59 = vld [vmem:[%s6743_s29 + $0x2a0] sm:$0xff] }
 0x29f   : > { %v2651_v36 = vpop.f32.mrf.mxu0  ;;  %3848 = vst.msk [vmem:[%s6817_s8 + $0x770] sm:$0xff] %vm3609_vm3, %v7948_v0  ;;  %v1602_v39 = vpack.c.bf16 %v1196_v22, %v1195_v40 }
 0x2a0   : > { %3675 = vst.msk [vmem:[%s6817_s8 + $0x208] sm:$0xff] %vm3609_vm3, %v2651_v36  ;;  %v4187_v62 = vsel %vm3609_vm3, %v2651_v36, 0.0  ;;  %v5024_v57 = vmul.f32 %v2651_v36, %v2651_v36  ;;  %6500 = vmatmul.msk.bf16.gmra.mxu1 %vm1800_vm2, %v1646_v11  ;;  %v1369_v33 = vadd.f32 %v7665_v15, %v919_v5  ;;  %v747_v5 = vmul.f32 %v7701_v17, %v297_v59 }
 0x2a1   : > { %v4188_v13 = vadd.f32 %v4187_v62, %v4186_v44  ;;  %v553_v44 = vld [vmem:[%s6743_s29 + $0xaa0] sm:$0xff] }
 0x2a2   : > { %v5536_v31 = vsel %vm3609_vm3, %v5024_v57, 0.0  ;;  %v1003_v62 = vmul.f32 %v7701_v17, %v553_v44  ;;  %v1370_v44 = vadd.f32 %v7665_v15, %v920_v21 }
 0x2a3   : > { %v5537_v41 = vadd.f32 %v5536_v31, %v5535_v42  ;;  %v7965_v36 = vpop.f32.mrf.mxu1  ;;  %v1004_v42 = vmul.f32 %v7701_v17, %v554_v8  ;;  %v7973_v31 = vpop.f32.mrf.mxu2 }
 0x2a4   : > { %12677 = vst [vmem:[#allocation27_spill] sm:$0xff] %v7965_v36  ;;  %v1453_v0 = vadd.f32 %v7665_v15, %v1003_v62 }
 0x2a5   : > { %12678 = vst [vmem:[#allocation28_spill] sm:$0xff] %v7973_v31 }
 0x2a6   : > { %3765 = vst.msk [vmem:[%s6817_s8 + $0x4d8] sm:$0xff] %vm3609_vm3, %v7965_v36  ;;  %v386_v36 = vld [vmem:[%s6743_s29 + $0x568] sm:$0xff] }
 0x2a7   : > { %v2654_v58 = vpop.f32.mrf.mxu0  ;;  %3849 = vst.msk [vmem:[%s6817_s8 + $0x778] sm:$0xff] %vm3609_vm3, %v7973_v31  ;;  %v836_v63 = vmul.f32 %v7701_v17, %v386_v36 }
 0x2a8   : > { %3676 = vst.msk [vmem:[%s6817_s8 + $0x210] sm:$0xff] %vm3609_vm3, %v2654_v58  ;;  %v4189_v57 = vsel %vm3609_vm3, %v2654_v58, 0.0  ;;  %v5025_v11 = vmul.f32 %v2654_v58, %v2654_v58  ;;  %v298_v58 = vld [vmem:[%s6743_s29 + $0x2a8] sm:$0xff] }
 0x2a9   : > { %v4190_v40 = vadd.f32 %v4189_v57, %v4188_v13  ;;  %v1454_v13 = vadd.f32 %v7665_v15, %v1004_v42  ;;  %v385_v57 = vld [vmem:[%s6743_s29 + $0x560] sm:$0xff]  ;;  %v748_v21 = vmul.f32 %v7701_v17, %v298_v58  ;;  %v1286_v62 = vadd.f32 %v7665_v15, %v836_v63 }
 0x2aa   : > { %v5538_v22 = vsel %vm3609_vm3, %v5025_v11, 0.0  ;;  %6456 = vmatmul.msk.bf16.gmra.mxu0 %vm1800_vm2, %v1602_v39  ;;  %v1689_v11 = vpack.c.bf16 %v1370_v44, %v1369_v33  ;;  %v835_v39 = vmul.f32 %v7701_v17, %v385_v57  ;;  %v471_v57 = vld [vmem:[%s6743_s29 + $0x810] sm:$0xff] }
 0x2ab   : > { %v5539_v8 = vadd.f32 %v5538_v22, %v5537_v41  ;;  %v1731_v31 = vpack.c.bf16 %v1454_v13, %v1453_v0  ;;  %v7999_v22 = vpop.f32.mrf.mxu1  ;;  %v8004_v59 = vpop.f32.mrf.mxu2  ;;  %v1198_v58 = vadd.f32 %v7665_v15, %v748_v21 }
 0x2ac   : > { %6543 = vmatmul.msk.bf16.gmra.mxu2 %vm1800_vm2, %v1689_v11  ;;  %v1285_v41 = vadd.f32 %v7665_v15, %v835_v39  ;;  %12679 = vst [vmem:[#allocation29_spill] sm:$0xff] %v7999_v22  ;;  %v472_v11 = vld [vmem:[%s6743_s29 + $0x818] sm:$0xff] }
 0x2ad   : > { %6585 = vmatmul.msk.bf16.gmra.mxu3 %vm1800_vm2, %v1731_v31  ;;  %12680 = vst [vmem:[#allocation30_spill] sm:$0xff] %v8004_v59  ;;  %v1197_v31 = vadd.f32 %v7665_v15, %v747_v5  ;;  %v922_v21 = vmul.f32 %v7701_v17, %v472_v11 }
 0x2ae   : > { %v1647_v33 = vpack.c.bf16 %v1286_v62, %v1285_v41  ;;  %3766 = vst.msk [vmem:[%s6817_s8 + $0x4e0] sm:$0xff] %vm3609_vm3, %v7999_v22  ;;  %v921_v41 = vmul.f32 %v7701_v17, %v471_v57  ;;  %v556_v62 = vld [vmem:[%s6743_s29 + $0xab8] sm:$0xff]  ;;  %v299_v57 = vld [vmem:[%s6743_s29 + $0x2b0] sm:$0xff] }
 0x2af   : > { %v2656_v42 = vpop.f32.mrf.mxu0  ;;  %3850 = vst.msk [vmem:[%s6817_s8 + $0x780] sm:$0xff] %vm3609_vm3, %v8004_v59  ;;  %v1603_v39 = vpack.c.bf16 %v1198_v58, %v1197_v31 }
 0x2b0   : > { %3677 = vst.msk [vmem:[%s6817_s8 + $0x218] sm:$0xff] %vm3609_vm3, %v2656_v42  ;;  %v4191_v0 = vsel %vm3609_vm3, %v2656_v42, 0.0  ;;  %v5026_v36 = vmul.f32 %v2656_v42, %v2656_v42  ;;  %6501 = vmatmul.msk.bf16.gmra.mxu1 %vm1800_vm2, %v1647_v33  ;;  %v1371_v11 = vadd.f32 %v7665_v15, %v921_v41  ;;  %v749_v41 = vmul.f32 %v7701_v17, %v299_v57 }
 0x2b1   : > { %v4192_v44 = vadd.f32 %v4191_v0, %v4190_v40  ;;  %v555_v40 = vld [vmem:[%s6743_s29 + $0xab0] sm:$0xff] }
 0x2b2   : > { %v5540_v63 = vsel %vm3609_vm3, %v5026_v36, 0.0  ;;  %v1005_v0 = vmul.f32 %v7701_v17, %v555_v40  ;;  %v1372_v40 = vadd.f32 %v7665_v15, %v922_v21 }
 0x2b3   : > { %v5541_v13 = vadd.f32 %v5540_v63, %v5539_v8  ;;  %v8021_v42 = vpop.f32.mrf.mxu1  ;;  %v1006_v8 = vmul.f32 %v7701_v17, %v556_v62  ;;  %v8029_v63 = vpop.f32.mrf.mxu2 }
 0x2b4   : > { %12681 = vst [vmem:[#allocation31_spill] sm:$0xff] %v8021_v42  ;;  %v1455_v59 = vadd.f32 %v7665_v15, %v1005_v0 }
 0x2b5   : > { %12682 = vst [vmem:[#allocation32_spill] sm:$0xff] %v8029_v63 }
 0x2b6   : > { %3767 = vst.msk [vmem:[%s6817_s8 + $0x4e8] sm:$0xff] %vm3609_vm3, %v8021_v42  ;;  %v388_v42 = vld [vmem:[%s6743_s29 + $0x578] sm:$0xff] }
 0x2b7   : > { %v2659_v5 = vpop.f32.mrf.mxu0  ;;  %3851 = vst.msk [vmem:[%s6817_s8 + $0x788] sm:$0xff] %vm3609_vm3, %v8029_v63  ;;  %v838_v22 = vmul.f32 %v7701_v17, %v388_v42 }
 0x2b8   : > { %3678 = vst.msk [vmem:[%s6817_s8 + $0x220] sm:$0xff] %vm3609_vm3, %v2659_v5  ;;  %v4193_v36 = vsel %vm3609_vm3, %v2659_v5, 0.0  ;;  %v5027_v33 = vmul.f32 %v2659_v5, %v2659_v5  ;;  %v300_v5 = vld [vmem:[%s6743_s29 + $0x2b8] sm:$0xff] }
 0x2b9   : > { %v4194_v31 = vadd.f32 %v4193_v36, %v4192_v44  ;;  %v1456_v44 = vadd.f32 %v7665_v15, %v1006_v8  ;;  %v387_v36 = vld [vmem:[%s6743_s29 + $0x570] sm:$0xff]  ;;  %v750_v21 = vmul.f32 %v7701_v17, %v300_v5  ;;  %v1288_v0 = vadd.f32 %v7665_v15, %v838_v22 }
 0x2ba   : > { %v5542_v58 = vsel %vm3609_vm3, %v5027_v33, 0.0  ;;  %6457 = vmatmul.msk.bf16.gmra.mxu0 %vm1800_vm2, %v1603_v39  ;;  %v1690_v33 = vpack.c.bf16 %v1372_v40, %v1371_v11  ;;  %v837_v39 = vmul.f32 %v7701_v17, %v387_v36  ;;  %v474_v36 = vld [vmem:[%s6743_s29 + $0x828] sm:$0xff] }
 0x2bb   : > { %v5543_v62 = vadd.f32 %v5542_v58, %v5541_v13  ;;  %v1732_v63 = vpack.c.bf16 %v1456_v44, %v1455_v59  ;;  %v8055_v58 = vpop.f32.mrf.mxu1  ;;  %v8063_v22 = vpop.f32.mrf.mxu2  ;;  %v1200_v5 = vadd.f32 %v7665_v15, %v750_v21  ;;  %v924_v21 = vmul.f32 %v7701_v17, %v474_v36 }
 0x2bc   : > { %6544 = vmatmul.msk.bf16.gmra.mxu2 %vm1800_vm2, %v1690_v33  ;;  %v1287_v13 = vadd.f32 %v7665_v15, %v837_v39  ;;  %12683 = vst [vmem:[#allocation33_spill] sm:$0xff] %v8055_v58  ;;  %v557_v33 = vld [vmem:[%s6743_s29 + $0xac0] sm:$0xff] }
 0x2bd   : > { %6586 = vmatmul.msk.bf16.gmra.mxu3 %vm1800_vm2, %v1732_v63  ;;  %3768 = vst.msk [vmem:[%s6817_s8 + $0x4f0] sm:$0xff] %vm3609_vm3, %v8055_v58  ;;  %v1199_v63 = vadd.f32 %v7665_v15, %v749_v41 }
 0x2be   : > { %v1648_v57 = vpack.c.bf16 %v1288_v0, %v1287_v13  ;;  %12684 = vst [vmem:[#allocation34_spill] sm:$0xff] %v8063_v22  ;;  %v558_v0 = vld [vmem:[%s6743_s29 + $0xac8] sm:$0xff] }
 0x2bf   : > { %v2661_v8 = vpop.f32.mrf.mxu0  ;;  %3852 = vst.msk [vmem:[%s6817_s8 + $0x790] sm:$0xff] %vm3609_vm3, %v8063_v22  ;;  %v1604_v39 = vpack.c.bf16 %v1200_v5, %v1199_v63 }
 0x2c0   : > { %3679 = vst.msk [vmem:[%s6817_s8 + $0x228] sm:$0xff] %vm3609_vm3, %v2661_v8  ;;  %v4195_v59 = vsel %vm3609_vm3, %v2661_v8, 0.0  ;;  %v5028_v42 = vmul.f32 %v2661_v8, %v2661_v8  ;;  %6502 = vmatmul.msk.bf16.gmra.mxu1 %vm1800_vm2, %v1648_v57 }
 0x2c1   : > { %v4196_v11 = vadd.f32 %v4195_v59, %v4194_v31  ;;  %v473_v31 = vld [vmem:[%s6743_s29 + $0x820] sm:$0xff]  ;;  %v1007_v59 = vmul.f32 %v7701_v17, %v557_v33 }
 0x2c2   : > { %v5544_v40 = vsel %vm3609_vm3, %v5028_v42, 0.0  ;;  %v923_v13 = vmul.f32 %v7701_v17, %v473_v31  ;;  %v1374_v31 = vadd.f32 %v7665_v15, %v924_v21  ;;  %v301_v33 = vld [vmem:[%s6743_s29 + $0x2c0] sm:$0xff] }
 0x2c3   : > { %v5545_v44 = vadd.f32 %v5544_v40, %v5543_v62  ;;  %v8077_v41 = vpop.f32.mrf.mxu1  ;;  %v1008_v62 = vmul.f32 %v7701_v17, %v558_v0  ;;  %v8088_v63 = vpop.f32.mrf.mxu2  ;;  %v751_v58 = vmul.f32 %v7701_v17, %v301_v33 }
 0x2c4   : > { %12685 = vst [vmem:[#allocation35_spill] sm:$0xff] %v8077_v41  ;;  %v1373_v5 = vadd.f32 %v7665_v15, %v923_v13  ;;  %v390_v13 = vld [vmem:[%s6743_s29 + $0x588] sm:$0xff] }
 0x2c5   : > { %3769 = vst.msk [vmem:[%s6817_s8 + $0x4f8] sm:$0xff] %vm3609_vm3, %v8077_v41  ;;  %v1458_v22 = vadd.f32 %v7665_v15, %v1008_v62  ;;  %v389_v41 = vld [vmem:[%s6743_s29 + $0x580] sm:$0xff] }
 0x2c6   : > { %12686 = vst [vmem:[#allocation36_spill] sm:$0xff] %v8088_v63  ;;  %v839_v21 = vmul.f32 %v7701_v17, %v389_v41 }
 0x2c7   : > { %v2664_v8 = vpop.f32.mrf.mxu0  ;;  %3853 = vst.msk [vmem:[%s6817_s8 + $0x798] sm:$0xff] %vm3609_vm3, %v8088_v63 }
 0x2c8   : > { %3680 = vst.msk [vmem:[%s6817_s8 + $0x230] sm:$0xff] %vm3609_vm3, %v2664_v8  ;;  %v4197_v42 = vsel %vm3609_vm3, %v2664_v8, 0.0  ;;  %v5029_v57 = vmul.f32 %v2664_v8, %v2664_v8  ;;  %v302_v8 = vld [vmem:[%s6743_s29 + $0x2c8] sm:$0xff] }
 0x2c9   : > { %v4198_v40 = vadd.f32 %v4197_v42, %v4196_v11  ;;  %v1691_v11 = vpack.c.bf16 %v1374_v31, %v1373_v5  ;;  %v1457_v42 = vadd.f32 %v7665_v15, %v1007_v59  ;;  %v752_v63 = vmul.f32 %v7701_v17, %v302_v8 }
 0x2ca   : > { %v5546_v36 = vsel %vm3609_vm3, %v5029_v57, 0.0  ;;  %6458 = vmatmul.msk.bf16.gmra.mxu0 %vm1800_vm2, %v1604_v39  ;;  %v840_v57 = vmul.f32 %v7701_v17, %v390_v13 }
 0x2cb   : > { %v5547_v0 = vadd.f32 %v5546_v36, %v5545_v44  ;;  %v1733_v39 = vpack.c.bf16 %v1458_v22, %v1457_v42  ;;  %v1289_v44 = vadd.f32 %v7665_v15, %v839_v21  ;;  %v8111_v41 = vpop.f32.mrf.mxu1  ;;  %v8119_v33 = vpop.f32.mrf.mxu2  ;;  %v1202_v42 = vadd.f32 %v7665_v15, %v752_v63  ;;  %v476_v21 = vld [vmem:[%s6743_s29 + $0x838] sm:$0xff] }
 0x2cc   : > { %6545 = vmatmul.msk.bf16.gmra.mxu2 %vm1800_vm2, %v1691_v11  ;;  %v1290_v59 = vadd.f32 %v7665_v15, %v840_v57  ;;  %12687 = vst [vmem:[#allocation37_spill] sm:$0xff] %v8111_v41  ;;  %v1201_v11 = vadd.f32 %v7665_v15, %v751_v58  ;;  %v559_v57 = vld [vmem:[%s6743_s29 + $0xad0] sm:$0xff]  ;;  %v926_v63 = vmul.f32 %v7701_v17, %v476_v21 }
 0x2cd   : > { %6587 = vmatmul.msk.bf16.gmra.mxu3 %vm1800_vm2, %v1733_v39  ;;  %3770 = vst.msk [vmem:[%s6817_s8 + $0x500] sm:$0xff] %vm3609_vm3, %v8111_v41 }
 0x2ce   : > { %v1649_v31 = vpack.c.bf16 %v1290_v59, %v1289_v44  ;;  %12688 = vst [vmem:[#allocation38_spill] sm:$0xff] %v8119_v33  ;;  %v1605_v39 = vpack.c.bf16 %v1202_v42, %v1201_v11  ;;  %v560_v59 = vld [vmem:[%s6743_s29 + $0xad8] sm:$0xff] }
 0x2cf   : > { %v2666_v62 = vpop.f32.mrf.mxu0  ;;  %3854 = vst.msk [vmem:[%s6817_s8 + $0x7a0] sm:$0xff] %vm3609_vm3, %v8119_v33 }
 0x2d0   : > { %3681 = vst.msk [vmem:[%s6817_s8 + $0x238] sm:$0xff] %vm3609_vm3, %v2666_v62  ;;  %v4199_v22 = vsel %vm3609_vm3, %v2666_v62, 0.0  ;;  %v5030_v5 = vmul.f32 %v2666_v62, %v2666_v62  ;;  %6503 = vmatmul.msk.bf16.gmra.mxu1 %vm1800_vm2, %v1649_v31 }
 0x2d1   : > { %v4200_v36 = vadd.f32 %v4199_v22, %v4198_v40  ;;  %v475_v40 = vld [vmem:[%s6743_s29 + $0x830] sm:$0xff]  ;;  %v1009_v22 = vmul.f32 %v7701_v17, %v559_v57 }
 0x2d2   : > { %v5548_v8 = vsel %vm3609_vm3, %v5030_v5, 0.0  ;;  %v925_v44 = vmul.f32 %v7701_v17, %v475_v40  ;;  %v1376_v40 = vadd.f32 %v7665_v15, %v926_v63  ;;  %v303_v57 = vld [vmem:[%s6743_s29 + $0x2d0] sm:$0xff] }
 0x2d3   : > { %v5549_v13 = vadd.f32 %v5548_v8, %v5547_v0  ;;  %v8133_v58 = vpop.f32.mrf.mxu1  ;;  %v1010_v0 = vmul.f32 %v7701_v17, %v560_v59  ;;  %v8144_v11 = vpop.f32.mrf.mxu2  ;;  %v753_v41 = vmul.f32 %v7701_v17, %v303_v57 }
 0x2d4   : > { %12689 = vst [vmem:[#allocation39_spill] sm:$0xff] %v8133_v58  ;;  %v1375_v42 = vadd.f32 %v7665_v15, %v925_v44  ;;  %v392_v44 = vld [vmem:[%s6743_s29 + $0x598] sm:$0xff] }
 0x2d5   : > { %3771 = vst.msk [vmem:[%s6817_s8 + $0x508] sm:$0xff] %vm3609_vm3, %v8133_v58  ;;  %v1460_v33 = vadd.f32 %v7665_v15, %v1010_v0  ;;  %v391_v58 = vld [vmem:[%s6743_s29 + $0x590] sm:$0xff] }
 0x2d6   : > { %12690 = vst [vmem:[#allocation40_spill] sm:$0xff] %v8144_v11  ;;  %v841_v63 = vmul.f32 %v7701_v17, %v391_v58 }
 0x2d7   : > { %v2669_v62 = vpop.f32.mrf.mxu0  ;;  %3855 = vst.msk [vmem:[%s6817_s8 + $0x7a8] sm:$0xff] %vm3609_vm3, %v8144_v11 }
 0x2d8   : > { %3682 = vst.msk [vmem:[%s6817_s8 + $0x240] sm:$0xff] %vm3609_vm3, %v2669_v62  ;;  %v4201_v5 = vsel %vm3609_vm3, %v2669_v62, 0.0  ;;  %v5031_v31 = vmul.f32 %v2669_v62, %v2669_v62  ;;  %v304_v62 = vld [vmem:[%s6743_s29 + $0x2d8] sm:$0xff] }
 0x2d9   : > { %v4202_v8 = vadd.f32 %v4201_v5, %v4200_v36  ;;  %v1692_v36 = vpack.c.bf16 %v1376_v40, %v1375_v42  ;;  %v1459_v5 = vadd.f32 %v7665_v15, %v1009_v22  ;;  %v754_v11 = vmul.f32 %v7701_v17, %v304_v62 }
 0x2da   : > { %v5550_v21 = vsel %vm3609_vm3, %v5031_v31, 0.0  ;;  %6459 = vmatmul.msk.bf16.gmra.mxu0 %vm1800_vm2, %v1605_v39  ;;  %v842_v31 = vmul.f32 %v7701_v17, %v392_v44 }
 0x2db   : > { %v5551_v59 = vadd.f32 %v5550_v21, %v5549_v13  ;;  %v1734_v39 = vpack.c.bf16 %v1460_v33, %v1459_v5  ;;  %v1291_v13 = vadd.f32 %v7665_v15, %v841_v63  ;;  %v1204_v5 = vadd.f32 %v7665_v15, %v754_v11  ;;  %v478_v63 = vld [vmem:[%s6743_s29 + $0x848] sm:$0xff] }
 0x2dc   : > { %6546 = vmatmul.msk.bf16.gmra.mxu2 %vm1800_vm2, %v1692_v36  ;;  %v1292_v22 = vadd.f32 %v7665_v15, %v842_v31  ;;  %v8167_v58 = vpop.f32.mrf.mxu1  ;;  %v1203_v36 = vadd.f32 %v7665_v15, %v753_v41  ;;  %v561_v31 = vld [vmem:[%s6743_s29 + $0xae0] sm:$0xff]  ;;  %v928_v11 = vmul.f32 %v7701_v17, %v478_v63 }
 0x2dd   : > { %6588 = vmatmul.msk.bf16.gmra.mxu3 %vm1800_vm2, %v1734_v39  ;;  %12691 = vst [vmem:[#allocation41_spill] sm:$0xff] %v8167_v58 }
 0x2de   : > { %v1650_v40 = vpack.c.bf16 %v1292_v22, %v1291_v13  ;;  %3772 = vst.msk [vmem:[%s6817_s8 + $0x510] sm:$0xff] %vm3609_vm3, %v8167_v58  ;;  %v8175_v57 = vpop.f32.mrf.mxu2  ;;  %v1606_v39 = vpack.c.bf16 %v1204_v5, %v1203_v36  ;;  %v562_v22 = vld [vmem:[%s6743_s29 + $0xae8] sm:$0xff] }
 0x2df   : > { %v2671_v0 = vpop.f32.mrf.mxu0  ;;  %12692 = vst [vmem:[#allocation42_spill] sm:$0xff] %v8175_v57 }
 0x2e0   : > { %3683 = vst.msk [vmem:[%s6817_s8 + $0x248] sm:$0xff] %vm3609_vm3, %v2671_v0  ;;  %v4203_v33 = vsel %vm3609_vm3, %v2671_v0, 0.0  ;;  %v5032_v42 = vmul.f32 %v2671_v0, %v2671_v0  ;;  %6504 = vmatmul.msk.bf16.gmra.mxu1 %vm1800_vm2, %v1650_v40 }
 0x2e1   : > { %v4204_v21 = vadd.f32 %v4203_v33, %v4202_v8  ;;  %3856 = vst.msk [vmem:[%s6817_s8 + $0x7b0] sm:$0xff] %vm3609_vm3, %v8175_v57  ;;  %v477_v8 = vld [vmem:[%s6743_s29 + $0x840] sm:$0xff]  ;;  %v1011_v33 = vmul.f32 %v7701_v17, %v561_v31 }
 0x2e2   : > { %v5552_v62 = vsel %vm3609_vm3, %v5032_v42, 0.0  ;;  %v927_v13 = vmul.f32 %v7701_v17, %v477_v8  ;;  %v1378_v8 = vadd.f32 %v7665_v15, %v928_v11  ;;  %v305_v31 = vld [vmem:[%s6743_s29 + $0x2e0] sm:$0xff] }
 0x2e3   : > { %v5553_v44 = vadd.f32 %v5552_v62, %v5551_v59  ;;  %v1012_v59 = vmul.f32 %v7701_v17, %v562_v22  ;;  %v393_v11 = vld [vmem:[%s6743_s29 + $0x5a0] sm:$0xff] }
 0x2e4   : > { %v8189_v41 = vpop.f32.mrf.mxu1  ;;  %v1377_v5 = vadd.f32 %v7665_v15, %v927_v13 }
 0x2e5   : > { %12693 = vst [vmem:[#allocation43_spill] sm:$0xff] %v8189_v41 }
 0x2e6   : > { %3773 = vst.msk [vmem:[%s6817_s8 + $0x518] sm:$0xff] %vm3609_vm3, %v8189_v41  ;;  %v8200_v36 = vpop.f32.mrf.mxu2  ;;  %v395_v41 = vld [vmem:[%s6743_s29 + $0x5b0] sm:$0xff] }
 0x2e7   : > { %v2674_v0 = vpop.f32.mrf.mxu0  ;;  %12694 = vst [vmem:[#allocation44_spill] sm:$0xff] %v8200_v36 }
 0x2e8   : > { %3684 = vst.msk [vmem:[%s6817_s8 + $0x250] sm:$0xff] %vm3609_vm3, %v2674_v0  ;;  %v4205_v42 = vsel %vm3609_vm3, %v2674_v0, 0.0  ;;  %v5033_v40 = vmul.f32 %v2674_v0, %v2674_v0  ;;  %v1693_v0 = vpack.c.bf16 %v1378_v8, %v1377_v5  ;;  %v755_v5 = vmul.f32 %v7701_v17, %v305_v31 }
 0x2e9   : > { %v4206_v62 = vadd.f32 %v4205_v42, %v4204_v21  ;;  %3857 = vst.msk [vmem:[%s6817_s8 + $0x7b8] sm:$0xff] %vm3609_vm3, %v8200_v36  ;;  %v306_v21 = vld [vmem:[%s6743_s29 + $0x2e8] sm:$0xff]  ;;  %v8214_v42 = vld [vmem:[%s12276_s1 + $0x1] ss:$0 sm:$0xff] }
 0x2ea   : > { %v5554_v63 = vsel %vm3609_vm3, %v5033_v40, 0.0  ;;  %6460 = vmatmul.msk.bf16.gmra.mxu0 %vm1800_vm2, %v1606_v39  ;;  %v1461_v13 = vadd.f32 %v8214_v42, %v1011_v33  ;;  %v1462_v15 = vadd.f32 %v8214_v42, %v1012_v59  ;;  %v394_v40 = vld [vmem:[%s6743_s29 + $0x5a8] sm:$0xff]  ;;  %v843_v39 = vmul.f32 %v7701_v17, %v393_v11 }
 0x2eb   : > { %v5555_v22 = vadd.f32 %v5554_v63, %v5553_v44  ;;  %v844_v36 = vmul.f32 %v7701_v17, %v394_v40  ;;  %v756_v8 = vmul.f32 %v7701_v17, %v306_v21 }
 0x2ec   : > { %v1735_v44 = vpack.c.bf16 %v1462_v15, %v1461_v13  ;;  %6547 = vmatmul.msk.bf16.gmra.mxu2 %vm1800_vm2, %v1693_v0  ;;  %v1293_v63 = vadd.f32 %v8214_v42, %v843_v39  ;;  %v1205_v15 = vadd.f32 %v8214_v42, %v755_v5 }
 0x2ed   : > { %v1294_v33 = vadd.f32 %v8214_v42, %v844_v36  ;;  %v8228_v11 = vpop.f32.mrf.mxu1  ;;  %v1206_v40 = vadd.f32 %v8214_v42, %v756_v8  ;;  %v564_v8 = vld [vmem:[%s6743_s29 + $0xaf8] sm:$0xff] }
 0x2ee   : > { %6589 = vmatmul.msk.bf16.gmra.mxu3 %vm1800_vm2, %v1735_v44  ;;  %12695 = vst [vmem:[#allocation45_spill] sm:$0xff] %v8228_v11  ;;  %v8236_v36 = vpop.f32.mrf.mxu2  ;;  %v479_v44 = vld [vmem:[%s6743_s29 + $0x850] sm:$0xff] }
 0x2ef   : > { %v2676_v59 = vpop.f32.mrf.mxu0  ;;  %v1651_v21 = vpack.c.bf16 %v1294_v33, %v1293_v63  ;;  %3774 = vst.msk [vmem:[%s6817_s8 + $0x520] sm:$0xff] %vm3609_vm3, %v8228_v11  ;;  %v563_v63 = vld [vmem:[%s6743_s29 + $0xaf0] sm:$0xff]  ;;  %v1607_v33 = vpack.c.bf16 %v1206_v40, %v1205_v15  ;;  %v308_v11 = vld [vmem:[%s6743_s29 + $0x2f8] sm:$0xff] }
 0x2f0   : > { %3685 = vst.msk [vmem:[%s6817_s8 + $0x258] sm:$0xff] %vm3609_vm3, %v2676_v59  ;;  %v4207_v31 = vsel %vm3609_vm3, %v2676_v59, 0.0  ;;  %v5034_v17 = vmul.f32 %v2676_v59, %v2676_v59  ;;  %v8251_v59 = vld [vmem:[%s12276_s1] ss:$0 sm:$0xff] }
 0x2f1   : > { %v4208_v0 = vadd.f32 %v4207_v31, %v4206_v62  ;;  %12696 = vst [vmem:[#allocation46_spill] sm:$0xff] %v8236_v36  ;;  %6505 = vmatmul.msk.bf16.gmra.mxu1 %vm1800_vm2, %v1651_v21  ;;  %v480_v62 = vld [vmem:[%s6743_s29 + $0x858] sm:$0xff]  ;;  %v929_v5 = vmul.f32 %v8251_v59, %v479_v44  ;;  %v1013_v21 = vmul.f32 %v8251_v59, %v563_v63 }
 0x2f2   : > { %v5556_v13 = vsel %vm3609_vm3, %v5034_v17, 0.0  ;;  %3858 = vst.msk [vmem:[%s6817_s8 + $0x7c0] sm:$0xff] %vm3609_vm3, %v8236_v36 }
 0x2f3   : > { %v5557_v39 = vadd.f32 %v5556_v13, %v5555_v22  ;;  %v930_v22 = vmul.f32 %v8251_v59, %v480_v62  ;;  %v1014_v13 = vmul.f32 %v8251_v59, %v564_v8  ;;  %v1379_v62 = vadd.f32 %v8214_v42, %v929_v5  ;;  %v307_v8 = vld [vmem:[%s6743_s29 + $0x2f0] sm:$0xff]  ;;  %v396_v5 = vld [vmem:[%s6743_s29 + $0x5b8] sm:$0xff] }
 0x2f4   : > { %v757_v58 = vmul.f32 %v8251_v59, %v307_v8 }
 0x2f5   : > { %v8255_v17 = vpop.f32.mrf.mxu1  ;;  %v1380_v57 = vadd.f32 %v8214_v42, %v930_v22  ;;  %v845_v22 = vmul.f32 %v8251_v59, %v395_v41 }
 0x2f6   : > { %12697 = vst [vmem:[#allocation47_spill] sm:$0xff] %v8255_v17  ;;  %v8266_v36 = vpop.f32.mrf.mxu2 }
 0x2f7   : > { %v2679_v31 = vpop.f32.mrf.mxu0  ;;  %3775 = vst.msk [vmem:[%s6817_s8 + $0x528] sm:$0xff] %vm3609_vm3, %v8255_v17  ;;  %v1464_v17 = vadd.f32 %v8214_v42, %v1014_v13 }
 0x2f8   : > { %3686 = vst.msk [vmem:[%s6817_s8 + $0x260] sm:$0xff] %vm3609_vm3, %v2679_v31  ;;  %v4209_v15 = vsel %vm3609_vm3, %v2679_v31, 0.0  ;;  %v5035_v40 = vmul.f32 %v2679_v31, %v2679_v31 }
 0x2f9   : > { %v4210_v44 = vadd.f32 %v4209_v15, %v4208_v0  ;;  %12698 = vst [vmem:[#allocation48_spill] sm:$0xff] %v8266_v36  ;;  %v1694_v0 = vpack.c.bf16 %v1380_v57, %v1379_v62  ;;  %v1463_v15 = vadd.f32 %v8214_v42, %v1013_v21  ;;  %v1295_v57 = vadd.f32 %v8214_v42, %v845_v22  ;;  %v482_v22 = vld [vmem:[%s6743_s29 + $0x868] sm:$0xff] }
 0x2fa   : > { %v5558_v63 = vsel %vm3609_vm3, %v5035_v40, 0.0  ;;  %6461 = vmatmul.msk.bf16.gmra.mxu0 %vm1800_vm2, %v1607_v33  ;;  %3859 = vst.msk [vmem:[%s6817_s8 + $0x7c8] sm:$0xff] %vm3609_vm3, %v8266_v36  ;;  %v846_v40 = vmul.f32 %v8251_v59, %v396_v5  ;;  %v758_v36 = vmul.f32 %v8251_v59, %v308_v11 }
 0x2fb   : > { %v5559_v31 = vadd.f32 %v5558_v63, %v5557_v39  ;;  %v1736_v33 = vpack.c.bf16 %v1464_v17, %v1463_v15 }
 0x2fc   : > { %6548 = vmatmul.msk.bf16.gmra.mxu2 %vm1800_vm2, %v1694_v0  ;;  %v1296_v39 = vadd.f32 %v8214_v42, %v846_v40  ;;  %v1207_v0 = vadd.f32 %v8214_v42, %v757_v58  ;;  %v1208_v15 = vadd.f32 %v8214_v42, %v758_v36  ;;  %v565_v40 = vld [vmem:[%s6743_s29 + $0xb00] sm:$0xff]  ;;  %v566_v58 = vld [vmem:[%s6743_s29 + $0xb08] sm:$0xff] }
 0x2fd   : > { %v8289_v41 = vpop.f32.mrf.mxu1 }
 0x2fe   : > { %6590 = vmatmul.msk.bf16.gmra.mxu3 %vm1800_vm2, %v1736_v33  ;;  %12699 = vst [vmem:[#allocation49_spill] sm:$0xff] %v8289_v41  ;;  %v1652_v13 = vpack.c.bf16 %v1296_v39, %v1295_v57  ;;  %v8297_v63 = vpop.f32.mrf.mxu2  ;;  %v1608_v33 = vpack.c.bf16 %v1208_v15, %v1207_v0  ;;  %v932_v39 = vmul.f32 %v8251_v59, %v482_v22 }
 0x2ff   : > { %v2681_v21 = vpop.f32.mrf.mxu0  ;;  %3776 = vst.msk [vmem:[%s6817_s8 + $0x530] sm:$0xff] %vm3609_vm3, %v8289_v41 }
 0x300   : > { %3687 = vst.msk [vmem:[%s6817_s8 + $0x268] sm:$0xff] %vm3609_vm3, %v2681_v21  ;;  %v4211_v17 = vsel %vm3609_vm3, %v2681_v21, 0.0  ;;  %v5036_v11 = vmul.f32 %v2681_v21, %v2681_v21 }
 0x301   : > { %v4212_v62 = vadd.f32 %v4211_v17, %v4210_v44  ;;  %12700 = vst [vmem:[#allocation50_spill] sm:$0xff] %v8297_v63  ;;  %6506 = vmatmul.msk.bf16.gmra.mxu1 %vm1800_vm2, %v1652_v13  ;;  %v481_v44 = vld [vmem:[%s6743_s29 + $0x860] sm:$0xff]  ;;  %v1015_v17 = vmul.f32 %v8251_v59, %v565_v40 }
 0x302   : > { %v5560_v8 = vsel %vm3609_vm3, %v5036_v11, 0.0  ;;  %3860 = vst.msk [vmem:[%s6817_s8 + $0x7d0] sm:$0xff] %vm3609_vm3, %v8297_v63  ;;  %v931_v57 = vmul.f32 %v8251_v59, %v481_v44  ;;  %v1382_v44 = vadd.f32 %v8214_v42, %v932_v39  ;;  %v309_v40 = vld [vmem:[%s6743_s29 + $0x300] sm:$0xff] }
 0x303   : > { %v5561_v5 = vadd.f32 %v5560_v8, %v5559_v31  ;;  %v1016_v31 = vmul.f32 %v8251_v59, %v566_v58  ;;  %v759_v41 = vmul.f32 %v8251_v59, %v309_v40 }
 0x304   : > { %v1381_v15 = vadd.f32 %v8214_v42, %v931_v57  ;;  %v398_v57 = vld [vmem:[%s6743_s29 + $0x5c8] sm:$0xff] }
 0x305   : > { %v8312_v36 = vpop.f32.mrf.mxu1  ;;  %v1466_v63 = vadd.f32 %v8214_v42, %v1016_v31 }
 0x306   : > { %12701 = vst [vmem:[#allocation51_spill] sm:$0xff] %v8312_v36  ;;  %v8322_v0 = vpop.f32.mrf.mxu2 }
 0x307   : > { %v2684_v21 = vpop.f32.mrf.mxu0  ;;  %3777 = vst.msk [vmem:[%s6817_s8 + $0x538] sm:$0xff] %vm3609_vm3, %v8312_v36  ;;  %v397_v36 = vld [vmem:[%s6743_s29 + $0x5c0] sm:$0xff] }
 0x308   : > { %3688 = vst.msk [vmem:[%s6817_s8 + $0x270] sm:$0xff] %vm3609_vm3, %v2684_v21  ;;  %v4213_v11 = vsel %vm3609_vm3, %v2684_v21, 0.0  ;;  %v5037_v13 = vmul.f32 %v2684_v21, %v2684_v21  ;;  %v310_v21 = vld [vmem:[%s6743_s29 + $0x308] sm:$0xff]  ;;  %v847_v39 = vmul.f32 %v8251_v59, %v397_v36 }
 0x309   : > { %v4214_v8 = vadd.f32 %v4213_v11, %v4212_v62  ;;  %12702 = vst [vmem:[#allocation52_spill] sm:$0xff] %v8322_v0  ;;  %v1695_v62 = vpack.c.bf16 %v1382_v44, %v1381_v15  ;;  %v1465_v11 = vadd.f32 %v8214_v42, %v1015_v17 }
 0x30a   : > { %v5562_v22 = vsel %vm3609_vm3, %v5037_v13, 0.0  ;;  %6462 = vmatmul.msk.bf16.gmra.mxu0 %vm1800_vm2, %v1608_v33  ;;  %3861 = vst.msk [vmem:[%s6817_s8 + $0x7d8] sm:$0xff] %vm3609_vm3, %v8322_v0  ;;  %v848_v13 = vmul.f32 %v8251_v59, %v398_v57  ;;  %v760_v0 = vmul.f32 %v8251_v59, %v310_v21 }
 0x30b   : > { %v5563_v58 = vadd.f32 %v5562_v22, %v5561_v5  ;;  %v1737_v33 = vpack.c.bf16 %v1466_v63, %v1465_v11  ;;  %v1297_v5 = vadd.f32 %v8214_v42, %v847_v39  ;;  %v483_v39 = vld [vmem:[%s6743_s29 + $0x870] sm:$0xff] }
 0x30c   : > { %6549 = vmatmul.msk.bf16.gmra.mxu2 %vm1800_vm2, %v1695_v62  ;;  %v1298_v17 = vadd.f32 %v8214_v42, %v848_v13  ;;  %v1209_v62 = vadd.f32 %v8214_v42, %v759_v41  ;;  %v1210_v11 = vadd.f32 %v8214_v42, %v760_v0  ;;  %v484_v13 = vld [vmem:[%s6743_s29 + $0x878] sm:$0xff]  ;;  %v933_v41 = vmul.f32 %v8251_v59, %v483_v39 }
 0x30d   : > { %v8345_v36 = vpop.f32.mrf.mxu1  ;;  %v934_v0 = vmul.f32 %v8251_v59, %v484_v13 }
 0x30e   : > { %6591 = vmatmul.msk.bf16.gmra.mxu3 %vm1800_vm2, %v1737_v33  ;;  %12703 = vst [vmem:[#allocation53_spill] sm:$0xff] %v8345_v36  ;;  %v1653_v44 = vpack.c.bf16 %v1298_v17, %v1297_v5  ;;  %v567_v33 = vld [vmem:[%s6743_s29 + $0xb10] sm:$0xff]  ;;  %v1609_v5 = vpack.c.bf16 %v1210_v11, %v1209_v62  ;;  %v568_v17 = vld [vmem:[%s6743_s29 + $0xb18] sm:$0xff]  ;;  %v1383_v39 = vadd.f32 %v8214_v42, %v933_v41 }
 0x30f   : > { %v2686_v31 = vpop.f32.mrf.mxu0  ;;  %3778 = vst.msk [vmem:[%s6817_s8 + $0x540] sm:$0xff] %vm3609_vm3, %v8345_v36  ;;  %v8353_v40 = vpop.f32.mrf.mxu2  ;;  %v1384_v13 = vadd.f32 %v8214_v42, %v934_v0  ;;  %v399_v41 = vld [vmem:[%s6743_s29 + $0x5d0] sm:$0xff] }
 0x310   : > { %3689 = vst.msk [vmem:[%s6817_s8 + $0x278] sm:$0xff] %vm3609_vm3, %v2686_v31  ;;  %v4215_v63 = vsel %vm3609_vm3, %v2686_v31, 0.0  ;;  %v5038_v15 = vmul.f32 %v2686_v31, %v2686_v31  ;;  %v8361_v57 = vpop.f32.mrf.mxu3 }
 0x311   : > { %v4216_v22 = vadd.f32 %v4215_v63, %v4214_v8  ;;  %12704 = vst [vmem:[#allocation54_spill] sm:$0xff] %v8353_v40  ;;  %6507 = vmatmul.msk.bf16.gmra.mxu1 %vm1800_vm2, %v1653_v44  ;;  %v1017_v44 = vmul.f32 %v8251_v59, %v567_v33 }
 0x312   : > { %v5564_v21 = vsel %vm3609_vm3, %v5038_v15, 0.0  ;;  %3862 = vst.msk [vmem:[%s6817_s8 + $0x7e0] sm:$0xff] %vm3609_vm3, %v8353_v40  ;;  %v400_v40 = vld [vmem:[%s6743_s29 + $0x5d8] sm:$0xff] }
 0x313   : > { %12705 = vst [vmem:[#allocation55_spill] sm:$0xff] %v8361_v57  ;;  %v5565_v8 = vadd.f32 %v5564_v21, %v5563_v58  ;;  %v1018_v21 = vmul.f32 %v8251_v59, %v568_v17  ;;  %v312_v17 = vld [vmem:[%s6743_s29 + $0x318] sm:$0xff]  ;;  %v1467_v0 = vadd.f32 %v8214_v42, %v1017_v44 }
 0x314   : > { %3946 = vst.msk [vmem:[%s6817_s8 + $0xa80] sm:$0xff] %vm3609_vm3, %v8361_v57 }
 0x315   : > { %v8373_v63 = vpop.f32.mrf.mxu1 }
 0x316   : > { %12706 = vst [vmem:[#allocation56_spill] sm:$0xff] %v8373_v63 }
 0x317   : > { %v2689_v31 = vpop.f32.mrf.mxu0  ;;  %3779 = vst.msk [vmem:[%s6817_s8 + $0x548] sm:$0xff] %vm3609_vm3, %v8373_v63  ;;  %v8383_v11 = vpop.f32.mrf.mxu2 }
 0x318   : > { %3690 = vst.msk [vmem:[%s6817_s8 + $0x280] sm:$0xff] %vm3609_vm3, %v2689_v31  ;;  %v4217_v58 = vsel %vm3609_vm3, %v2689_v31, 0.0  ;;  %v5039_v15 = vmul.f32 %v2689_v31, %v2689_v31  ;;  %v311_v31 = vld [vmem:[%s6743_s29 + $0x310] sm:$0xff]  ;;  %v8393_v33 = vpop.f32.mrf.mxu3 }
 0x319   : > { %v4218_v62 = vadd.f32 %v4217_v58, %v4216_v22  ;;  %12707 = vst [vmem:[#allocation57_spill] sm:$0xff] %v8383_v11  ;;  %v1696_v58 = vpack.c.bf16 %v1384_v13, %v1383_v39  ;;  %v761_v63 = vmul.f32 %v8251_v59, %v311_v31 }
 0x31a   : > { %v5566_v57 = vsel %vm3609_vm3, %v5039_v15, 0.0  ;;  %6463 = vmatmul.msk.bf16.gmra.mxu0 %vm1800_vm2, %v1609_v5  ;;  %3863 = vst.msk [vmem:[%s6817_s8 + $0x7e8] sm:$0xff] %vm3609_vm3, %v8383_v11  ;;  %v1468_v15 = vadd.f32 %v8214_v42, %v1018_v21  ;;  %v849_v5 = vmul.f32 %v8251_v59, %v399_v41  ;;  %v850_v11 = vmul.f32 %v8251_v59, %v400_v40 }
 0x31b   : > { %12708 = vst [vmem:[#allocation58_spill] sm:$0xff] %v8393_v33  ;;  %v5567_v22 = vadd.f32 %v5566_v57, %v5565_v8  ;;  %v762_v57 = vmul.f32 %v8251_v59, %v312_v17  ;;  %v1211_v41 = vadd.f32 %v8214_v42, %v761_v63 }
 0x31c   : > { %3947 = vst.msk [vmem:[%s6817_s8 + $0xa88] sm:$0xff] %vm3609_vm3, %v8393_v33  ;;  %6550 = vmatmul.msk.bf16.gmra.mxu2 %vm1800_vm2, %v1696_v58  ;;  %v1738_v8 = vpack.c.bf16 %v1468_v15, %v1467_v0  ;;  %v1299_v39 = vadd.f32 %v8214_v42, %v849_v5  ;;  %v1300_v44 = vadd.f32 %v8214_v42, %v850_v11  ;;  %v485_v5 = vld [vmem:[%s6743_s29 + $0x880] sm:$0xff] }
 0x31d   : > { %v8409_v33 = vpop.f32.mrf.mxu1  ;;  %v1212_v0 = vadd.f32 %v8214_v42, %v762_v57  ;;  %v935_v63 = vmul.f32 %v8251_v59, %v485_v5 }
 0x31e   : > { %12709 = vst [vmem:[#allocation59_spill] sm:$0xff] %v8409_v33  ;;  %6592 = vmatmul.msk.bf16.gmra.mxu3 %vm1800_vm2, %v1738_v8  ;;  %v1654_v58 = vpack.c.bf16 %v1300_v44, %v1299_v39  ;;  %v486_v8 = vld [vmem:[%s6743_s29 + $0x888] sm:$0xff]  ;;  %v569_v39 = vld [vmem:[%s6743_s29 + $0xb20] sm:$0xff] }
 0x31f   : > { %v2691_v13 = vpop.f32.mrf.mxu0  ;;  %3780 = vst.msk [vmem:[%s6817_s8 + $0x550] sm:$0xff] %vm3609_vm3, %v8409_v33  ;;  %v8419_v17 = vpop.f32.mrf.mxu2  ;;  %v936_v57 = vmul.f32 %v8251_v59, %v486_v8  ;;  %v570_v44 = vld [vmem:[%s6743_s29 + $0xb28] sm:$0xff]  ;;  %v1385_v8 = vadd.f32 %v8214_v42, %v935_v63  ;;  %v401_v63 = vld [vmem:[%s6743_s29 + $0x5e0] sm:$0xff] }
 0x320   : > { %3691 = vst.msk [vmem:[%s6817_s8 + $0x288] sm:$0xff] %vm3609_vm3, %v2691_v13  ;;  %v4219_v40 = vsel %vm3609_vm3, %v2691_v13, 0.0  ;;  %v5040_v21 = vmul.f32 %v2691_v13, %v2691_v13  ;;  %v8427_v15 = vpop.f32.mrf.mxu3  ;;  %v1610_v13 = vpack.c.bf16 %v1212_v0, %v1211_v41  ;;  %v1020_v41 = vmul.f32 %v8251_v59, %v570_v44  ;;  %v314_v44 = vld [vmem:[%s6743_s29 + $0x328] sm:$0xff] }
 0x321   : > { %v4220_v31 = vadd.f32 %v4219_v40, %v4218_v62  ;;  %12710 = vst [vmem:[#allocation60_spill] sm:$0xff] %v8419_v17  ;;  %6508 = vmatmul.msk.bf16.gmra.mxu1 %vm1800_vm2, %v1654_v58 }
 0x322   : > { %v5568_v11 = vsel %vm3609_vm3, %v5040_v21, 0.0  ;;  %3864 = vst.msk [vmem:[%s6817_s8 + $0x7f0] sm:$0xff] %vm3609_vm3, %v8419_v17 }
 0x323   : > { %12711 = vst [vmem:[#allocation61_spill] sm:$0xff] %v8427_v15  ;;  %v5569_v62 = vadd.f32 %v5568_v11, %v5567_v22  ;;  %v1019_v11 = vmul.f32 %v8251_v59, %v569_v39 }
 0x324   : > { %3948 = vst.msk [vmem:[%s6817_s8 + $0xa90] sm:$0xff] %vm3609_vm3, %v8427_v15  ;;  %v1386_v15 = vadd.f32 %v8214_v42, %v936_v57 }
 0x325   : > { %v8439_v21 = vpop.f32.mrf.mxu1  ;;  %v1469_v57 = vadd.f32 %v8214_v42, %v1019_v11 }
 0x326   : > { %12712 = vst [vmem:[#allocation62_spill] sm:$0xff] %v8439_v21 }
 0x327   : > { %v2694_v40 = vpop.f32.mrf.mxu0  ;;  %3781 = vst.msk [vmem:[%s6817_s8 + $0x558] sm:$0xff] %vm3609_vm3, %v8439_v21  ;;  %v8449_v5 = vpop.f32.mrf.mxu2  ;;  %v402_v21 = vld [vmem:[%s6743_s29 + $0x5e8] sm:$0xff] }
 0x328   : > { %3692 = vst.msk [vmem:[%s6817_s8 + $0x290] sm:$0xff] %vm3609_vm3, %v2694_v40  ;;  %v4221_v22 = vsel %vm3609_vm3, %v2694_v40, 0.0  ;;  %v5041_v58 = vmul.f32 %v2694_v40, %v2694_v40  ;;  %v313_v40 = vld [vmem:[%s6743_s29 + $0x320] sm:$0xff]  ;;  %v8459_v39 = vpop.f32.mrf.mxu3 }
 0x329   : > { %v4222_v0 = vadd.f32 %v4221_v22, %v4220_v31  ;;  %12713 = vst [vmem:[#allocation63_spill] sm:$0xff] %v8449_v5  ;;  %v1697_v22 = vpack.c.bf16 %v1386_v15, %v1385_v8  ;;  %v763_v33 = vmul.f32 %v8251_v59, %v313_v40 }
 0x32a   : > { %v5570_v17 = vsel %vm3609_vm3, %v5041_v58, 0.0  ;;  %6464 = vmatmul.msk.bf16.gmra.mxu0 %vm1800_vm2, %v1610_v13  ;;  %3865 = vst.msk [vmem:[%s6817_s8 + $0x7f8] sm:$0xff] %vm3609_vm3, %v8449_v5  ;;  %v1470_v58 = vadd.f32 %v8214_v42, %v1020_v41  ;;  %v851_v13 = vmul.f32 %v8251_v59, %v401_v63  ;;  %v852_v5 = vmul.f32 %v8251_v59, %v402_v21 }
 0x32b   : > { %12714 = vst [vmem:[#allocation64_spill] sm:$0xff] %v8459_v39  ;;  %v5571_v31 = vadd.f32 %v5570_v17, %v5569_v62  ;;  %v764_v17 = vmul.f32 %v8251_v59, %v314_v44  ;;  %v1213_v63 = vadd.f32 %v8214_v42, %v763_v33 }
 0x32c   : > { %3949 = vst.msk [vmem:[%s6817_s8 + $0xa98] sm:$0xff] %vm3609_vm3, %v8459_v39  ;;  %6551 = vmatmul.msk.bf16.gmra.mxu2 %vm1800_vm2, %v1697_v22  ;;  %v1739_v62 = vpack.c.bf16 %v1470_v58, %v1469_v57  ;;  %v1301_v15 = vadd.f32 %v8214_v42, %v851_v13  ;;  %v1302_v11 = vadd.f32 %v8214_v42, %v852_v5  ;;  %v487_v13 = vld [vmem:[%s6743_s29 + $0x890] sm:$0xff] }
 0x32d   : > { %v8475_v39 = vpop.f32.mrf.mxu1  ;;  %v1214_v57 = vadd.f32 %v8214_v42, %v764_v17  ;;  %v937_v33 = vmul.f32 %v8251_v59, %v487_v13 }
 0x32e   : > { %12715 = vst [vmem:[#allocation65_spill] sm:$0xff] %v8475_v39  ;;  %6593 = vmatmul.msk.bf16.gmra.mxu3 %vm1800_vm2, %v1739_v62  ;;  %v1655_v22 = vpack.c.bf16 %v1302_v11, %v1301_v15  ;;  %v488_v62 = vld [vmem:[%s6743_s29 + $0x898] sm:$0xff]  ;;  %v571_v15 = vld [vmem:[%s6743_s29 + $0xb30] sm:$0xff] }
 0x32f   : > { %v2696_v8 = vpop.f32.mrf.mxu0  ;;  %3782 = vst.msk [vmem:[%s6817_s8 + $0x560] sm:$0xff] %vm3609_vm3, %v8475_v39  ;;  %v8485_v44 = vpop.f32.mrf.mxu2  ;;  %v938_v17 = vmul.f32 %v8251_v59, %v488_v62  ;;  %v572_v11 = vld [vmem:[%s6743_s29 + $0xb38] sm:$0xff]  ;;  %v1387_v62 = vadd.f32 %v8214_v42, %v937_v33  ;;  %v403_v33 = vld [vmem:[%s6743_s29 + $0x5f0] sm:$0xff] }
 0x330   : > { %3693 = vst.msk [vmem:[%s6817_s8 + $0x298] sm:$0xff] %vm3609_vm3, %v2696_v8  ;;  %v4223_v21 = vsel %vm3609_vm3, %v2696_v8, 0.0  ;;  %v5042_v41 = vmul.f32 %v2696_v8, %v2696_v8  ;;  %v8493_v58 = vpop.f32.mrf.mxu3  ;;  %v1611_v8 = vpack.c.bf16 %v1214_v57, %v1213_v63  ;;  %v1022_v63 = vmul.f32 %v8251_v59, %v572_v11  ;;  %v316_v11 = vld [vmem:[%s6743_s29 + $0x338] sm:$0xff] }
 0x331   : > { %v4224_v40 = vadd.f32 %v4223_v21, %v4222_v0  ;;  %12716 = vst [vmem:[#allocation66_spill] sm:$0xff] %v8485_v44  ;;  %6509 = vmatmul.msk.bf16.gmra.mxu1 %vm1800_vm2, %v1655_v22 }
 0x332   : > { %v5572_v5 = vsel %vm3609_vm3, %v5042_v41, 0.0  ;;  %3866 = vst.msk [vmem:[%s6817_s8 + $0x800] sm:$0xff] %vm3609_vm3, %v8485_v44 }
 0x333   : > { %12717 = vst [vmem:[#allocation67_spill] sm:$0xff] %v8493_v58  ;;  %v5573_v0 = vadd.f32 %v5572_v5, %v5571_v31  ;;  %v1021_v5 = vmul.f32 %v8251_v59, %v571_v15 }
 0x334   : > { %3950 = vst.msk [vmem:[%s6817_s8 + $0xaa0] sm:$0xff] %vm3609_vm3, %v8493_v58  ;;  %v1388_v58 = vadd.f32 %v8214_v42, %v938_v17 }
 0x335   : > { %v8505_v41 = vpop.f32.mrf.mxu1  ;;  %v1471_v17 = vadd.f32 %v8214_v42, %v1021_v5 }
 0x336   : > { %12718 = vst [vmem:[#allocation68_spill] sm:$0xff] %v8505_v41 }
 0x337   : > { %v2699_v21 = vpop.f32.mrf.mxu0  ;;  %3783 = vst.msk [vmem:[%s6817_s8 + $0x568] sm:$0xff] %vm3609_vm3, %v8505_v41  ;;  %v8515_v13 = vpop.f32.mrf.mxu2  ;;  %v404_v41 = vld [vmem:[%s6743_s29 + $0x5f8] sm:$0xff] }
 0x338   : > { %3694 = vst.msk [vmem:[%s6817_s8 + $0x2a0] sm:$0xff] %vm3609_vm3, %v2699_v21  ;;  %v4225_v31 = vsel %vm3609_vm3, %v2699_v21, 0.0  ;;  %v5043_v22 = vmul.f32 %v2699_v21, %v2699_v21  ;;  %v315_v21 = vld [vmem:[%s6743_s29 + $0x330] sm:$0xff]  ;;  %v8525_v15 = vpop.f32.mrf.mxu3 }
 0x339   : > { %v4226_v57 = vadd.f32 %v4225_v31, %v4224_v40  ;;  %12719 = vst [vmem:[#allocation69_spill] sm:$0xff] %v8515_v13  ;;  %v1698_v31 = vpack.c.bf16 %v1388_v58, %v1387_v62  ;;  %v765_v39 = vmul.f32 %v8251_v59, %v315_v21 }
 0x33a   : > { %v5574_v44 = vsel %vm3609_vm3, %v5043_v22, 0.0  ;;  %6465 = vmatmul.msk.bf16.gmra.mxu0 %vm1800_vm2, %v1611_v8  ;;  %3867 = vst.msk [vmem:[%s6817_s8 + $0x808] sm:$0xff] %vm3609_vm3, %v8515_v13  ;;  %v1472_v22 = vadd.f32 %v8214_v42, %v1022_v63  ;;  %v853_v8 = vmul.f32 %v8251_v59, %v403_v33  ;;  %v854_v13 = vmul.f32 %v8251_v59, %v404_v41 }
 0x33b   : > { %12720 = vst [vmem:[#allocation70_spill] sm:$0xff] %v8525_v15  ;;  %v5575_v40 = vadd.f32 %v5574_v44, %v5573_v0  ;;  %v766_v44 = vmul.f32 %v8251_v59, %v316_v11  ;;  %v1215_v33 = vadd.f32 %v8214_v42, %v765_v39 }
 0x33c   : > { %3951 = vst.msk [vmem:[%s6817_s8 + $0xaa8] sm:$0xff] %vm3609_vm3, %v8525_v15  ;;  %6552 = vmatmul.msk.bf16.gmra.mxu2 %vm1800_vm2, %v1698_v31  ;;  %v1740_v0 = vpack.c.bf16 %v1472_v22, %v1471_v17  ;;  %v1303_v58 = vadd.f32 %v8214_v42, %v853_v8  ;;  %v1304_v5 = vadd.f32 %v8214_v42, %v854_v13  ;;  %v489_v8 = vld [vmem:[%s6743_s29 + $0x8a0] sm:$0xff] }
 0x33d   : > { %v8541_v15 = vpop.f32.mrf.mxu1  ;;  %v1216_v17 = vadd.f32 %v8214_v42, %v766_v44  ;;  %v939_v39 = vmul.f32 %v8251_v59, %v489_v8 }
 0x33e   : > { %12721 = vst [vmem:[#allocation71_spill] sm:$0xff] %v8541_v15  ;;  %6594 = vmatmul.msk.bf16.gmra.mxu3 %vm1800_vm2, %v1740_v0  ;;  %v1656_v31 = vpack.c.bf16 %v1304_v5, %v1303_v58  ;;  %v490_v0 = vld [vmem:[%s6743_s29 + $0x8a8] sm:$0xff]  ;;  %v573_v58 = vld [vmem:[%s6743_s29 + $0xb40] sm:$0xff] }
 0x33f   : > { %v2701_v62 = vpop.f32.mrf.mxu0  ;;  %3784 = vst.msk [vmem:[%s6817_s8 + $0x570] sm:$0xff] %vm3609_vm3, %v8541_v15  ;;  %v8551_v11 = vpop.f32.mrf.mxu2  ;;  %v574_v5 = vld [vmem:[%s6743_s29 + $0xb48] sm:$0xff] }
 0x340   : > { %3695 = vst.msk [vmem:[%s6817_s8 + $0x2a8] sm:$0xff] %vm3609_vm3, %v2701_v62  ;;  %v4227_v41 = vsel %vm3609_vm3, %v2701_v62, 0.0  ;;  %v5044_v63 = vmul.f32 %v2701_v62, %v2701_v62  ;;  %v8559_v22 = vpop.f32.mrf.mxu3  ;;  %v1612_v62 = vpack.c.bf16 %v1216_v17, %v1215_v33  ;;  %v1024_v33 = vmul.f32 %v8251_v59, %v574_v5  ;;  %v318_v5 = vld [vmem:[%s6743_s29 + $0x348] sm:$0xff] }
 0x341   : > { %v4228_v21 = vadd.f32 %v4227_v41, %v4226_v57  ;;  %12722 = vst [vmem:[#allocation72_spill] sm:$0xff] %v8551_v11  ;;  %6510 = vmatmul.msk.bf16.gmra.mxu1 %vm1800_vm2, %v1656_v31 }
 0x342   : > { %v5576_v13 = vsel %vm3609_vm3, %v5044_v63, 0.0  ;;  %3868 = vst.msk [vmem:[%s6817_s8 + $0x810] sm:$0xff] %vm3609_vm3, %v8551_v11 }
 0x343   : > { %12723 = vst [vmem:[#allocation73_spill] sm:$0xff] %v8559_v22  ;;  %v5577_v57 = vadd.f32 %v5576_v13, %v5575_v40  ;;  %v940_v40 = vmul.f32 %v8251_v59, %v490_v0  ;;  %v1023_v13 = vmul.f32 %v8251_v59, %v573_v58  ;;  %v1389_v0 = vadd.f32 %v8214_v42, %v939_v39  ;;  %v405_v39 = vld [vmem:[%s6743_s29 + $0x600] sm:$0xff] }
 0x344   : > { %3952 = vst.msk [vmem:[%s6817_s8 + $0xab0] sm:$0xff] %vm3609_vm3, %v8559_v22 }
 0x345   : > { %v8570_v41 = vpop.f32.mrf.mxu1  ;;  %v1390_v22 = vadd.f32 %v8214_v42, %v940_v40  ;;  %v1473_v40 = vadd.f32 %v8214_v42, %v1023_v13 }
 0x346   : > { %12724 = vst [vmem:[#allocation74_spill] sm:$0xff] %v8570_v41 }
 0x347   : > { %v2704_v44 = vpop.f32.mrf.mxu0  ;;  %3785 = vst.msk [vmem:[%s6817_s8 + $0x578] sm:$0xff] %vm3609_vm3, %v8570_v41  ;;  %v8581_v8 = vpop.f32.mrf.mxu2  ;;  %v406_v41 = vld [vmem:[%s6743_s29 + $0x608] sm:$0xff] }
 0x348   : > { %3696 = vst.msk [vmem:[%s6817_s8 + $0x2b0] sm:$0xff] %vm3609_vm3, %v2704_v44  ;;  %v4229_v63 = vsel %vm3609_vm3, %v2704_v44, 0.0  ;;  %v5045_v31 = vmul.f32 %v2704_v44, %v2704_v44  ;;  %v317_v44 = vld [vmem:[%s6743_s29 + $0x340] sm:$0xff]  ;;  %v8591_v58 = vpop.f32.mrf.mxu3 }
 0x349   : > { %v4230_v17 = vadd.f32 %v4229_v63, %v4228_v21  ;;  %12725 = vst [vmem:[#allocation75_spill] sm:$0xff] %v8581_v8  ;;  %v1699_v63 = vpack.c.bf16 %v1390_v22, %v1389_v0  ;;  %v767_v15 = vmul.f32 %v8251_v59, %v317_v44 }
 0x34a   : > { %v5578_v11 = vsel %vm3609_vm3, %v5045_v31, 0.0  ;;  %6466 = vmatmul.msk.bf16.gmra.mxu0 %vm1800_vm2, %v1612_v62  ;;  %3869 = vst.msk [vmem:[%s6817_s8 + $0x818] sm:$0xff] %vm3609_vm3, %v8581_v8  ;;  %v1474_v31 = vadd.f32 %v8214_v42, %v1024_v33  ;;  %v855_v62 = vmul.f32 %v8251_v59, %v405_v39  ;;  %v856_v8 = vmul.f32 %v8251_v59, %v406_v41 }
 0x34b   : > { %12726 = vst [vmem:[#allocation76_spill] sm:$0xff] %v8591_v58  ;;  %v5579_v21 = vadd.f32 %v5578_v11, %v5577_v57  ;;  %v768_v11 = vmul.f32 %v8251_v59, %v318_v5  ;;  %v1217_v39 = vadd.f32 %v8214_v42, %v767_v15 }
 0x34c   : > { %3953 = vst.msk [vmem:[%s6817_s8 + $0xab8] sm:$0xff] %vm3609_vm3, %v8591_v58  ;;  %6553 = vmatmul.msk.bf16.gmra.mxu2 %vm1800_vm2, %v1699_v63  ;;  %v1741_v57 = vpack.c.bf16 %v1474_v31, %v1473_v40  ;;  %v1305_v22 = vadd.f32 %v8214_v42, %v855_v62  ;;  %v1306_v13 = vadd.f32 %v8214_v42, %v856_v8  ;;  %v491_v62 = vld [vmem:[%s6743_s29 + $0x8b0] sm:$0xff] }
 0x34d   : > { %v8607_v58 = vpop.f32.mrf.mxu1  ;;  %v1218_v40 = vadd.f32 %v8214_v42, %v768_v11  ;;  %v941_v15 = vmul.f32 %v8251_v59, %v491_v62 }
 0x34e   : > { %12727 = vst [vmem:[#allocation77_spill] sm:$0xff] %v8607_v58  ;;  %6595 = vmatmul.msk.bf16.gmra.mxu3 %vm1800_vm2, %v1741_v57  ;;  %v1657_v63 = vpack.c.bf16 %v1306_v13, %v1305_v22  ;;  %v492_v57 = vld [vmem:[%s6743_s29 + $0x8b8] sm:$0xff]  ;;  %v575_v22 = vld [vmem:[%s6743_s29 + $0xb50] sm:$0xff] }
 0x34f   : > { %v2706_v0 = vpop.f32.mrf.mxu0  ;;  %3786 = vst.msk [vmem:[%s6817_s8 + $0x580] sm:$0xff] %vm3609_vm3, %v8607_v58  ;;  %v8617_v5 = vpop.f32.mrf.mxu2  ;;  %v576_v13 = vld [vmem:[%s6743_s29 + $0xb58] sm:$0xff] }
 0x350   : > { %3697 = vst.msk [vmem:[%s6817_s8 + $0x2b8] sm:$0xff] %vm3609_vm3, %v2706_v0  ;;  %v4231_v41 = vsel %vm3609_vm3, %v2706_v0, 0.0  ;;  %v5046_v33 = vmul.f32 %v2706_v0, %v2706_v0  ;;  %v8625_v31 = vpop.f32.mrf.mxu3  ;;  %v1613_v0 = vpack.c.bf16 %v1218_v40, %v1217_v39  ;;  %v1026_v39 = vmul.f32 %v8251_v59, %v576_v13  ;;  %v320_v13 = vld [vmem:[%s6743_s29 + $0x358] sm:$0xff] }
 0x351   : > { %v4232_v44 = vadd.f32 %v4231_v41, %v4230_v17  ;;  %12728 = vst [vmem:[#allocation78_spill] sm:$0xff] %v8617_v5  ;;  %6511 = vmatmul.msk.bf16.gmra.mxu1 %vm1800_vm2, %v1657_v63 }
 0x352   : > { %v5580_v8 = vsel %vm3609_vm3, %v5046_v33, 0.0  ;;  %3870 = vst.msk [vmem:[%s6817_s8 + $0x820] sm:$0xff] %vm3609_vm3, %v8617_v5 }
 0x353   : > { %12729 = vst [vmem:[#allocation79_spill] sm:$0xff] %v8625_v31  ;;  %v5581_v17 = vadd.f32 %v5580_v8, %v5579_v21  ;;  %v942_v21 = vmul.f32 %v8251_v59, %v492_v57  ;;  %v1025_v8 = vmul.f32 %v8251_v59, %v575_v22  ;;  %v1391_v57 = vadd.f32 %v8214_v42, %v941_v15  ;;  %v407_v15 = vld [vmem:[%s6743_s29 + $0x610] sm:$0xff] }
 0x354   : > { %3954 = vst.msk [vmem:[%s6817_s8 + $0xac0] sm:$0xff] %vm3609_vm3, %v8625_v31 }
 0x355   : > { %v8636_v41 = vpop.f32.mrf.mxu1  ;;  %v1392_v31 = vadd.f32 %v8214_v42, %v942_v21  ;;  %v1475_v21 = vadd.f32 %v8214_v42, %v1025_v8 }
 0x356   : > { %12730 = vst [vmem:[#allocation80_spill] sm:$0xff] %v8636_v41 }
 0x357   : > { %v2709_v11 = vpop.f32.mrf.mxu0  ;;  %3787 = vst.msk [vmem:[%s6817_s8 + $0x588] sm:$0xff] %vm3609_vm3, %v8636_v41  ;;  %v8647_v62 = vpop.f32.mrf.mxu2  ;;  %v408_v41 = vld [vmem:[%s6743_s29 + $0x618] sm:$0xff] }
 0x358   : > { %3698 = vst.msk [vmem:[%s6817_s8 + $0x2c0] sm:$0xff] %vm3609_vm3, %v2709_v11  ;;  %v4233_v33 = vsel %vm3609_vm3, %v2709_v11, 0.0  ;;  %v5047_v63 = vmul.f32 %v2709_v11, %v2709_v11  ;;  %v319_v11 = vld [vmem:[%s6743_s29 + $0x350] sm:$0xff]  ;;  %v8657_v22 = vpop.f32.mrf.mxu3 }
 0x359   : > { %v4234_v40 = vadd.f32 %v4233_v33, %v4232_v44  ;;  %12731 = vst [vmem:[#allocation81_spill] sm:$0xff] %v8647_v62  ;;  %v1700_v33 = vpack.c.bf16 %v1392_v31, %v1391_v57  ;;  %v769_v58 = vmul.f32 %v8251_v59, %v319_v11 }
 0x35a   : > { %v5582_v5 = vsel %vm3609_vm3, %v5047_v63, 0.0  ;;  %6467 = vmatmul.msk.bf16.gmra.mxu0 %vm1800_vm2, %v1613_v0  ;;  %3871 = vst.msk [vmem:[%s6817_s8 + $0x828] sm:$0xff] %vm3609_vm3, %v8647_v62  ;;  %v1476_v63 = vadd.f32 %v8214_v42, %v1026_v39  ;;  %v857_v0 = vmul.f32 %v8251_v59, %v407_v15  ;;  %v858_v62 = vmul.f32 %v8251_v59, %v408_v41 }
 0x35b   : > { %12732 = vst [vmem:[#allocation82_spill] sm:$0xff] %v8657_v22  ;;  %v5583_v44 = vadd.f32 %v5582_v5, %v5581_v17  ;;  %v770_v5 = vmul.f32 %v8251_v59, %v320_v13  ;;  %v1219_v15 = vadd.f32 %v8214_v42, %v769_v58 }
 0x35c   : > { %3955 = vst.msk [vmem:[%s6817_s8 + $0xac8] sm:$0xff] %vm3609_vm3, %v8657_v22  ;;  %6554 = vmatmul.msk.bf16.gmra.mxu2 %vm1800_vm2, %v1700_v33  ;;  %v1742_v17 = vpack.c.bf16 %v1476_v63, %v1475_v21  ;;  %v1307_v31 = vadd.f32 %v8214_v42, %v857_v0  ;;  %v1308_v8 = vadd.f32 %v8214_v42, %v858_v62  ;;  %v493_v0 = vld [vmem:[%s6743_s29 + $0x8c0] sm:$0xff] }
 0x35d   : > { %v8673_v22 = vpop.f32.mrf.mxu1  ;;  %v1220_v21 = vadd.f32 %v8214_v42, %v770_v5  ;;  %v943_v58 = vmul.f32 %v8251_v59, %v493_v0 }
 0x35e   : > { %12733 = vst [vmem:[#allocation83_spill] sm:$0xff] %v8673_v22  ;;  %6596 = vmatmul.msk.bf16.gmra.mxu3 %vm1800_vm2, %v1742_v17  ;;  %v1658_v33 = vpack.c.bf16 %v1308_v8, %v1307_v31  ;;  %v494_v17 = vld [vmem:[%s6743_s29 + $0x8c8] sm:$0xff]  ;;  %v577_v31 = vld [vmem:[%s6743_s29 + $0xb60] sm:$0xff] }
 0x35f   : > { %v2711_v57 = vpop.f32.mrf.mxu0  ;;  %3788 = vst.msk [vmem:[%s6817_s8 + $0x590] sm:$0xff] %vm3609_vm3, %v8673_v22  ;;  %v8683_v13 = vpop.f32.mrf.mxu2  ;;  %v578_v8 = vld [vmem:[%s6743_s29 + $0xb68] sm:$0xff] }
 0x360   : > { %3699 = vst.msk [vmem:[%s6817_s8 + $0x2c8] sm:$0xff] %vm3609_vm3, %v2711_v57  ;;  %v4235_v41 = vsel %vm3609_vm3, %v2711_v57, 0.0  ;;  %v5048_v39 = vmul.f32 %v2711_v57, %v2711_v57  ;;  %v8691_v63 = vpop.f32.mrf.mxu3  ;;  %v1614_v57 = vpack.c.bf16 %v1220_v21, %v1219_v15  ;;  %v1028_v15 = vmul.f32 %v8251_v59, %v578_v8  ;;  %v322_v8 = vld [vmem:[%s6743_s29 + $0x368] sm:$0xff] }
 0x361   : > { %v4236_v11 = vadd.f32 %v4235_v41, %v4234_v40  ;;  %12734 = vst [vmem:[#allocation84_spill] sm:$0xff] %v8683_v13  ;;  %6512 = vmatmul.msk.bf16.gmra.mxu1 %vm1800_vm2, %v1658_v33 }
 0x362   : > { %v5584_v62 = vsel %vm3609_vm3, %v5048_v39, 0.0  ;;  %3872 = vst.msk [vmem:[%s6817_s8 + $0x830] sm:$0xff] %vm3609_vm3, %v8683_v13 }
 0x363   : > { %12735 = vst [vmem:[#allocation85_spill] sm:$0xff] %v8691_v63  ;;  %v5585_v40 = vadd.f32 %v5584_v62, %v5583_v44  ;;  %v944_v44 = vmul.f32 %v8251_v59, %v494_v17  ;;  %v1027_v62 = vmul.f32 %v8251_v59, %v577_v31  ;;  %v1393_v17 = vadd.f32 %v8214_v42, %v943_v58  ;;  %v409_v58 = vld [vmem:[%s6743_s29 + $0x620] sm:$0xff] }
 0x364   : > { %3956 = vst.msk [vmem:[%s6817_s8 + $0xad0] sm:$0xff] %vm3609_vm3, %v8691_v63 }
 0x365   : > { %v8702_v41 = vpop.f32.mrf.mxu1  ;;  %v1394_v63 = vadd.f32 %v8214_v42, %v944_v44  ;;  %v1477_v44 = vadd.f32 %v8214_v42, %v1027_v62 }
 0x366   : > { %12736 = vst [vmem:[#allocation86_spill] sm:$0xff] %v8702_v41 }
 0x367   : > { %v2714_v5 = vpop.f32.mrf.mxu0  ;;  %3789 = vst.msk [vmem:[%s6817_s8 + $0x598] sm:$0xff] %vm3609_vm3, %v8702_v41  ;;  %v8713_v0 = vpop.f32.mrf.mxu2  ;;  %v410_v41 = vld [vmem:[%s6743_s29 + $0x628] sm:$0xff] }
 0x368   : > { %3700 = vst.msk [vmem:[%s6817_s8 + $0x2d0] sm:$0xff] %vm3609_vm3, %v2714_v5  ;;  %v4237_v39 = vsel %vm3609_vm3, %v2714_v5, 0.0  ;;  %v5049_v33 = vmul.f32 %v2714_v5, %v2714_v5  ;;  %v321_v5 = vld [vmem:[%s6743_s29 + $0x360] sm:$0xff]  ;;  %v8723_v31 = vpop.f32.mrf.mxu3 }
 0x369   : > { %v4238_v21 = vadd.f32 %v4237_v39, %v4236_v11  ;;  %12737 = vst [vmem:[#allocation87_spill] sm:$0xff] %v8713_v0  ;;  %v1701_v39 = vpack.c.bf16 %v1394_v63, %v1393_v17  ;;  %v771_v22 = vmul.f32 %v8251_v59, %v321_v5 }
 0x36a   : > { %v5586_v13 = vsel %vm3609_vm3, %v5049_v33, 0.0  ;;  %6468 = vmatmul.msk.bf16.gmra.mxu0 %vm1800_vm2, %v1614_v57  ;;  %3873 = vst.msk [vmem:[%s6817_s8 + $0x838] sm:$0xff] %vm3609_vm3, %v8713_v0  ;;  %v1478_v33 = vadd.f32 %v8214_v42, %v1028_v15  ;;  %v859_v57 = vmul.f32 %v8251_v59, %v409_v58  ;;  %v860_v0 = vmul.f32 %v8251_v59, %v410_v41 }
 0x36b   : > { %12738 = vst [vmem:[#allocation88_spill] sm:$0xff] %v8723_v31  ;;  %v5587_v11 = vadd.f32 %v5586_v13, %v5585_v40  ;;  %v772_v13 = vmul.f32 %v8251_v59, %v322_v8  ;;  %v1221_v58 = vadd.f32 %v8214_v42, %v771_v22 }
 0x36c   : > { %3957 = vst.msk [vmem:[%s6817_s8 + $0xad8] sm:$0xff] %vm3609_vm3, %v8723_v31  ;;  %6555 = vmatmul.msk.bf16.gmra.mxu2 %vm1800_vm2, %v1701_v39  ;;  %v1743_v40 = vpack.c.bf16 %v1478_v33, %v1477_v44  ;;  %v1309_v63 = vadd.f32 %v8214_v42, %v859_v57  ;;  %v1310_v62 = vadd.f32 %v8214_v42, %v860_v0  ;;  %v495_v57 = vld [vmem:[%s6743_s29 + $0x8d0] sm:$0xff] }
 0x36d   : > { %v1222_v44 = vadd.f32 %v8214_v42, %v772_v13  ;;  %v945_v22 = vmul.f32 %v8251_v59, %v495_v57 }
 0x36e   : > { %v8739_v31 = vpop.f32.mrf.mxu1  ;;  %6597 = vmatmul.msk.bf16.gmra.mxu3 %vm1800_vm2, %v1743_v40  ;;  %v1659_v39 = vpack.c.bf16 %v1310_v62, %v1309_v63  ;;  %v496_v40 = vld [vmem:[%s6743_s29 + $0x8d8] sm:$0xff]  ;;  %v579_v63 = vld [vmem:[%s6743_s29 + $0xb70] sm:$0xff] }
 0x36f   : > { %v2716_v17 = vpop.f32.mrf.mxu0  ;;  %12739 = vst [vmem:[#allocation89_spill] sm:$0xff] %v8739_v31  ;;  %v8749_v8 = vpop.f32.mrf.mxu2  ;;  %v946_v13 = vmul.f32 %v8251_v59, %v496_v40  ;;  %v580_v62 = vld [vmem:[%s6743_s29 + $0xb78] sm:$0xff]  ;;  %v1395_v40 = vadd.f32 %v8214_v42, %v945_v22 }
 0x370   : > { %3701 = vst.msk [vmem:[%s6817_s8 + $0x2d8] sm:$0xff] %vm3609_vm3, %v2716_v17  ;;  %v4239_v41 = vsel %vm3609_vm3, %v2716_v17, 0.0  ;;  %v5050_v15 = vmul.f32 %v2716_v17, %v2716_v17  ;;  %v1615_v17 = vpack.c.bf16 %v1222_v44, %v1221_v58  ;;  %v1030_v58 = vmul.f32 %v8251_v59, %v580_v62 }
 0x371   : > { %v4240_v5 = vadd.f32 %v4239_v41, %v4238_v21  ;;  %3790 = vst.msk [vmem:[%s6817_s8 + $0x5a0] sm:$0xff] %vm3609_vm3, %v8739_v31  ;;  %v8757_v33 = vpop.f32.mrf.mxu3  ;;  %6513 = vmatmul.msk.bf16.gmra.mxu1 %vm1800_vm2, %v1659_v39 }
 0x372   : > { %12740 = vst [vmem:[#allocation90_spill] sm:$0xff] %v8749_v8  ;;  %v5588_v0 = vsel %vm3609_vm3, %v5050_v15, 0.0 }
 0x373   : > { %3874 = vst.msk [vmem:[%s6817_s8 + $0x840] sm:$0xff] %vm3609_vm3, %v8749_v8  ;;  %v5589_v21 = vadd.f32 %v5588_v0, %v5587_v11  ;;  %v1029_v11 = vmul.f32 %v8251_v59, %v579_v63  ;;  %v1396_v63 = vadd.f32 %v8214_v42, %v946_v13  ;;  %v323_v8 = vld [vmem:[%s6743_s29 + $0x370] sm:$0xff] }
 0x374   : > { %12741 = vst [vmem:[#allocation91_spill] sm:$0xff] %v8757_v33  ;;  %v411_v13 = vld [vmem:[%s6743_s29 + $0x630] sm:$0xff] }
 0x375   : > { %3958 = vst.msk [vmem:[%s6817_s8 + $0xae0] sm:$0xff] %vm3609_vm3, %v8757_v33  ;;  %v1702_v22 = vpack.c.bf16 %v1396_v63, %v1395_v40 }
 0x376   : > { %v8769_v15 = vpop.f32.mrf.mxu1 }
 0x377   : > { %v2719_v41 = vpop.f32.mrf.mxu0  ;;  %12742 = vst [vmem:[#allocation92_spill] sm:$0xff] %v8769_v15  ;;  %v8779_v57 = vpop.f32.mrf.mxu2 }
 0x378   : > { %3702 = vst.msk [vmem:[%s6817_s8 + $0x2e0] sm:$0xff] %vm3609_vm3, %v2719_v41  ;;  %v4241_v39 = vsel %vm3609_vm3, %v2719_v41, 0.0  ;;  %v5051_v0 = vmul.f32 %v2719_v41, %v2719_v41 }
 0x379   : > { %v4242_v44 = vadd.f32 %v4241_v39, %v4240_v5  ;;  %3791 = vst.msk [vmem:[%s6817_s8 + $0x5a8] sm:$0xff] %vm3609_vm3, %v8769_v15  ;;  %v8789_v62 = vpop.f32.mrf.mxu3  ;;  %v1479_v5 = vadd.f32 %v8214_v42, %v1029_v11  ;;  %v324_v39 = vld [vmem:[%s6743_s29 + $0x378] sm:$0xff] }
 0x37a   : > { %12743 = vst [vmem:[#allocation93_spill] sm:$0xff] %v8779_v57  ;;  %v5590_v33 = vsel %vm3609_vm3, %v5051_v0, 0.0  ;;  %6469 = vmatmul.msk.bf16.gmra.mxu0 %vm1800_vm2, %v1615_v17  ;;  %v412_v15 = vld [vmem:[%s6743_s29 + $0x638] sm:$0xff]  ;;  %v8801_v17 = vld [vmem:[%s12276_s1 + $0x1] ss:$0 sm:$0xff] }
 0x37b   : > { %3875 = vst.msk [vmem:[%s6817_s8 + $0x848] sm:$0xff] %vm3609_vm3, %v8779_v57  ;;  %v5591_v41 = vadd.f32 %v5590_v33, %v5589_v21  ;;  %v1480_v0 = vadd.f32 %v8801_v17, %v1030_v58  ;;  %v861_v57 = vmul.f32 %v8251_v59, %v411_v13  ;;  %v862_v42 = vmul.f32 %v8251_v59, %v412_v15 }
 0x37c   : > { %12744 = vst [vmem:[#allocation94_spill] sm:$0xff] %v8789_v62  ;;  %v773_v33 = vmul.f32 %v8251_v59, %v323_v8  ;;  %v774_v21 = vmul.f32 %v8251_v59, %v324_v39  ;;  %6556 = vmatmul.msk.bf16.gmra.mxu2 %vm1800_vm2, %v1702_v22 }
 0x37d   : > { %3959 = vst.msk [vmem:[%s6817_s8 + $0xae8] sm:$0xff] %vm3609_vm3, %v8789_v62  ;;  %v1744_v11 = vpack.c.bf16 %v1480_v0, %v1479_v5  ;;  %v1311_v40 = vadd.f32 %v8801_v17, %v861_v57  ;;  %v1312_v63 = vadd.f32 %v8801_v17, %v862_v42  ;;  %v498_v42 = vld [vmem:[%s6743_s29 + $0x8e8] sm:$0xff] }
 0x37e   : > { %v8811_v58 = vpop.f32.mrf.mxu1  ;;  %v1223_v22 = vadd.f32 %v8801_v17, %v773_v33  ;;  %v1224_v13 = vadd.f32 %v8801_v17, %v774_v21  ;;  %v8840_v33 = vld [vmem:[%s12276_s1] ss:$0 sm:$0xff] }
 0x37f   : > { %v2721_v62 = vpop.f32.mrf.mxu0  ;;  %12745 = vst [vmem:[#allocation95_spill] sm:$0xff] %v8811_v58  ;;  %6598 = vmatmul.msk.bf16.gmra.mxu3 %vm1800_vm2, %v1744_v11  ;;  %v1660_v59 = vpack.c.bf16 %v1312_v63, %v1311_v40  ;;  %v8820_v57 = vpop.f32.mrf.mxu2  ;;  %v581_v11 = vld [vmem:[%s6743_s29 + $0xb80] sm:$0xff]  ;;  %v948_v63 = vmul.f32 %v8840_v33, %v498_v42 }
 0x380   : > { %3703 = vst.msk [vmem:[%s6817_s8 + $0x2e8] sm:$0xff] %vm3609_vm3, %v2721_v62  ;;  %v4243_v15 = vsel %vm3609_vm3, %v2721_v62, 0.0  ;;  %v5052_v8 = vmul.f32 %v2721_v62, %v2721_v62  ;;  %v1616_v40 = vpack.c.bf16 %v1224_v13, %v1223_v22 }
 0x381   : > { %v4244_v5 = vadd.f32 %v4243_v15, %v4242_v44  ;;  %3792 = vst.msk [vmem:[%s6817_s8 + $0x5b0] sm:$0xff] %vm3609_vm3, %v8811_v58  ;;  %v8828_v62 = vpop.f32.mrf.mxu3  ;;  %6514 = vmatmul.msk.bf16.gmra.mxu1 %vm1800_vm2, %v1660_v59  ;;  %v497_v44 = vld [vmem:[%s6743_s29 + $0x8e0] sm:$0xff]  ;;  %v1031_v59 = vmul.f32 %v8840_v33, %v581_v11  ;;  %v1398_v11 = vadd.f32 %v8801_v17, %v948_v63 }
 0x382   : > { %12746 = vst [vmem:[#allocation96_spill] sm:$0xff] %v8820_v57  ;;  %v5592_v39 = vsel %vm3609_vm3, %v5052_v8, 0.0  ;;  %v947_v21 = vmul.f32 %v8840_v33, %v497_v44 }
 0x383   : > { %3876 = vst.msk [vmem:[%s6817_s8 + $0x850] sm:$0xff] %vm3609_vm3, %v8820_v57  ;;  %v5593_v0 = vadd.f32 %v5592_v39, %v5591_v41  ;;  %v582_v41 = vld [vmem:[%s6743_s29 + $0xb88] sm:$0xff] }
 0x384   : > { %12747 = vst [vmem:[#allocation97_spill] sm:$0xff] %v8828_v62  ;;  %v1032_v13 = vmul.f32 %v8840_v33, %v582_v41 }
 0x385   : > { %3960 = vst.msk [vmem:[%s6817_s8 + $0xaf0] sm:$0xff] %vm3609_vm3, %v8828_v62  ;;  %v1397_v62 = vadd.f32 %v8801_v17, %v947_v21  ;;  %v413_v21 = vld [vmem:[%s6743_s29 + $0x640] sm:$0xff] }
 0x386   : > { %v8845_v8 = vpop.f32.mrf.mxu1  ;;  %v1482_v63 = vadd.f32 %v8801_v17, %v1032_v13 }
 0x387   : > { %v2724_v15 = vpop.f32.mrf.mxu0  ;;  %12748 = vst [vmem:[#allocation98_spill] sm:$0xff] %v8845_v8  ;;  %v8855_v42 = vpop.f32.mrf.mxu2 }
 0x388   : > { %3704 = vst.msk [vmem:[%s6817_s8 + $0x2f0] sm:$0xff] %vm3609_vm3, %v2724_v15  ;;  %v4245_v39 = vsel %vm3609_vm3, %v2724_v15, 0.0  ;;  %v5053_v22 = vmul.f32 %v2724_v15, %v2724_v15 }
 0x389   : > { %v4246_v44 = vadd.f32 %v4245_v39, %v4244_v5  ;;  %3793 = vst.msk [vmem:[%s6817_s8 + $0x5b8] sm:$0xff] %vm3609_vm3, %v8845_v8  ;;  %v8864_v15 = vpop.f32.mrf.mxu3  ;;  %v1481_v5 = vadd.f32 %v8801_v17, %v1031_v59  ;;  %v1703_v39 = vpack.c.bf16 %v1398_v11, %v1397_v62  ;;  %v414_v8 = vld [vmem:[%s6743_s29 + $0x648] sm:$0xff] }
 0x38a   : > { %12749 = vst [vmem:[#allocation99_spill] sm:$0xff] %v8855_v42  ;;  %v5594_v57 = vsel %vm3609_vm3, %v5053_v22, 0.0  ;;  %6470 = vmatmul.msk.bf16.gmra.mxu0 %vm1800_vm2, %v1616_v40  ;;  %v863_v40 = vmul.f32 %v8840_v33, %v413_v21  ;;  %v864_v22 = vmul.f32 %v8840_v33, %v414_v8 }
 0x38b   : > { %3877 = vst.msk [vmem:[%s6817_s8 + $0x858] sm:$0xff] %vm3609_vm3, %v8855_v42  ;;  %v5595_v41 = vadd.f32 %v5594_v57, %v5593_v0  ;;  %v1745_v42 = vpack.c.bf16 %v1482_v63, %v1481_v5 }
 0x38c   : > { %12750 = vst [vmem:[#allocation100_spill] sm:$0xff] %v8864_v15  ;;  %6557 = vmatmul.msk.bf16.gmra.mxu2 %vm1800_vm2, %v1703_v39  ;;  %v1313_v59 = vadd.f32 %v8801_v17, %v863_v40  ;;  %v1314_v57 = vadd.f32 %v8801_v17, %v864_v22  ;;  %v583_v22 = vld [vmem:[%s6743_s29 + $0xb90] sm:$0xff] }
 0x38d   : > { %3961 = vst.msk [vmem:[%s6817_s8 + $0xaf8] sm:$0xff] %vm3609_vm3, %v8864_v15 }
 0x38e   : > { %v8878_v62 = vpop.f32.mrf.mxu1  ;;  %v1661_v11 = vpack.c.bf16 %v1314_v57, %v1313_v59 }
 0x38f   : > { %v2726_v0 = vpop.f32.mrf.mxu0  ;;  %12751 = vst [vmem:[#allocation101_spill] sm:$0xff] %v8878_v62  ;;  %6599 = vmatmul.msk.bf16.gmra.mxu3 %vm1800_vm2, %v1745_v42  ;;  %v8887_v39 = vpop.f32.mrf.mxu2  ;;  %v500_v42 = vld [vmem:[%s6743_s29 + $0x8f8] sm:$0xff] }
 0x390   : > { %3705 = vst.msk [vmem:[%s6817_s8 + $0x2f8] sm:$0xff] %vm3609_vm3, %v2726_v0  ;;  %v4247_v13 = vsel %vm3609_vm3, %v2726_v0, 0.0  ;;  %v5054_v8 = vmul.f32 %v2726_v0, %v2726_v0  ;;  %v950_v57 = vmul.f32 %v8840_v33, %v500_v42  ;;  %v584_v0 = vld [vmem:[%s6743_s29 + $0xb98] sm:$0xff] }
 0x391   : > { %v4248_v5 = vadd.f32 %v4247_v13, %v4246_v44  ;;  %3794 = vst.msk [vmem:[%s6817_s8 + $0x5c0] sm:$0xff] %vm3609_vm3, %v8878_v62  ;;  %v8893_v63 = vpop.f32.mrf.mxu3  ;;  %6515 = vmatmul.msk.bf16.gmra.mxu1 %vm1800_vm2, %v1661_v11  ;;  %v499_v44 = vld [vmem:[%s6743_s29 + $0x8f0] sm:$0xff] }
 0x392   : > { %12752 = vst [vmem:[#allocation102_spill] sm:$0xff] %v8887_v39  ;;  %v5596_v21 = vsel %vm3609_vm3, %v5054_v8, 0.0  ;;  %v949_v59 = vmul.f32 %v8840_v33, %v499_v44 }
 0x393   : > { %3878 = vst.msk [vmem:[%s6817_s8 + $0x860] sm:$0xff] %vm3609_vm3, %v8887_v39  ;;  %v5597_v40 = vadd.f32 %v5596_v21, %v5595_v41  ;;  %v1033_v41 = vmul.f32 %v8840_v33, %v583_v22  ;;  %v1400_v39 = vadd.f32 %v8801_v17, %v950_v57 }
 0x394   : > { %12753 = vst [vmem:[#allocation103_spill] sm:$0xff] %v8893_v63  ;;  %v1399_v15 = vadd.f32 %v8801_v17, %v949_v59 }
 0x395   : > { %3962 = vst.msk [vmem:[%s6817_s8 + $0xb00] sm:$0xff] %vm3609_vm3, %v8893_v63  ;;  %v1034_v63 = vmul.f32 %v8840_v33, %v584_v0  ;;  %v1483_v0 = vadd.f32 %v8801_v17, %v1033_v41 }
 0x396   : > { %v8905_v8 = vpop.f32.mrf.mxu1 }
 0x397   : > { %v2729_v13 = vpop.f32.mrf.mxu0  ;;  %12754 = vst [vmem:[#allocation104_spill] sm:$0xff] %v8905_v8  ;;  %v8915_v42 = vpop.f32.mrf.mxu2  ;;  %v1484_v59 = vadd.f32 %v8801_v17, %v1034_v63 }
 0x398   : > { %3706 = vst.msk [vmem:[%s6817_s8 + $0x300] sm:$0xff] %vm3609_vm3, %v2729_v13  ;;  %v4249_v11 = vsel %vm3609_vm3, %v2729_v13, 0.0  ;;  %v5055_v21 = vmul.f32 %v2729_v13, %v2729_v13  ;;  %v1704_v13 = vpack.c.bf16 %v1400_v39, %v1399_v15 }
 0x399   : > { %v4250_v44 = vadd.f32 %v4249_v11, %v4248_v5  ;;  %3795 = vst.msk [vmem:[%s6817_s8 + $0x5c8] sm:$0xff] %vm3609_vm3, %v8905_v8  ;;  %v8923_v62 = vpop.f32.mrf.mxu3  ;;  %v415_v11 = vld [vmem:[%s6743_s29 + $0x650] sm:$0xff]  ;;  %v416_v8 = vld [vmem:[%s6743_s29 + $0x658] sm:$0xff] }
 0x39a   : > { %12755 = vst [vmem:[#allocation105_spill] sm:$0xff] %v8915_v42  ;;  %v5598_v22 = vsel %vm3609_vm3, %v5055_v21, 0.0  ;;  %v865_v57 = vmul.f32 %v8840_v33, %v415_v11  ;;  %v866_v21 = vmul.f32 %v8840_v33, %v416_v8 }
 0x39b   : > { %3879 = vst.msk [vmem:[%s6817_s8 + $0x868] sm:$0xff] %vm3609_vm3, %v8915_v42  ;;  %v5599_v5 = vadd.f32 %v5598_v22, %v5597_v40  ;;  %v1746_v42 = vpack.c.bf16 %v1484_v59, %v1483_v0 }
 0x39c   : > { %12756 = vst [vmem:[#allocation106_spill] sm:$0xff] %v8923_v62  ;;  %6558 = vmatmul.msk.bf16.gmra.mxu2 %vm1800_vm2, %v1704_v13  ;;  %v1315_v41 = vadd.f32 %v8801_v17, %v865_v57  ;;  %v1316_v40 = vadd.f32 %v8801_v17, %v866_v21  ;;  %v585_v21 = vld [vmem:[%s6743_s29 + $0xba0] sm:$0xff] }
 0x39d   : > { %3963 = vst.msk [vmem:[%s6817_s8 + $0xb08] sm:$0xff] %vm3609_vm3, %v8923_v62 }
 0x39e   : > { %v8941_v63 = vpop.f32.mrf.mxu1  ;;  %v1662_v8 = vpack.c.bf16 %v1316_v40, %v1315_v41 }
 0x39f   : > { %v2731_v22 = vpop.f32.mrf.mxu0  ;;  %6600 = vmatmul.msk.bf16.gmra.mxu3 %vm1800_vm2, %v1746_v42  ;;  %12757 = vst [vmem:[#allocation107_spill] sm:$0xff] %v8941_v63  ;;  %v8946_v13 = vpop.f32.mrf.mxu2  ;;  %v502_v42 = vld [vmem:[%s6743_s29 + $0x908] sm:$0xff] }
 0x3a0   : > { %3707 = vst.msk [vmem:[%s6817_s8 + $0x308] sm:$0xff] %vm3609_vm3, %v2731_v22  ;;  %v4251_v15 = vsel %vm3609_vm3, %v2731_v22, 0.0  ;;  %v5056_v39 = vmul.f32 %v2731_v22, %v2731_v22  ;;  %v952_v40 = vmul.f32 %v8840_v33, %v502_v42  ;;  %v586_v22 = vld [vmem:[%s6743_s29 + $0xba8] sm:$0xff] }
 0x3a1   : > { %v4252_v0 = vadd.f32 %v4251_v15, %v4250_v44  ;;  %3796 = vst.msk [vmem:[%s6817_s8 + $0x5d0] sm:$0xff] %vm3609_vm3, %v8941_v63  ;;  %v8952_v57 = vpop.f32.mrf.mxu3  ;;  %6516 = vmatmul.msk.bf16.gmra.mxu1 %vm1800_vm2, %v1662_v8  ;;  %v501_v44 = vld [vmem:[%s6743_s29 + $0x900] sm:$0xff] }
 0x3a2   : > { %12758 = vst [vmem:[#allocation108_spill] sm:$0xff] %v8946_v13  ;;  %v5600_v11 = vsel %vm3609_vm3, %v5056_v39, 0.0  ;;  %v951_v41 = vmul.f32 %v8840_v33, %v501_v44  ;;  %v1036_v39 = vmul.f32 %v8840_v33, %v586_v22  ;;  %v1402_v42 = vadd.f32 %v8801_v17, %v952_v40  ;;  %v418_v40 = vld [vmem:[%s6743_s29 + $0x668] sm:$0xff] }
 0x3a3   : > { %3880 = vst.msk [vmem:[%s6817_s8 + $0x870] sm:$0xff] %vm3609_vm3, %v8946_v13  ;;  %v5601_v59 = vadd.f32 %v5600_v11, %v5599_v5  ;;  %v1035_v5 = vmul.f32 %v8840_v33, %v585_v21 }
 0x3a4   : > { %12759 = vst [vmem:[#allocation109_spill] sm:$0xff] %v8952_v57  ;;  %v1401_v44 = vadd.f32 %v8801_v17, %v951_v41  ;;  %v1486_v41 = vadd.f32 %v8801_v17, %v1036_v39 }
 0x3a5   : > { %3964 = vst.msk [vmem:[%s6817_s8 + $0xb10] sm:$0xff] %vm3609_vm3, %v8952_v57  ;;  %v1485_v22 = vadd.f32 %v8801_v17, %v1035_v5 }
 0x3a6   : > { %v8969_v57 = vpop.f32.mrf.mxu1 }
 0x3a7   : > { %v2734_v15 = vpop.f32.mrf.mxu0  ;;  %12760 = vst [vmem:[#allocation110_spill] sm:$0xff] %v8969_v57  ;;  %v8976_v21 = vpop.f32.mrf.mxu2 }
 0x3a8   : > { %3708 = vst.msk [vmem:[%s6817_s8 + $0x310] sm:$0xff] %vm3609_vm3, %v2734_v15  ;;  %v4253_v8 = vsel %vm3609_vm3, %v2734_v15, 0.0  ;;  %v5057_v11 = vmul.f32 %v2734_v15, %v2734_v15  ;;  %v1705_v15 = vpack.c.bf16 %v1402_v42, %v1401_v44 }
 0x3a9   : > { %v4254_v62 = vadd.f32 %v4253_v8, %v4252_v0  ;;  %3797 = vst.msk [vmem:[%s6817_s8 + $0x5d8] sm:$0xff] %vm3609_vm3, %v8969_v57  ;;  %v8983_v58 = vpop.f32.mrf.mxu3  ;;  %v417_v0 = vld [vmem:[%s6743_s29 + $0x660] sm:$0xff]  ;;  %v1747_v8 = vpack.c.bf16 %v1486_v41, %v1485_v22 }
 0x3aa   : > { %12761 = vst [vmem:[#allocation111_spill] sm:$0xff] %v8976_v21  ;;  %v5602_v13 = vsel %vm3609_vm3, %v5057_v11, 0.0  ;;  %v867_v5 = vmul.f32 %v8840_v33, %v417_v0  ;;  %v868_v11 = vmul.f32 %v8840_v33, %v418_v40 }
 0x3ab   : > { %3881 = vst.msk [vmem:[%s6817_s8 + $0x878] sm:$0xff] %vm3609_vm3, %v8976_v21  ;;  %v5603_v63 = vadd.f32 %v5602_v13, %v5601_v59 }
 0x3ac   : > { %12762 = vst [vmem:[#allocation112_spill] sm:$0xff] %v8983_v58  ;;  %6559 = vmatmul.msk.bf16.gmra.mxu2 %vm1800_vm2, %v1705_v15  ;;  %v1317_v13 = vadd.f32 %v8801_v17, %v867_v5  ;;  %v1318_v39 = vadd.f32 %v8801_v17, %v868_v11 }
 0x3ad   : > { %3965 = vst.msk [vmem:[%s6817_s8 + $0xb18] sm:$0xff] %vm3609_vm3, %v8983_v58 }
 0x3ae   : > { %v9000_v22 = vpop.f32.mrf.mxu1  ;;  %v1663_v0 = vpack.c.bf16 %v1318_v39, %v1317_v13 }
 0x3af   : > { %v2736_v59 = vpop.f32.mrf.mxu0  ;;  %6601 = vmatmul.msk.bf16.gmra.mxu3 %vm1800_vm2, %v1747_v8  ;;  %12763 = vst [vmem:[#allocation113_spill] sm:$0xff] %v9000_v22  ;;  %v9005_v41 = vpop.f32.mrf.mxu2  ;;  %v504_v8 = vld [vmem:[%s6743_s29 + $0x918] sm:$0xff] }
 0x3b0   : > { %3709 = vst.msk [vmem:[%s6817_s8 + $0x318] sm:$0xff] %vm3609_vm3, %v2736_v59  ;;  %v4255_v44 = vsel %vm3609_vm3, %v2736_v59, 0.0  ;;  %v5058_v42 = vmul.f32 %v2736_v59, %v2736_v59  ;;  %v587_v59 = vld [vmem:[%s6743_s29 + $0xbb0] sm:$0xff]  ;;  %v954_v39 = vmul.f32 %v8840_v33, %v504_v8 }
 0x3b1   : > { %v4256_v15 = vadd.f32 %v4255_v44, %v4254_v62  ;;  %3798 = vst.msk [vmem:[%s6817_s8 + $0x5e0] sm:$0xff] %vm3609_vm3, %v9000_v22  ;;  %v9011_v11 = vpop.f32.mrf.mxu3  ;;  %6517 = vmatmul.msk.bf16.gmra.mxu1 %vm1800_vm2, %v1663_v0  ;;  %v503_v62 = vld [vmem:[%s6743_s29 + $0x910] sm:$0xff]  ;;  %v588_v44 = vld [vmem:[%s6743_s29 + $0xbb8] sm:$0xff] }
 0x3b2   : > { %12764 = vst [vmem:[#allocation114_spill] sm:$0xff] %v9005_v41  ;;  %v5604_v40 = vsel %vm3609_vm3, %v5058_v42, 0.0  ;;  %v953_v13 = vmul.f32 %v8840_v33, %v503_v62  ;;  %v1404_v8 = vadd.f32 %v8801_v17, %v954_v39  ;;  %v419_v39 = vld [vmem:[%s6743_s29 + $0x670] sm:$0xff] }
 0x3b3   : > { %3882 = vst.msk [vmem:[%s6817_s8 + $0x880] sm:$0xff] %vm3609_vm3, %v9005_v41  ;;  %v5605_v5 = vadd.f32 %v5604_v40, %v5603_v63  ;;  %v1037_v63 = vmul.f32 %v8840_v33, %v587_v59  ;;  %v1038_v40 = vmul.f32 %v8840_v33, %v588_v44 }
 0x3b4   : > { %12765 = vst [vmem:[#allocation115_spill] sm:$0xff] %v9011_v11  ;;  %v1403_v62 = vadd.f32 %v8801_v17, %v953_v13 }
 0x3b5   : > { %3966 = vst.msk [vmem:[%s6817_s8 + $0xb20] sm:$0xff] %vm3609_vm3, %v9011_v11  ;;  %v1487_v44 = vadd.f32 %v8801_v17, %v1037_v63 }
 0x3b6   : > { %v9028_v58 = vpop.f32.mrf.mxu1 }
 0x3b7   : > { %v2739_v42 = vpop.f32.mrf.mxu0  ;;  %12766 = vst [vmem:[#allocation116_spill] sm:$0xff] %v9028_v58  ;;  %v9037_v59 = vpop.f32.mrf.mxu2 }
 0x3b8   : > { %3710 = vst.msk [vmem:[%s6817_s8 + $0x320] sm:$0xff] %vm3609_vm3, %v2739_v42  ;;  %v4257_v0 = vsel %vm3609_vm3, %v2739_v42, 0.0  ;;  %v5059_v11 = vmul.f32 %v2739_v42, %v2739_v42  ;;  %v1706_v42 = vpack.c.bf16 %v1404_v8, %v1403_v62 }
 0x3b9   : > { %v9032_v41 = vadd.f32 %v4257_v0, %v4256_v15  ;;  %3799 = vst.msk [vmem:[%s6817_s8 + $0x5e8] sm:$0xff] %vm3609_vm3, %v9028_v58  ;;  %v9046_v13 = vpop.f32.mrf.mxu3  ;;  %v1488_v15 = vadd.f32 %v8801_v17, %v1038_v40  ;;  %v420_v0 = vld [vmem:[%s6743_s29 + $0x678] sm:$0xff] }
 0x3ba   : > { %12767 = vst [vmem:[#allocation117_spill] sm:$0xff] %v9037_v59  ;;  %v5606_v21 = vsel %vm3609_vm3, %v5059_v11, 0.0  ;;  %v869_v11 = vmul.f32 %v8840_v33, %v419_v39  ;;  %v870_v62 = vmul.f32 %v8840_v33, %v420_v0  ;;  %v505_v39 = vld [vmem:[%s6743_s29 + $0x920] sm:$0xff]  ;;  %v506_v0 = vld [vmem:[%s6743_s29 + $0x928] sm:$0xff] }
 0x3bb   : > { %3883 = vst.msk [vmem:[%s6817_s8 + $0x888] sm:$0xff] %vm3609_vm3, %v9037_v59  ;;  %v9044_v22 = vadd.f32 %v5606_v21, %v5605_v5  ;;  %v1748_v63 = vpack.c.bf16 %v1488_v15, %v1487_v44 }
 0x3bc   : > { %12768 = vst [vmem:[#allocation118_spill] sm:$0xff] %v9046_v13  ;;  %6560 = vmatmul.msk.bf16.gmra.mxu2 %vm1800_vm2, %v1706_v42  ;;  %v1319_v21 = vadd.f32 %v8801_v17, %v869_v11  ;;  %v1320_v40 = vadd.f32 %v8801_v17, %v870_v62  ;;  %v589_v11 = vld [vmem:[%s6743_s29 + $0xbc0] sm:$0xff]  ;;  %v956_v62 = vmul.f32 %v8840_v33, %v506_v0 }
 0x3bd   : > { %3967 = vst.msk [vmem:[%s6817_s8 + $0xb28] sm:$0xff] %vm3609_vm3, %v9046_v13  ;;  %v1039_v13 = vmul.f32 %v8840_v33, %v589_v11 }
 0x3be   : > { %v9065_v8 = vpop.f32.mrf.mxu1  ;;  %v1664_v42 = vpack.c.bf16 %v1320_v40, %v1319_v21  ;;  %v590_v21 = vld [vmem:[%s6743_s29 + $0xbc8] sm:$0xff] }
 0x3bf   : > { %v9058_v5 = vpop.f32.mrf.mxu0  ;;  %6602 = vmatmul.msk.bf16.gmra.mxu3 %vm1800_vm2, %v1748_v63  ;;  %12769 = vst [vmem:[#allocation119_spill] sm:$0xff] %v9065_v8  ;;  %v9070_v44 = vpop.f32.mrf.mxu2  ;;  %v955_v63 = vmul.f32 %v8840_v33, %v505_v39  ;;  %v1406_v39 = vadd.f32 %v8801_v17, %v956_v62  ;;  %v1489_v59 = vadd.f32 %v8801_v17, %v1039_v13  ;;  %v422_v62 = vld [vmem:[%s6743_s29 + $0x688] sm:$0xff] }
 0x3c0   : > { %3711 = vst.msk [vmem:[%s6817_s8 + $0x328] sm:$0xff] %vm3609_vm3, %v9058_v5  ;;  %v872_v13 = vmul.f32 %v8840_v33, %v422_v62  ;;  %v591_v62 = vld [vmem:[%s6743_s29 + $0xbd0] sm:$0xff] }
 0x3c1   : > { %3800 = vst.msk [vmem:[%s6817_s8 + $0x5f0] sm:$0xff] %vm3609_vm3, %v9065_v8  ;;  %v9075_v15 = vpop.f32.mrf.mxu3  ;;  %6518 = vmatmul.msk.bf16.gmra.mxu1 %vm1800_vm2, %v1664_v42  ;;  %v1040_v42 = vmul.f32 %v8840_v33, %v590_v21 }
 0x3c2   : > { %12770 = vst [vmem:[#allocation120_spill] sm:$0xff] %v9070_v44 }
 0x3c3   : > { %3884 = vst.msk [vmem:[%s6817_s8 + $0x890] sm:$0xff] %vm3609_vm3, %v9070_v44  ;;  %v1405_v44 = vadd.f32 %v8801_v17, %v955_v63  ;;  %v1490_v8 = vadd.f32 %v8801_v17, %v1040_v42  ;;  %v421_v63 = vld [vmem:[%s6743_s29 + $0x680] sm:$0xff] }
 0x3c4   : > { %12771 = vst [vmem:[#allocation121_spill] sm:$0xff] %v9075_v15 }
 0x3c5   : > { %3968 = vst.msk [vmem:[%s6817_s8 + $0xb30] sm:$0xff] %vm3609_vm3, %v9075_v15  ;;  %v1707_v11 = vpack.c.bf16 %v1406_v39, %v1405_v44  ;;  %v1749_v58 = vpack.c.bf16 %v1490_v8, %v1489_v59  ;;  %v1322_v39 = vadd.f32 %v8801_v17, %v872_v13 }
 0x3c6   : > { %v9094_v15 = vpop.f32.mrf.mxu1 }
 0x3c7   : > { %v9087_v40 = vpop.f32.mrf.mxu0  ;;  %12772 = vst [vmem:[#allocation122_spill] sm:$0xff] %v9094_v15  ;;  %v9101_v0 = vpop.f32.mrf.mxu2 }
 0x3c8   : > { %3712 = vst.msk [vmem:[%s6817_s8 + $0x330] sm:$0xff] %vm3609_vm3, %v9087_v40 }
 0x3c9   : > { %3801 = vst.msk [vmem:[%s6817_s8 + $0x5f8] sm:$0xff] %vm3609_vm3, %v9094_v15  ;;  %v9107_v21 = vpop.f32.mrf.mxu3  ;;  %v871_v15 = vmul.f32 %v8840_v33, %v421_v63  ;;  %v508_v63 = vld [vmem:[%s6743_s29 + $0x938] sm:$0xff] }
 0x3ca   : > { %12773 = vst [vmem:[#allocation123_spill] sm:$0xff] %v9101_v0 }
 0x3cb   : > { %3885 = vst.msk [vmem:[%s6817_s8 + $0x898] sm:$0xff] %vm3609_vm3, %v9101_v0  ;;  %v1321_v44 = vadd.f32 %v8801_v17, %v871_v15 }
 0x3cc   : > { %12774 = vst [vmem:[#allocation124_spill] sm:$0xff] %v9107_v21  ;;  %6561 = vmatmul.msk.bf16.gmra.mxu2 %vm1800_vm2, %v1707_v11 }
 0x3cd   : > { %3969 = vst.msk [vmem:[%s6817_s8 + $0xb38] sm:$0xff] %vm3609_vm3, %v9107_v21  ;;  %v1665_v11 = vpack.c.bf16 %v1322_v39, %v1321_v44  ;;  %v958_v21 = vmul.f32 %v8840_v33, %v508_v63  ;;  %v592_v44 = vld [vmem:[%s6743_s29 + $0xbd8] sm:$0xff] }
 0x3ce   : > { %v9126_v59 = vpop.f32.mrf.mxu1 }
 0x3cf   : > { %v9119_v42 = vpop.f32.mrf.mxu0  ;;  %6603 = vmatmul.msk.bf16.gmra.mxu3 %vm1800_vm2, %v1749_v58  ;;  %12775 = vst [vmem:[#allocation125_spill] sm:$0xff] %v9126_v59  ;;  %v9131_v8 = vpop.f32.mrf.mxu2  ;;  %v507_v58 = vld [vmem:[%s6743_s29 + $0x930] sm:$0xff] }
 0x3d0   : > { %3713 = vst.msk [vmem:[%s6817_s8 + $0x338] sm:$0xff] %vm3609_vm3, %v9119_v42  ;;  %v957_v13 = vmul.f32 %v8840_v33, %v507_v58  ;;  %v1408_v58 = vadd.f32 %v8801_v17, %v958_v21  ;;  %v424_v21 = vld [vmem:[%s6743_s29 + $0x698] sm:$0xff]  ;;  %v5062_v28 = vmul.f32 %v9119_v42, %v9119_v42  ;;  %v4263_v51 = vsel %vm3609_vm3, %v9119_v42, 0.0 }
 0x3d1   : > { %3802 = vst.msk [vmem:[%s6817_s8 + $0x600] sm:$0xff] %vm3609_vm3, %v9126_v59  ;;  %v9136_v15 = vpop.f32.mrf.mxu3  ;;  %6519 = vmatmul.msk.bf16.gmra.mxu1 %vm1800_vm2, %v1665_v11  ;;  %v1042_v11 = vmul.f32 %v8840_v33, %v592_v44  ;;  %v877_v42 = vmul.f32 %v8840_v33, %v427_v14 }
 0x3d2   : > { %12776 = vst [vmem:[#allocation126_spill] sm:$0xff] %v9131_v8  ;;  %v1407_v0 = vadd.f32 %v8801_v17, %v957_v13  ;;  %v423_v13 = vld [vmem:[%s6743_s29 + $0x690] sm:$0xff] }
 0x3d3   : > { %3886 = vst.msk [vmem:[%s6817_s8 + $0x8a0] sm:$0xff] %vm3609_vm3, %v9131_v8  ;;  %v1041_v8 = vmul.f32 %v8840_v33, %v591_v62  ;;  %v1492_v57 = vadd.f32 %v8801_v17, %v1042_v11  ;;  %v1327_v14 = vadd.f32 %v8801_v17, %v877_v42 }
 0x3d4   : > { %12777 = vst [vmem:[#allocation127_spill] sm:$0xff] %v9136_v15  ;;  %v1708_v62 = vpack.c.bf16 %v1408_v58, %v1407_v0 }
 0x3d5   : > { %3970 = vst.msk [vmem:[%s6817_s8 + $0xb40] sm:$0xff] %vm3609_vm3, %v9136_v15  ;;  %v1491_v59 = vadd.f32 %v8801_v17, %v1041_v8  ;;  %v874_v8 = vmul.f32 %v8840_v33, %v424_v21  ;;  %v593_v21 = vld [vmem:[%s6743_s29 + $0xbe0] sm:$0xff] }
 0x3d6   : > { %v9155_v15 = vpop.f32.mrf.mxu1 }
 0x3d7   : > { %v9148_v39 = vpop.f32.mrf.mxu0  ;;  %12778 = vst [vmem:[#allocation128_spill] sm:$0xff] %v9155_v15  ;;  %v9162_v63 = vpop.f32.mrf.mxu2  ;;  %v1750_v31 = vpack.c.bf16 %v1492_v57, %v1491_v59  ;;  %v1324_v58 = vadd.f32 %v8801_v17, %v874_v8 }
 0x3d8   : > { %3714 = vst.msk [vmem:[%s6817_s8 + $0x340] sm:$0xff] %vm3609_vm3, %v9148_v39 }
 0x3d9   : > { %3803 = vst.msk [vmem:[%s6817_s8 + $0x608] sm:$0xff] %vm3609_vm3, %v9155_v15  ;;  %v9168_v44 = vpop.f32.mrf.mxu3  ;;  %v873_v15 = vmul.f32 %v8840_v33, %v423_v13  ;;  %v510_v13 = vld [vmem:[%s6743_s29 + $0x948] sm:$0xff] }
 0x3da   : > { %12779 = vst [vmem:[#allocation129_spill] sm:$0xff] %v9162_v63 }
 0x3db   : > { %3887 = vst.msk [vmem:[%s6817_s8 + $0x8a8] sm:$0xff] %vm3609_vm3, %v9162_v63  ;;  %v1323_v0 = vadd.f32 %v8801_v17, %v873_v15 }
 0x3dc   : > { %12780 = vst [vmem:[#allocation130_spill] sm:$0xff] %v9168_v44  ;;  %6562 = vmatmul.msk.bf16.gmra.mxu2 %vm1800_vm2, %v1708_v62 }
 0x3dd   : > { %3971 = vst.msk [vmem:[%s6817_s8 + $0xb48] sm:$0xff] %vm3609_vm3, %v9168_v44  ;;  %v1666_v62 = vpack.c.bf16 %v1324_v58, %v1323_v0  ;;  %v960_v44 = vmul.f32 %v8840_v33, %v510_v13  ;;  %v594_v0 = vld [vmem:[%s6743_s29 + $0xbe8] sm:$0xff] }
 0x3de   : > { %v9187_v57 = vpop.f32.mrf.mxu1 }
 0x3df   : > { %v9180_v11 = vpop.f32.mrf.mxu0  ;;  %6604 = vmatmul.msk.bf16.gmra.mxu3 %vm1800_vm2, %v1750_v31  ;;  %12781 = vst [vmem:[#allocation131_spill] sm:$0xff] %v9187_v57  ;;  %v9192_v59 = vpop.f32.mrf.mxu2  ;;  %v509_v31 = vld [vmem:[%s6743_s29 + $0x940] sm:$0xff] }
 0x3e0   : > { %3715 = vst.msk [vmem:[%s6817_s8 + $0x348] sm:$0xff] %vm3609_vm3, %v9180_v11  ;;  %v959_v8 = vmul.f32 %v8840_v33, %v509_v31  ;;  %v1410_v31 = vadd.f32 %v8801_v17, %v960_v44  ;;  %v426_v44 = vld [vmem:[%s6743_s29 + $0x6a8] sm:$0xff] }
 0x3e1   : > { %3804 = vst.msk [vmem:[%s6817_s8 + $0x610] sm:$0xff] %vm3609_vm3, %v9187_v57  ;;  %v9197_v15 = vpop.f32.mrf.mxu3  ;;  %6520 = vmatmul.msk.bf16.gmra.mxu1 %vm1800_vm2, %v1666_v62  ;;  %v1044_v62 = vmul.f32 %v8840_v33, %v594_v0 }
 0x3e2   : > { %12782 = vst [vmem:[#allocation132_spill] sm:$0xff] %v9192_v59  ;;  %v1409_v63 = vadd.f32 %v8801_v17, %v959_v8  ;;  %v425_v8 = vld [vmem:[%s6743_s29 + $0x6a0] sm:$0xff] }
 0x3e3   : > { %3888 = vst.msk [vmem:[%s6817_s8 + $0x8b0] sm:$0xff] %vm3609_vm3, %v9192_v59  ;;  %v1043_v59 = vmul.f32 %v8840_v33, %v593_v21  ;;  %v1494_v36 = vadd.f32 %v8801_v17, %v1044_v62 }
 0x3e4   : > { %12783 = vst [vmem:[#allocation133_spill] sm:$0xff] %v9197_v15  ;;  %v1709_v21 = vpack.c.bf16 %v1410_v31, %v1409_v63 }
 0x3e5   : > { %3972 = vst.msk [vmem:[%s6817_s8 + $0xb50] sm:$0xff] %vm3609_vm3, %v9197_v15  ;;  %v1493_v57 = vadd.f32 %v8801_v17, %v1043_v59  ;;  %v876_v59 = vmul.f32 %v8840_v33, %v426_v44  ;;  %v512_v44 = vld [vmem:[%s6743_s29 + $0x958] sm:$0xff] }
 0x3e6   : > { %v9216_v15 = vpop.f32.mrf.mxu1 }
 0x3e7   : > { %v9209_v58 = vpop.f32.mrf.mxu0  ;;  %12784 = vst [vmem:[#allocation134_spill] sm:$0xff] %v9216_v15  ;;  %v9223_v13 = vpop.f32.mrf.mxu2  ;;  %v1751_v10 = vpack.c.bf16 %v1494_v36, %v1493_v57  ;;  %v1326_v31 = vadd.f32 %v8801_v17, %v876_v59  ;;  %v595_v59 = vld [vmem:[%s6743_s29 + $0xbf0] sm:$0xff] }
 0x3e8   : > { %3716 = vst.msk [vmem:[%s6817_s8 + $0x350] sm:$0xff] %vm3609_vm3, %v9209_v58  ;;  %v1045_v27 = vmul.f32 %v8840_v33, %v595_v59 }
 0x3e9   : > { %3805 = vst.msk [vmem:[%s6817_s8 + $0x618] sm:$0xff] %vm3609_vm3, %v9216_v15  ;;  %v9229_v0 = vpop.f32.mrf.mxu3  ;;  %v875_v15 = vmul.f32 %v8840_v33, %v425_v8  ;;  %v511_v8 = vld [vmem:[%s6743_s29 + $0x950] sm:$0xff] }
 0x3ea   : > { %12785 = vst [vmem:[#allocation135_spill] sm:$0xff] %v9223_v13 }
 0x3eb   : > { %3889 = vst.msk [vmem:[%s6817_s8 + $0x8b8] sm:$0xff] %vm3609_vm3, %v9223_v13  ;;  %v1325_v63 = vadd.f32 %v8801_v17, %v875_v15 }
 0x3ec   : > { %12786 = vst [vmem:[#allocation136_spill] sm:$0xff] %v9229_v0  ;;  %6563 = vmatmul.msk.bf16.gmra.mxu2 %vm1800_vm2, %v1709_v21 }
 0x3ed   : > { %3973 = vst.msk [vmem:[%s6817_s8 + $0xb58] sm:$0xff] %vm3609_vm3, %v9229_v0  ;;  %v1667_v15 = vpack.c.bf16 %v1326_v31, %v1325_v63  ;;  %v596_v63 = vld [vmem:[%s6743_s29 + $0xbf8] sm:$0xff]  ;;  %v4259_v31 = vsel %vm3609_vm3, %v9058_v5, 0.0 }
 0x3ee   : > { %v9248_v36 = vpop.f32.mrf.mxu1 }
 0x3ef   : > { %v9241_v62 = vpop.f32.mrf.mxu0  ;;  %6605 = vmatmul.msk.bf16.gmra.mxu3 %vm1800_vm2, %v1751_v10  ;;  %12787 = vst [vmem:[#allocation137_spill] sm:$0xff] %v9248_v36  ;;  %v9253_v57 = vpop.f32.mrf.mxu2  ;;  %v5060_v10 = vmul.f32 %v9058_v5, %v9058_v5  ;;  %v962_v5 = vmul.f32 %v8840_v33, %v512_v44 }
 0x3f0   : > { %3717 = vst.msk [vmem:[%s6817_s8 + $0x358] sm:$0xff] %vm3609_vm3, %v9241_v62 }
 0x3f1   : > { %3806 = vst.msk [vmem:[%s6817_s8 + $0x620] sm:$0xff] %vm3609_vm3, %v9248_v36  ;;  %v9258_v21 = vpop.f32.mrf.mxu3  ;;  %6521 = vmatmul.msk.bf16.gmra.mxu1 %vm1800_vm2, %v1667_v15  ;;  %v5061_v15 = vmul.f32 %v9087_v40, %v9087_v40  ;;  %v961_v36 = vmul.f32 %v8840_v33, %v511_v8  ;;  %v4260_v8 = vadd.f32 %v4259_v31, %v9032_v41 }
 0x3f2   : > { %12788 = vst [vmem:[#allocation138_spill] sm:$0xff] %v9253_v57  ;;  %v1412_v9 = vadd.f32 %v8801_v17, %v962_v5  ;;  %v1495_v41 = vadd.f32 %v8801_v17, %v1045_v27 }
 0x3f3   : > { %3890 = vst.msk [vmem:[%s6817_s8 + $0x8c0] sm:$0xff] %vm3609_vm3, %v9253_v57  ;;  %v5608_v57 = vsel %vm3609_vm3, %v5060_v10, 0.0  ;;  %v1046_v10 = vmul.f32 %v8840_v33, %v596_v63  ;;  %v5610_v59 = vsel %vm3609_vm3, %v5061_v15, 0.0  ;;  %v1411_v63 = vadd.f32 %v8801_v17, %v961_v36 }
 0x3f4   : > { %12789 = vst [vmem:[#allocation139_spill] sm:$0xff] %v9258_v21  ;;  %v5609_v44 = vadd.f32 %v5608_v57, %v9044_v22  ;;  %v5612_v57 = vsel %vm3609_vm3, %v5062_v28, 0.0  ;;  %v4265_v15 = vsel %vm3609_vm3, %v9148_v39, 0.0 }
 0x3f5   : > { %3974 = vst.msk [vmem:[%s6817_s8 + $0xb60] sm:$0xff] %vm3609_vm3, %v9258_v21  ;;  %v1496_v31 = vadd.f32 %v8801_v17, %v1046_v10  ;;  %v1710_v36 = vpack.c.bf16 %v1412_v9, %v1411_v63  ;;  %v5065_v9 = vmul.f32 %v9209_v58, %v9209_v58 }
 0x3f6   : > { %v9279_v21 = vpop.f32.mrf.mxu1  ;;  %v5611_v26 = vadd.f32 %v5610_v59, %v5609_v44  ;;  %v4269_v59 = vsel %vm3609_vm3, %v9209_v58, 0.0 }
 0x3f7   : > { %v9269_v0 = vpop.f32.mrf.mxu0  ;;  %12790 = vst [vmem:[#allocation140_spill] sm:$0xff] %v9279_v21  ;;  %v9285_v13 = vpop.f32.mrf.mxu2  ;;  %v1752_v28 = vpack.c.bf16 %v1496_v31, %v1495_v41 }
 0x3f8   : > { %3718 = vst.msk [vmem:[%s6817_s8 + $0x360] sm:$0xff] %vm3609_vm3, %v9269_v0  ;;  %v5067_v58 = vmul.f32 %v9269_v0, %v9269_v0 }
 0x3f9   : > { %3807 = vst.msk [vmem:[%s6817_s8 + $0x628] sm:$0xff] %vm3609_vm3, %v9279_v21  ;;  %v4261_v21 = vsel %vm3609_vm3, %v9087_v40, 0.0  ;;  %v9298_v45 = vpop.f32.mrf.mxu3  ;;  %v5063_v40 = vmul.f32 %v9148_v39, %v9148_v39  ;;  %v4267_v39 = vsel %vm3609_vm3, %v9180_v11, 0.0 }
 0x3fa   : > { %12791 = vst [vmem:[#allocation141_spill] sm:$0xff] %v9285_v13  ;;  %v4262_v22 = vadd.f32 %v4261_v21, %v4260_v8  ;;  %v5613_v8 = vadd.f32 %v5612_v57, %v5611_v26  ;;  %v5618_v57 = vsel %vm3609_vm3, %v5065_v9, 0.0 }
 0x3fb   : > { %3891 = vst.msk [vmem:[%s6817_s8 + $0x8c8] sm:$0xff] %vm3609_vm3, %v9285_v13  ;;  %v428_v13 = vld [vmem:[%s6743_s29 + $0x6b8] sm:$0xff]  ;;  %v5614_v10 = vsel %vm3609_vm3, %v5063_v40, 0.0  ;;  %v5066_v40 = vmul.f32 %v9241_v62, %v9241_v62 }
 0x3fc   : > { %12792 = vst [vmem:[#allocation142_spill] sm:$0xff] %v9298_v45  ;;  %v878_v5 = vmul.f32 %v8840_v33, %v428_v13  ;;  %v4264_v27 = vadd.f32 %v4263_v51, %v4262_v22  ;;  %6564 = vmatmul.msk.bf16.gmra.mxu2 %vm1800_vm2, %v1710_v36  ;;  %v5615_v41 = vadd.f32 %v5614_v10, %v5613_v8  ;;  %v514_v36 = vld [vmem:[%s6743_s29 + $0x968] sm:$0xff]  ;;  %v5622_v8 = vsel %vm3609_vm3, %v5067_v58, 0.0  ;;  %v429_v58 = vld [vmem:[%s6743_s29 + $0x6c0] sm:$0xff] }
 0x3fd   : > { %3975 = vst.msk [vmem:[%s6817_s8 + $0xb68] sm:$0xff] %vm3609_vm3, %v9298_v45  ;;  %v5064_v45 = vmul.f32 %v9180_v11, %v9180_v11 }
 0x3fe   : > { %v9325_v21 = vpop.f32.mrf.mxu1  ;;  %v1328_v13 = vadd.f32 %v8801_v17, %v878_v5  ;;  %v4266_v44 = vadd.f32 %v4265_v15, %v4264_v27  ;;  %v513_v15 = vld [vmem:[%s6743_s29 + $0x960] sm:$0xff]  ;;  %v5620_v27 = vsel %vm3609_vm3, %v5066_v40, 0.0 }
 0x3ff   : > { %v2761_v19 = vpop.f32.mrf.mxu0  ;;  %3808 = vst.msk [vmem:[%s6817_s8 + $0x630] sm:$0xff] %vm3609_vm3, %v9325_v21  ;;  %v9337_v51 = vpop.f32.mrf.mxu2  ;;  %6606 = vmatmul.msk.bf16.gmra.mxu3 %vm1800_vm2, %v1752_v28  ;;  %v5616_v11 = vsel %vm3609_vm3, %v5064_v45, 0.0  ;;  %v4271_v45 = vsel %vm3609_vm3, %v9241_v62, 0.0  ;;  %v597_v5 = vld [vmem:[%s6743_s29 + $0xc00] sm:$0xff]  ;;  %v4273_v62 = vsel %vm3609_vm3, %v9269_v0, 0.0 }
 0x400   : > { %3719 = vst.msk [vmem:[%s6817_s8 + $0x368] sm:$0xff] %vm3609_vm3, %v2761_v19  ;;  %v1668_v26 = vpack.c.bf16 %v1328_v13, %v1327_v14  ;;  %v4268_v22 = vadd.f32 %v4267_v39, %v4266_v44  ;;  %v5617_v31 = vadd.f32 %v5616_v11, %v5615_v41  ;;  %v598_v14 = vld [vmem:[%s6743_s29 + $0xc08] sm:$0xff]  ;;  %v5068_v9 = vmul.f32 %v2761_v19, %v2761_v19 }
 0x401   : > { %3892 = vst.msk [vmem:[%s6817_s8 + $0x8d0] sm:$0xff] %vm3609_vm3, %v9337_v51  ;;  %v963_v11 = vmul.f32 %v8840_v33, %v513_v15  ;;  %v1047_v0 = vmul.f32 %v8840_v33, %v597_v5 }
 0x402   : > { %v9349_v63 = vpop.f32.mrf.mxu3  ;;  %6522 = vmatmul.msk.bf16.gmra.mxu1 %vm1800_vm2, %v1668_v26  ;;  %v4270_v42 = vadd.f32 %v4269_v59, %v4268_v22  ;;  %v5619_v10 = vadd.f32 %v5618_v57, %v5617_v31  ;;  %v964_v59 = vmul.f32 %v8840_v33, %v514_v36  ;;  %v4275_v26 = vsel %vm3609_vm3, %v2761_v19, 0.0  ;;  %v430_v19 = vld [vmem:[%s6743_s29 + $0x6c8] sm:$0xff] }
 0x403   : > { %12793 = vst [vmem:[#allocation143_spill] sm:$0xff] %v9349_v63  ;;  %v1048_v22 = vmul.f32 %v8840_v33, %v598_v14  ;;  %v1413_v5 = vadd.f32 %v8801_v17, %v963_v11  ;;  %v1497_v14 = vadd.f32 %v8801_v17, %v1047_v0  ;;  %v880_v11 = vmul.f32 %v8840_v33, %v430_v19 }
 0x404   : > { %3976 = vst.msk [vmem:[%s6817_s8 + $0xb70] sm:$0xff] %vm3609_vm3, %v9349_v63  ;;  %v4272_v39 = vadd.f32 %v4271_v45, %v4270_v42  ;;  %v5621_v40 = vadd.f32 %v5620_v27, %v5619_v10  ;;  %v5624_v42 = vsel %vm3609_vm3, %v5068_v9, 0.0  ;;  %v1414_v27 = vadd.f32 %v8801_v17, %v964_v59 }
 0x405   : > { %v5071_v10 = vmul.f32 %v7055_v43, %v7055_v43 }
 0x406   : > { %v9369_v13 = vpop.f32.mrf.mxu1  ;;  %v4274_v57 = vadd.f32 %v4273_v62, %v4272_v39  ;;  %v5623_v31 = vadd.f32 %v5622_v8, %v5621_v40  ;;  %v1498_v62 = vadd.f32 %v8801_v17, %v1048_v22 }
 0x407   : > { %v2764_v28 = vpop.f32.mrf.mxu0  ;;  %3809 = vst.msk [vmem:[%s6817_s8 + $0x638] sm:$0xff] %vm3609_vm3, %v9369_v13  ;;  %v9375_v44 = vpop.f32.mrf.mxu2 }
 0x408   : > { %3720 = vst.msk [vmem:[%s6817_s8 + $0x370] sm:$0xff] %vm3609_vm3, %v2764_v28  ;;  %v5069_v41 = vmul.f32 %v2764_v28, %v2764_v28  ;;  %v4277_v15 = vsel %vm3609_vm3, %v2764_v28, 0.0  ;;  %v4276_v36 = vadd.f32 %v4275_v26, %v4274_v57  ;;  %v879_v28 = vmul.f32 %v8840_v33, %v429_v58 }
 0x409   : > { %3893 = vst.msk [vmem:[%s6817_s8 + $0x8d8] sm:$0xff] %vm3609_vm3, %v9375_v44  ;;  %v5625_v9 = vadd.f32 %v5624_v42, %v5623_v31  ;;  %v1711_v26 = vpack.c.bf16 %v1414_v27, %v1413_v5  ;;  %v1753_v57 = vpack.c.bf16 %v1498_v62, %v1497_v14  ;;  %v1330_v31 = vadd.f32 %v8801_v17, %v880_v11 }
 0x40a   : > { %v9385_v45 = vpop.f32.mrf.mxu3  ;;  %v5626_v39 = vsel %vm3609_vm3, %v5069_v41, 0.0  ;;  %v4278_v8 = vadd.f32 %v4277_v15, %v4276_v36  ;;  %v1329_v41 = vadd.f32 %v8801_v17, %v879_v28  ;;  %v4281_v42 = vsel %vm3609_vm3, %v7055_v43, 0.0 }
 0x40b   : > { %12794 = vst [vmem:[#allocation144_spill] sm:$0xff] %v9385_v45  ;;  %v5627_v22 = vadd.f32 %v5626_v39, %v5625_v9  ;;  %v5072_v15 = vmul.f32 %v7067_v54, %v7067_v54  ;;  %v5073_v36 = vmul.f32 %v7087_v7, %v7087_v7  ;;  %v5630_v14 = vsel %vm3609_vm3, %v5071_v10, 0.0  ;;  %v515_v10 = vld [vmem:[%s6743_s29 + $0x970] sm:$0xff] }
 0x40c   : > { %3977 = vst.msk [vmem:[%s6817_s8 + $0xb78] sm:$0xff] %vm3609_vm3, %v9385_v45  ;;  %6565 = vmatmul.msk.bf16.gmra.mxu2 %vm1800_vm2, %v1711_v26  ;;  %v1669_v43 = vpack.c.bf16 %v1330_v31, %v1329_v41  ;;  %v4283_v39 = vsel %vm3609_vm3, %v7067_v54, 0.0  ;;  %v5074_v62 = vmul.f32 %v7099_v20, %v7099_v20 }
 0x40d   : > { %v5634_v54 = vsel %vm3609_vm3, %v5073_v36, 0.0 }
 0x40e   : > { %v9406_v45 = vpop.f32.mrf.mxu1  ;;  %v5636_v41 = vsel %vm3609_vm3, %v5074_v62, 0.0 }
 0x40f   : > { %v2766_v40 = vpop.f32.mrf.mxu0  ;;  %3810 = vst.msk [vmem:[%s6817_s8 + $0x640] sm:$0xff] %vm3609_vm3, %v9406_v45  ;;  %v9413_v58 = vpop.f32.mrf.mxu2  ;;  %6607 = vmatmul.msk.bf16.gmra.mxu3 %vm1800_vm2, %v1753_v57  ;;  %v4287_v57 = vsel %vm3609_vm3, %v7099_v20, 0.0  ;;  %v965_v20 = vmul.f32 %v8840_v33, %v515_v10  ;;  %v431_v10 = vld [vmem:[%s6743_s29 + $0x6d0] sm:$0xff] }
 0x410   : > { %3721 = vst.msk [vmem:[%s6817_s8 + $0x378] sm:$0xff] %vm3609_vm3, %v2766_v40  ;;  %v4279_v59 = vsel %vm3609_vm3, %v2766_v40, 0.0  ;;  %v5070_v0 = vmul.f32 %v2766_v40, %v2766_v40  ;;  %v516_v40 = vld [vmem:[%s6743_s29 + $0x978] sm:$0xff] }
 0x411   : > { %v4280_v63 = vadd.f32 %v4279_v59, %v4278_v8  ;;  %3894 = vst.msk [vmem:[%s6817_s8 + $0x8e0] sm:$0xff] %vm3609_vm3, %v9413_v58  ;;  %v4285_v8 = vsel %vm3609_vm3, %v7087_v7, 0.0  ;;  %v599_v59 = vld [vmem:[%s6743_s29 + $0xc10] sm:$0xff]  ;;  %v5076_v7 = vmul.f32 %v7131_v49, %v7131_v49  ;;  %v966_v36 = vmul.f32 %v8840_v33, %v516_v40 }
 0x412   : > { %v5628_v19 = vsel %vm3609_vm3, %v5070_v0, 0.0  ;;  %v9427_v27 = vpop.f32.mrf.mxu3  ;;  %6523 = vmatmul.msk.bf16.gmra.mxu1 %vm1800_vm2, %v1669_v43  ;;  %v600_v0 = vld [vmem:[%s6743_s29 + $0xc18] sm:$0xff]  ;;  %v1049_v43 = vmul.f32 %v8840_v33, %v599_v59 }
 0x413   : > { %v4282_v5 = vadd.f32 %v4281_v42, %v4280_v63  ;;  %v5629_v17 = vadd.f32 %v5628_v19, %v5627_v22  ;;  %12795 = vst [vmem:[#allocation145_spill] sm:$0xff] %v9427_v27  ;;  %v5632_v63 = vsel %vm3609_vm3, %v5072_v15, 0.0  ;;  %v5075_v22 = vmul.f32 %v7119_v37, %v7119_v37  ;;  %v432_v59 = vld [vmem:[%s6743_s29 + $0x6d8] sm:$0xff] }
 0x414   : > { %3978 = vst.msk [vmem:[%s6817_s8 + $0xb80] sm:$0xff] %vm3609_vm3, %v9427_v27 }
 0x415   : > { %v4284_v28 = vadd.f32 %v4283_v39, %v4282_v5  ;;  %v5631_v9 = vadd.f32 %v5630_v14, %v5629_v17  ;;  %v4289_v5 = vsel %vm3609_vm3, %v7119_v37, 0.0  ;;  %v5077_v17 = vmul.f32 %v7151_v3, %v7151_v3 }
 0x416   : > { %v9453_v31 = vpop.f32.mrf.mxu1  ;;  %v1050_v14 = vmul.f32 %v8840_v33, %v600_v0  ;;  %v4291_v37 = vsel %vm3609_vm3, %v7131_v49, 0.0 }
 0x417   : > { %v4286_v26 = vadd.f32 %v4285_v8, %v4284_v28  ;;  %v5633_v11 = vadd.f32 %v5632_v63, %v5631_v9  ;;  %3811 = vst.msk [vmem:[%s6817_s8 + $0x648] sm:$0xff] %vm3609_vm3, %v9453_v31  ;;  %v9458_v19 = vpop.f32.mrf.mxu2  ;;  %v5638_v9 = vsel %vm3609_vm3, %v5075_v22, 0.0  ;;  %v5640_v63 = vsel %vm3609_vm3, %v5076_v7, 0.0 }
 0x418   : > { %3895 = vst.msk [vmem:[%s6817_s8 + $0x8e8] sm:$0xff] %vm3609_vm3, %v9458_v19  ;;  %v4293_v8 = vsel %vm3609_vm3, %v7151_v3, 0.0  ;;  %v5642_v0 = vsel %vm3609_vm3, %v5077_v17, 0.0  ;;  %v5078_v3 = vmul.f32 %v7168_v16, %v7168_v16 }
 0x419   : > { %v4288_v42 = vadd.f32 %v4287_v57, %v4286_v26  ;;  %v5635_v15 = vadd.f32 %v5634_v54, %v5633_v11  ;;  %v9486_v26 = vld [vmem:[%s12276_s1 + $0x1] ss:$0 sm:$0xff] }
 0x41a   : > { %v9471_v28 = vpop.f32.mrf.mxu3  ;;  %v1415_v11 = vadd.f32 %v9486_v26, %v965_v20  ;;  %v1416_v49 = vadd.f32 %v9486_v26, %v966_v36  ;;  %v1499_v57 = vadd.f32 %v9486_v26, %v1049_v43  ;;  %v4295_v20 = vsel %vm3609_vm3, %v7168_v16, 0.0 }
 0x41b   : > { %v4290_v39 = vadd.f32 %v4289_v5, %v4288_v42  ;;  %v5637_v62 = vadd.f32 %v5636_v41, %v5635_v15  ;;  %12796 = vst [vmem:[#allocation146_spill] sm:$0xff] %v9471_v28  ;;  %v1500_v41 = vadd.f32 %v9486_v26, %v1050_v14  ;;  %v881_v15 = vmul.f32 %v8840_v33, %v431_v10 }
 0x41c   : > { %3979 = vst.msk [vmem:[%s6817_s8 + $0xb88] sm:$0xff] %vm3609_vm3, %v9471_v28  ;;  %v1712_v42 = vpack.c.bf16 %v1416_v49, %v1415_v11  ;;  %v5079_v36 = vmul.f32 %v7193_v35, %v7193_v35  ;;  %v4299_v11 = vsel %vm3609_vm3, %v7205_v48, 0.0  ;;  %v5082_v49 = vmul.f32 %v7241_v23, %v7241_v23  ;;  %v12851_v28 = vld [vmem:[#allocation92_spill] sm:$0xff] }
 0x41d   : > { %v4292_v40 = vadd.f32 %v4291_v37, %v4290_v39  ;;  %v5639_v54 = vadd.f32 %v5638_v9, %v5637_v62  ;;  %v1754_v5 = vpack.c.bf16 %v1500_v41, %v1499_v57  ;;  %v882_v39 = vmul.f32 %v8840_v33, %v432_v59 }
 0x41e   : > { %v9501_v17 = vpop.f32.mrf.mxu1  ;;  %6566 = vmatmul.msk.bf16.gmra.mxu2 %vm1800_vm2, %v1712_v42  ;;  %v1331_v16 = vadd.f32 %v9486_v26, %v881_v15  ;;  %v5644_v9 = vsel %vm3609_vm3, %v5078_v3, 0.0  ;;  %v4297_v37 = vsel %vm3609_vm3, %v7193_v35, 0.0  ;;  %v5080_v33 = vmul.f32 %v7205_v48, %v7205_v48 }
 0x41f   : > { %v4294_v22 = vadd.f32 %v4293_v8, %v4292_v40  ;;  %v5641_v7 = vadd.f32 %v5640_v63, %v5639_v54  ;;  %3812 = vst.msk [vmem:[%s6817_s8 + $0x650] sm:$0xff] %vm3609_vm3, %v9501_v17  ;;  %v9508_v14 = vpop.f32.mrf.mxu2  ;;  %6608 = vmatmul.msk.bf16.gmra.mxu3 %vm1800_vm2, %v1754_v5  ;;  %v1332_v63 = vadd.f32 %v9486_v26, %v882_v39  ;;  %v5646_v35 = vsel %vm3609_vm3, %v5079_v36, 0.0  ;;  %v602_v36 = vld [vmem:[%s6743_s29 + $0xc28] sm:$0xff] }
 0x420   : > { %3896 = vst.msk [vmem:[%s6817_s8 + $0x8f0] sm:$0xff] %vm3609_vm3, %v9508_v14  ;;  %v5081_v8 = vmul.f32 %v7225_v4, %v7225_v4  ;;  %v5648_v57 = vsel %vm3609_vm3, %v5080_v33, 0.0  ;;  %v4301_v41 = vsel %vm3609_vm3, %v7225_v4, 0.0  ;;  %v4303_v5 = vsel %vm3609_vm3, %v7241_v23, 0.0  ;;  %v9559_v23 = vld [vmem:[%s12276_s1] ss:$0 sm:$0xff] }
 0x421   : > { %v4296_v43 = vadd.f32 %v4295_v20, %v4294_v22  ;;  %v5643_v62 = vadd.f32 %v5642_v0, %v5641_v7  ;;  %v1670_v59 = vpack.c.bf16 %v1332_v63, %v1331_v16  ;;  %v517_v22 = vld [vmem:[%s6743_s29 + $0x980] sm:$0xff]  ;;  %v518_v7 = vld [vmem:[%s6743_s29 + $0x988] sm:$0xff]  ;;  %v5652_v39 = vsel %vm3609_vm3, %v5082_v49, 0.0 }
 0x422   : > { %v9523_v54 = vpop.f32.mrf.mxu3  ;;  %v5650_v48 = vsel %vm3609_vm3, %v5081_v8, 0.0  ;;  %v601_v20 = vld [vmem:[%s6743_s29 + $0xc20] sm:$0xff]  ;;  %v5083_v4 = vmul.f32 %v7264_v47, %v7264_v47  ;;  %v967_v33 = vmul.f32 %v9559_v23, %v517_v22  ;;  %v968_v63 = vmul.f32 %v9559_v23, %v518_v7 }
 0x423   : > { %v4298_v10 = vadd.f32 %v4297_v37, %v4296_v43  ;;  %v5645_v40 = vadd.f32 %v5644_v9, %v5643_v62  ;;  %12797 = vst [vmem:[#allocation147_spill] sm:$0xff] %v9523_v54  ;;  %6524 = vmatmul.msk.bf16.gmra.mxu1 %vm1800_vm2, %v1670_v59  ;;  %v5084_v43 = vmul.f32 %v7280_v1, %v7280_v1  ;;  %v4305_v8 = vsel %vm3609_vm3, %v7264_v47, 0.0 }
 0x424   : > { %3980 = vst.msk [vmem:[%s6817_s8 + $0xb90] sm:$0xff] %vm3609_vm3, %v9523_v54  ;;  %v4307_v47 = vsel %vm3609_vm3, %v7280_v1, 0.0  ;;  %v5086_v1 = vmul.f32 %v7319_v50, %v7319_v50 }
 0x425   : > { %v4300_v0 = vadd.f32 %v4299_v11, %v4298_v10  ;;  %v5647_v3 = vadd.f32 %v5646_v35, %v5645_v40  ;;  %v5085_v10 = vmul.f32 %v7303_v29, %v7303_v29  ;;  %v1051_v40 = vmul.f32 %v9559_v23, %v601_v20 }
 0x426   : > { %v9549_v62 = vpop.f32.mrf.mxu1  ;;  %v1052_v35 = vmul.f32 %v9559_v23, %v602_v36 }
 0x427   : > { %v4302_v42 = vadd.f32 %v4301_v41, %v4300_v0  ;;  %v5649_v15 = vadd.f32 %v5648_v57, %v5647_v3  ;;  %3813 = vst.msk [vmem:[%s6817_s8 + $0x658] sm:$0xff] %vm3609_vm3, %v9549_v62  ;;  %v9554_v37 = vpop.f32.mrf.mxu2  ;;  %v5654_v0 = vsel %vm3609_vm3, %v5083_v4, 0.0  ;;  %v5656_v3 = vsel %vm3609_vm3, %v5084_v43, 0.0  ;;  %v433_v41 = vld [vmem:[%s6743_s29 + $0x6e0] sm:$0xff] }
 0x428   : > { %3897 = vst.msk [vmem:[%s6817_s8 + $0x8f8] sm:$0xff] %vm3609_vm3, %v9554_v37  ;;  %v4309_v57 = vsel %vm3609_vm3, %v7303_v29, 0.0  ;;  %v5658_v20 = vsel %vm3609_vm3, %v5085_v10, 0.0  ;;  %v1501_v36 = vadd.f32 %v9486_v26, %v1051_v40  ;;  %v1502_v29 = vadd.f32 %v9486_v26, %v1052_v35 }
 0x429   : > { %v4304_v16 = vadd.f32 %v4303_v5, %v4302_v42  ;;  %v5651_v9 = vadd.f32 %v5650_v48, %v5649_v15  ;;  %v1417_v48 = vadd.f32 %v9486_v26, %v967_v33  ;;  %v1418_v42 = vadd.f32 %v9486_v26, %v968_v63  ;;  %v434_v15 = vld [vmem:[%s6743_s29 + $0x6e8] sm:$0xff] }
 0x42a   : > { %v9572_v59 = vpop.f32.mrf.mxu3  ;;  %v883_v43 = vmul.f32 %v9559_v23, %v433_v41  ;;  %v1755_v33 = vpack.c.bf16 %v1502_v29, %v1501_v36  ;;  %v4317_v36 = vsel %vm3609_vm3, %v7381_v60, 0.0  ;;  %v519_v29 = vld [vmem:[%s6743_s29 + $0x990] sm:$0xff] }
 0x42b   : > { %v4306_v11 = vadd.f32 %v4305_v8, %v4304_v16  ;;  %v5653_v49 = vadd.f32 %v5652_v39, %v5651_v9  ;;  %12798 = vst [vmem:[#allocation148_spill] sm:$0xff] %v9572_v59  ;;  %v1713_v4 = vpack.c.bf16 %v1418_v42, %v1417_v48  ;;  %v4311_v16 = vsel %vm3609_vm3, %v7319_v50, 0.0 }
 0x42c   : > { %3981 = vst.msk [vmem:[%s6817_s8 + $0xb98] sm:$0xff] %vm3609_vm3, %v9572_v59  ;;  %v5087_v9 = vmul.f32 %v7342_v12, %v7342_v12  ;;  %v884_v8 = vmul.f32 %v9559_v23, %v434_v15  ;;  %v1333_v50 = vadd.f32 %v9486_v26, %v883_v43  ;;  %v5090_v48 = vmul.f32 %v7397_v18, %v7397_v18  ;;  %v603_v43 = vld [vmem:[%s6743_s29 + $0xc30] sm:$0xff] }
 0x42d   : > { %v4308_v22 = vadd.f32 %v4307_v47, %v4306_v11  ;;  %v5655_v7 = vadd.f32 %v5654_v0, %v5653_v49  ;;  %v5660_v11 = vsel %vm3609_vm3, %v5086_v1, 0.0  ;;  %v4313_v49 = vsel %vm3609_vm3, %v7342_v12, 0.0 }
 0x42e   : > { %v9597_v63 = vpop.f32.mrf.mxu1  ;;  %6567 = vmatmul.msk.bf16.gmra.mxu2 %vm1800_vm2, %v1713_v4  ;;  %v5088_v0 = vmul.f32 %v7358_v32, %v7358_v32  ;;  %v1334_v47 = vadd.f32 %v9486_v26, %v884_v8  ;;  %v5662_v12 = vsel %vm3609_vm3, %v5087_v9, 0.0  ;;  %v4319_v9 = vsel %vm3609_vm3, %v7397_v18, 0.0 }
 0x42f   : > { %v4310_v5 = vadd.f32 %v4309_v57, %v4308_v22  ;;  %v5657_v39 = vadd.f32 %v5656_v3, %v5655_v7  ;;  %3814 = vst.msk [vmem:[%s6817_s8 + $0x660] sm:$0xff] %vm3609_vm3, %v9597_v63  ;;  %v9604_v35 = vpop.f32.mrf.mxu2  ;;  %6609 = vmatmul.msk.bf16.gmra.mxu3 %vm1800_vm2, %v1755_v33  ;;  %v5089_v3 = vmul.f32 %v7381_v60, %v7381_v60  ;;  %v4315_v7 = vsel %vm3609_vm3, %v7358_v32, 0.0 }
 0x430   : > { %3898 = vst.msk [vmem:[%s6817_s8 + $0x900] sm:$0xff] %vm3609_vm3, %v9604_v35  ;;  %v1671_v42 = vpack.c.bf16 %v1334_v47, %v1333_v50  ;;  %v5664_v1 = vsel %vm3609_vm3, %v5088_v0, 0.0  ;;  %v5668_v33 = vsel %vm3609_vm3, %v5090_v48, 0.0  ;;  %v5091_v60 = vmul.f32 %v7420_v46, %v7420_v46 }
 0x431   : > { %v4312_v10 = vadd.f32 %v4311_v16, %v4310_v5  ;;  %v5659_v40 = vadd.f32 %v5658_v20, %v5657_v39  ;;  %v520_v5 = vld [vmem:[%s6743_s29 + $0x998] sm:$0xff]  ;;  %v5666_v32 = vsel %vm3609_vm3, %v5089_v3, 0.0  ;;  %v5092_v8 = vmul.f32 %v7436_v6, %v7436_v6 }
 0x432   : > { %v9619_v22 = vpop.f32.mrf.mxu3  ;;  %v604_v16 = vld [vmem:[%s6743_s29 + $0xc38] sm:$0xff]  ;;  %v969_v18 = vmul.f32 %v9559_v23, %v519_v29  ;;  %v4321_v0 = vsel %vm3609_vm3, %v7420_v46, 0.0  ;;  %v5093_v47 = vmul.f32 %v7459_v38, %v7459_v38  ;;  %v1053_v3 = vmul.f32 %v9559_v23, %v603_v43 }
 0x433   : > { %v4314_v57 = vadd.f32 %v4313_v49, %v4312_v10  ;;  %v5661_v41 = vadd.f32 %v5660_v11, %v5659_v40  ;;  %12799 = vst [vmem:[#allocation149_spill] sm:$0xff] %v9619_v22  ;;  %6525 = vmatmul.msk.bf16.gmra.mxu1 %vm1800_vm2, %v1671_v42  ;;  %v970_v49 = vmul.f32 %v9559_v23, %v520_v5  ;;  %v5670_v48 = vsel %vm3609_vm3, %v5091_v60, 0.0 }
 0x434   : > { %3982 = vst.msk [vmem:[%s6817_s8 + $0xba0] sm:$0xff] %vm3609_vm3, %v9619_v22  ;;  %v4323_v46 = vsel %vm3609_vm3, %v7436_v6, 0.0  ;;  %v5672_v42 = vsel %vm3609_vm3, %v5092_v8, 0.0  ;;  %v1419_v29 = vadd.f32 %v9486_v26, %v969_v18  ;;  %v5094_v6 = vmul.f32 %v7475_v61, %v7475_v61  ;;  %v12839_v22 = vld [vmem:[#allocation68_spill] sm:$0xff] }
 0x435   : > { %v4316_v15 = vadd.f32 %v4315_v7, %v4314_v57  ;;  %v5663_v20 = vadd.f32 %v5662_v12, %v5661_v41  ;;  %v1054_v57 = vmul.f32 %v9559_v23, %v604_v16  ;;  %v1420_v5 = vadd.f32 %v9486_v26, %v970_v49 }
 0x436   : > { %v9645_v10 = vpop.f32.mrf.mxu1  ;;  %v4327_v60 = vsel %vm3609_vm3, %v7475_v61, 0.0  ;;  %v5095_v8 = vmul.f32 %v7498_v30, %v7498_v30 }
 0x437   : > { %v4318_v39 = vadd.f32 %v4317_v36, %v4316_v15  ;;  %v5665_v4 = vadd.f32 %v5664_v1, %v5663_v20  ;;  %3815 = vst.msk [vmem:[%s6817_s8 + $0x668] sm:$0xff] %vm3609_vm3, %v9645_v10  ;;  %v9650_v11 = vpop.f32.mrf.mxu2  ;;  %v4325_v15 = vsel %vm3609_vm3, %v7459_v38, 0.0  ;;  %v435_v20 = vld [vmem:[%s6743_s29 + $0x6f0] sm:$0xff]  ;;  %v1504_v38 = vadd.f32 %v9486_v26, %v1054_v57 }
 0x438   : > { %3899 = vst.msk [vmem:[%s6817_s8 + $0x908] sm:$0xff] %vm3609_vm3, %v9650_v11  ;;  %v4329_v57 = vsel %vm3609_vm3, %v7498_v30, 0.0  ;;  %v4331_v30 = vsel %vm3609_vm3, %v7514_v56, 0.0 }
 0x439   : > { %v4320_v40 = vadd.f32 %v4319_v9, %v4318_v39  ;;  %v5667_v50 = vadd.f32 %v5666_v32, %v5665_v4  ;;  %v436_v32 = vld [vmem:[%s6743_s29 + $0x6f8] sm:$0xff]  ;;  %v5674_v39 = vsel %vm3609_vm3, %v5093_v47, 0.0  ;;  %v1503_v4 = vadd.f32 %v9486_v26, %v1053_v3 }
 0x43a   : > { %v9663_v7 = vpop.f32.mrf.mxu3  ;;  %v1714_v9 = vpack.c.bf16 %v1420_v5, %v1419_v29  ;;  %v886_v18 = vmul.f32 %v9559_v23, %v436_v32  ;;  %v5676_v3 = vsel %vm3609_vm3, %v5094_v6, 0.0  ;;  %v4333_v32 = vsel %vm3609_vm3, %v7537_v25, 0.0  ;;  %v522_v6 = vld [vmem:[%s6743_s29 + $0x9a8] sm:$0xff] }
 0x43b   : > { %v4322_v41 = vadd.f32 %v4321_v0, %v4320_v40  ;;  %v5669_v12 = vadd.f32 %v5668_v33, %v5667_v50  ;;  %12800 = vst [vmem:[#allocation150_spill] sm:$0xff] %v9663_v7  ;;  %v885_v33 = vmul.f32 %v9559_v23, %v435_v20  ;;  %v1756_v40 = vpack.c.bf16 %v1504_v38, %v1503_v4 }
 0x43c   : > { %3983 = vst.msk [vmem:[%s6817_s8 + $0xba8] sm:$0xff] %vm3609_vm3, %v9663_v7  ;;  %v5097_v20 = vmul.f32 %v7537_v25, %v7537_v25  ;;  %v5099_v25 = vmul.f32 %v7576_v24, %v7576_v24 }
 0x43d   : > { %v4324_v1 = vadd.f32 %v4323_v46, %v4322_v41  ;;  %v5671_v36 = vadd.f32 %v5670_v48, %v5669_v12  ;;  %v1335_v61 = vadd.f32 %v9486_v26, %v885_v33  ;;  %v5096_v41 = vmul.f32 %v7514_v56, %v7514_v56  ;;  %v521_v56 = vld [vmem:[%s6743_s29 + $0x9a0] sm:$0xff] }
 0x43e   : > { %v9688_v50 = vpop.f32.mrf.mxu1  ;;  %6568 = vmatmul.msk.bf16.gmra.mxu2 %vm1800_vm2, %v1714_v9  ;;  %v1336_v12 = vadd.f32 %v9486_v26, %v886_v18  ;;  %v5682_v9 = vsel %vm3609_vm3, %v5097_v20, 0.0  ;;  %v4335_v33 = vsel %vm3609_vm3, %v7553_v53, 0.0 }
 0x43f   : > { %v4326_v43 = vadd.f32 %v4325_v15, %v4324_v1  ;;  %v5673_v16 = vadd.f32 %v5672_v42, %v5671_v36  ;;  %3816 = vst.msk [vmem:[%s6817_s8 + $0x670] sm:$0xff] %vm3609_vm3, %v9688_v50  ;;  %v9695_v47 = vpop.f32.mrf.mxu2  ;;  %6610 = vmatmul.msk.bf16.gmra.mxu3 %vm1800_vm2, %v1756_v40  ;;  %v5678_v15 = vsel %vm3609_vm3, %v5095_v8, 0.0  ;;  %v5680_v5 = vsel %vm3609_vm3, %v5096_v41, 0.0 }
 0x440   : > { %3900 = vst.msk [vmem:[%s6817_s8 + $0x910] sm:$0xff] %vm3609_vm3, %v9695_v47  ;;  %v1672_v1 = vpack.c.bf16 %v1336_v12, %v1335_v61 }
 0x441   : > { %v4328_v49 = vadd.f32 %v4327_v60, %v4326_v43  ;;  %v5675_v0 = vadd.f32 %v5674_v39, %v5673_v16  ;;  %v5098_v39 = vmul.f32 %v7553_v53, %v7553_v53  ;;  %v605_v43 = vld [vmem:[%s6743_s29 + $0xc40] sm:$0xff]  ;;  %v606_v16 = vld [vmem:[%s6743_s29 + $0xc48] sm:$0xff]  ;;  %v5100_v60 = vmul.f32 %v7596_v55, %v7596_v55 }
 0x442   : > { %v9708_v42 = vpop.f32.mrf.mxu3  ;;  %v972_v53 = vmul.f32 %v9559_v23, %v522_v6  ;;  %v1056_v41 = vmul.f32 %v9559_v23, %v606_v16  ;;  %v4343_v16 = vsel %vm3609_vm3, %v7645_v2, 0.0 }
 0x443   : > { %v4330_v48 = vadd.f32 %v4329_v57, %v4328_v49  ;;  %v5677_v46 = vadd.f32 %v5676_v3, %v5675_v0  ;;  %12801 = vst [vmem:[#allocation151_spill] sm:$0xff] %v9708_v42  ;;  %6526 = vmatmul.msk.bf16.gmra.mxu1 %vm1800_vm2, %v1672_v1  ;;  %v971_v0 = vmul.f32 %v9559_v23, %v521_v56  ;;  %v5684_v61 = vsel %vm3609_vm3, %v5098_v39, 0.0 }
 0x444   : > { %3984 = vst.msk [vmem:[%s6817_s8 + $0xbb0] sm:$0xff] %vm3609_vm3, %v9708_v42  ;;  %v4337_v3 = vsel %vm3609_vm3, %v7576_v24, 0.0  ;;  %v1055_v57 = vmul.f32 %v9559_v23, %v605_v43  ;;  %v5688_v20 = vsel %vm3609_vm3, %v5100_v60, 0.0  ;;  %v5101_v24 = vmul.f32 %v7625_v34, %v7625_v34 }
 0x445   : > { %v4332_v36 = vadd.f32 %v4331_v30, %v4330_v48  ;;  %v5679_v29 = vadd.f32 %v5678_v15, %v5677_v46  ;;  %v5686_v15 = vsel %vm3609_vm3, %v5099_v25, 0.0  ;;  %v4339_v30 = vsel %vm3609_vm3, %v7596_v55, 0.0 }
 0x446   : > { %v9735_v8 = vpop.f32.mrf.mxu1  ;;  %v5102_v55 = vmul.f32 %v7645_v2, %v7645_v2  ;;  %v1505_v39 = vadd.f32 %v9486_v26, %v1055_v57  ;;  %v1506_v56 = vadd.f32 %v9486_v26, %v1056_v41  ;;  %v5690_v43 = vsel %vm3609_vm3, %v5101_v24, 0.0 }
 0x447   : > { %v4334_v4 = vadd.f32 %v4333_v32, %v4332_v36  ;;  %v5681_v38 = vadd.f32 %v5680_v5, %v5679_v29  ;;  %3817 = vst.msk [vmem:[%s6817_s8 + $0x678] sm:$0xff] %vm3609_vm3, %v9735_v8  ;;  %v9740_v49 = vpop.f32.mrf.mxu2  ;;  %v1421_v29 = vadd.f32 %v9486_v26, %v971_v0  ;;  %v1422_v5 = vadd.f32 %v9486_v26, %v972_v53  ;;  %v12803_v0 = vld [vmem:[#allocation7_spill] sm:$0xff] }
 0x448   : > { %3901 = vst.msk [vmem:[%s6817_s8 + $0x918] sm:$0xff] %vm3609_vm3, %v9740_v49  ;;  %v4341_v32 = vsel %vm3609_vm3, %v7625_v34, 0.0  ;;  %v1757_v34 = vpack.c.bf16 %v1506_v56, %v1505_v39  ;;  %v4345_v2 = vsel %vm3609_vm3, %v7679_v52, 0.0  ;;  %v5104_v53 = vmul.f32 %v12803_v0, %v12803_v0  ;;  %v607_v39 = vld [vmem:[%s6743_s29 + $0xc50] sm:$0xff]  ;;  %v608_v56 = vld [vmem:[%s6743_s29 + $0xc58] sm:$0xff] }
 0x449   : > { %v4336_v40 = vadd.f32 %v4335_v33, %v4334_v4  ;;  %v5683_v18 = vadd.f32 %v5682_v9, %v5681_v38  ;;  %v1715_v38 = vpack.c.bf16 %v1422_v5, %v1421_v29  ;;  %v5103_v9 = vmul.f32 %v7679_v52, %v7679_v52  ;;  %v523_v29 = vld [vmem:[%s6743_s29 + $0x9b0] sm:$0xff]  ;;  %v524_v5 = vld [vmem:[%s6743_s29 + $0x9b8] sm:$0xff] }
 0x44a   : > { %v9752_v46 = vpop.f32.mrf.mxu3  ;;  %v4347_v52 = vsel %vm3609_vm3, %v12803_v0, 0.0  ;;  %v974_v0 = vmul.f32 %v9559_v23, %v524_v5 }
 0x44b   : > { %v4338_v12 = vadd.f32 %v4337_v3, %v4336_v40  ;;  %v5685_v48 = vadd.f32 %v5684_v61, %v5683_v18  ;;  %12802 = vst [vmem:[#allocation152_spill] sm:$0xff] %v9752_v46  ;;  %v5692_v18 = vsel %vm3609_vm3, %v5102_v55, 0.0  ;;  %v5694_v41 = vsel %vm3609_vm3, %v5103_v9, 0.0 }
 0x44c   : > { %3985 = vst.msk [vmem:[%s6817_s8 + $0xbb8] sm:$0xff] %vm3609_vm3, %v9752_v46 }
 0x44d   : > { %v4340_v1 = vadd.f32 %v4339_v30, %v4338_v12  ;;  %v5687_v36 = vadd.f32 %v5686_v15, %v5685_v48  ;;  %v12805_v12 = vld [vmem:[#allocation9_spill] sm:$0xff] }
 0x44e   : > { %v9776_v33 = vpop.f32.mrf.mxu1  ;;  %6569 = vmatmul.msk.bf16.gmra.mxu2 %vm1800_vm2, %v1715_v38  ;;  %v5105_v48 = vmul.f32 %v12805_v12, %v12805_v12  ;;  %v4349_v24 = vsel %vm3609_vm3, %v12805_v12, 0.0  ;;  %v12807_v38 = vld [vmem:[#allocation13_spill] sm:$0xff] }
 0x44f   : > { %v4342_v6 = vadd.f32 %v4341_v32, %v4340_v1  ;;  %v5689_v4 = vadd.f32 %v5688_v20, %v5687_v36  ;;  %3818 = vst.msk [vmem:[%s6817_s8 + $0x680] sm:$0xff] %vm3609_vm3, %v9776_v33  ;;  %v9782_v40 = vpop.f32.mrf.mxu2  ;;  %6611 = vmatmul.msk.bf16.gmra.mxu3 %vm1800_vm2, %v1757_v34  ;;  %v5696_v20 = vsel %vm3609_vm3, %v5104_v53, 0.0  ;;  %v12806_v1 = vld [vmem:[#allocation11_spill] sm:$0xff] }
 0x450   : > { %3902 = vst.msk [vmem:[%s6817_s8 + $0x920] sm:$0xff] %vm3609_vm3, %v9782_v40  ;;  %v5106_v36 = vmul.f32 %v12806_v1, %v12806_v1 }
 0x451   : > { %v4344_v25 = vadd.f32 %v4343_v16, %v4342_v6  ;;  %v5691_v60 = vadd.f32 %v5690_v43, %v5689_v4  ;;  %v5698_v6 = vsel %vm3609_vm3, %v5105_v48, 0.0  ;;  %v4351_v4 = vsel %vm3609_vm3, %v12806_v1, 0.0  ;;  %v12808_v16 = vld [vmem:[#allocation15_spill] sm:$0xff] }
 0x452   : > { %v9793_v57 = vpop.f32.mrf.mxu3  ;;  %v5107_v43 = vmul.f32 %v12807_v38, %v12807_v38  ;;  %v5108_v9 = vmul.f32 %v12808_v16, %v12808_v16  ;;  %v5700_v53 = vsel %vm3609_vm3, %v5106_v36, 0.0 }
 0x453   : > { %v4346_v61 = vadd.f32 %v4345_v2, %v4344_v25  ;;  %v5693_v3 = vadd.f32 %v5692_v18, %v5691_v60  ;;  %12804 = vst [vmem:[#allocation7_spill] sm:$0xff] %v9793_v57  ;;  %v973_v2 = vmul.f32 %v9559_v23, %v523_v29 }
 0x454   : > { %3986 = vst.msk [vmem:[%s6817_s8 + $0xbc0] sm:$0xff] %vm3609_vm3, %v9793_v57 }
 0x455   : > { %v4348_v15 = vadd.f32 %v4347_v52, %v4346_v61  ;;  %v5695_v30 = vadd.f32 %v5694_v41, %v5693_v3  ;;  %v4353_v61 = vsel %vm3609_vm3, %v12807_v38, 0.0  ;;  %v1057_v3 = vmul.f32 %v9559_v23, %v607_v39  ;;  %v12811_v39 = vld [vmem:[#allocation19_spill] sm:$0xff] }
 0x456   : > { %v9819_v34 = vpop.f32.mrf.mxu1  ;;  %v1058_v41 = vmul.f32 %v9559_v23, %v608_v56  ;;  %v1423_v5 = vadd.f32 %v9486_v26, %v973_v2  ;;  %v5110_v56 = vmul.f32 %v12811_v39, %v12811_v39 }
 0x457   : > { %v4350_v32 = vadd.f32 %v4349_v24, %v4348_v15  ;;  %v5697_v55 = vadd.f32 %v5696_v20, %v5695_v30  ;;  %3819 = vst.msk [vmem:[%s6817_s8 + $0x688] sm:$0xff] %vm3609_vm3, %v9819_v34  ;;  %v9824_v18 = vpop.f32.mrf.mxu2  ;;  %v5702_v15 = vsel %vm3609_vm3, %v5107_v43, 0.0  ;;  %v4355_v30 = vsel %vm3609_vm3, %v12808_v16, 0.0  ;;  %v12810_v24 = vld [vmem:[#allocation17_spill] sm:$0xff] }
 0x458   : > { %3903 = vst.msk [vmem:[%s6817_s8 + $0x928] sm:$0xff] %vm3609_vm3, %v9824_v18  ;;  %v5704_v20 = vsel %vm3609_vm3, %v5108_v9, 0.0  ;;  %v5109_v1 = vmul.f32 %v12810_v24, %v12810_v24 }
 0x459   : > { %v4352_v25 = vadd.f32 %v4351_v4, %v4350_v32  ;;  %v5699_v60 = vadd.f32 %v5698_v6, %v5697_v55  ;;  %v1424_v32 = vadd.f32 %v9486_v26, %v974_v0  ;;  %v4357_v55 = vsel %vm3609_vm3, %v12810_v24, 0.0 }
 0x45a   : > { %v9836_v48 = vpop.f32.mrf.mxu3  ;;  %v1507_v6 = vadd.f32 %v9486_v26, %v1057_v3  ;;  %v1508_v4 = vadd.f32 %v9486_v26, %v1058_v41  ;;  %v5706_v9 = vsel %vm3609_vm3, %v5109_v1, 0.0 }
 0x45b   : > { %v4354_v52 = vadd.f32 %v4353_v61, %v4352_v25  ;;  %v5701_v12 = vadd.f32 %v5700_v53, %v5699_v60  ;;  %12809 = vst [vmem:[#allocation9_spill] sm:$0xff] %v9836_v48  ;;  %v1716_v16 = vpack.c.bf16 %v1424_v32, %v1423_v5  ;;  %v4359_v25 = vsel %vm3609_vm3, %v12811_v39, 0.0  ;;  %v12812_v60 = vld [vmem:[#allocation21_spill] sm:$0xff] }
 0x45c   : > { %3987 = vst.msk [vmem:[%s6817_s8 + $0xbc8] sm:$0xff] %vm3609_vm3, %v9836_v48  ;;  %v5111_v2 = vmul.f32 %v12812_v60, %v12812_v60  ;;  %v1758_v0 = vpack.c.bf16 %v1508_v4, %v1507_v6  ;;  %v12815_v5 = vld [vmem:[#allocation25_spill] sm:$0xff]  ;;  %v12816_v4 = vld [vmem:[#allocation27_spill] sm:$0xff] }
 0x45d   : > { %v4356_v36 = vadd.f32 %v4355_v30, %v4354_v52  ;;  %v5703_v29 = vadd.f32 %v5702_v15, %v5701_v12  ;;  %v5708_v52 = vsel %vm3609_vm3, %v5110_v56, 0.0  ;;  %v4361_v12 = vsel %vm3609_vm3, %v12812_v60, 0.0  ;;  %v12813_v15 = vld [vmem:[#allocation23_spill] sm:$0xff]  ;;  %v609_v60 = vld [vmem:[%s6743_s29 + $0xc60] sm:$0xff]  ;;  %v12830_v48 = vld [vmem:[#allocation49_spill] sm:$0xff] }
 0x45e   : > { %v9860_v53 = vpop.f32.mrf.mxu1  ;;  %6570 = vmatmul.msk.bf16.gmra.mxu2 %vm1800_vm2, %v1716_v16  ;;  %v5112_v30 = vmul.f32 %v12813_v15, %v12813_v15  ;;  %v5113_v32 = vmul.f32 %v12815_v5, %v12815_v5  ;;  %v4365_v6 = vsel %vm3609_vm3, %v12815_v5, 0.0  ;;  %v526_v16 = vld [vmem:[%s6743_s29 + $0x9c8] sm:$0xff] }
 0x45f   : > { %v4358_v38 = vadd.f32 %v4357_v55, %v4356_v36  ;;  %v5705_v43 = vadd.f32 %v5704_v20, %v5703_v29  ;;  %3820 = vst.msk [vmem:[%s6817_s8 + $0x690] sm:$0xff] %vm3609_vm3, %v9860_v53  ;;  %v9866_v41 = vpop.f32.mrf.mxu2  ;;  %6612 = vmatmul.msk.bf16.gmra.mxu3 %vm1800_vm2, %v1758_v0  ;;  %v5710_v36 = vsel %vm3609_vm3, %v5111_v2, 0.0  ;;  %v4363_v29 = vsel %vm3609_vm3, %v12813_v15, 0.0  ;;  %v610_v2 = vld [vmem:[%s6743_s29 + $0xc68] sm:$0xff] }
 0x460   : > { %3904 = vst.msk [vmem:[%s6817_s8 + $0x930] sm:$0xff] %vm3609_vm3, %v9866_v41  ;;  %v5712_v56 = vsel %vm3609_vm3, %v5112_v30, 0.0  ;;  %v5714_v0 = vsel %vm3609_vm3, %v5113_v32, 0.0  ;;  %v976_v5 = vmul.f32 %v9559_v23, %v526_v16 }
 0x461   : > { %v4360_v61 = vadd.f32 %v4359_v25, %v4358_v38  ;;  %v5707_v3 = vadd.f32 %v5706_v9, %v5705_v43  ;;  %v5114_v38 = vmul.f32 %v12816_v4, %v12816_v4  ;;  %v525_v43 = vld [vmem:[%s6743_s29 + $0x9c0] sm:$0xff] }
 0x462   : > { %v9877_v1 = vpop.f32.mrf.mxu3 }
 0x463   : > { %v4362_v20 = vadd.f32 %v4361_v12, %v4360_v61  ;;  %v5709_v24 = vadd.f32 %v5708_v52, %v5707_v3  ;;  %12814 = vst [vmem:[#allocation11_spill] sm:$0xff] %v9877_v1  ;;  %v4367_v61 = vsel %vm3609_vm3, %v12816_v4, 0.0  ;;  %v12817_v3 = vld [vmem:[#allocation29_spill] sm:$0xff]  ;;  %v12818_v12 = vld [vmem:[#allocation31_spill] sm:$0xff]  ;;  %v5716_v32 = vsel %vm3609_vm3, %v5114_v38, 0.0 }
 0x464   : > { %3988 = vst.msk [vmem:[%s6817_s8 + $0xbd0] sm:$0xff] %vm3609_vm3, %v9877_v1  ;;  %v5115_v52 = vmul.f32 %v12817_v3, %v12817_v3  ;;  %v5116_v15 = vmul.f32 %v12818_v12, %v12818_v12  ;;  %v4371_v16 = vsel %vm3609_vm3, %v12818_v12, 0.0 }
 0x465   : > { %v4364_v55 = vadd.f32 %v4363_v29, %v4362_v20  ;;  %v5711_v39 = vadd.f32 %v5710_v36, %v5709_v24  ;;  %v975_v29 = vmul.f32 %v9559_v23, %v525_v43 }
 0x466   : > { %v9903_v30 = vpop.f32.mrf.mxu1  ;;  %v5718_v43 = vsel %vm3609_vm3, %v5115_v52, 0.0  ;;  %v5720_v38 = vsel %vm3609_vm3, %v5116_v15, 0.0 }
 0x467   : > { %v5713_v9 = vadd.f32 %v5712_v56, %v5711_v39  ;;  %v4366_v25 = vadd.f32 %v4365_v6, %v4364_v55  ;;  %3821 = vst.msk [vmem:[%s6817_s8 + $0x698] sm:$0xff] %vm3609_vm3, %v9903_v30  ;;  %v9908_v36 = vpop.f32.mrf.mxu2  ;;  %v4369_v55 = vsel %vm3609_vm3, %v12817_v3, 0.0  ;;  %v1059_v39 = vmul.f32 %v9559_v23, %v609_v60 }
 0x468   : > { %3905 = vst.msk [vmem:[%s6817_s8 + $0x938] sm:$0xff] %vm3609_vm3, %v9908_v36  ;;  %v1060_v56 = vmul.f32 %v9559_v23, %v610_v2  ;;  %v1425_v2 = vadd.f32 %v9486_v26, %v975_v29  ;;  %v1426_v3 = vadd.f32 %v9486_v26, %v976_v5  ;;  %v12822_v5 = vld [vmem:[#allocation37_spill] sm:$0xff] }
 0x469   : > { %v4368_v20 = vadd.f32 %v4367_v61, %v4366_v25  ;;  %v5715_v24 = vadd.f32 %v5714_v0, %v5713_v9  ;;  %v12820_v25 = vld [vmem:[#allocation33_spill] sm:$0xff]  ;;  %v1509_v15 = vadd.f32 %v9486_v26, %v1059_v39 }
 0x46a   : > { %v9920_v9 = vpop.f32.mrf.mxu3  ;;  %v5117_v0 = vmul.f32 %v12820_v25, %v12820_v25  ;;  %v4373_v52 = vsel %vm3609_vm3, %v12820_v25, 0.0 }
 0x46b   : > { %v4370_v6 = vadd.f32 %v4369_v55, %v4368_v20  ;;  %v5717_v4 = vadd.f32 %v5716_v32, %v5715_v24  ;;  %12819 = vst [vmem:[#allocation13_spill] sm:$0xff] %v9920_v9  ;;  %v12821_v20 = vld [vmem:[#allocation35_spill] sm:$0xff]  ;;  %v1510_v24 = vadd.f32 %v9486_v26, %v1060_v56 }
 0x46c   : > { %3989 = vst.msk [vmem:[%s6817_s8 + $0xbd8] sm:$0xff] %vm3609_vm3, %v9920_v9  ;;  %v5118_v12 = vmul.f32 %v12821_v20, %v12821_v20  ;;  %v4375_v29 = vsel %vm3609_vm3, %v12821_v20, 0.0 }
 0x46d   : > { %v4372_v60 = vadd.f32 %v4371_v16, %v4370_v6  ;;  %v5719_v61 = vadd.f32 %v5718_v43, %v5717_v4  ;;  %v1717_v6 = vpack.c.bf16 %v1426_v3, %v1425_v2  ;;  %v5722_v4 = vsel %vm3609_vm3, %v5117_v0, 0.0 }
 0x46e   : > { %v5119_v43 = vmul.f32 %v12822_v5, %v12822_v5  ;;  %v1759_v16 = vpack.c.bf16 %v1510_v24, %v1509_v15  ;;  %v9944_v25 = vpop.f32.mrf.mxu1  ;;  %v4377_v0 = vsel %vm3609_vm3, %v12822_v5, 0.0  ;;  %v12825_v15 = vld [vmem:[#allocation41_spill] sm:$0xff]  ;;  %v527_v5 = vld [vmem:[%s6743_s29 + $0x9d0] sm:$0xff] }
 0x46f   : > { %v4374_v32 = vadd.f32 %v4373_v52, %v4372_v60  ;;  %v5721_v55 = vadd.f32 %v5720_v38, %v5719_v61  ;;  %6571 = vmatmul.msk.bf16.gmra.mxu2 %vm1800_vm2, %v1717_v6  ;;  %3822 = vst.msk [vmem:[%s6817_s8 + $0x6a0] sm:$0xff] %vm3609_vm3, %v9944_v25  ;;  %v9950_v56 = vpop.f32.mrf.mxu2  ;;  %v5724_v38 = vsel %vm3609_vm3, %v5118_v12, 0.0  ;;  %v12823_v60 = vld [vmem:[#allocation39_spill] sm:$0xff]  ;;  %v5121_v24 = vmul.f32 %v12825_v15, %v12825_v15 }
 0x470   : > { %v5120_v61 = vmul.f32 %v12823_v60, %v12823_v60  ;;  %6613 = vmatmul.msk.bf16.gmra.mxu3 %vm1800_vm2, %v1759_v16  ;;  %3906 = vst.msk [vmem:[%s6817_s8 + $0x940] sm:$0xff] %vm3609_vm3, %v9950_v56  ;;  %v5726_v20 = vsel %vm3609_vm3, %v5119_v43, 0.0  ;;  %v4379_v12 = vsel %vm3609_vm3, %v12823_v60, 0.0  ;;  %v4381_v6 = vsel %vm3609_vm3, %v12825_v15, 0.0  ;;  %v528_v43 = vld [vmem:[%s6743_s29 + $0x9d8] sm:$0xff] }
 0x471   : > { %v4376_v9 = vadd.f32 %v4375_v29, %v4374_v32  ;;  %v5723_v39 = vadd.f32 %v5722_v4, %v5721_v55  ;;  %v12826_v4 = vld [vmem:[#allocation43_spill] sm:$0xff]  ;;  %v5730_v60 = vsel %vm3609_vm3, %v5121_v24, 0.0  ;;  %v977_v24 = vmul.f32 %v9559_v23, %v527_v5 }
 0x472   : > { %v9961_v52 = vpop.f32.mrf.mxu3  ;;  %v5122_v29 = vmul.f32 %v12826_v4, %v12826_v4 }
 0x473   : > { %v4378_v2 = vadd.f32 %v4377_v0, %v4376_v9  ;;  %v5725_v3 = vadd.f32 %v5724_v38, %v5723_v39  ;;  %12824 = vst [vmem:[#allocation15_spill] sm:$0xff] %v9961_v52  ;;  %v5728_v9 = vsel %vm3609_vm3, %v5120_v61, 0.0  ;;  %v611_v38 = vld [vmem:[%s6743_s29 + $0xc70] sm:$0xff]  ;;  %v612_v0 = vld [vmem:[%s6743_s29 + $0xc78] sm:$0xff] }
 0x474   : > { %3990 = vst.msk [vmem:[%s6817_s8 + $0xbe0] sm:$0xff] %vm3609_vm3, %v9961_v52  ;;  %v12827_v61 = vld [vmem:[#allocation45_spill] sm:$0xff] }
 0x475   : > { %v4380_v32 = vadd.f32 %v4379_v12, %v4378_v2  ;;  %v5727_v55 = vadd.f32 %v5726_v20, %v5725_v3  ;;  %v4383_v2 = vsel %vm3609_vm3, %v12826_v4, 0.0  ;;  %v5123_v3 = vmul.f32 %v12827_v61, %v12827_v61  ;;  %v12828_v20 = vld [vmem:[#allocation47_spill] sm:$0xff] }
 0x476   : > { %v5124_v12 = vmul.f32 %v12828_v20, %v12828_v20  ;;  %v9987_v15 = vpop.f32.mrf.mxu1  ;;  %v1061_v4 = vmul.f32 %v9559_v23, %v611_v38 }
 0x477   : > { %v4382_v16 = vadd.f32 %v4381_v6, %v4380_v32  ;;  %v5729_v39 = vadd.f32 %v5728_v9, %v5727_v55  ;;  %3823 = vst.msk [vmem:[%s6817_s8 + $0x6a8] sm:$0xff] %vm3609_vm3, %v9987_v15  ;;  %v9992_v32 = vpop.f32.mrf.mxu2  ;;  %v978_v55 = vmul.f32 %v9559_v23, %v528_v43  ;;  %v5732_v9 = vsel %vm3609_vm3, %v5122_v29, 0.0 }
 0x478   : > { %v4385_v6 = vsel %vm3609_vm3, %v12827_v61, 0.0  ;;  %3907 = vst.msk [vmem:[%s6817_s8 + $0x948] sm:$0xff] %vm3609_vm3, %v9992_v32  ;;  %v5734_v5 = vsel %vm3609_vm3, %v5123_v3, 0.0  ;;  %v4387_v43 = vsel %vm3609_vm3, %v12828_v20, 0.0  ;;  %v5736_v29 = vsel %vm3609_vm3, %v5124_v12, 0.0  ;;  %v12831_v3 = vld [vmem:[#allocation51_spill] sm:$0xff] }
 0x479   : > { %v4384_v52 = vadd.f32 %v4383_v2, %v4382_v16  ;;  %v5731_v1 = vadd.f32 %v5730_v60, %v5729_v39  ;;  %v1062_v16 = vmul.f32 %v9559_v23, %v612_v0  ;;  %v5125_v61 = vmul.f32 %v12830_v48, %v12830_v48 }
 0x47a   : > { %v10004_v2 = vpop.f32.mrf.mxu3  ;;  %v4389_v0 = vsel %vm3609_vm3, %v12830_v48, 0.0  ;;  %v5126_v20 = vmul.f32 %v12831_v3, %v12831_v3  ;;  %v1511_v12 = vadd.f32 %v9486_v26, %v1061_v4 }
 0x47b   : > { %v4386_v39 = vadd.f32 %v4385_v6, %v4384_v52  ;;  %v5733_v60 = vadd.f32 %v5732_v9, %v5731_v1  ;;  %12829 = vst [vmem:[#allocation17_spill] sm:$0xff] %v10004_v2  ;;  %v1427_v52 = vadd.f32 %v9486_v26, %v977_v24  ;;  %v1428_v1 = vadd.f32 %v9486_v26, %v978_v55  ;;  %v12832_v55 = vld [vmem:[#allocation53_spill] sm:$0xff] }
 0x47c   : > { %3991 = vst.msk [vmem:[%s6817_s8 + $0xbe8] sm:$0xff] %vm3609_vm3, %v10004_v2  ;;  %v1512_v9 = vadd.f32 %v9486_v26, %v1062_v16  ;;  %v4391_v24 = vsel %vm3609_vm3, %v12831_v3, 0.0  ;;  %v5740_v4 = vsel %vm3609_vm3, %v5126_v20, 0.0  ;;  %v12833_v16 = vld [vmem:[#allocation56_spill] sm:$0xff]  ;;  %v12836_v20 = vld [vmem:[#allocation62_spill] sm:$0xff] }
 0x47d   : > { %v4388_v38 = vadd.f32 %v4387_v43, %v4386_v39  ;;  %v5735_v57 = vadd.f32 %v5734_v5, %v5733_v60  ;;  %v1718_v2 = vpack.c.bf16 %v1428_v1, %v1427_v52  ;;  %v5738_v39 = vsel %vm3609_vm3, %v5125_v61, 0.0  ;;  %v12834_v1 = vld [vmem:[#allocation59_spill] sm:$0xff] }
 0x47e   : > { %v5127_v60 = vmul.f32 %v12832_v55, %v12832_v55  ;;  %v1760_v48 = vpack.c.bf16 %v1512_v9, %v1511_v12  ;;  %v4395_v52 = vsel %vm3609_vm3, %v12833_v16, 0.0  ;;  %v5130_v12 = vmul.f32 %v12836_v20, %v12836_v20 }
 0x47f   : > { %v4390_v6 = vadd.f32 %v4389_v0, %v4388_v38  ;;  %v5737_v46 = vadd.f32 %v5736_v29, %v5735_v57  ;;  %6572 = vmatmul.msk.bf16.gmra.mxu2 %vm1800_vm2, %v1718_v2  ;;  %v4393_v57 = vsel %vm3609_vm3, %v12832_v55, 0.0  ;;  %v5128_v29 = vmul.f32 %v12833_v16, %v12833_v16  ;;  %v10035_v61 = vpop.f32.mrf.mxu1  ;;  %v10045_v3 = vpop.f32.mrf.mxu2  ;;  %v530_v55 = vld [vmem:[%s6743_s29 + $0x9e8] sm:$0xff]  ;;  %v12838_v16 = vld [vmem:[#allocation65_spill] sm:$0xff] }
 0x480   : > { %6614 = vmatmul.msk.bf16.gmra.mxu3 %vm1800_vm2, %v1760_v48  ;;  %3824 = vst.msk [vmem:[%s6817_s8 + $0x6b0] sm:$0xff] %vm3609_vm3, %v10035_v61  ;;  %v5742_v2 = vsel %vm3609_vm3, %v5127_v60, 0.0  ;;  %v5129_v0 = vmul.f32 %v12834_v1, %v12834_v1  ;;  %v613_v60 = vld [vmem:[%s6743_s29 + $0xc80] sm:$0xff]  ;;  %v4401_v7 = vsel %vm3609_vm3, %v12838_v16, 0.0 }
 0x481   : > { %v4392_v5 = vadd.f32 %v4391_v24, %v4390_v6  ;;  %v5739_v43 = vadd.f32 %v5738_v39, %v5737_v46  ;;  %12835 = vst [vmem:[#allocation19_spill] sm:$0xff] %v10045_v3  ;;  %v529_v24 = vld [vmem:[%s6743_s29 + $0x9e0] sm:$0xff]  ;;  %v5744_v48 = vsel %vm3609_vm3, %v5128_v29, 0.0  ;;  %v4399_v29 = vsel %vm3609_vm3, %v12836_v20, 0.0 }
 0x482   : > { %3908 = vst.msk [vmem:[%s6817_s8 + $0x950] sm:$0xff] %vm3609_vm3, %v10045_v3  ;;  %v10052_v39 = vpop.f32.mrf.mxu3 }
 0x483   : > { %v4394_v38 = vadd.f32 %v4393_v57, %v4392_v5  ;;  %v5741_v46 = vadd.f32 %v5740_v4, %v5739_v43  ;;  %12837 = vst [vmem:[#allocation21_spill] sm:$0xff] %v10052_v39  ;;  %v4397_v5 = vsel %vm3609_vm3, %v12834_v1, 0.0  ;;  %v979_v43 = vmul.f32 %v9559_v23, %v529_v24  ;;  %v614_v57 = vld [vmem:[%s6743_s29 + $0xc88] sm:$0xff] }
 0x484   : > { %3992 = vst.msk [vmem:[%s6817_s8 + $0xbf0] sm:$0xff] %vm3609_vm3, %v10052_v39  ;;  %v980_v4 = vmul.f32 %v9559_v23, %v530_v55  ;;  %v1063_v1 = vmul.f32 %v9559_v23, %v613_v60  ;;  %v1064_v39 = vmul.f32 %v9559_v23, %v614_v57  ;;  %v5748_v24 = vsel %vm3609_vm3, %v5130_v12, 0.0  ;;  %v12840_v57 = vld [vmem:[#allocation71_spill] sm:$0xff] }
 0x485   : > { %v4396_v9 = vadd.f32 %v4395_v52, %v4394_v38  ;;  %v5743_v6 = vadd.f32 %v5742_v2, %v5741_v46  ;;  %v5131_v38 = vmul.f32 %v12838_v16, %v12838_v16  ;;  %v5746_v52 = vsel %vm3609_vm3, %v5129_v0, 0.0 }
 0x486   : > { %v1429_v0 = vadd.f32 %v9486_v26, %v979_v43  ;;  %v1430_v20 = vadd.f32 %v9486_v26, %v980_v4  ;;  %v5133_v16 = vmul.f32 %v12840_v57, %v12840_v57  ;;  %v1513_v43 = vadd.f32 %v9486_v26, %v1063_v1 }
 0x487   : > { %v4398_v46 = vadd.f32 %v4397_v5, %v4396_v9  ;;  %v5745_v2 = vadd.f32 %v5744_v48, %v5743_v6  ;;  %v5132_v9 = vmul.f32 %v12839_v22, %v12839_v22  ;;  %v10078_v6 = vpop.f32.mrf.mxu1  ;;  %v5750_v60 = vsel %vm3609_vm3, %v5131_v38, 0.0 }
 0x488   : > { %3825 = vst.msk [vmem:[%s6817_s8 + $0x6b8] sm:$0xff] %vm3609_vm3, %v10078_v6  ;;  %v4403_v5 = vsel %vm3609_vm3, %v12839_v22, 0.0  ;;  %v1514_v4 = vadd.f32 %v9486_v26, %v1064_v39  ;;  %v4405_v22 = vsel %vm3609_vm3, %v12840_v57, 0.0  ;;  %v12845_v57 = vld [vmem:[#allocation80_spill] sm:$0xff] }
 0x489   : > { %v4400_v42 = vadd.f32 %v4399_v29, %v4398_v46  ;;  %v5747_v55 = vadd.f32 %v5746_v52, %v5745_v2  ;;  %v10090_v46 = vpop.f32.mrf.mxu2  ;;  %v5752_v52 = vsel %vm3609_vm3, %v5132_v9, 0.0  ;;  %v12843_v29 = vld [vmem:[#allocation74_spill] sm:$0xff] }
 0x48a   : > { %12841 = vst [vmem:[#allocation23_spill] sm:$0xff] %v10090_v46  ;;  %v1761_v26 = vpack.c.bf16 %v1514_v4, %v1513_v43 }
 0x48b   : > { %v4402_v48 = vadd.f32 %v4401_v7, %v4400_v42  ;;  %v5749_v12 = vadd.f32 %v5748_v24, %v5747_v55  ;;  %3909 = vst.msk [vmem:[%s6817_s8 + $0x958] sm:$0xff] %vm3609_vm3, %v10090_v46  ;;  %v10097_v7 = vpop.f32.mrf.mxu3  ;;  %v1719_v42 = vpack.c.bf16 %v1430_v20, %v1429_v0  ;;  %v5134_v24 = vmul.f32 %v12843_v29, %v12843_v29  ;;  %v12844_v20 = vld [vmem:[#allocation77_spill] sm:$0xff] }
 0x48c   : > { %12842 = vst [vmem:[#allocation25_spill] sm:$0xff] %v10097_v7  ;;  %v5754_v55 = vsel %vm3609_vm3, %v5133_v16, 0.0  ;;  %v4407_v0 = vsel %vm3609_vm3, %v12843_v29, 0.0  ;;  %v5135_v9 = vmul.f32 %v12844_v20, %v12844_v20  ;;  %v5136_v16 = vmul.f32 %v12845_v57, %v12845_v57 }
 0x48d   : > { %v4404_v2 = vadd.f32 %v4403_v5, %v4402_v48  ;;  %v5751_v38 = vadd.f32 %v5750_v60, %v5749_v12  ;;  %3993 = vst.msk [vmem:[%s6817_s8 + $0xbf8] sm:$0xff] %vm3609_vm3, %v10097_v7  ;;  %v5756_v12 = vsel %vm3609_vm3, %v5134_v24, 0.0  ;;  %v4409_v5 = vsel %vm3609_vm3, %v12844_v20, 0.0  ;;  %v12848_v24 = vld [vmem:[#allocation86_spill] sm:$0xff]  ;;  %v532_v20 = vld [vmem:[%s6743_s29 + $0x9f8] sm:$0xff] }
 0x48f   : > { %v4406_v39 = vadd.f32 %v4405_v22, %v4404_v2  ;;  %v5753_v1 = vadd.f32 %v5752_v52, %v5751_v38  ;;  %6573 = vmatmul.msk.bf16.gmra.mxu2 %vm1800_vm2, %v1719_v42  ;;  %v10119_v43 = vpop.f32.mrf.mxu1  ;;  %v5758_v38 = vsel %vm3609_vm3, %v5135_v9, 0.0  ;;  %v4411_v42 = vsel %vm3609_vm3, %v12845_v57, 0.0  ;;  %v12846_v52 = vld [vmem:[#allocation83_spill] sm:$0xff]  ;;  %v615_v9 = vld [vmem:[%s6743_s29 + $0xc90] sm:$0xff]  ;;  %v616_v57 = vld [vmem:[%s6743_s29 + $0xc98] sm:$0xff] }
 0x490   : > { %6615 = vmatmul.msk.bf16.gmra.mxu3 %vm1800_vm2, %v1761_v26  ;;  %3826 = vst.msk [vmem:[%s6817_s8 + $0x6c0] sm:$0xff] %vm3609_vm3, %v10119_v43  ;;  %v5137_v22 = vmul.f32 %v12846_v52, %v12846_v52  ;;  %v5138_v26 = vmul.f32 %v12848_v24, %v12848_v24 }
 0x491   : > { %v4408_v60 = vadd.f32 %v4407_v0, %v4406_v39  ;;  %v5755_v48 = vadd.f32 %v5754_v55, %v5753_v1  ;;  %v10129_v29 = vpop.f32.mrf.mxu2  ;;  %v531_v0 = vld [vmem:[%s6743_s29 + $0x9f0] sm:$0xff] }
 0x492   : > { %12847 = vst [vmem:[#allocation27_spill] sm:$0xff] %v10129_v29  ;;  %v5762_v7 = vsel %vm3609_vm3, %v5137_v22, 0.0 }
 0x493   : > { %v4410_v4 = vadd.f32 %v4409_v5, %v4408_v60  ;;  %v5757_v2 = vadd.f32 %v5756_v12, %v5755_v48  ;;  %3910 = vst.msk [vmem:[%s6817_s8 + $0x960] sm:$0xff] %vm3609_vm3, %v10129_v29  ;;  %v10136_v55 = vpop.f32.mrf.mxu3  ;;  %v5760_v60 = vsel %vm3609_vm3, %v5136_v16, 0.0  ;;  %v4413_v48 = vsel %vm3609_vm3, %v12846_v52, 0.0 }
 0x494   : > { %12849 = vst [vmem:[#allocation29_spill] sm:$0xff] %v10136_v55  ;;  %v981_v12 = vmul.f32 %v9559_v23, %v531_v0  ;;  %v982_v5 = vmul.f32 %v9559_v23, %v532_v20  ;;  %v4415_v16 = vsel %vm3609_vm3, %v12848_v24, 0.0  ;;  %v1065_v52 = vmul.f32 %v9559_v23, %v615_v9  ;;  %v10167_v24 = vld [vmem:[%s12276_s1 + $0x1] ss:$0 sm:$0xff] }
 0x495   : > { %v4412_v39 = vadd.f32 %v4411_v42, %v4410_v4  ;;  %v5759_v1 = vadd.f32 %v5758_v38, %v5757_v2  ;;  %3994 = vst.msk [vmem:[%s6817_s8 + $0xc00] sm:$0xff] %vm3609_vm3, %v10136_v55  ;;  %v12850_v4 = vld [vmem:[#allocation89_spill] sm:$0xff]  ;;  %v1066_v55 = vmul.f32 %v9559_v23, %v616_v57  ;;  %v5764_v0 = vsel %vm3609_vm3, %v5138_v26, 0.0 }
 0x496   : > { %v5139_v2 = vmul.f32 %v12850_v4, %v12850_v4  ;;  %v4417_v54 = vsel %vm3609_vm3, %v12850_v4, 0.0  ;;  %v1431_v23 = vadd.f32 %v10167_v24, %v981_v12  ;;  %v1432_v26 = vadd.f32 %v10167_v24, %v982_v5 }
 0x497   : > { %v4414_v38 = vadd.f32 %v4413_v48, %v4412_v39  ;;  %v5761_v42 = vadd.f32 %v5760_v60, %v5759_v1  ;;  %v5140_v39 = vmul.f32 %v12851_v28, %v12851_v28  ;;  %v10162_v22 = vpop.f32.mrf.mxu1  ;;  %v4419_v60 = vsel %vm3609_vm3, %v12851_v28, 0.0  ;;  %v12852_v48 = vld [vmem:[#allocation95_spill] sm:$0xff] }
 0x498   : > { %3827 = vst.msk [vmem:[%s6817_s8 + $0x6c8] sm:$0xff] %vm3609_vm3, %v10162_v22  ;;  %v5141_v57 = vmul.f32 %v12852_v48, %v12852_v48  ;;  %v1515_v12 = vadd.f32 %v10167_v24, %v1065_v52  ;;  %v1516_v5 = vadd.f32 %v10167_v24, %v1066_v55  ;;  %v4421_v28 = vsel %vm3609_vm3, %v12852_v48, 0.0 }
 0x499   : > { %v4416_v59 = vadd.f32 %v4415_v16, %v4414_v38  ;;  %v5763_v20 = vadd.f32 %v5762_v7, %v5761_v42  ;;  %v5766_v7 = vsel %vm3609_vm3, %v5139_v2, 0.0  ;;  %v10179_v4 = vpop.f32.mrf.mxu2  ;;  %v5768_v42 = vsel %vm3609_vm3, %v5140_v39, 0.0  ;;  %v12855_v16 = vld [vmem:[#allocation98_spill] sm:$0xff] }
 0x49a   : > { %12853 = vst [vmem:[#allocation31_spill] sm:$0xff] %v10179_v4  ;;  %v1762_v55 = vpack.c.bf16 %v1516_v5, %v1515_v12  ;;  %v12857_v12 = vld [vmem:[#allocation104_spill] sm:$0xff] }
 0x49b   : > { %v4418_v1 = vadd.f32 %v4417_v54, %v4416_v59  ;;  %v5765_v9 = vadd.f32 %v5764_v0, %v5763_v20  ;;  %3911 = vst.msk [vmem:[%s6817_s8 + $0x968] sm:$0xff] %vm3609_vm3, %v10179_v4  ;;  %v10186_v54 = vpop.f32.mrf.mxu3  ;;  %v1720_v59 = vpack.c.bf16 %v1432_v26, %v1431_v23  ;;  %v5142_v0 = vmul.f32 %v12855_v16, %v12855_v16  ;;  %v12856_v26 = vld [vmem:[#allocation101_spill] sm:$0xff] }
 0x49c   : > { %12854 = vst [vmem:[#allocation33_spill] sm:$0xff] %v10186_v54  ;;  %v4423_v23 = vsel %vm3609_vm3, %v12855_v16, 0.0  ;;  %v5143_v39 = vmul.f32 %v12856_v26, %v12856_v26  ;;  %v4425_v48 = vsel %vm3609_vm3, %v12856_v26, 0.0  ;;  %v533_v26 = vld [vmem:[%s6743_s29 + $0xa00] sm:$0xff] }
 0x49d   : > { %v4420_v38 = vadd.f32 %v4419_v60, %v4418_v1  ;;  %v5767_v2 = vadd.f32 %v5766_v7, %v5765_v9  ;;  %3995 = vst.msk [vmem:[%s6817_s8 + $0xc08] sm:$0xff] %vm3609_vm3, %v10186_v54  ;;  %v5770_v7 = vsel %vm3609_vm3, %v5141_v57, 0.0  ;;  %v5772_v60 = vsel %vm3609_vm3, %v5142_v0, 0.0 }
 0x49e   : > { %v5144_v57 = vmul.f32 %v12857_v12, %v12857_v12 }
 0x49f   : > { %v4422_v52 = vadd.f32 %v4421_v28, %v4420_v38  ;;  %v5769_v20 = vadd.f32 %v5768_v42, %v5767_v2  ;;  %6574 = vmatmul.msk.bf16.gmra.mxu2 %vm1800_vm2, %v1720_v59  ;;  %v5774_v59 = vsel %vm3609_vm3, %v5143_v39, 0.0  ;;  %v4427_v42 = vsel %vm3609_vm3, %v12857_v12, 0.0  ;;  %v12858_v28 = vld [vmem:[#allocation107_spill] sm:$0xff] }
 0x4a0   : > { %6616 = vmatmul.msk.bf16.gmra.mxu3 %vm1800_vm2, %v1762_v55  ;;  %v10208_v2 = vpop.f32.mrf.mxu1  ;;  %v5145_v16 = vmul.f32 %v12858_v28, %v12858_v28  ;;  %v12860_v55 = vld [vmem:[#allocation110_spill] sm:$0xff]  ;;  %v534_v39 = vld [vmem:[%s6743_s29 + $0xa08] sm:$0xff] }
 0x4a1   : > { %v4424_v1 = vadd.f32 %v4423_v23, %v4422_v52  ;;  %v5771_v9 = vadd.f32 %v5770_v7, %v5769_v20  ;;  %3828 = vst.msk [vmem:[%s6817_s8 + $0x6d0] sm:$0xff] %vm3609_vm3, %v10208_v2  ;;  %v10218_v0 = vpop.f32.mrf.mxu2  ;;  %v5146_v52 = vmul.f32 %v12860_v55, %v12860_v55 }
 0x4a2   : > { %12859 = vst [vmem:[#allocation35_spill] sm:$0xff] %v10218_v0  ;;  %v5778_v54 = vsel %vm3609_vm3, %v5145_v16, 0.0 }
 0x4a3   : > { %v4426_v5 = vadd.f32 %v4425_v48, %v4424_v1  ;;  %v5773_v38 = vadd.f32 %v5772_v60, %v5771_v9  ;;  %3912 = vst.msk [vmem:[%s6817_s8 + $0x970] sm:$0xff] %vm3609_vm3, %v10218_v0  ;;  %v10225_v23 = vpop.f32.mrf.mxu3  ;;  %v617_v1 = vld [vmem:[%s6743_s29 + $0xca0] sm:$0xff]  ;;  %v5776_v9 = vsel %vm3609_vm3, %v5144_v57, 0.0  ;;  %v4429_v60 = vsel %vm3609_vm3, %v12858_v28, 0.0 }
 0x4a4   : > { %12861 = vst [vmem:[#allocation37_spill] sm:$0xff] %v10225_v23  ;;  %v10239_v48 = vld [vmem:[%s12276_s1] ss:$0 sm:$0xff]  ;;  %v4431_v28 = vsel %vm3609_vm3, %v12860_v55, 0.0 }
 0x4a5   : > { %v4428_v20 = vadd.f32 %v4427_v42, %v4426_v5  ;;  %v5775_v7 = vadd.f32 %v5774_v59, %v5773_v38  ;;  %3996 = vst.msk [vmem:[%s6817_s8 + $0xc10] sm:$0xff] %vm3609_vm3, %v10225_v23  ;;  %v983_v12 = vmul.f32 %v10239_v48, %v533_v26  ;;  %v984_v5 = vmul.f32 %v10239_v48, %v534_v39  ;;  %v618_v38 = vld [vmem:[%s6743_s29 + $0xca8] sm:$0xff]  ;;  %v12862_v23 = vld [vmem:[#allocation113_spill] sm:$0xff] }
 0x4a6   : > { %v1067_v57 = vmul.f32 %v10239_v48, %v617_v1  ;;  %v5147_v27 = vmul.f32 %v12862_v23, %v12862_v23  ;;  %v1068_v0 = vmul.f32 %v10239_v48, %v618_v38  ;;  %v5780_v26 = vsel %vm3609_vm3, %v5146_v52, 0.0  ;;  %v12864_v38 = vld [vmem:[#allocation119_spill] sm:$0xff] }
 0x4a7   : > { %v4430_v59 = vadd.f32 %v4429_v60, %v4428_v20  ;;  %v5777_v42 = vadd.f32 %v5776_v9, %v5775_v7  ;;  %v4433_v20 = vsel %vm3609_vm3, %v12862_v23, 0.0  ;;  %v12863_v7 = vld [vmem:[#allocation116_spill] sm:$0xff]  ;;  %v1433_v1 = vadd.f32 %v10167_v24, %v983_v12 }
 0x4a8   : > { %v5148_v16 = vmul.f32 %v12863_v7, %v12863_v7  ;;  %v1434_v55 = vadd.f32 %v10167_v24, %v984_v5  ;;  %v10258_v29 = vpop.f32.mrf.mxu1  ;;  %v1517_v52 = vadd.f32 %v10167_v24, %v1067_v57  ;;  %v4435_v23 = vsel %vm3609_vm3, %v12863_v7, 0.0 }
 0x4a9   : > { %v4432_v4 = vadd.f32 %v4431_v28, %v4430_v59  ;;  %v5779_v39 = vadd.f32 %v5778_v54, %v5777_v42  ;;  %v5782_v54 = vsel %vm3609_vm3, %v5147_v27, 0.0  ;;  %v5149_v59 = vmul.f32 %v12864_v38, %v12864_v38  ;;  %3829 = vst.msk [vmem:[%s6817_s8 + $0x6d8] sm:$0xff] %vm3609_vm3, %v10258_v29  ;;  %v10269_v12 = vpop.f32.mrf.mxu2 }
 0x4aa   : > { %12865 = vst [vmem:[#allocation39_spill] sm:$0xff] %v10269_v12  ;;  %v1721_v27 = vpack.c.bf16 %v1434_v55, %v1433_v1  ;;  %v5784_v28 = vsel %vm3609_vm3, %v5148_v16, 0.0  ;;  %v12868_v55 = vld [vmem:[#allocation125_spill] sm:$0xff] }
 0x4ab   : > { %v4434_v9 = vadd.f32 %v4433_v20, %v4432_v4  ;;  %v5781_v60 = vadd.f32 %v5780_v26, %v5779_v39  ;;  %v1518_v4 = vadd.f32 %v10167_v24, %v1068_v0  ;;  %3913 = vst.msk [vmem:[%s6817_s8 + $0x978] sm:$0xff] %vm3609_vm3, %v10269_v12  ;;  %v10275_v57 = vpop.f32.mrf.mxu3  ;;  %v4437_v26 = vsel %vm3609_vm3, %v12864_v38, 0.0  ;;  %v12867_v39 = vld [vmem:[#allocation122_spill] sm:$0xff]  ;;  %v12874_v12 = vld [vmem:[#allocation137_spill] sm:$0xff] }
 0x4ac   : > { %12866 = vst [vmem:[#allocation41_spill] sm:$0xff] %v10275_v57  ;;  %v5150_v20 = vmul.f32 %v12867_v39, %v12867_v39  ;;  %v4439_v1 = vsel %vm3609_vm3, %v12867_v39, 0.0  ;;  %v5151_v16 = vmul.f32 %v12868_v55, %v12868_v55  ;;  %v12870_v39 = vld [vmem:[#allocation131_spill] sm:$0xff] }
 0x4ad   : > { %v4436_v5 = vadd.f32 %v4435_v23, %v4434_v9  ;;  %v5783_v42 = vadd.f32 %v5782_v54, %v5781_v60  ;;  %3997 = vst.msk [vmem:[%s6817_s8 + $0xc18] sm:$0xff] %vm3609_vm3, %v10275_v57  ;;  %v1763_v0 = vpack.c.bf16 %v1518_v4, %v1517_v52  ;;  %v5786_v60 = vsel %vm3609_vm3, %v5149_v59, 0.0  ;;  %v12869_v4 = vld [vmem:[#allocation128_spill] sm:$0xff] }
 0x4ae   : > { %v5788_v38 = vsel %vm3609_vm3, %v5150_v20, 0.0  ;;  %v4441_v52 = vsel %vm3609_vm3, %v12868_v55, 0.0  ;;  %v5152_v59 = vmul.f32 %v12869_v4, %v12869_v4  ;;  %v5153_v20 = vmul.f32 %v12870_v39, %v12870_v39 }
 0x4af   : > { %v4438_v7 = vadd.f32 %v4437_v26, %v4436_v5  ;;  %v5785_v9 = vadd.f32 %v5784_v28, %v5783_v42  ;;  %6575 = vmatmul.msk.bf16.gmra.mxu2 %vm1800_vm2, %v1721_v27  ;;  %v5790_v27 = vsel %vm3609_vm3, %v5151_v16, 0.0  ;;  %v4443_v26 = vsel %vm3609_vm3, %v12869_v4, 0.0  ;;  %v535_v16 = vld [vmem:[%s6743_s29 + $0xa10] sm:$0xff] }
 0x4b0   : > { %6617 = vmatmul.msk.bf16.gmra.mxu3 %vm1800_vm2, %v1763_v0  ;;  %v10297_v28 = vpop.f32.mrf.mxu1  ;;  %v12872_v0 = vld [vmem:[#allocation134_spill] sm:$0xff]  ;;  %v985_v4 = vmul.f32 %v10239_v48, %v535_v16 }
 0x4b1   : > { %v4440_v54 = vadd.f32 %v4439_v1, %v4438_v7  ;;  %v5787_v23 = vadd.f32 %v5786_v60, %v5785_v9  ;;  %3830 = vst.msk [vmem:[%s6817_s8 + $0x6e0] sm:$0xff] %vm3609_vm3, %v10297_v28  ;;  %v10307_v7 = vpop.f32.mrf.mxu2  ;;  %v5154_v9 = vmul.f32 %v12872_v0, %v12872_v0 }
 0x4b2   : > { %12871 = vst [vmem:[#allocation43_spill] sm:$0xff] %v10307_v7 }
 0x4b3   : > { %v4442_v5 = vadd.f32 %v4441_v52, %v4440_v54  ;;  %v5789_v42 = vadd.f32 %v5788_v38, %v5787_v23  ;;  %3914 = vst.msk [vmem:[%s6817_s8 + $0x980] sm:$0xff] %vm3609_vm3, %v10307_v7  ;;  %v10314_v55 = vpop.f32.mrf.mxu3  ;;  %v536_v54 = vld [vmem:[%s6743_s29 + $0xa18] sm:$0xff]  ;;  %v619_v23 = vld [vmem:[%s6743_s29 + $0xcb0] sm:$0xff]  ;;  %v5792_v38 = vsel %vm3609_vm3, %v5152_v59, 0.0  ;;  %v4445_v52 = vsel %vm3609_vm3, %v12870_v39, 0.0 }
 0x4b4   : > { %12873 = vst [vmem:[#allocation45_spill] sm:$0xff] %v10314_v55  ;;  %v1069_v57 = vmul.f32 %v10239_v48, %v619_v23  ;;  %v5794_v7 = vsel %vm3609_vm3, %v5153_v20, 0.0  ;;  %v4447_v59 = vsel %vm3609_vm3, %v12872_v0, 0.0  ;;  %v5155_v39 = vmul.f32 %v12874_v12, %v12874_v12 }
 0x4b5   : > { %v4444_v60 = vadd.f32 %v4443_v26, %v4442_v5  ;;  %v5791_v1 = vadd.f32 %v5790_v27, %v5789_v42  ;;  %3998 = vst.msk [vmem:[%s6817_s8 + $0xc20] sm:$0xff] %vm3609_vm3, %v10314_v55  ;;  %v986_v5 = vmul.f32 %v10239_v48, %v536_v54  ;;  %v620_v42 = vld [vmem:[%s6743_s29 + $0xcb8] sm:$0xff]  ;;  %v5796_v16 = vsel %vm3609_vm3, %v5154_v9, 0.0 }
 0x4b6   : > { %v1070_v55 = vmul.f32 %v10239_v48, %v620_v42  ;;  %v1435_v23 = vadd.f32 %v10167_v24, %v985_v4  ;;  %v1519_v9 = vadd.f32 %v10167_v24, %v1069_v57  ;;  %v5157_v42 = vmul.f32 %v9325_v21, %v9325_v21 }
 0x4b7   : > { %v4446_v27 = vadd.f32 %v4445_v52, %v4444_v60  ;;  %v5793_v26 = vadd.f32 %v5792_v38, %v5791_v1  ;;  %v4449_v60 = vsel %vm3609_vm3, %v12874_v12, 0.0  ;;  %v12875_v1 = vld [vmem:[#allocation140_spill] sm:$0xff]  ;;  %v1436_v0 = vadd.f32 %v10167_v24, %v986_v5 }
 0x4b8   : > { %v5156_v20 = vmul.f32 %v12875_v1, %v12875_v1  ;;  %v10342_v3 = vpop.f32.mrf.mxu1  ;;  %v4451_v12 = vsel %vm3609_vm3, %v12875_v1, 0.0  ;;  %v5802_v1 = vsel %vm3609_vm3, %v5157_v42, 0.0 }
 0x4b9   : > { %v4448_v46 = vadd.f32 %v4447_v59, %v4446_v27  ;;  %v5795_v54 = vadd.f32 %v5794_v7, %v5793_v26  ;;  %v5798_v7 = vsel %vm3609_vm3, %v5155_v39, 0.0  ;;  %3831 = vst.msk [vmem:[%s6817_s8 + $0x6e8] sm:$0xff] %vm3609_vm3, %v10342_v3  ;;  %v10353_v4 = vpop.f32.mrf.mxu2  ;;  %v1722_v26 = vpack.c.bf16 %v1436_v0, %v1435_v23 }
 0x4ba   : > { %3915 = vst.msk [vmem:[%s6817_s8 + $0x988] sm:$0xff] %vm3609_vm3, %v10353_v4  ;;  %v5800_v59 = vsel %vm3609_vm3, %v5156_v20, 0.0  ;;  %v4453_v39 = vsel %vm3609_vm3, %v9325_v21, 0.0  ;;  %v4455_v23 = vsel %vm3609_vm3, %v9369_v13, 0.0  ;;  %v5159_v20 = vmul.f32 %v9406_v45, %v9406_v45 }
 0x4bb   : > { %v4450_v38 = vadd.f32 %v4449_v60, %v4448_v46  ;;  %v5797_v52 = vadd.f32 %v5796_v16, %v5795_v54  ;;  %v1520_v46 = vadd.f32 %v10167_v24, %v1070_v55  ;;  %v10359_v57 = vpop.f32.mrf.mxu3  ;;  %v5158_v16 = vmul.f32 %v9369_v13, %v9369_v13 }
 0x4bc   : > { %3999 = vst.msk [vmem:[%s6817_s8 + $0xc28] sm:$0xff] %vm3609_vm3, %v10359_v57  ;;  %v5806_v42 = vsel %vm3609_vm3, %v5159_v20, 0.0  ;;  %v622_v20 = vld [vmem:[%s6743_s29 + $0xcc8] sm:$0xff] }
 0x4bd   : > { %v5799_v5 = vadd.f32 %v5798_v7, %v5797_v52  ;;  %v4452_v27 = vadd.f32 %v4451_v12, %v4450_v38  ;;  %v1764_v55 = vpack.c.bf16 %v1520_v46, %v1519_v9  ;;  %v5804_v38 = vsel %vm3609_vm3, %v5158_v16, 0.0  ;;  %v538_v16 = vld [vmem:[%s6743_s29 + $0xa28] sm:$0xff] }
 0x4be   : > { %v4457_v52 = vsel %vm3609_vm3, %v9406_v45, 0.0  ;;  %v5160_v9 = vmul.f32 %v9453_v31, %v9453_v31  ;;  %v4459_v46 = vsel %vm3609_vm3, %v9453_v31, 0.0  ;;  %v5161_v45 = vmul.f32 %v9501_v17, %v9501_v17  ;;  %v537_v31 = vld [vmem:[%s6743_s29 + $0xa20] sm:$0xff] }
 0x4bf   : > { %v4454_v54 = vadd.f32 %v4453_v39, %v4452_v27  ;;  %v5801_v60 = vadd.f32 %v5800_v59, %v5799_v5  ;;  %6576 = vmatmul.msk.bf16.gmra.mxu2 %vm1800_vm2, %v1722_v26  ;;  %v5162_v59 = vmul.f32 %v9549_v62, %v9549_v62 }
 0x4c0   : > { %6618 = vmatmul.msk.bf16.gmra.mxu3 %vm1800_vm2, %v1764_v55  ;;  %v10381_v12 = vpop.f32.mrf.mxu1  ;;  %v621_v55 = vld [vmem:[%s6743_s29 + $0xcc0] sm:$0xff] }
 0x4c1   : > { %v5803_v0 = vadd.f32 %v5802_v1, %v5801_v60  ;;  %v4456_v21 = vadd.f32 %v4455_v23, %v4454_v54  ;;  %3832 = vst.msk [vmem:[%s6817_s8 + $0x6f0] sm:$0xff] %vm3609_vm3, %v10381_v12  ;;  %v10391_v5 = vpop.f32.mrf.mxu2  ;;  %v5808_v54 = vsel %vm3609_vm3, %v5160_v9, 0.0  ;;  %v4461_v60 = vsel %vm3609_vm3, %v9501_v17, 0.0 }
 0x4c2   : > { %3916 = vst.msk [vmem:[%s6817_s8 + $0x990] sm:$0xff] %vm3609_vm3, %v10391_v5  ;;  %v987_v1 = vmul.f32 %v10239_v48, %v537_v31  ;;  %v988_v23 = vmul.f32 %v10239_v48, %v538_v16  ;;  %v4463_v9 = vsel %vm3609_vm3, %v9549_v62, 0.0  ;;  %v5163_v17 = vmul.f32 %v9597_v63, %v9597_v63 }
 0x4c3   : > { %v4458_v13 = vadd.f32 %v4457_v52, %v4456_v21  ;;  %v5805_v7 = vadd.f32 %v5804_v38, %v5803_v0  ;;  %v10398_v39 = vpop.f32.mrf.mxu3  ;;  %v1071_v38 = vmul.f32 %v10239_v48, %v621_v55  ;;  %v5810_v52 = vsel %vm3609_vm3, %v5161_v45, 0.0 }
 0x4c4   : > { %4000 = vst.msk [vmem:[%s6817_s8 + $0xc30] sm:$0xff] %vm3609_vm3, %v10398_v39  ;;  %v5164_v45 = vmul.f32 %v9645_v10, %v9645_v10  ;;  %v1438_v62 = vadd.f32 %v10167_v24, %v988_v23 }
 0x4c5   : > { %v5807_v27 = vadd.f32 %v5806_v42, %v5805_v7  ;;  %v4460_v26 = vadd.f32 %v4459_v46, %v4458_v13  ;;  %v1072_v13 = vmul.f32 %v10239_v48, %v622_v20  ;;  %v5812_v46 = vsel %vm3609_vm3, %v5162_v59, 0.0 }
 0x4c6   : > { %v5814_v59 = vsel %vm3609_vm3, %v5163_v17, 0.0 }
 0x4c7   : > { %v5809_v0 = vadd.f32 %v5808_v54, %v5807_v27  ;;  %v4462_v21 = vadd.f32 %v4461_v60, %v4460_v26  ;;  %v4465_v27 = vsel %vm3609_vm3, %v9597_v63, 0.0  ;;  %v1437_v26 = vadd.f32 %v10167_v24, %v987_v1 }
 0x4c8   : > { %v10426_v55 = vpop.f32.mrf.mxu1  ;;  %v1521_v54 = vadd.f32 %v10167_v24, %v1071_v38  ;;  %v4467_v63 = vsel %vm3609_vm3, %v9645_v10, 0.0  ;;  %v5165_v60 = vmul.f32 %v9688_v50, %v9688_v50  ;;  %v1522_v23 = vadd.f32 %v10167_v24, %v1072_v13 }
 0x4c9   : > { %v5811_v7 = vadd.f32 %v5810_v52, %v5809_v0  ;;  %v4464_v42 = vadd.f32 %v4463_v9, %v4462_v21  ;;  %3833 = vst.msk [vmem:[%s6817_s8 + $0x6f8] sm:$0xff] %vm3609_vm3, %v10426_v55  ;;  %v10437_v1 = vpop.f32.mrf.mxu2  ;;  %v1723_v38 = vpack.c.bf16 %v1438_v62, %v1437_v26  ;;  %v5816_v10 = vsel %vm3609_vm3, %v5164_v45, 0.0 }
 0x4ca   : > { %3917 = vst.msk [vmem:[%s6817_s8 + $0x998] sm:$0xff] %vm3609_vm3, %v10437_v1  ;;  %v4469_v52 = vsel %vm3609_vm3, %v9688_v50, 0.0  ;;  %v5166_v9 = vmul.f32 %v9735_v8, %v9735_v8  ;;  %v1765_v17 = vpack.c.bf16 %v1522_v23, %v1521_v54  ;;  %v5168_v50 = vmul.f32 %v9819_v34, %v9819_v34 }
 0x4cb   : > { %v5813_v31 = vadd.f32 %v5812_v46, %v5811_v7  ;;  %v4466_v16 = vadd.f32 %v4465_v27, %v4464_v42  ;;  %v10443_v21 = vpop.f32.mrf.mxu3  ;;  %v5818_v42 = vsel %vm3609_vm3, %v5165_v60, 0.0  ;;  %v4471_v46 = vsel %vm3609_vm3, %v9735_v8, 0.0 }
 0x4cc   : > { %4001 = vst.msk [vmem:[%s6817_s8 + $0xc38] sm:$0xff] %vm3609_vm3, %v10443_v21  ;;  %v5167_v27 = vmul.f32 %v9776_v33, %v9776_v33  ;;  %v5820_v62 = vsel %vm3609_vm3, %v5166_v9, 0.0  ;;  %v5170_v60 = vmul.f32 %v9903_v30, %v9903_v30  ;;  %v4477_v9 = vsel %vm3609_vm3, %v9860_v53, 0.0 }
 0x4cd   : > { %v5815_v20 = vadd.f32 %v5814_v59, %v5813_v31  ;;  %v4468_v0 = vadd.f32 %v4467_v63, %v4466_v16  ;;  %v4473_v31 = vsel %vm3609_vm3, %v9776_v33, 0.0  ;;  %v4475_v59 = vsel %vm3609_vm3, %v9819_v34, 0.0  ;;  %v540_v34 = vld [vmem:[%s6743_s29 + $0xa38] sm:$0xff] }
 0x4ce   : > { %v5822_v54 = vsel %vm3609_vm3, %v5167_v27, 0.0  ;;  %v5169_v63 = vmul.f32 %v9860_v53, %v9860_v53  ;;  %v5828_v53 = vsel %vm3609_vm3, %v5170_v60, 0.0 }
 0x4cf   : > { %v5817_v13 = vadd.f32 %v5816_v10, %v5815_v20  ;;  %v4470_v7 = vadd.f32 %v4469_v52, %v4468_v0  ;;  %6577 = vmatmul.msk.bf16.gmra.mxu2 %vm1800_vm2, %v1723_v38  ;;  %v5824_v0 = vsel %vm3609_vm3, %v5168_v50, 0.0  ;;  %v539_v10 = vld [vmem:[%s6743_s29 + $0xa30] sm:$0xff]  ;;  %v4479_v50 = vsel %vm3609_vm3, %v9903_v30, 0.0 }
 0x4d0   : > { %6619 = vmatmul.msk.bf16.gmra.mxu3 %vm1800_vm2, %v1765_v17  ;;  %v623_v52 = vld [vmem:[%s6743_s29 + $0xcd0] sm:$0xff]  ;;  %v989_v17 = vmul.f32 %v10239_v48, %v539_v10  ;;  %v4483_v10 = vsel %vm3609_vm3, %v9987_v15, 0.0 }
 0x4d1   : > { %v5819_v45 = vadd.f32 %v5818_v42, %v5817_v13  ;;  %v4472_v26 = vadd.f32 %v4471_v46, %v4470_v7  ;;  %v10472_v23 = vpop.f32.mrf.mxu2  ;;  %v990_v13 = vmul.f32 %v10239_v48, %v540_v34  ;;  %v624_v7 = vld [vmem:[%s6743_s29 + $0xcd8] sm:$0xff]  ;;  %v1073_v42 = vmul.f32 %v10239_v48, %v623_v52 }
 0x4d2   : > { %3918 = vst.msk [vmem:[%s6817_s8 + $0x9a0] sm:$0xff] %vm3609_vm3, %v10472_v23  ;;  %v5173_v34 = vmul.f32 %v10035_v61, %v10035_v61 }
 0x4d3   : > { %v5821_v8 = vadd.f32 %v5820_v62, %v5819_v45  ;;  %v4474_v16 = vadd.f32 %v4473_v31, %v4472_v26  ;;  %v10478_v38 = vpop.f32.mrf.mxu3  ;;  %v1074_v45 = vmul.f32 %v10239_v48, %v624_v7  ;;  %v5826_v26 = vsel %vm3609_vm3, %v5169_v63, 0.0 }
 0x4d4   : > { %4002 = vst.msk [vmem:[%s6817_s8 + $0xc40] sm:$0xff] %vm3609_vm3, %v10478_v38  ;;  %v5171_v62 = vmul.f32 %v9944_v25, %v9944_v25  ;;  %v5172_v63 = vmul.f32 %v9987_v15, %v9987_v15  ;;  %v1523_v30 = vadd.f32 %v10167_v24, %v1073_v42  ;;  %v4485_v42 = vsel %vm3609_vm3, %v10035_v61, 0.0 }
 0x4d5   : > { %v5823_v33 = vadd.f32 %v5822_v54, %v5821_v8  ;;  %v4476_v20 = vadd.f32 %v4475_v59, %v4474_v16  ;;  %v1439_v16 = vadd.f32 %v10167_v24, %v989_v17  ;;  %v1440_v54 = vadd.f32 %v10167_v24, %v990_v13 }
 0x4d6   : > { %v4481_v59 = vsel %vm3609_vm3, %v9944_v25, 0.0  ;;  %v1524_v60 = vadd.f32 %v10167_v24, %v1074_v45  ;;  %v5832_v7 = vsel %vm3609_vm3, %v5172_v63, 0.0  ;;  %v5174_v15 = vmul.f32 %v10078_v6, %v10078_v6 }
 0x4d7   : > { %v5825_v46 = vadd.f32 %v5824_v0, %v5823_v33  ;;  %v4478_v27 = vadd.f32 %v4477_v9, %v4476_v20  ;;  %v5830_v0 = vsel %vm3609_vm3, %v5171_v62, 0.0  ;;  %v1724_v13 = vpack.c.bf16 %v1440_v54, %v1439_v16 }
 0x4d8   : > { %v5176_v61 = vmul.f32 %v10162_v22, %v10162_v22  ;;  %v4489_v16 = vsel %vm3609_vm3, %v10119_v43, 0.0  ;;  %v4491_v63 = vsel %vm3609_vm3, %v10162_v22, 0.0  ;;  %v542_v22 = vld [vmem:[%s6743_s29 + $0xa48] sm:$0xff] }
 0x4d9   : > { %v5827_v31 = vadd.f32 %v5826_v26, %v5825_v46  ;;  %v4480_v8 = vadd.f32 %v4479_v50, %v4478_v27  ;;  %v10512_v52 = vpop.f32.mrf.mxu2  ;;  %v1766_v46 = vpack.c.bf16 %v1524_v60, %v1523_v30  ;;  %v5834_v26 = vsel %vm3609_vm3, %v5173_v34, 0.0  ;;  %v541_v34 = vld [vmem:[%s6743_s29 + $0xa40] sm:$0xff] }
 0x4da   : > { %3919 = vst.msk [vmem:[%s6817_s8 + $0x9a8] sm:$0xff] %vm3609_vm3, %v10512_v52  ;;  %v4487_v50 = vsel %vm3609_vm3, %v10078_v6, 0.0  ;;  %v5177_v30 = vmul.f32 %v10208_v2, %v10208_v2  ;;  %v5178_v60 = vmul.f32 %v10258_v29, %v10258_v29 }
 0x4db   : > { %v5829_v33 = vadd.f32 %v5828_v53, %v5827_v31  ;;  %v4482_v20 = vadd.f32 %v4481_v59, %v4480_v8  ;;  %v10517_v17 = vpop.f32.mrf.mxu3  ;;  %v5175_v53 = vmul.f32 %v10119_v43, %v10119_v43  ;;  %v5836_v8 = vsel %vm3609_vm3, %v5174_v15, 0.0 }
 0x4dc   : > { %4003 = vst.msk [vmem:[%s6817_s8 + $0xc48] sm:$0xff] %vm3609_vm3, %v10517_v17 }
 0x4dd   : > { %v5831_v25 = vadd.f32 %v5830_v0, %v5829_v33  ;;  %v4484_v9 = vadd.f32 %v4483_v10, %v4482_v20  ;;  %v5838_v59 = vsel %vm3609_vm3, %v5175_v53, 0.0  ;;  %v5840_v0 = vsel %vm3609_vm3, %v5176_v61, 0.0 }
 0x4de   : > { %v5179_v53 = vmul.f32 %v10297_v28, %v10297_v28 }
 0x4df   : > { %v5833_v27 = vadd.f32 %v5832_v7, %v5831_v25  ;;  %v4486_v45 = vadd.f32 %v4485_v42, %v4484_v9  ;;  %6578 = vmatmul.msk.bf16.gmra.mxu2 %vm1800_vm2, %v1724_v13  ;;  %v625_v25 = vld [vmem:[%s6743_s29 + $0xce0] sm:$0xff]  ;;  %v4493_v9 = vsel %vm3609_vm3, %v10208_v2, 0.0  ;;  %v991_v13 = vmul.f32 %v10239_v48, %v541_v34  ;;  %v626_v42 = vld [vmem:[%s6743_s29 + $0xce8] sm:$0xff] }
 0x4e0   : > { %6620 = vmatmul.msk.bf16.gmra.mxu3 %vm1800_vm2, %v1766_v46  ;;  %v992_v7 = vmul.f32 %v10239_v48, %v542_v22  ;;  %v1075_v15 = vmul.f32 %v10239_v48, %v625_v25  ;;  %v5844_v2 = vsel %vm3609_vm3, %v5178_v60, 0.0  ;;  %v4499_v60 = vsel %vm3609_vm3, %v10342_v3, 0.0 }
 0x4e1   : > { %v5835_v62 = vadd.f32 %v5834_v26, %v5833_v27  ;;  %v4488_v31 = vadd.f32 %v4487_v50, %v4486_v45  ;;  %v10546_v33 = vpop.f32.mrf.mxu2  ;;  %v1076_v45 = vmul.f32 %v10239_v48, %v626_v42  ;;  %v5842_v26 = vsel %vm3609_vm3, %v5177_v30, 0.0 }
 0x4e2   : > { %3920 = vst.msk [vmem:[%s6817_s8 + $0x9b0] sm:$0xff] %vm3609_vm3, %v10546_v33  ;;  %v4495_v50 = vsel %vm3609_vm3, %v10258_v29, 0.0  ;;  %v1441_v61 = vadd.f32 %v10167_v24, %v991_v13  ;;  %v1525_v29 = vadd.f32 %v10167_v24, %v1075_v15  ;;  %v5846_v30 = vsel %vm3609_vm3, %v5179_v53, 0.0  ;;  %v12878_v15 = vld [vmem:[#allocation2_spill] sm:$0xff] }
 0x4e3   : > { %v5837_v6 = vadd.f32 %v5836_v8, %v5835_v62  ;;  %v4490_v54 = vadd.f32 %v4489_v16, %v4488_v31  ;;  %v10552_v10 = vpop.f32.mrf.mxu3  ;;  %v1442_v8 = vadd.f32 %v10167_v24, %v992_v7  ;;  %v4497_v16 = vsel %vm3609_vm3, %v10297_v28, 0.0 }
 0x4e4   : > { %12876 = vst [vmem:[#allocation47_spill] sm:$0xff] %v10552_v10  ;;  %v4505_v53 = vsel %vm3609_vm3, %v12878_v15, 0.0 }
 0x4e5   : > { %v5839_v43 = vadd.f32 %v5838_v59, %v5837_v6  ;;  %v4492_v20 = vadd.f32 %v4491_v63, %v4490_v54  ;;  %4004 = vst.msk [vmem:[%s6817_s8 + $0xc50] sm:$0xff] %vm3609_vm3, %v10552_v10  ;;  %v5180_v6 = vmul.f32 %v10342_v3, %v10342_v3  ;;  %v1526_v54 = vadd.f32 %v10167_v24, %v1076_v45 }
 0x4e6   : > { %v1725_v22 = vpack.c.bf16 %v1442_v8, %v1441_v61  ;;  %v5182_v3 = vmul.f32 %v10426_v55, %v10426_v55  ;;  %v4503_v45 = vsel %vm3609_vm3, %v10426_v55, 0.0 }
 0x4e7   : > { %v5841_v46 = vadd.f32 %v5840_v0, %v5839_v43  ;;  %v4494_v27 = vadd.f32 %v4493_v9, %v4492_v20  ;;  %v5181_v43 = vmul.f32 %v10381_v12, %v10381_v12  ;;  %v5848_v25 = vsel %vm3609_vm3, %v5180_v6, 0.0 }
 0x4e8   : > { %v4501_v9 = vsel %vm3609_vm3, %v10381_v12, 0.0  ;;  %v1767_v13 = vpack.c.bf16 %v1526_v54, %v1525_v29  ;;  %v12881_v29 = vld [vmem:[#allocation5_spill] sm:$0xff] }
 0x4e9   : > { %v5843_v62 = vadd.f32 %v5842_v26, %v5841_v46  ;;  %v4496_v31 = vadd.f32 %v4495_v50, %v4494_v27  ;;  %v10586_v20 = vpop.f32.mrf.mxu2  ;;  %v5183_v46 = vmul.f32 %v12878_v15, %v12878_v15  ;;  %v5850_v27 = vsel %vm3609_vm3, %v5181_v43, 0.0  ;;  %v12879_v26 = vld [vmem:[#allocation3_spill] sm:$0xff] }
 0x4ea   : > { %3921 = vst.msk [vmem:[%s6817_s8 + $0x9b8] sm:$0xff] %vm3609_vm3, %v10586_v20  ;;  %v5184_v12 = vmul.f32 %v12879_v26, %v12879_v26  ;;  %v4507_v8 = vsel %vm3609_vm3, %v12879_v26, 0.0  ;;  %v5186_v54 = vmul.f32 %v12881_v29, %v12881_v29 }
 0x4eb   : > { %v5845_v59 = vadd.f32 %v5844_v2, %v5843_v62  ;;  %v4498_v63 = vadd.f32 %v4497_v16, %v4496_v31  ;;  %v10591_v34 = vpop.f32.mrf.mxu3  ;;  %v5852_v62 = vsel %vm3609_vm3, %v5182_v3, 0.0  ;;  %v5854_v61 = vsel %vm3609_vm3, %v5183_v46, 0.0  ;;  %v12880_v16 = vld [vmem:[#allocation4_spill] sm:$0xff] }
 0x4ec   : > { %12877 = vst [vmem:[#allocation49_spill] sm:$0xff] %v10591_v34  ;;  %v5185_v6 = vmul.f32 %v12880_v16, %v12880_v16  ;;  %v5860_v26 = vsel %vm3609_vm3, %v5186_v54, 0.0 }
 0x4ed   : > { %v5847_v28 = vadd.f32 %v5846_v30, %v5845_v59  ;;  %v4500_v0 = vadd.f32 %v4499_v60, %v4498_v63  ;;  %4005 = vst.msk [vmem:[%s6817_s8 + $0xc58] sm:$0xff] %vm3609_vm3, %v10591_v34  ;;  %v5856_v63 = vsel %vm3609_vm3, %v5184_v12, 0.0  ;;  %v12883_v12 = vld [vmem:[#allocation6_spill] sm:$0xff] }
 0x4ef   : > { %v5849_v7 = vadd.f32 %v5848_v25, %v5847_v28  ;;  %v4502_v42 = vadd.f32 %v4501_v9, %v4500_v0  ;;  %6579 = vmatmul.msk.bf16.gmra.mxu2 %vm1800_vm2, %v1725_v22  ;;  %v543_v28 = vld [vmem:[%s6743_s29 + $0xa50] sm:$0xff]  ;;  %v544_v0 = vld [vmem:[%s6743_s29 + $0xa58] sm:$0xff]  ;;  %v4509_v25 = vsel %vm3609_vm3, %v12880_v16, 0.0 }
 0x4f0   : > { %6621 = vmatmul.msk.bf16.gmra.mxu3 %vm1800_vm2, %v1767_v13  ;;  %v627_v22 = vld [vmem:[%s6743_s29 + $0xcf0] sm:$0xff]  ;;  %v993_v9 = vmul.f32 %v10239_v48, %v543_v28  ;;  %v994_v3 = vmul.f32 %v10239_v48, %v544_v0  ;;  %v628_v13 = vld [vmem:[%s6743_s29 + $0xcf8] sm:$0xff] }
 0x4f1   : > { %v5851_v50 = vadd.f32 %v5850_v27, %v5849_v7  ;;  %v4504_v2 = vadd.f32 %v4503_v45, %v4502_v42  ;;  %v1077_v7 = vmul.f32 %v10239_v48, %v627_v22  ;;  %v1078_v46 = vmul.f32 %v10239_v48, %v628_v13 }
 0x4f2   : > { %v10620_v59 = vpop.f32.mrf.mxu2  ;;  %v5858_v27 = vsel %vm3609_vm3, %v5185_v6, 0.0  ;;  %v4511_v45 = vsel %vm3609_vm3, %v12881_v29, 0.0 }
 0x4f3   : > { %v4506_v31 = vadd.f32 %v4505_v53, %v4504_v2  ;;  %v5853_v55 = vadd.f32 %v5852_v62, %v5851_v50  ;;  %3922 = vst.msk [vmem:[%s6817_s8 + $0x9c0] sm:$0xff] %vm3609_vm3, %v10620_v59  ;;  %v10626_v43 = vpop.f32.mrf.mxu3  ;;  %v5187_v50 = vmul.f32 %v12883_v12, %v12883_v12  ;;  %v1443_v62 = vadd.f32 %v10167_v24, %v993_v9 }
 0x4f4   : > { %12882 = vst [vmem:[#allocation51_spill] sm:$0xff] %v10626_v43  ;;  %v1527_v16 = vadd.f32 %v10167_v24, %v1077_v7  ;;  %v1528_v6 = vadd.f32 %v10167_v24, %v1078_v46 }
 0x4f5   : > { %v4508_v30 = vadd.f32 %v4507_v8, %v4506_v31  ;;  %v5855_v60 = vadd.f32 %v5854_v61, %v5853_v55  ;;  %4006 = vst.msk [vmem:[%s6817_s8 + $0xc60] sm:$0xff] %vm3609_vm3, %v10626_v43  ;;  %v1444_v31 = vadd.f32 %v10167_v24, %v994_v3  ;;  %v4513_v55 = vsel %vm3609_vm3, %v12883_v12, 0.0  ;;  %v12884_v61 = vld [vmem:[#allocation8_spill] sm:$0xff] }
 0x4f6   : > { %v5188_v8 = vmul.f32 %v12884_v61, %v12884_v61  ;;  %v1768_v46 = vpack.c.bf16 %v1528_v6, %v1527_v16 }
 0x4f7   : > { %v4510_v42 = vadd.f32 %v4509_v25, %v4508_v30  ;;  %v5857_v15 = vadd.f32 %v5856_v63, %v5855_v60  ;;  %v5862_v63 = vsel %vm3609_vm3, %v5187_v50, 0.0  ;;  %v4515_v30 = vsel %vm3609_vm3, %v12884_v61, 0.0  ;;  %v12885_v60 = vld [vmem:[#allocation10_spill] sm:$0xff] }
 0x4f8   : > { %v5189_v28 = vmul.f32 %v12885_v60, %v12885_v60  ;;  %v1726_v3 = vpack.c.bf16 %v1444_v31, %v1443_v62  ;;  %v5864_v13 = vsel %vm3609_vm3, %v5188_v8, 0.0  ;;  %v4517_v7 = vsel %vm3609_vm3, %v12885_v60, 0.0  ;;  %v12888_v50 = vld [vmem:[#allocation14_spill] sm:$0xff]  ;;  %v12891_v60 = vld [vmem:[#allocation20_spill] sm:$0xff] }
 0x4f9   : > { %v4512_v2 = vadd.f32 %v4511_v45, %v4510_v42  ;;  %v5859_v53 = vadd.f32 %v5858_v27, %v5857_v15  ;;  %v12887_v42 = vld [vmem:[#allocation12_spill] sm:$0xff]  ;;  %v4521_v8 = vsel %vm3609_vm3, %v12888_v50, 0.0 }
 0x4fa   : > { %v10660_v0 = vpop.f32.mrf.mxu2  ;;  %v5190_v15 = vmul.f32 %v12887_v42, %v12887_v42  ;;  %v4519_v12 = vsel %vm3609_vm3, %v12887_v42, 0.0  ;;  %v545_v42 = vld [vmem:[%s6743_s29 + $0xa60] sm:$0xff] }
 0x4fb   : > { %v4514_v29 = vadd.f32 %v4513_v55, %v4512_v2  ;;  %v5861_v54 = vadd.f32 %v5860_v26, %v5859_v53  ;;  %3923 = vst.msk [vmem:[%s6817_s8 + $0x9c8] sm:$0xff] %vm3609_vm3, %v10660_v0  ;;  %v10665_v9 = vpop.f32.mrf.mxu3  ;;  %v5866_v26 = vsel %vm3609_vm3, %v5189_v28, 0.0  ;;  %v5191_v2 = vmul.f32 %v12888_v50, %v12888_v50  ;;  %v12889_v53 = vld [vmem:[#allocation16_spill] sm:$0xff] }
 0x4fc   : > { %12886 = vst [vmem:[#allocation53_spill] sm:$0xff] %v10665_v9  ;;  %v5192_v62 = vmul.f32 %v12889_v53, %v12889_v53  ;;  %v5868_v61 = vsel %vm3609_vm3, %v5190_v15, 0.0  ;;  %v5194_v28 = vmul.f32 %v12891_v60, %v12891_v60  ;;  %v546_v15 = vld [vmem:[%s6743_s29 + $0xa68] sm:$0xff] }
 0x4fd   : > { %v4516_v22 = vadd.f32 %v4515_v30, %v4514_v29  ;;  %v5863_v25 = vadd.f32 %v5862_v63, %v5861_v54  ;;  %4007 = vst.msk [vmem:[%s6817_s8 + $0xc68] sm:$0xff] %vm3609_vm3, %v10665_v9  ;;  %v5870_v29 = vsel %vm3609_vm3, %v5191_v2, 0.0  ;;  %v4523_v54 = vsel %vm3609_vm3, %v12889_v53, 0.0  ;;  %v12890_v63 = vld [vmem:[#allocation18_spill] sm:$0xff] }
 0x4fe   : > { %v5193_v30 = vmul.f32 %v12890_v63, %v12890_v63 }
 0x4ff   : > { %v4518_v27 = vadd.f32 %v4517_v7, %v4516_v22  ;;  %v5865_v45 = vadd.f32 %v5864_v13, %v5863_v25  ;;  %6580 = vmatmul.msk.bf16.gmra.mxu2 %vm1800_vm2, %v1726_v3  ;;  %v5872_v25 = vsel %vm3609_vm3, %v5192_v62, 0.0 }
 0x500   : > { %6622 = vmatmul.msk.bf16.gmra.mxu3 %vm1800_vm2, %v1768_v46  ;;  %v629_v46 = vld [vmem:[%s6743_s29 + $0xd00] sm:$0xff] }
 0x501   : > { %v4520_v31 = vadd.f32 %v4519_v12, %v4518_v27  ;;  %v5867_v55 = vadd.f32 %v5866_v26, %v5865_v45  ;;  %v4525_v27 = vsel %vm3609_vm3, %v12890_v63, 0.0  ;;  %v995_v45 = vmul.f32 %v10239_v48, %v545_v42  ;;  %v630_v12 = vld [vmem:[%s6743_s29 + $0xd08] sm:$0xff] }
 0x502   : > { %v10694_v22 = vpop.f32.mrf.mxu2  ;;  %v996_v26 = vmul.f32 %v10239_v48, %v546_v15  ;;  %v1079_v50 = vmul.f32 %v10239_v48, %v629_v46  ;;  %v1080_v62 = vmul.f32 %v10239_v48, %v630_v12 }
 0x503   : > { %v4522_v16 = vadd.f32 %v4521_v8, %v4520_v31  ;;  %v5869_v6 = vadd.f32 %v5868_v61, %v5867_v55  ;;  %3924 = vst.msk [vmem:[%s6817_s8 + $0x9d0] sm:$0xff] %vm3609_vm3, %v10694_v22  ;;  %v10700_v7 = vpop.f32.mrf.mxu3  ;;  %v5874_v31 = vsel %vm3609_vm3, %v5193_v30, 0.0  ;;  %v4527_v55 = vsel %vm3609_vm3, %v12891_v60, 0.0  ;;  %v12893_v8 = vld [vmem:[#allocation22_spill] sm:$0xff] }
 0x504   : > { %12892 = vst [vmem:[#allocation56_spill] sm:$0xff] %v10700_v7  ;;  %v5876_v61 = vsel %vm3609_vm3, %v5194_v28, 0.0  ;;  %v1446_v63 = vadd.f32 %v10167_v24, %v996_v26  ;;  %v1529_v60 = vadd.f32 %v10167_v24, %v1079_v50  ;;  %v1530_v28 = vadd.f32 %v10167_v24, %v1080_v62 }
 0x505   : > { %v4524_v3 = vadd.f32 %v4523_v54, %v4522_v16  ;;  %v5871_v13 = vadd.f32 %v5870_v29, %v5869_v6  ;;  %4008 = vst.msk [vmem:[%s6817_s8 + $0xc70] sm:$0xff] %vm3609_vm3, %v10700_v7  ;;  %v5195_v16 = vmul.f32 %v12893_v8, %v12893_v8  ;;  %v1445_v54 = vadd.f32 %v10167_v24, %v995_v45 }
 0x507   : > { %v4526_v2 = vadd.f32 %v4525_v27, %v4524_v3  ;;  %v5873_v53 = vadd.f32 %v5872_v25, %v5871_v13  ;;  %v4529_v25 = vsel %vm3609_vm3, %v12893_v8, 0.0  ;;  %v12894_v3 = vld [vmem:[#allocation24_spill] sm:$0xff]  ;;  %v5878_v15 = vsel %vm3609_vm3, %v5195_v16, 0.0  ;;  %v12895_v27 = vld [vmem:[#allocation26_spill] sm:$0xff] }
 0x508   : > { %v5196_v30 = vmul.f32 %v12894_v3, %v12894_v3  ;;  %v4531_v46 = vsel %vm3609_vm3, %v12894_v3, 0.0  ;;  %v5197_v45 = vmul.f32 %v12895_v27, %v12895_v27  ;;  %v1727_v24 = vpack.c.bf16 %v1446_v63, %v1445_v54  ;;  %v12898_v54 = vld [vmem:[#allocation30_spill] sm:$0xff] }
 0x509   : > { %v4528_v6 = vadd.f32 %v4527_v55, %v4526_v2  ;;  %v5875_v29 = vadd.f32 %v5874_v31, %v5873_v53  ;;  %v4533_v62 = vsel %vm3609_vm3, %v12895_v27, 0.0  ;;  %v12897_v31 = vld [vmem:[#allocation28_spill] sm:$0xff]  ;;  %v5199_v63 = vmul.f32 %v12898_v54, %v12898_v54 }
 0x50a   : > { %v10734_v26 = vpop.f32.mrf.mxu2  ;;  %v5880_v53 = vsel %vm3609_vm3, %v5196_v30, 0.0  ;;  %v5198_v55 = vmul.f32 %v12897_v31, %v12897_v31 }
 0x50b   : > { %v4530_v13 = vadd.f32 %v4529_v25, %v4528_v6  ;;  %v5877_v42 = vadd.f32 %v5876_v61, %v5875_v29  ;;  %3925 = vst.msk [vmem:[%s6817_s8 + $0x9d8] sm:$0xff] %vm3609_vm3, %v10734_v26  ;;  %v10739_v50 = vpop.f32.mrf.mxu3  ;;  %v1769_v61 = vpack.c.bf16 %v1530_v28, %v1529_v60  ;;  %v5882_v6 = vsel %vm3609_vm3, %v5197_v45, 0.0  ;;  %v12899_v25 = vld [vmem:[#allocation32_spill] sm:$0xff]  ;;  %v12900_v45 = vld [vmem:[#allocation34_spill] sm:$0xff] }
 0x50c   : > { %12896 = vst [vmem:[#allocation59_spill] sm:$0xff] %v10739_v50  ;;  %v4535_v29 = vsel %vm3609_vm3, %v12897_v31, 0.0  ;;  %v5200_v3 = vmul.f32 %v12899_v25, %v12899_v25  ;;  %v5884_v60 = vsel %vm3609_vm3, %v5198_v55, 0.0  ;;  %v4537_v28 = vsel %vm3609_vm3, %v12898_v54, 0.0 }
 0x50d   : > { %v4532_v12 = vadd.f32 %v4531_v46, %v4530_v13  ;;  %v5879_v2 = vadd.f32 %v5878_v15, %v5877_v42  ;;  %4009 = vst.msk [vmem:[%s6817_s8 + $0xc78] sm:$0xff] %vm3609_vm3, %v10739_v50  ;;  %v5886_v46 = vsel %vm3609_vm3, %v5199_v63, 0.0  ;;  %v4539_v27 = vsel %vm3609_vm3, %v12899_v25, 0.0  ;;  %v632_v25 = vld [vmem:[%s6743_s29 + $0xd18] sm:$0xff] }
 0x50f   : > { %v4534_v8 = vadd.f32 %v4533_v62, %v4532_v12  ;;  %v5881_v16 = vadd.f32 %v5880_v53, %v5879_v2  ;;  %6581 = vmatmul.msk.bf16.gmra.mxu2 %vm1800_vm2, %v1727_v24  ;;  %v5201_v12 = vmul.f32 %v12900_v45, %v12900_v45  ;;  %v12901_v2 = vld [vmem:[#allocation36_spill] sm:$0xff]  ;;  %v5888_v62 = vsel %vm3609_vm3, %v5200_v3, 0.0 }
 0x510   : > { %6623 = vmatmul.msk.bf16.gmra.mxu3 %vm1800_vm2, %v1769_v61  ;;  %v5202_v24 = vmul.f32 %v12901_v2, %v12901_v2 }
 0x511   : > { %v4536_v30 = vadd.f32 %v4535_v29, %v4534_v8  ;;  %v5883_v13 = vadd.f32 %v5882_v6, %v5881_v16  ;;  %v547_v8 = vld [vmem:[%s6743_s29 + $0xa70] sm:$0xff]  ;;  %v548_v16 = vld [vmem:[%s6743_s29 + $0xa78] sm:$0xff]  ;;  %v4541_v29 = vsel %vm3609_vm3, %v12900_v45, 0.0 }
 0x512   : > { %v10768_v53 = vpop.f32.mrf.mxu2  ;;  %v631_v6 = vld [vmem:[%s6743_s29 + $0xd10] sm:$0xff]  ;;  %v997_v54 = vmul.f32 %v10239_v48, %v547_v8  ;;  %v998_v63 = vmul.f32 %v10239_v48, %v548_v16 }
 0x513   : > { %v4538_v42 = vadd.f32 %v4537_v28, %v4536_v30  ;;  %v5885_v15 = vadd.f32 %v5884_v60, %v5883_v13  ;;  %3926 = vst.msk [vmem:[%s6817_s8 + $0x9e0] sm:$0xff] %vm3609_vm3, %v10768_v53  ;;  %v10774_v61 = vpop.f32.mrf.mxu3  ;;  %v1081_v3 = vmul.f32 %v10239_v48, %v631_v6  ;;  %v1082_v60 = vmul.f32 %v10239_v48, %v632_v25 }
 0x514   : > { %12902 = vst [vmem:[#allocation62_spill] sm:$0xff] %v10774_v61  ;;  %v5890_v28 = vsel %vm3609_vm3, %v5201_v12, 0.0 }
 0x515   : > { %v4540_v31 = vadd.f32 %v4539_v27, %v4538_v42  ;;  %v5887_v55 = vadd.f32 %v5886_v46, %v5885_v15  ;;  %4010 = vst.msk [vmem:[%s6817_s8 + $0xc80] sm:$0xff] %vm3609_vm3, %v10774_v61  ;;  %v4543_v42 = vsel %vm3609_vm3, %v12901_v2, 0.0  ;;  %v5892_v15 = vsel %vm3609_vm3, %v5202_v24, 0.0  ;;  %v12903_v46 = vld [vmem:[#allocation38_spill] sm:$0xff]  ;;  %v12914_v61 = vld [vmem:[#allocation57_spill] sm:$0xff] }
 0x516   : > { %v5203_v27 = vmul.f32 %v12903_v46, %v12903_v46  ;;  %v4545_v2 = vsel %vm3609_vm3, %v12903_v46, 0.0 }
 0x517   : > { %v4542_v30 = vadd.f32 %v4541_v29, %v4540_v31  ;;  %v5889_v13 = vadd.f32 %v5888_v62, %v5887_v55  ;;  %v10798_v31 = vld [vmem:[%s12276_s1 + $0x1] ss:$0 sm:$0xff]  ;;  %v12904_v62 = vld [vmem:[#allocation40_spill] sm:$0xff] }
 0x518   : > { %v1447_v48 = vadd.f32 %v10798_v31, %v997_v54  ;;  %v1448_v12 = vadd.f32 %v10798_v31, %v998_v63  ;;  %v5204_v24 = vmul.f32 %v12904_v62, %v12904_v62  ;;  %v1531_v55 = vadd.f32 %v10798_v31, %v1081_v3 }
 0x519   : > { %v4544_v45 = vadd.f32 %v4543_v42, %v4542_v30  ;;  %v5891_v8 = vadd.f32 %v5890_v28, %v5889_v13  ;;  %v1532_v16 = vadd.f32 %v10798_v31, %v1082_v60  ;;  %v5894_v25 = vsel %vm3609_vm3, %v5203_v27, 0.0  ;;  %v12905_v30 = vld [vmem:[#allocation42_spill] sm:$0xff]  ;;  %v12907_v27 = vld [vmem:[#allocation44_spill] sm:$0xff] }
 0x51a   : > { %v4547_v54 = vsel %vm3609_vm3, %v12904_v62, 0.0  ;;  %v5205_v63 = vmul.f32 %v12905_v30, %v12905_v30  ;;  %v10813_v13 = vpop.f32.mrf.mxu2  ;;  %v1728_v60 = vpack.c.bf16 %v1448_v12, %v1447_v48  ;;  %v4549_v46 = vsel %vm3609_vm3, %v12905_v30, 0.0  ;;  %v12908_v48 = vld [vmem:[#allocation46_spill] sm:$0xff] }
 0x51b   : > { %v4546_v6 = vadd.f32 %v4545_v2, %v4544_v45  ;;  %v5893_v29 = vadd.f32 %v5892_v15, %v5891_v8  ;;  %3927 = vst.msk [vmem:[%s6817_s8 + $0x9e8] sm:$0xff] %vm3609_vm3, %v10813_v13  ;;  %v10818_v3 = vpop.f32.mrf.mxu3  ;;  %v5896_v15 = vsel %vm3609_vm3, %v5204_v24, 0.0  ;;  %v5206_v45 = vmul.f32 %v12907_v27, %v12907_v27 }
 0x51c   : > { %12906 = vst [vmem:[#allocation65_spill] sm:$0xff] %v10818_v3  ;;  %v1770_v8 = vpack.c.bf16 %v1532_v16, %v1531_v55  ;;  %v5207_v12 = vmul.f32 %v12908_v48, %v12908_v48  ;;  %v4553_v55 = vsel %vm3609_vm3, %v12908_v48, 0.0  ;;  %v12909_v16 = vld [vmem:[#allocation48_spill] sm:$0xff]  ;;  %v634_v48 = vld [vmem:[%s6743_s29 + $0xd28] sm:$0xff] }
 0x51d   : > { %v4548_v28 = vadd.f32 %v4547_v54, %v4546_v6  ;;  %v5895_v42 = vadd.f32 %v5894_v25, %v5893_v29  ;;  %4011 = vst.msk [vmem:[%s6817_s8 + $0xc88] sm:$0xff] %vm3609_vm3, %v10818_v3  ;;  %v5898_v6 = vsel %vm3609_vm3, %v5205_v63, 0.0  ;;  %v4551_v29 = vsel %vm3609_vm3, %v12907_v27, 0.0 }
 0x51e   : > { %v5900_v54 = vsel %vm3609_vm3, %v5206_v45, 0.0  ;;  %v5208_v30 = vmul.f32 %v12909_v16, %v12909_v16  ;;  %v12911_v45 = vld [vmem:[#allocation52_spill] sm:$0xff] }
 0x51f   : > { %v4550_v2 = vadd.f32 %v4549_v46, %v4548_v28  ;;  %v5897_v62 = vadd.f32 %v5896_v15, %v5895_v42  ;;  %6582 = vmatmul.msk.bf16.gmra.mxu2 %vm1800_vm2, %v1728_v60  ;;  %v5902_v42 = vsel %vm3609_vm3, %v5207_v12, 0.0  ;;  %v4555_v60 = vsel %vm3609_vm3, %v12909_v16, 0.0  ;;  %v12910_v15 = vld [vmem:[#allocation50_spill] sm:$0xff] }
 0x520   : > { %6624 = vmatmul.msk.bf16.gmra.mxu3 %vm1800_vm2, %v1770_v8  ;;  %v5209_v46 = vmul.f32 %v12910_v15, %v12910_v15  ;;  %v5904_v12 = vsel %vm3609_vm3, %v5208_v30, 0.0  ;;  %v4559_v30 = vsel %vm3609_vm3, %v12911_v45, 0.0 }
 0x521   : > { %v4552_v24 = vadd.f32 %v4551_v29, %v4550_v2  ;;  %v5899_v25 = vadd.f32 %v5898_v6, %v5897_v62  ;;  %v5210_v2 = vmul.f32 %v12911_v45, %v12911_v45  ;;  %v633_v29 = vld [vmem:[%s6743_s29 + $0xd20] sm:$0xff] }
 0x522   : > { %v10845_v27 = vpop.f32.mrf.mxu2 }
 0x523   : > { %v4554_v63 = vadd.f32 %v4553_v55, %v4552_v24  ;;  %v5901_v28 = vadd.f32 %v5900_v54, %v5899_v25  ;;  %3928 = vst.msk [vmem:[%s6817_s8 + $0x9f0] sm:$0xff] %vm3609_vm3, %v10845_v27  ;;  %v10852_v8 = vpop.f32.mrf.mxu3  ;;  %v4557_v24 = vsel %vm3609_vm3, %v12910_v15, 0.0  ;;  %v10865_v25 = vld [vmem:[%s12276_s1] ss:$0 sm:$0xff]  ;;  %v5908_v15 = vsel %vm3609_vm3, %v5210_v2, 0.0 }
 0x524   : > { %12912 = vst [vmem:[#allocation68_spill] sm:$0xff] %v10852_v8  ;;  %v1083_v54 = vmul.f32 %v10865_v25, %v633_v29  ;;  %v1084_v55 = vmul.f32 %v10865_v25, %v634_v48  ;;  %v4563_v2 = vsel %vm3609_vm3, %v12914_v61, 0.0 }
 0x525   : > { %v4556_v62 = vadd.f32 %v4555_v60, %v4554_v63  ;;  %v5903_v6 = vadd.f32 %v5902_v42, %v5901_v28  ;;  %4012 = vst.msk [vmem:[%s6817_s8 + $0xc90] sm:$0xff] %vm3609_vm3, %v10852_v8  ;;  %v5906_v28 = vsel %vm3609_vm3, %v5209_v46, 0.0  ;;  %v12913_v42 = vld [vmem:[#allocation54_spill] sm:$0xff] }
 0x526   : > { %v5211_v60 = vmul.f32 %v12913_v42, %v12913_v42  ;;  %v4561_v29 = vsel %vm3609_vm3, %v12913_v42, 0.0  ;;  %v1533_v46 = vadd.f32 %v10798_v31, %v1083_v54 }
 0x527   : > { %v4558_v16 = vadd.f32 %v4557_v24, %v4556_v62  ;;  %v5905_v63 = vadd.f32 %v5904_v12, %v5903_v6  ;;  %v5212_v62 = vmul.f32 %v12914_v61, %v12914_v61  ;;  %v1534_v6 = vadd.f32 %v10798_v31, %v1084_v55  ;;  %v12915_v24 = vld [vmem:[#allocation60_spill] sm:$0xff]  ;;  %v12917_v55 = vld [vmem:[#allocation63_spill] sm:$0xff] }
 0x528   : > { %v5910_v12 = vsel %vm3609_vm3, %v5211_v60, 0.0  ;;  %v5214_v61 = vmul.f32 %v12917_v55, %v12917_v55 }
 0x529   : > { %v4560_v8 = vadd.f32 %v4559_v30, %v4558_v16  ;;  %v5907_v3 = vadd.f32 %v5906_v28, %v5905_v63  ;;  %v5213_v16 = vmul.f32 %v12915_v24, %v12915_v24  ;;  %v1771_v42 = vpack.c.bf16 %v1534_v6, %v1533_v46  ;;  %v12919_v6 = vld [vmem:[#allocation69_spill] sm:$0xff] }
 0x52a   : > { %v10886_v63 = vpop.f32.mrf.mxu2 }
 0x52b   : > { %v4562_v45 = vadd.f32 %v4561_v29, %v4560_v8  ;;  %v5909_v48 = vadd.f32 %v5908_v15, %v5907_v3  ;;  %3929 = vst.msk [vmem:[%s6817_s8 + $0x9f8] sm:$0xff] %vm3609_vm3, %v10886_v63  ;;  %v10891_v54 = vpop.f32.mrf.mxu3  ;;  %v5912_v8 = vsel %vm3609_vm3, %v5212_v62, 0.0  ;;  %v4565_v3 = vsel %vm3609_vm3, %v12915_v24, 0.0 }
 0x52c   : > { %12916 = vst [vmem:[#allocation71_spill] sm:$0xff] %v10891_v54  ;;  %v5914_v29 = vsel %vm3609_vm3, %v5213_v16, 0.0  ;;  %v5916_v24 = vsel %vm3609_vm3, %v5214_v61, 0.0 }
 0x52d   : > { %v4564_v28 = vadd.f32 %v4563_v2, %v4562_v45  ;;  %v5911_v30 = vadd.f32 %v5910_v12, %v5909_v48  ;;  %4013 = vst.msk [vmem:[%s6817_s8 + $0xc98] sm:$0xff] %vm3609_vm3, %v10891_v54  ;;  %v4567_v45 = vsel %vm3609_vm3, %v12917_v55, 0.0  ;;  %v12918_v48 = vld [vmem:[#allocation66_spill] sm:$0xff]  ;;  %v12920_v55 = vld [vmem:[#allocation72_spill] sm:$0xff] }
 0x52e   : > { %v5215_v62 = vmul.f32 %v12918_v48, %v12918_v48  ;;  %v4569_v46 = vsel %vm3609_vm3, %v12918_v48, 0.0  ;;  %v5217_v61 = vmul.f32 %v12920_v55, %v12920_v55  ;;  %v12923_v54 = vld [vmem:[#allocation78_spill] sm:$0xff] }
 0x52f   : > { %v4566_v60 = vadd.f32 %v4565_v3, %v4564_v28  ;;  %v5913_v15 = vadd.f32 %v5912_v8, %v5911_v30  ;;  %v5216_v28 = vmul.f32 %v12919_v6, %v12919_v6  ;;  %v4571_v3 = vsel %vm3609_vm3, %v12919_v6, 0.0 }
 0x530   : > { %6625 = vmatmul.msk.bf16.gmra.mxu3 %vm1800_vm2, %v1771_v42  ;;  %v5918_v8 = vsel %vm3609_vm3, %v5215_v62, 0.0  ;;  %v636_v62 = vld [vmem:[%s6743_s29 + $0xd38] sm:$0xff] }
 0x531   : > { %v4568_v12 = vadd.f32 %v4567_v45, %v4566_v60  ;;  %v5915_v2 = vadd.f32 %v5914_v29, %v5913_v15  ;;  %v12921_v15 = vld [vmem:[#allocation75_spill] sm:$0xff]  ;;  %v1086_v6 = vmul.f32 %v10865_v25, %v636_v62 }
 0x532   : > { %v10917_v60 = vpop.f32.mrf.mxu2  ;;  %v5218_v29 = vmul.f32 %v12921_v15, %v12921_v15 }
 0x533   : > { %v4570_v16 = vadd.f32 %v4569_v46, %v4568_v12  ;;  %v5917_v30 = vadd.f32 %v5916_v24, %v5915_v2  ;;  %3930 = vst.msk [vmem:[%s6817_s8 + $0xa00] sm:$0xff] %vm3609_vm3, %v10917_v60  ;;  %v10924_v42 = vpop.f32.mrf.mxu3  ;;  %v635_v12 = vld [vmem:[%s6743_s29 + $0xd30] sm:$0xff]  ;;  %v5920_v2 = vsel %vm3609_vm3, %v5216_v28, 0.0  ;;  %v4573_v24 = vsel %vm3609_vm3, %v12920_v55, 0.0 }
 0x534   : > { %12922 = vst [vmem:[#allocation74_spill] sm:$0xff] %v10924_v42  ;;  %v1085_v46 = vmul.f32 %v10865_v25, %v635_v12  ;;  %v5219_v28 = vmul.f32 %v12923_v54, %v12923_v54  ;;  %v5924_v55 = vsel %vm3609_vm3, %v5218_v29, 0.0  ;;  %v4577_v12 = vsel %vm3609_vm3, %v12923_v54, 0.0 }
 0x535   : > { %v4572_v45 = vadd.f32 %v4571_v3, %v4570_v16  ;;  %v5919_v48 = vadd.f32 %v5918_v8, %v5917_v30  ;;  %4014 = vst.msk [vmem:[%s6817_s8 + $0xca0] sm:$0xff] %vm3609_vm3, %v10924_v42  ;;  %v5922_v8 = vsel %vm3609_vm3, %v5217_v61, 0.0  ;;  %v4575_v3 = vsel %vm3609_vm3, %v12921_v15, 0.0  ;;  %v12924_v42 = vld [vmem:[#allocation81_spill] sm:$0xff] }
 0x536   : > { %v1535_v61 = vadd.f32 %v10798_v31, %v1085_v46  ;;  %v4579_v29 = vsel %vm3609_vm3, %v12924_v42, 0.0 }
 0x537   : > { %v4574_v16 = vadd.f32 %v4573_v24, %v4572_v45  ;;  %v5921_v30 = vadd.f32 %v5920_v2, %v5919_v48  ;;  %v5220_v45 = vmul.f32 %v12924_v42, %v12924_v42  ;;  %v1536_v48 = vadd.f32 %v10798_v31, %v1086_v6  ;;  %v12925_v24 = vld [vmem:[#allocation84_spill] sm:$0xff]  ;;  %v12927_v6 = vld [vmem:[#allocation87_spill] sm:$0xff] }
 0x538   : > { %v5926_v2 = vsel %vm3609_vm3, %v5219_v28, 0.0  ;;  %v5222_v42 = vmul.f32 %v12927_v6, %v12927_v6 }
 0x539   : > { %v4576_v50 = vadd.f32 %v4575_v3, %v4574_v16  ;;  %v5923_v7 = vadd.f32 %v5922_v8, %v5921_v30  ;;  %v5221_v16 = vmul.f32 %v12925_v24, %v12925_v24  ;;  %v1772_v3 = vpack.c.bf16 %v1536_v48, %v1535_v61  ;;  %v12929_v48 = vld [vmem:[#allocation93_spill] sm:$0xff] }
 0x53a   : > { %v10953_v30 = vpop.f32.mrf.mxu2 }
 0x53b   : > { %v4578_v15 = vadd.f32 %v4577_v12, %v4576_v50  ;;  %v5925_v62 = vadd.f32 %v5924_v55, %v5923_v7  ;;  %3931 = vst.msk [vmem:[%s6817_s8 + $0xa08] sm:$0xff] %vm3609_vm3, %v10953_v30  ;;  %v10958_v46 = vpop.f32.mrf.mxu3  ;;  %v5928_v50 = vsel %vm3609_vm3, %v5220_v45, 0.0  ;;  %v4581_v7 = vsel %vm3609_vm3, %v12925_v24, 0.0 }
 0x53c   : > { %12926 = vst [vmem:[#allocation77_spill] sm:$0xff] %v10958_v46  ;;  %v5930_v12 = vsel %vm3609_vm3, %v5221_v16, 0.0  ;;  %v5932_v24 = vsel %vm3609_vm3, %v5222_v42, 0.0 }
 0x53d   : > { %v4580_v54 = vadd.f32 %v4579_v29, %v4578_v15  ;;  %v5927_v8 = vadd.f32 %v5926_v2, %v5925_v62  ;;  %4015 = vst.msk [vmem:[%s6817_s8 + $0xca8] sm:$0xff] %vm3609_vm3, %v10958_v46  ;;  %v4583_v15 = vsel %vm3609_vm3, %v12927_v6, 0.0  ;;  %v12928_v62 = vld [vmem:[#allocation90_spill] sm:$0xff]  ;;  %v12930_v6 = vld [vmem:[#allocation96_spill] sm:$0xff] }
 0x53e   : > { %v5223_v45 = vmul.f32 %v12928_v62, %v12928_v62  ;;  %v4585_v61 = vsel %vm3609_vm3, %v12928_v62, 0.0  ;;  %v5225_v42 = vmul.f32 %v12930_v6, %v12930_v6  ;;  %v12933_v46 = vld [vmem:[#allocation102_spill] sm:$0xff] }
 0x53f   : > { %v4582_v28 = vadd.f32 %v4581_v7, %v4580_v54  ;;  %v5929_v55 = vadd.f32 %v5928_v50, %v5927_v8  ;;  %v5224_v54 = vmul.f32 %v12929_v48, %v12929_v48  ;;  %v4587_v7 = vsel %vm3609_vm3, %v12929_v48, 0.0 }
 0x540   : > { %6626 = vmatmul.msk.bf16.gmra.mxu3 %vm1800_vm2, %v1772_v3  ;;  %v5934_v50 = vsel %vm3609_vm3, %v5223_v45, 0.0  ;;  %v638_v45 = vld [vmem:[%s6743_s29 + $0xd48] sm:$0xff] }
 0x541   : > { %v4584_v2 = vadd.f32 %v4583_v15, %v4582_v28  ;;  %v5931_v29 = vadd.f32 %v5930_v12, %v5929_v55  ;;  %v12931_v55 = vld [vmem:[#allocation99_spill] sm:$0xff]  ;;  %v1088_v48 = vmul.f32 %v10865_v25, %v638_v45 }
 0x542   : > { %v10984_v28 = vpop.f32.mrf.mxu2  ;;  %v5226_v12 = vmul.f32 %v12931_v55, %v12931_v55 }
 0x543   : > { %v4586_v16 = vadd.f32 %v4585_v61, %v4584_v2  ;;  %v5933_v8 = vadd.f32 %v5932_v24, %v5931_v29  ;;  %3932 = vst.msk [vmem:[%s6817_s8 + $0xa10] sm:$0xff] %vm3609_vm3, %v10984_v28  ;;  %v10991_v3 = vpop.f32.mrf.mxu3  ;;  %v637_v2 = vld [vmem:[%s6743_s29 + $0xd40] sm:$0xff]  ;;  %v5936_v29 = vsel %vm3609_vm3, %v5224_v54, 0.0  ;;  %v4589_v24 = vsel %vm3609_vm3, %v12930_v6, 0.0 }
 0x544   : > { %12932 = vst [vmem:[#allocation80_spill] sm:$0xff] %v10991_v3  ;;  %v1087_v61 = vmul.f32 %v10865_v25, %v637_v2  ;;  %v5227_v54 = vmul.f32 %v12933_v46, %v12933_v46  ;;  %v5940_v6 = vsel %vm3609_vm3, %v5226_v12, 0.0  ;;  %v4593_v2 = vsel %vm3609_vm3, %v12933_v46, 0.0 }
 0x545   : > { %v4588_v15 = vadd.f32 %v4587_v7, %v4586_v16  ;;  %v5935_v62 = vadd.f32 %v5934_v50, %v5933_v8  ;;  %4016 = vst.msk [vmem:[%s6817_s8 + $0xcb0] sm:$0xff] %vm3609_vm3, %v10991_v3  ;;  %v5938_v50 = vsel %vm3609_vm3, %v5225_v42, 0.0  ;;  %v4591_v7 = vsel %vm3609_vm3, %v12931_v55, 0.0  ;;  %v12934_v3 = vld [vmem:[#allocation105_spill] sm:$0xff] }
 0x546   : > { %v1537_v42 = vadd.f32 %v10798_v31, %v1087_v61  ;;  %v4595_v12 = vsel %vm3609_vm3, %v12934_v3, 0.0 }
 0x547   : > { %v5937_v16 = vadd.f32 %v5936_v29, %v5935_v62  ;;  %v4590_v8 = vadd.f32 %v4589_v24, %v4588_v15  ;;  %v5228_v62 = vmul.f32 %v12934_v3, %v12934_v3  ;;  %v1538_v15 = vadd.f32 %v10798_v31, %v1088_v48  ;;  %v12935_v24 = vld [vmem:[#allocation108_spill] sm:$0xff]  ;;  %v12937_v48 = vld [vmem:[#allocation111_spill] sm:$0xff] }
 0x548   : > { %v5942_v29 = vsel %vm3609_vm3, %v5227_v54, 0.0  ;;  %v5230_v3 = vmul.f32 %v12937_v48, %v12937_v48 }
 0x549   : > { %v4592_v9 = vadd.f32 %v4591_v7, %v4590_v8  ;;  %v5939_v43 = vadd.f32 %v5938_v50, %v5937_v16  ;;  %v5229_v16 = vmul.f32 %v12935_v24, %v12935_v24  ;;  %v1773_v7 = vpack.c.bf16 %v1538_v15, %v1537_v42  ;;  %v12939_v15 = vld [vmem:[#allocation117_spill] sm:$0xff] }
 0x54a   : > { %v11020_v8 = vpop.f32.mrf.mxu2 }
 0x54b   : > { %v4594_v55 = vadd.f32 %v4593_v2, %v4592_v9  ;;  %v5941_v45 = vadd.f32 %v5940_v6, %v5939_v43  ;;  %3933 = vst.msk [vmem:[%s6817_s8 + $0xa18] sm:$0xff] %vm3609_vm3, %v11020_v8  ;;  %v11025_v61 = vpop.f32.mrf.mxu3  ;;  %v5944_v9 = vsel %vm3609_vm3, %v5228_v62, 0.0  ;;  %v4597_v43 = vsel %vm3609_vm3, %v12935_v24, 0.0 }
 0x54c   : > { %12936 = vst [vmem:[#allocation83_spill] sm:$0xff] %v11025_v61  ;;  %v5946_v2 = vsel %vm3609_vm3, %v5229_v16, 0.0  ;;  %v5948_v24 = vsel %vm3609_vm3, %v5230_v3, 0.0 }
 0x54d   : > { %v4596_v46 = vadd.f32 %v4595_v12, %v4594_v55  ;;  %v5943_v50 = vadd.f32 %v5942_v29, %v5941_v45  ;;  %4017 = vst.msk [vmem:[%s6817_s8 + $0xcb8] sm:$0xff] %vm3609_vm3, %v11025_v61  ;;  %v4599_v55 = vsel %vm3609_vm3, %v12937_v48, 0.0  ;;  %v12938_v45 = vld [vmem:[#allocation114_spill] sm:$0xff]  ;;  %v12940_v48 = vld [vmem:[#allocation120_spill] sm:$0xff] }
 0x54e   : > { %v5231_v62 = vmul.f32 %v12938_v45, %v12938_v45  ;;  %v4601_v42 = vsel %vm3609_vm3, %v12938_v45, 0.0  ;;  %v5233_v3 = vmul.f32 %v12940_v48, %v12940_v48  ;;  %v12943_v61 = vld [vmem:[#allocation126_spill] sm:$0xff] }
 0x54f   : > { %v4598_v54 = vadd.f32 %v4597_v43, %v4596_v46  ;;  %v5945_v6 = vadd.f32 %v5944_v9, %v5943_v50  ;;  %v5232_v46 = vmul.f32 %v12939_v15, %v12939_v15  ;;  %v4603_v43 = vsel %vm3609_vm3, %v12939_v15, 0.0 }
 0x550   : > { %6627 = vmatmul.msk.bf16.gmra.mxu3 %vm1800_vm2, %v1773_v7  ;;  %v5950_v9 = vsel %vm3609_vm3, %v5231_v62, 0.0  ;;  %v640_v62 = vld [vmem:[%s6743_s29 + $0xd58] sm:$0xff] }
 0x551   : > { %v4600_v29 = vadd.f32 %v4599_v55, %v4598_v54  ;;  %v5947_v12 = vadd.f32 %v5946_v2, %v5945_v6  ;;  %v12941_v6 = vld [vmem:[#allocation123_spill] sm:$0xff]  ;;  %v1090_v15 = vmul.f32 %v10865_v25, %v640_v62 }
 0x552   : > { %v11051_v54 = vpop.f32.mrf.mxu2  ;;  %v5234_v2 = vmul.f32 %v12941_v6, %v12941_v6 }
 0x553   : > { %v4602_v16 = vadd.f32 %v4601_v42, %v4600_v29  ;;  %v5949_v50 = vadd.f32 %v5948_v24, %v5947_v12  ;;  %3934 = vst.msk [vmem:[%s6817_s8 + $0xa20] sm:$0xff] %vm3609_vm3, %v11051_v54  ;;  %v11058_v7 = vpop.f32.mrf.mxu3  ;;  %v639_v29 = vld [vmem:[%s6743_s29 + $0xd50] sm:$0xff]  ;;  %v5952_v12 = vsel %vm3609_vm3, %v5232_v46, 0.0  ;;  %v4605_v24 = vsel %vm3609_vm3, %v12940_v48, 0.0 }
 0x554   : > { %12942 = vst [vmem:[#allocation86_spill] sm:$0xff] %v11058_v7  ;;  %v1089_v42 = vmul.f32 %v10865_v25, %v639_v29  ;;  %v5235_v46 = vmul.f32 %v12943_v61, %v12943_v61  ;;  %v5956_v48 = vsel %vm3609_vm3, %v5234_v2, 0.0  ;;  %v4609_v29 = vsel %vm3609_vm3, %v12943_v61, 0.0 }
 0x555   : > { %v4604_v55 = vadd.f32 %v4603_v43, %v4602_v16  ;;  %v5951_v45 = vadd.f32 %v5950_v9, %v5949_v50  ;;  %4018 = vst.msk [vmem:[%s6817_s8 + $0xcc0] sm:$0xff] %vm3609_vm3, %v11058_v7  ;;  %v5954_v9 = vsel %vm3609_vm3, %v5233_v3, 0.0  ;;  %v4607_v43 = vsel %vm3609_vm3, %v12941_v6, 0.0  ;;  %v12944_v7 = vld [vmem:[#allocation129_spill] sm:$0xff] }
 0x556   : > { %v1539_v3 = vadd.f32 %v10798_v31, %v1089_v42  ;;  %v4611_v2 = vsel %vm3609_vm3, %v12944_v7, 0.0 }
 0x557   : > { %v4606_v16 = vadd.f32 %v4605_v24, %v4604_v55  ;;  %v5953_v50 = vadd.f32 %v5952_v12, %v5951_v45  ;;  %v5236_v55 = vmul.f32 %v12944_v7, %v12944_v7  ;;  %v1540_v45 = vadd.f32 %v10798_v31, %v1090_v15  ;;  %v12945_v24 = vld [vmem:[#allocation132_spill] sm:$0xff]  ;;  %v12946_v15 = vld [vmem:[#allocation135_spill] sm:$0xff] }
 0x558   : > { %v5958_v12 = vsel %vm3609_vm3, %v5235_v46, 0.0  ;;  %v5238_v7 = vmul.f32 %v12946_v15, %v12946_v15 }
 0x559   : > { %v4608_v34 = vadd.f32 %v4607_v43, %v4606_v16  ;;  %v5955_v10 = vadd.f32 %v5954_v9, %v5953_v50  ;;  %v5237_v16 = vmul.f32 %v12945_v24, %v12945_v24  ;;  %v1774_v43 = vpack.c.bf16 %v1540_v45, %v1539_v3  ;;  %v12948_v45 = vld [vmem:[#allocation141_spill] sm:$0xff] }
 0x55a   : > { %v11087_v50 = vpop.f32.mrf.mxu2 }
 0x55b   : > { %v4610_v6 = vadd.f32 %v4609_v29, %v4608_v34  ;;  %v5957_v62 = vadd.f32 %v5956_v48, %v5955_v10  ;;  %3935 = vst.msk [vmem:[%s6817_s8 + $0xa28] sm:$0xff] %vm3609_vm3, %v11087_v50  ;;  %v11092_v42 = vpop.f32.mrf.mxu3  ;;  %v5960_v34 = vsel %vm3609_vm3, %v5236_v55, 0.0  ;;  %v4613_v10 = vsel %vm3609_vm3, %v12945_v24, 0.0 }
 0x55c   : > { %4019 = vst.msk [vmem:[%s6817_s8 + $0xcc8] sm:$0xff] %vm3609_vm3, %v11092_v42  ;;  %v5962_v29 = vsel %vm3609_vm3, %v5237_v16, 0.0  ;;  %v5964_v24 = vsel %vm3609_vm3, %v5238_v7, 0.0 }
 0x55d   : > { %v4612_v61 = vadd.f32 %v4611_v2, %v4610_v6  ;;  %v5959_v9 = vadd.f32 %v5958_v12, %v5957_v62  ;;  %v4615_v6 = vsel %vm3609_vm3, %v12946_v15, 0.0  ;;  %v12947_v62 = vld [vmem:[#allocation138_spill] sm:$0xff]  ;;  %v5241_v15 = vmul.f32 %v9337_v51, %v9337_v51 }
 0x55e   : > { %v5239_v55 = vmul.f32 %v12947_v62, %v12947_v62  ;;  %v4617_v3 = vsel %vm3609_vm3, %v12947_v62, 0.0  ;;  %v642_v62 = vld [vmem:[%s6743_s29 + $0xd68] sm:$0xff] }
 0x55f   : > { %v4614_v46 = vadd.f32 %v4613_v10, %v4612_v61  ;;  %v5961_v48 = vadd.f32 %v5960_v34, %v5959_v9  ;;  %v5240_v61 = vmul.f32 %v12948_v45, %v12948_v45  ;;  %v4619_v10 = vsel %vm3609_vm3, %v12948_v45, 0.0 }
 0x560   : > { %6628 = vmatmul.msk.bf16.gmra.mxu3 %vm1800_vm2, %v1774_v43  ;;  %v5966_v34 = vsel %vm3609_vm3, %v5239_v55, 0.0 }
 0x561   : > { %v4616_v12 = vadd.f32 %v4615_v6, %v4614_v46  ;;  %v5963_v2 = vadd.f32 %v5962_v29, %v5961_v48  ;;  %v5242_v46 = vmul.f32 %v9375_v44, %v9375_v44  ;;  %v641_v6 = vld [vmem:[%s6743_s29 + $0xd60] sm:$0xff]  ;;  %v5968_v55 = vsel %vm3609_vm3, %v5240_v61, 0.0 }
 0x562   : > { %v11118_v7 = vpop.f32.mrf.mxu2  ;;  %v5243_v61 = vmul.f32 %v9413_v58, %v9413_v58 }
 0x563   : > { %v4618_v16 = vadd.f32 %v4617_v3, %v4616_v12  ;;  %v5965_v9 = vadd.f32 %v5964_v24, %v5963_v2  ;;  %3936 = vst.msk [vmem:[%s6817_s8 + $0xa30] sm:$0xff] %vm3609_vm3, %v11118_v7  ;;  %v11125_v43 = vpop.f32.mrf.mxu3  ;;  %v4621_v12 = vsel %vm3609_vm3, %v9337_v51, 0.0  ;;  %v1091_v2 = vmul.f32 %v10865_v25, %v641_v6 }
 0x564   : > { %4020 = vst.msk [vmem:[%s6817_s8 + $0xcd0] sm:$0xff] %vm3609_vm3, %v11125_v43  ;;  %v1092_v24 = vmul.f32 %v10865_v25, %v642_v62  ;;  %v5972_v51 = vsel %vm3609_vm3, %v5242_v46, 0.0  ;;  %v4625_v6 = vsel %vm3609_vm3, %v9413_v58, 0.0  ;;  %v4627_v46 = vsel %vm3609_vm3, %v9458_v19, 0.0 }
 0x565   : > { %v4620_v48 = vadd.f32 %v4619_v10, %v4618_v16  ;;  %v5967_v29 = vadd.f32 %v5966_v34, %v5965_v9  ;;  %v5970_v16 = vsel %vm3609_vm3, %v5241_v15, 0.0  ;;  %v4623_v9 = vsel %vm3609_vm3, %v9375_v44, 0.0 }
 0x566   : > { %v1541_v15 = vadd.f32 %v10798_v31, %v1091_v2 }
 0x567   : > { %v4622_v3 = vadd.f32 %v4621_v12, %v4620_v48  ;;  %v5969_v45 = vadd.f32 %v5968_v55, %v5967_v29  ;;  %v5244_v48 = vmul.f32 %v9458_v19, %v9458_v19  ;;  %v1542_v29 = vadd.f32 %v10798_v31, %v1092_v24 }
 0x568   : > { %v5974_v55 = vsel %vm3609_vm3, %v5243_v61, 0.0  ;;  %v5245_v12 = vmul.f32 %v9508_v14, %v9508_v14  ;;  %v5246_v19 = vmul.f32 %v9554_v37, %v9554_v37 }
 0x569   : > { %v4624_v34 = vadd.f32 %v4623_v9, %v4622_v3  ;;  %v5971_v10 = vadd.f32 %v5970_v16, %v5969_v45  ;;  %v5976_v24 = vsel %vm3609_vm3, %v5244_v48, 0.0  ;;  %v4629_v16 = vsel %vm3609_vm3, %v9508_v14, 0.0 }
 0x56a   : > { %v11154_v3 = vpop.f32.mrf.mxu2  ;;  %v1775_v9 = vpack.c.bf16 %v1542_v29, %v1541_v15  ;;  %v4633_v15 = vsel %vm3609_vm3, %v9604_v35, 0.0  ;;  %v5248_v29 = vmul.f32 %v9650_v11, %v9650_v11 }
 0x56b   : > { %v4626_v44 = vadd.f32 %v4625_v6, %v4624_v34  ;;  %v5973_v62 = vadd.f32 %v5972_v51, %v5971_v10  ;;  %3937 = vst.msk [vmem:[%s6817_s8 + $0xa38] sm:$0xff] %vm3609_vm3, %v11154_v3  ;;  %v11159_v2 = vpop.f32.mrf.mxu3  ;;  %v5978_v34 = vsel %vm3609_vm3, %v5245_v12, 0.0  ;;  %v4631_v10 = vsel %vm3609_vm3, %v9554_v37, 0.0 }
 0x56c   : > { %4021 = vst.msk [vmem:[%s6817_s8 + $0xcd8] sm:$0xff] %vm3609_vm3, %v11159_v2  ;;  %v5247_v6 = vmul.f32 %v9604_v35, %v9604_v35  ;;  %v5249_v12 = vmul.f32 %v9695_v47, %v9695_v47  ;;  %v5250_v35 = vmul.f32 %v9740_v49, %v9740_v49 }
 0x56d   : > { %v4628_v58 = vadd.f32 %v4627_v46, %v4626_v44  ;;  %v5975_v45 = vadd.f32 %v5974_v55, %v5973_v62  ;;  %v5980_v44 = vsel %vm3609_vm3, %v5246_v19, 0.0  ;;  %v4635_v46 = vsel %vm3609_vm3, %v9650_v11, 0.0  ;;  %v643_v19 = vld [vmem:[%s6743_s29 + $0xd70] sm:$0xff] }
 0x56e   : > { %v5982_v55 = vsel %vm3609_vm3, %v5247_v6, 0.0  ;;  %v4637_v11 = vsel %vm3609_vm3, %v9695_v47, 0.0  ;;  %v5988_v47 = vsel %vm3609_vm3, %v5250_v35, 0.0  ;;  %v4643_v35 = vsel %vm3609_vm3, %v9824_v18, 0.0 }
 0x56f   : > { %v4630_v61 = vadd.f32 %v4629_v16, %v4628_v58  ;;  %v5977_v51 = vadd.f32 %v5976_v24, %v5975_v45 }
 0x570   : > { %6629 = vmatmul.msk.bf16.gmra.mxu3 %vm1800_vm2, %v1775_v9  ;;  %v644_v9 = vld [vmem:[%s6743_s29 + $0xd78] sm:$0xff] }
 0x571   : > { %v4632_v48 = vadd.f32 %v4631_v10, %v4630_v61  ;;  %v5979_v14 = vadd.f32 %v5978_v34, %v5977_v51  ;;  %v5984_v61 = vsel %vm3609_vm3, %v5248_v29, 0.0  ;;  %v1093_v51 = vmul.f32 %v10865_v25, %v643_v19 }
 0x572   : > { %v11185_v58 = vpop.f32.mrf.mxu2  ;;  %v1094_v34 = vmul.f32 %v10865_v25, %v644_v9 }
 0x573   : > { %v4634_v37 = vadd.f32 %v4633_v15, %v4632_v48  ;;  %v5981_v62 = vadd.f32 %v5980_v44, %v5979_v14  ;;  %3938 = vst.msk [vmem:[%s6817_s8 + $0xa40] sm:$0xff] %vm3609_vm3, %v11185_v58  ;;  %v11192_v16 = vpop.f32.mrf.mxu3  ;;  %v5986_v48 = vsel %vm3609_vm3, %v5249_v12, 0.0  ;;  %v4639_v14 = vsel %vm3609_vm3, %v9740_v49, 0.0 }
 0x574   : > { %4022 = vst.msk [vmem:[%s6817_s8 + $0xce0] sm:$0xff] %vm3609_vm3, %v11192_v16  ;;  %v5251_v44 = vmul.f32 %v9782_v40, %v9782_v40 }
 0x575   : > { %v4636_v45 = vadd.f32 %v4635_v46, %v4634_v37  ;;  %v5983_v24 = vadd.f32 %v5982_v55, %v5981_v62  ;;  %v4641_v37 = vsel %vm3609_vm3, %v9782_v40, 0.0  ;;  %v5252_v62 = vmul.f32 %v9824_v18, %v9824_v18 }
 0x576   : > { %v1543_v55 = vadd.f32 %v10798_v31, %v1093_v51  ;;  %v1544_v46 = vadd.f32 %v10798_v31, %v1094_v34  ;;  %v4645_v51 = vsel %vm3609_vm3, %v9866_v41, 0.0  ;;  %v5254_v18 = vmul.f32 %v9908_v36, %v9908_v36 }
 0x577   : > { %v4638_v10 = vadd.f32 %v4637_v11, %v4636_v45  ;;  %v5985_v6 = vadd.f32 %v5984_v61, %v5983_v24  ;;  %v5990_v45 = vsel %vm3609_vm3, %v5251_v44, 0.0  ;;  %v5253_v24 = vmul.f32 %v9866_v41, %v9866_v41 }
 0x578   : > { %v5992_v11 = vsel %vm3609_vm3, %v5252_v62, 0.0  ;;  %v1776_v34 = vpack.c.bf16 %v1544_v46, %v1543_v55  ;;  %v5255_v44 = vmul.f32 %v9950_v56, %v9950_v56  ;;  %v4651_v46 = vsel %vm3609_vm3, %v9992_v32, 0.0 }
 0x579   : > { %v4640_v15 = vadd.f32 %v4639_v14, %v4638_v10  ;;  %v5987_v29 = vadd.f32 %v5986_v48, %v5985_v6  ;;  %v5994_v48 = vsel %vm3609_vm3, %v5253_v24, 0.0  ;;  %v4647_v14 = vsel %vm3609_vm3, %v9908_v36, 0.0 }
 0x57a   : > { %v11221_v19 = vpop.f32.mrf.mxu2  ;;  %v5998_v55 = vsel %vm3609_vm3, %v5255_v44, 0.0 }
 0x57b   : > { %v4642_v49 = vadd.f32 %v4641_v37, %v4640_v15  ;;  %v5989_v12 = vadd.f32 %v5988_v47, %v5987_v29  ;;  %3939 = vst.msk [vmem:[%s6817_s8 + $0xa48] sm:$0xff] %vm3609_vm3, %v11221_v19  ;;  %v11226_v61 = vpop.f32.mrf.mxu3  ;;  %v5996_v15 = vsel %vm3609_vm3, %v5254_v18, 0.0  ;;  %v4649_v29 = vsel %vm3609_vm3, %v9950_v56, 0.0 }
 0x57c   : > { %4023 = vst.msk [vmem:[%s6817_s8 + $0xce8] sm:$0xff] %vm3609_vm3, %v11226_v61  ;;  %v5256_v37 = vmul.f32 %v9992_v32, %v9992_v32 }
 0x57d   : > { %v4644_v40 = vadd.f32 %v4643_v35, %v4642_v49  ;;  %v5991_v9 = vadd.f32 %v5990_v45, %v5989_v12  ;;  %v12949_v49 = vld [vmem:[#allocation19_spill] sm:$0xff] }
 0x57e   : > { %v5257_v12 = vmul.f32 %v12949_v49, %v12949_v49  ;;  %v12950_v35 = vld [vmem:[#allocation23_spill] sm:$0xff]  ;;  %v6000_v18 = vsel %vm3609_vm3, %v5256_v37, 0.0  ;;  %v4653_v32 = vsel %vm3609_vm3, %v12949_v49, 0.0 }
 0x57f   : > { %v4646_v10 = vadd.f32 %v4645_v51, %v4644_v40  ;;  %v5993_v6 = vadd.f32 %v5992_v11, %v5991_v9  ;;  %v5258_v56 = vmul.f32 %v12950_v35, %v12950_v35  ;;  %v645_v11 = vld [vmem:[%s6743_s29 + $0xd80] sm:$0xff]  ;;  %v646_v51 = vld [vmem:[%s6743_s29 + $0xd88] sm:$0xff]  ;;  %v4655_v44 = vsel %vm3609_vm3, %v12950_v35, 0.0 }
 0x580   : > { %6630 = vmatmul.msk.bf16.gmra.mxu3 %vm1800_vm2, %v1776_v34  ;;  %v1095_v34 = vmul.f32 %v10865_v25, %v645_v11 }
 0x581   : > { %v4648_v47 = vadd.f32 %v4647_v14, %v4646_v10  ;;  %v5995_v41 = vadd.f32 %v5994_v48, %v5993_v6  ;;  %v1096_v10 = vmul.f32 %v10865_v25, %v646_v51  ;;  %v6002_v14 = vsel %vm3609_vm3, %v5257_v12, 0.0 }
 0x582   : > { %v11252_v45 = vpop.f32.mrf.mxu2 }
 0x583   : > { %v4650_v36 = vadd.f32 %v4649_v29, %v4648_v47  ;;  %v5997_v62 = vadd.f32 %v5996_v15, %v5995_v41  ;;  %3940 = vst.msk [vmem:[%s6817_s8 + $0xa50] sm:$0xff] %vm3609_vm3, %v11252_v45  ;;  %v11259_v9 = vpop.f32.mrf.mxu3  ;;  %v12951_v47 = vld [vmem:[#allocation27_spill] sm:$0xff]  ;;  %v6004_v15 = vsel %vm3609_vm3, %v5258_v56, 0.0  ;;  %v1546_v49 = vadd.f32 %v10798_v31, %v1096_v10 }
 0x584   : > { %4024 = vst.msk [vmem:[%s6817_s8 + $0xcf0] sm:$0xff] %vm3609_vm3, %v11259_v9  ;;  %v5259_v41 = vmul.f32 %v12951_v47, %v12951_v47 }
 0x585   : > { %v4652_v24 = vadd.f32 %v4651_v46, %v4650_v36  ;;  %v5999_v40 = vadd.f32 %v5998_v55, %v5997_v62  ;;  %v4657_v36 = vsel %vm3609_vm3, %v12951_v47, 0.0  ;;  %v12952_v62 = vld [vmem:[#allocation31_spill] sm:$0xff]  ;;  %v1545_v46 = vadd.f32 %v10798_v31, %v1095_v34 }
 0x586   : > { %v5260_v55 = vmul.f32 %v12952_v62, %v12952_v62  ;;  %v4659_v56 = vsel %vm3609_vm3, %v12952_v62, 0.0 }
 0x587   : > { %v4654_v6 = vadd.f32 %v4653_v32, %v4652_v24  ;;  %v6001_v48 = vadd.f32 %v6000_v18, %v5999_v40  ;;  %v6006_v24 = vsel %vm3609_vm3, %v5259_v41, 0.0  ;;  %v12953_v40 = vld [vmem:[#allocation35_spill] sm:$0xff] }
 0x588   : > { %v5261_v11 = vmul.f32 %v12953_v40, %v12953_v40  ;;  %v6008_v10 = vsel %vm3609_vm3, %v5260_v55, 0.0 }
 0x589   : > { %v4656_v29 = vadd.f32 %v4655_v44, %v4654_v6  ;;  %v6003_v37 = vadd.f32 %v6002_v14, %v6001_v48  ;;  %v4661_v6 = vsel %vm3609_vm3, %v12953_v40, 0.0  ;;  %v12954_v48 = vld [vmem:[#allocation39_spill] sm:$0xff]  ;;  %v1777_v44 = vpack.c.bf16 %v1546_v49, %v1545_v46 }
 0x58a   : > { %v11288_v51 = vpop.f32.mrf.mxu2  ;;  %v5262_v14 = vmul.f32 %v12954_v48, %v12954_v48  ;;  %v5264_v49 = vmul.f32 %v10353_v4, %v10353_v4  ;;  %v4667_v40 = vsel %vm3609_vm3, %v10353_v4, 0.0  ;;  %v4669_v4 = vsel %vm3609_vm3, %v10391_v5, 0.0 }
 0x58b   : > { %v4658_v12 = vadd.f32 %v4657_v36, %v4656_v29  ;;  %v6005_v35 = vadd.f32 %v6004_v15, %v6003_v37  ;;  %3941 = vst.msk [vmem:[%s6817_s8 + $0xa58] sm:$0xff] %vm3609_vm3, %v11288_v51  ;;  %v11293_v34 = vpop.f32.mrf.mxu3  ;;  %v6010_v15 = vsel %vm3609_vm3, %v5261_v11, 0.0  ;;  %v4663_v29 = vsel %vm3609_vm3, %v12954_v48, 0.0  ;;  %v12955_v37 = vld [vmem:[#allocation43_spill] sm:$0xff] }
 0x58c   : > { %4025 = vst.msk [vmem:[%s6817_s8 + $0xcf8] sm:$0xff] %vm3609_vm3, %v11293_v34  ;;  %v5263_v36 = vmul.f32 %v12955_v37, %v12955_v37  ;;  %v4665_v46 = vsel %vm3609_vm3, %v12955_v37, 0.0  ;;  %v5265_v11 = vmul.f32 %v10391_v5, %v10391_v5 }
 0x58d   : > { %v4660_v18 = vadd.f32 %v4659_v56, %v4658_v12  ;;  %v6007_v32 = vadd.f32 %v6006_v24, %v6005_v35  ;;  %v6012_v12 = vsel %vm3609_vm3, %v5262_v14, 0.0  ;;  %v647_v14 = vld [vmem:[%s6743_s29 + $0xd90] sm:$0xff] }
 0x58e   : > { %v6014_v56 = vsel %vm3609_vm3, %v5263_v36, 0.0  ;;  %v6018_v36 = vsel %vm3609_vm3, %v5265_v11, 0.0 }
 0x58f   : > { %v4662_v47 = vadd.f32 %v4661_v6, %v4660_v18  ;;  %v6009_v41 = vadd.f32 %v6008_v10, %v6007_v32  ;;  %v5266_v32 = vmul.f32 %v10437_v1, %v10437_v1 }
 0x590   : > { %6631 = vmatmul.msk.bf16.gmra.mxu3 %vm1800_vm2, %v1777_v44  ;;  %v648_v44 = vld [vmem:[%s6743_s29 + $0xd98] sm:$0xff] }
 0x591   : > { %v4664_v62 = vadd.f32 %v4663_v29, %v4662_v47  ;;  %v6011_v55 = vadd.f32 %v6010_v15, %v6009_v41  ;;  %v6016_v47 = vsel %vm3609_vm3, %v5264_v49, 0.0  ;;  %v1097_v41 = vmul.f32 %v10865_v25, %v647_v14 }
 0x592   : > { %v11319_v18 = vpop.f32.mrf.mxu2  ;;  %v1098_v15 = vmul.f32 %v10865_v25, %v648_v44  ;;  %v6020_v5 = vsel %vm3609_vm3, %v5266_v32, 0.0  ;;  %v4673_v49 = vsel %vm3609_vm3, %v10472_v23, 0.0  ;;  %v4675_v32 = vsel %vm3609_vm3, %v10512_v52, 0.0 }
 0x593   : > { %v4666_v35 = vadd.f32 %v4665_v46, %v4664_v62  ;;  %v6013_v24 = vadd.f32 %v6012_v12, %v6011_v55  ;;  %3942 = vst.msk [vmem:[%s6817_s8 + $0xa60] sm:$0xff] %vm3609_vm3, %v11319_v18  ;;  %v11326_v48 = vpop.f32.mrf.mxu3  ;;  %v4671_v62 = vsel %vm3609_vm3, %v10437_v1, 0.0  ;;  %v5267_v55 = vmul.f32 %v10472_v23, %v10472_v23 }
 0x594   : > { %4026 = vst.msk [vmem:[%s6817_s8 + $0xd00] sm:$0xff] %vm3609_vm3, %v11326_v48 }
 0x595   : > { %v4668_v10 = vadd.f32 %v4667_v40, %v4666_v35  ;;  %v6015_v6 = vadd.f32 %v6014_v56, %v6013_v24  ;;  %v5268_v35 = vmul.f32 %v10512_v52, %v10512_v52  ;;  %v1547_v24 = vadd.f32 %v10798_v31, %v1097_v41 }
 0x596   : > { %v1548_v56 = vadd.f32 %v10798_v31, %v1098_v15  ;;  %v6022_v11 = vsel %vm3609_vm3, %v5267_v55, 0.0  ;;  %v5270_v52 = vmul.f32 %v10586_v20, %v10586_v20 }
 0x597   : > { %v4670_v29 = vadd.f32 %v4669_v4, %v4668_v10  ;;  %v6017_v37 = vadd.f32 %v6016_v47, %v6015_v6  ;;  %v5269_v10 = vmul.f32 %v10546_v33, %v10546_v33  ;;  %v6024_v47 = vsel %vm3609_vm3, %v5268_v35, 0.0 }
 0x598   : > { %v4677_v4 = vsel %vm3609_vm3, %v10546_v33, 0.0  ;;  %v1778_v41 = vpack.c.bf16 %v1548_v56, %v1547_v24  ;;  %v4683_v24 = vsel %vm3609_vm3, %v10660_v0, 0.0  ;;  %v5273_v56 = vmul.f32 %v10694_v22, %v10694_v22 }
 0x599   : > { %v4672_v12 = vadd.f32 %v4671_v62, %v4670_v29  ;;  %v6019_v46 = vadd.f32 %v6018_v36, %v6017_v37  ;;  %v6026_v37 = vsel %vm3609_vm3, %v5269_v10, 0.0  ;;  %v4679_v36 = vsel %vm3609_vm3, %v10586_v20, 0.0  ;;  %v649_v10 = vld [vmem:[%s6743_s29 + $0xda0] sm:$0xff] }
 0x59a   : > { %v11355_v6 = vpop.f32.mrf.mxu2  ;;  %v5271_v62 = vmul.f32 %v10620_v59, %v10620_v59 }
 0x59b   : > { %v4674_v1 = vadd.f32 %v4673_v49, %v4672_v12  ;;  %v6021_v40 = vadd.f32 %v6020_v5, %v6019_v46  ;;  %3943 = vst.msk [vmem:[%s6817_s8 + $0xa68] sm:$0xff] %vm3609_vm3, %v11355_v6  ;;  %v11360_v44 = vpop.f32.mrf.mxu3  ;;  %v6028_v5 = vsel %vm3609_vm3, %v5270_v52, 0.0  ;;  %v4681_v12 = vsel %vm3609_vm3, %v10620_v59, 0.0 }
 0x59c   : > { %4027 = vst.msk [vmem:[%s6817_s8 + $0xd08] sm:$0xff] %vm3609_vm3, %v11360_v44  ;;  %v5272_v46 = vmul.f32 %v10660_v0, %v10660_v0  ;;  %v6030_v35 = vsel %vm3609_vm3, %v5271_v62, 0.0  ;;  %v4685_v0 = vsel %vm3609_vm3, %v10694_v22, 0.0 }
 0x59d   : > { %v6023_v23 = vadd.f32 %v6022_v11, %v6021_v40  ;;  %v4676_v14 = vadd.f32 %v4675_v32, %v4674_v1  ;;  %v5274_v11 = vmul.f32 %v10734_v26, %v10734_v26 }
 0x59f   : > { %v4678_v15 = vadd.f32 %v4677_v4, %v4676_v14  ;;  %v6025_v29 = vadd.f32 %v6024_v47, %v6023_v23  ;;  %v650_v23 = vld [vmem:[%s6743_s29 + $0xda8] sm:$0xff]  ;;  %v6032_v14 = vsel %vm3609_vm3, %v5272_v46, 0.0  ;;  %v1099_v47 = vmul.f32 %v10865_v25, %v649_v10 }
 0x5a0   : > { %6632 = vmatmul.msk.bf16.gmra.mxu3 %vm1800_vm2, %v1778_v41  ;;  %v1100_v4 = vmul.f32 %v10865_v25, %v650_v23  ;;  %v6036_v62 = vsel %vm3609_vm3, %v5274_v11, 0.0 }
 0x5a1   : > { %v6027_v55 = vadd.f32 %v6026_v37, %v6025_v29  ;;  %v4680_v33 = vadd.f32 %v4679_v36, %v4678_v15  ;;  %v6034_v15 = vsel %vm3609_vm3, %v5273_v56, 0.0  ;;  %v4687_v29 = vsel %vm3609_vm3, %v10734_v26, 0.0 }
 0x5a2   : > { %v11386_v1 = vpop.f32.mrf.mxu2  ;;  %v5275_v37 = vmul.f32 %v10768_v53, %v10768_v53 }
 0x5a3   : > { %v4682_v20 = vadd.f32 %v4681_v12, %v4680_v33  ;;  %v6029_v49 = vadd.f32 %v6028_v5, %v6027_v55  ;;  %3944 = vst.msk [vmem:[%s6817_s8 + $0xa70] sm:$0xff] %vm3609_vm3, %v11386_v1  ;;  %v11393_v32 = vpop.f32.mrf.mxu3  ;;  %v4689_v55 = vsel %vm3609_vm3, %v10768_v53, 0.0  ;;  %v5276_v33 = vmul.f32 %v10813_v13, %v10813_v13 }
 0x5a4   : > { %4028 = vst.msk [vmem:[%s6817_s8 + $0xd10] sm:$0xff] %vm3609_vm3, %v11393_v32  ;;  %v1549_v5 = vadd.f32 %v10798_v31, %v1099_v47  ;;  %v1550_v12 = vadd.f32 %v10798_v31, %v1100_v4  ;;  %v5279_v47 = vmul.f32 %v10917_v60, %v10917_v60 }
 0x5a5   : > { %v6031_v40 = vadd.f32 %v6030_v35, %v6029_v49  ;;  %v4684_v59 = vadd.f32 %v4683_v24, %v4682_v20  ;;  %v6038_v20 = vsel %vm3609_vm3, %v5275_v37, 0.0  ;;  %v4691_v49 = vsel %vm3609_vm3, %v10813_v13, 0.0 }
 0x5a6   : > { %v5277_v35 = vmul.f32 %v10845_v27, %v10845_v27  ;;  %v6040_v31 = vsel %vm3609_vm3, %v5276_v33, 0.0  ;;  %v5278_v13 = vmul.f32 %v10886_v63, %v10886_v63  ;;  %v1779_v11 = vpack.c.bf16 %v1550_v12, %v1549_v5  ;;  %v651_v5 = vld [vmem:[%s6743_s29 + $0xdb0] sm:$0xff]  ;;  %v652_v12 = vld [vmem:[%s6743_s29 + $0xdb8] sm:$0xff] }
 0x5a7   : > { %v6033_v52 = vadd.f32 %v6032_v14, %v6031_v40  ;;  %v4686_v41 = vadd.f32 %v4685_v0, %v4684_v59  ;;  %v4693_v59 = vsel %vm3609_vm3, %v10845_v27, 0.0  ;;  %v4695_v0 = vsel %vm3609_vm3, %v10886_v63, 0.0 }
 0x5a8   : > { %v6042_v14 = vsel %vm3609_vm3, %v5277_v35, 0.0  ;;  %v6046_v37 = vsel %vm3609_vm3, %v5279_v47, 0.0 }
 0x5a9   : > { %v6035_v36 = vadd.f32 %v6034_v15, %v6033_v52  ;;  %v4688_v22 = vadd.f32 %v4687_v29, %v4686_v41  ;;  %v6044_v52 = vsel %vm3609_vm3, %v5278_v13, 0.0  ;;  %v4697_v41 = vsel %vm3609_vm3, %v10917_v60, 0.0 }
 0x5aa   : > { %v11422_v24 = vpop.f32.mrf.mxu2  ;;  %v5280_v15 = vmul.f32 %v10953_v30, %v10953_v30  ;;  %v5282_v60 = vmul.f32 %v11020_v8, %v11020_v8 }
 0x5ab   : > { %v6037_v26 = vadd.f32 %v6036_v62, %v6035_v36  ;;  %v4690_v46 = vadd.f32 %v4689_v55, %v4688_v22  ;;  %3945 = vst.msk [vmem:[%s6817_s8 + $0xa78] sm:$0xff] %vm3609_vm3, %v11422_v24  ;;  %v11427_v40 = vpop.f32.mrf.mxu3  ;;  %v4699_v36 = vsel %vm3609_vm3, %v10953_v30, 0.0  ;;  %v5281_v22 = vmul.f32 %v10984_v28, %v10984_v28 }
 0x5ac   : > { %4029 = vst.msk [vmem:[%s6817_s8 + $0xd18] sm:$0xff] %vm3609_vm3, %v11427_v40  ;;  %v1101_v30 = vmul.f32 %v10865_v25, %v651_v5 }
 0x5ad   : > { %v6039_v53 = vadd.f32 %v6038_v20, %v6037_v26  ;;  %v4692_v56 = vadd.f32 %v4691_v49, %v4690_v46  ;;  %v6048_v26 = vsel %vm3609_vm3, %v5280_v15, 0.0  ;;  %v4701_v46 = vsel %vm3609_vm3, %v10984_v28, 0.0 }
 0x5ae   : > { %v1102_v20 = vmul.f32 %v10865_v25, %v652_v12  ;;  %v6052_v28 = vsel %vm3609_vm3, %v5282_v60, 0.0  ;;  %v5284_v25 = vmul.f32 %v11087_v50, %v11087_v50  ;;  %v4713_v12 = vsel %vm3609_vm3, %v11185_v58, 0.0 }
 0x5af   : > { %v6041_v10 = vadd.f32 %v6040_v31, %v6039_v53  ;;  %v4694_v23 = vadd.f32 %v4693_v59, %v4692_v56  ;;  %v6050_v53 = vsel %vm3609_vm3, %v5281_v22, 0.0  ;;  %v4703_v56 = vsel %vm3609_vm3, %v11020_v8, 0.0 }
 0x5b0   : > { %6633 = vmatmul.msk.bf16.gmra.mxu3 %vm1800_vm2, %v1779_v11  ;;  %v5283_v31 = vmul.f32 %v11051_v54, %v11051_v54  ;;  %v4705_v11 = vsel %vm3609_vm3, %v11051_v54, 0.0  ;;  %v4707_v54 = vsel %vm3609_vm3, %v11087_v50, 0.0  ;;  %v6056_v15 = vsel %vm3609_vm3, %v5284_v25, 0.0 }
 0x5b1   : > { %v6043_v4 = vadd.f32 %v6042_v14, %v6041_v10  ;;  %v4696_v27 = vadd.f32 %v4695_v0, %v4694_v23  ;;  %v11480_v10 = vld [vmem:[%s12276_s1 + $0x1] ss:$0 sm:$0xff] }
 0x5b2   : > { %v1551_v8 = vadd.f32 %v11480_v10, %v1101_v30  ;;  %v1552_v23 = vadd.f32 %v11480_v10, %v1102_v20  ;;  %v6054_v47 = vsel %vm3609_vm3, %v5283_v31, 0.0  ;;  %v4715_v20 = vsel %vm3609_vm3, %v11221_v19, 0.0  ;;  %v653_v31 = vld [vmem:[%s6743_s29 + $0xdc0] sm:$0xff] }
 0x5b3   : > { %v6045_v29 = vadd.f32 %v6044_v52, %v6043_v4  ;;  %v4698_v63 = vadd.f32 %v4697_v41, %v4696_v27  ;;  %v11455_v33 = vpop.f32.mrf.mxu3  ;;  %v5285_v4 = vmul.f32 %v11118_v7, %v11118_v7 }
 0x5b4   : > { %4030 = vst.msk [vmem:[%s6817_s8 + $0xd20] sm:$0xff] %vm3609_vm3, %v11455_v33 }
 0x5b5   : > { %v6047_v62 = vadd.f32 %v6046_v37, %v6045_v29  ;;  %v4700_v55 = vadd.f32 %v4699_v36, %v4698_v63  ;;  %v4709_v29 = vsel %vm3609_vm3, %v11118_v7, 0.0  ;;  %v5286_v63 = vmul.f32 %v11154_v3, %v11154_v3 }
 0x5b6   : > { %v1780_v37 = vpack.c.bf16 %v1552_v23, %v1551_v8  ;;  %v6058_v22 = vsel %vm3609_vm3, %v5285_v4, 0.0 }
 0x5b7   : > { %v6049_v49 = vadd.f32 %v6048_v26, %v6047_v62  ;;  %v4702_v35 = vadd.f32 %v4701_v46, %v4700_v55  ;;  %v4711_v62 = vsel %vm3609_vm3, %v11154_v3, 0.0  ;;  %v5287_v55 = vmul.f32 %v11185_v58, %v11185_v58 }
 0x5b8   : > { %v6060_v5 = vsel %vm3609_vm3, %v5286_v63, 0.0  ;;  %v5288_v26 = vmul.f32 %v11221_v19, %v11221_v19  ;;  %v5290_v58 = vmul.f32 %v11288_v51, %v11288_v51  ;;  %v11530_v19 = vld [vmem:[%s12276_s1] ss:$0 sm:$0xff] }
 0x5b9   : > { %v6051_v59 = vadd.f32 %v6050_v53, %v6049_v49  ;;  %v4704_v13 = vadd.f32 %v4703_v56, %v4702_v35  ;;  %v6062_v30 = vsel %vm3609_vm3, %v5287_v55, 0.0  ;;  %v5289_v49 = vmul.f32 %v11252_v45, %v11252_v45 }
 0x5ba   : > { %v6068_v4 = vsel %vm3609_vm3, %v5290_v58, 0.0 }
 0x5bb   : > { %v6053_v14 = vadd.f32 %v6052_v28, %v6051_v59  ;;  %v4706_v0 = vadd.f32 %v4705_v11, %v4704_v13  ;;  %v11489_v41 = vpop.f32.mrf.mxu3  ;;  %v654_v59 = vld [vmem:[%s6743_s29 + $0xdc8] sm:$0xff]  ;;  %v6064_v13 = vsel %vm3609_vm3, %v5288_v26, 0.0  ;;  %v4717_v28 = vsel %vm3609_vm3, %v11252_v45, 0.0 }
 0x5bc   : > { %4031 = vst.msk [vmem:[%s6817_s8 + $0xd28] sm:$0xff] %vm3609_vm3, %v11489_v41  ;;  %v1103_v11 = vmul.f32 %v11530_v19, %v653_v31  ;;  %v1104_v25 = vmul.f32 %v11530_v19, %v654_v59  ;;  %v5291_v45 = vmul.f32 %v11319_v18, %v11319_v18  ;;  %v12956_v26 = vld [vmem:[#allocation55_spill] sm:$0xff] }
 0x5bd   : > { %v6055_v27 = vadd.f32 %v6054_v47, %v6053_v14  ;;  %v4708_v52 = vadd.f32 %v4707_v54, %v4706_v0  ;;  %v6066_v14 = vsel %vm3609_vm3, %v5289_v49, 0.0  ;;  %v4719_v0 = vsel %vm3609_vm3, %v11288_v51, 0.0 }
 0x5be   : > { %v4729_v49 = vsel %vm3609_vm3, %v12956_v26, 0.0 }
 0x5bf   : > { %v6057_v50 = vadd.f32 %v6056_v15, %v6055_v27  ;;  %v4710_v36 = vadd.f32 %v4709_v29, %v4708_v52  ;;  %v4721_v27 = vsel %vm3609_vm3, %v11319_v18, 0.0  ;;  %v5292_v52 = vmul.f32 %v11355_v6, %v11355_v6 }
 0x5c0   : > { %6634 = vmatmul.msk.bf16.gmra.mxu3 %vm1800_vm2, %v1780_v37  ;;  %v1553_v15 = vadd.f32 %v11480_v10, %v1103_v11  ;;  %v1554_v29 = vadd.f32 %v11480_v10, %v1104_v25  ;;  %v6070_v37 = vsel %vm3609_vm3, %v5291_v45, 0.0  ;;  %v12959_v25 = vld [vmem:[#allocation64_spill] sm:$0xff] }
 0x5c1   : > { %v6059_v60 = vadd.f32 %v6058_v22, %v6057_v50  ;;  %v4712_v7 = vadd.f32 %v4711_v62, %v4710_v36  ;;  %v4723_v50 = vsel %vm3609_vm3, %v11355_v6, 0.0  ;;  %v5293_v36 = vmul.f32 %v11386_v1, %v11386_v1  ;;  %v655_v45 = vld [vmem:[%s6743_s29 + $0xdd0] sm:$0xff] }
 0x5c2   : > { %v6072_v55 = vsel %vm3609_vm3, %v5292_v52, 0.0 }
 0x5c3   : > { %v6061_v46 = vadd.f32 %v6060_v5, %v6059_v60  ;;  %v4714_v3 = vadd.f32 %v4713_v12, %v4712_v7  ;;  %v11517_v56 = vpop.f32.mrf.mxu3  ;;  %v4725_v60 = vsel %vm3609_vm3, %v11386_v1, 0.0  ;;  %v5294_v7 = vmul.f32 %v11422_v24, %v11422_v24 }
 0x5c4   : > { %4032 = vst.msk [vmem:[%s6817_s8 + $0xd30] sm:$0xff] %vm3609_vm3, %v11517_v56  ;;  %v1781_v5 = vpack.c.bf16 %v1554_v29, %v1553_v15 }
 0x5c5   : > { %v6063_v35 = vadd.f32 %v6062_v30, %v6061_v46  ;;  %v4716_v53 = vadd.f32 %v4715_v20, %v4714_v3  ;;  %v5295_v46 = vmul.f32 %v12956_v26, %v12956_v26  ;;  %v6074_v3 = vsel %vm3609_vm3, %v5293_v36, 0.0 }
 0x5c6   : > { %v4727_v30 = vsel %vm3609_vm3, %v11422_v24, 0.0  ;;  %v6076_v58 = vsel %vm3609_vm3, %v5294_v7, 0.0 }
 0x5c7   : > { %v6065_v8 = vadd.f32 %v6064_v13, %v6063_v35  ;;  %v4718_v23 = vadd.f32 %v4717_v28, %v4716_v53  ;;  %v12957_v35 = vld [vmem:[#allocation58_spill] sm:$0xff]  ;;  %v6078_v13 = vsel %vm3609_vm3, %v5295_v46, 0.0  ;;  %v12958_v28 = vld [vmem:[#allocation61_spill] sm:$0xff] }
 0x5c8   : > { %v5296_v53 = vmul.f32 %v12957_v35, %v12957_v35  ;;  %v4731_v24 = vsel %vm3609_vm3, %v12957_v35, 0.0  ;;  %v5297_v11 = vmul.f32 %v12958_v28, %v12958_v28 }
 0x5c9   : > { %v6067_v47 = vadd.f32 %v6066_v14, %v6065_v8  ;;  %v4720_v54 = vadd.f32 %v4719_v0, %v4718_v23  ;;  %v5298_v8 = vmul.f32 %v12959_v25, %v12959_v25 }
 0x5cb   : > { %v6069_v63 = vadd.f32 %v6068_v4, %v6067_v47  ;;  %v4722_v51 = vadd.f32 %v4721_v27, %v4720_v54  ;;  %v11551_v18 = vpop.f32.mrf.mxu3  ;;  %v656_v47 = vld [vmem:[%s6743_s29 + $0xdd8] sm:$0xff]  ;;  %v6080_v54 = vsel %vm3609_vm3, %v5296_v53, 0.0  ;;  %v4733_v4 = vsel %vm3609_vm3, %v12958_v28, 0.0 }
 0x5cc   : > { %4033 = vst.msk [vmem:[%s6817_s8 + $0xd38] sm:$0xff] %vm3609_vm3, %v11551_v18  ;;  %v1105_v27 = vmul.f32 %v11530_v19, %v655_v45  ;;  %v1106_v52 = vmul.f32 %v11530_v19, %v656_v47  ;;  %v6084_v36 = vsel %vm3609_vm3, %v5298_v8, 0.0  ;;  %v12964_v8 = vld [vmem:[#allocation79_spill] sm:$0xff] }
 0x5cd   : > { %v6071_v22 = vadd.f32 %v6070_v37, %v6069_v63  ;;  %v4724_v62 = vadd.f32 %v4723_v50, %v4722_v51  ;;  %v6082_v63 = vsel %vm3609_vm3, %v5297_v11, 0.0  ;;  %v4735_v51 = vsel %vm3609_vm3, %v12959_v25, 0.0  ;;  %v12960_v37 = vld [vmem:[#allocation67_spill] sm:$0xff] }
 0x5ce   : > { %v5299_v50 = vmul.f32 %v12960_v37, %v12960_v37 }
 0x5cf   : > { %v6073_v6 = vadd.f32 %v6072_v55, %v6071_v22  ;;  %v4726_v12 = vadd.f32 %v4725_v60, %v4724_v62  ;;  %v4737_v55 = vsel %vm3609_vm3, %v12960_v37, 0.0  ;;  %v12961_v60 = vld [vmem:[#allocation70_spill] sm:$0xff] }
 0x5d0   : > { %6635 = vmatmul.msk.bf16.gmra.mxu3 %vm1800_vm2, %v1781_v5  ;;  %v5300_v7 = vmul.f32 %v12961_v60, %v12961_v60  ;;  %v1555_v5 = vadd.f32 %v11480_v10, %v1105_v27  ;;  %v6086_v46 = vsel %vm3609_vm3, %v5299_v50, 0.0  ;;  %v12967_v50 = vld [vmem:[#allocation88_spill] sm:$0xff] }
 0x5d1   : > { %v6075_v20 = vadd.f32 %v6074_v3, %v6073_v6  ;;  %v4728_v1 = vadd.f32 %v4727_v30, %v4726_v12  ;;  %v1556_v6 = vadd.f32 %v11480_v10, %v1106_v52  ;;  %v4739_v3 = vsel %vm3609_vm3, %v12961_v60, 0.0  ;;  %v12962_v30 = vld [vmem:[#allocation73_spill] sm:$0xff]  ;;  %v657_v60 = vld [vmem:[%s6743_s29 + $0xde0] sm:$0xff] }
 0x5d2   : > { %v6088_v53 = vsel %vm3609_vm3, %v5300_v7, 0.0  ;;  %v658_v7 = vld [vmem:[%s6743_s29 + $0xde8] sm:$0xff] }
 0x5d3   : > { %v4730_v31 = vadd.f32 %v4729_v49, %v4728_v1  ;;  %v6077_v59 = vadd.f32 %v6076_v58, %v6075_v20  ;;  %v11579_v0 = vpop.f32.mrf.mxu3  ;;  %v5301_v20 = vmul.f32 %v12962_v30, %v12962_v30  ;;  %v4741_v58 = vsel %vm3609_vm3, %v12962_v30, 0.0 }
 0x5d4   : > { %4034 = vst.msk [vmem:[%s6817_s8 + $0xd40] sm:$0xff] %vm3609_vm3, %v11579_v0 }
 0x5d5   : > { %v4732_v23 = vadd.f32 %v4731_v24, %v4730_v31  ;;  %v6079_v14 = vadd.f32 %v6078_v13, %v6077_v59  ;;  %v12963_v31 = vld [vmem:[#allocation76_spill] sm:$0xff]  ;;  %v1782_v13 = vpack.c.bf16 %v1556_v6, %v1555_v5  ;;  %v6090_v11 = vsel %vm3609_vm3, %v5301_v20, 0.0 }
 0x5d6   : > { %v5302_v59 = vmul.f32 %v12963_v31, %v12963_v31  ;;  %v4743_v25 = vsel %vm3609_vm3, %v12963_v31, 0.0  ;;  %v4751_v20 = vsel %vm3609_vm3, %v12967_v50, 0.0 }
 0x5d7   : > { %v4734_v15 = vadd.f32 %v4733_v4, %v4732_v23  ;;  %v6081_v29 = vadd.f32 %v6080_v54, %v6079_v14  ;;  %v5303_v23 = vmul.f32 %v12964_v8, %v12964_v8  ;;  %v4745_v54 = vsel %vm3609_vm3, %v12964_v8, 0.0  ;;  %v12965_v4 = vld [vmem:[#allocation82_spill] sm:$0xff] }
 0x5d8   : > { %v6092_v47 = vsel %vm3609_vm3, %v5302_v59, 0.0  ;;  %v5304_v27 = vmul.f32 %v12965_v4, %v12965_v4 }
 0x5d9   : > { %v4736_v22 = vadd.f32 %v4735_v51, %v4734_v15  ;;  %v6083_v62 = vadd.f32 %v6082_v63, %v6081_v29  ;;  %v6094_v29 = vsel %vm3609_vm3, %v5303_v23, 0.0  ;;  %v4747_v63 = vsel %vm3609_vm3, %v12965_v4, 0.0  ;;  %v12966_v51 = vld [vmem:[#allocation85_spill] sm:$0xff] }
 0x5da   : > { %v5305_v37 = vmul.f32 %v12966_v51, %v12966_v51  ;;  %v6096_v5 = vsel %vm3609_vm3, %v5304_v27, 0.0  ;;  %v4749_v6 = vsel %vm3609_vm3, %v12966_v51, 0.0 }
 0x5db   : > { %v4738_v12 = vadd.f32 %v4737_v55, %v4736_v22  ;;  %v6085_v26 = vadd.f32 %v6084_v36, %v6083_v62  ;;  %v11608_v35 = vpop.f32.mrf.mxu3  ;;  %v5306_v36 = vmul.f32 %v12967_v50, %v12967_v50 }
 0x5dc   : > { %4035 = vst.msk [vmem:[%s6817_s8 + $0xd48] sm:$0xff] %vm3609_vm3, %v11608_v35  ;;  %v6098_v30 = vsel %vm3609_vm3, %v5305_v37, 0.0 }
 0x5dd   : > { %v4740_v1 = vadd.f32 %v4739_v3, %v4738_v12  ;;  %v6087_v49 = vadd.f32 %v6086_v46, %v6085_v26  ;;  %v1107_v12 = vmul.f32 %v11530_v19, %v657_v60  ;;  %v1108_v26 = vmul.f32 %v11530_v19, %v658_v7 }
 0x5df   : > { %v4742_v24 = vadd.f32 %v4741_v58, %v4740_v1  ;;  %v6089_v28 = vadd.f32 %v6088_v53, %v6087_v49  ;;  %v12968_v1 = vld [vmem:[#allocation91_spill] sm:$0xff]  ;;  %v6100_v53 = vsel %vm3609_vm3, %v5306_v36, 0.0 }
 0x5e0   : > { %6636 = vmatmul.msk.bf16.gmra.mxu3 %vm1800_vm2, %v1782_v13  ;;  %v5307_v49 = vmul.f32 %v12968_v1, %v12968_v1  ;;  %v4753_v59 = vsel %vm3609_vm3, %v12968_v1, 0.0  ;;  %v12969_v13 = vld [vmem:[#allocation94_spill] sm:$0xff] }
 0x5e1   : > { %v4744_v14 = vadd.f32 %v4743_v25, %v4742_v24  ;;  %v6091_v45 = vadd.f32 %v6090_v11, %v6089_v28  ;;  %v5308_v24 = vmul.f32 %v12969_v13, %v12969_v13  ;;  %v1557_v28 = vadd.f32 %v11480_v10, %v1107_v12 }
 0x5e2   : > { %v1558_v11 = vadd.f32 %v11480_v10, %v1108_v26  ;;  %v6102_v23 = vsel %vm3609_vm3, %v5307_v49, 0.0  ;;  %v12973_v26 = vld [vmem:[#allocation106_spill] sm:$0xff]  ;;  %v12974_v49 = vld [vmem:[#allocation109_spill] sm:$0xff] }
 0x5e3   : > { %v4746_v52 = vadd.f32 %v4745_v54, %v4744_v14  ;;  %v6093_v15 = vadd.f32 %v6092_v47, %v6091_v45  ;;  %v11636_v55 = vpop.f32.mrf.mxu3  ;;  %v4755_v14 = vsel %vm3609_vm3, %v12969_v13, 0.0  ;;  %v12970_v45 = vld [vmem:[#allocation97_spill] sm:$0xff]  ;;  %v4763_v1 = vsel %vm3609_vm3, %v12973_v26, 0.0 }
 0x5e4   : > { %4036 = vst.msk [vmem:[%s6817_s8 + $0xd50] sm:$0xff] %vm3609_vm3, %v11636_v55  ;;  %v5309_v47 = vmul.f32 %v12970_v45, %v12970_v45  ;;  %v1783_v51 = vpack.c.bf16 %v1558_v11, %v1557_v28  ;;  %v659_v28 = vld [vmem:[%s6743_s29 + $0xdf0] sm:$0xff]  ;;  %v660_v11 = vld [vmem:[%s6743_s29 + $0xdf8] sm:$0xff]  ;;  %s6406_s29 = sshll.u32 %s13027_s16, 1 }
 0x5e5   : > { %v4748_v22 = vadd.f32 %v4747_v63, %v4746_v52  ;;  %v6095_v62 = vadd.f32 %v6094_v29, %v6093_v15  ;;  %v6104_v52 = vsel %vm3609_vm3, %v5308_v24, 0.0  ;;  %v4757_v15 = vsel %vm3609_vm3, %v12970_v45, 0.0  ;;  %v12971_v29 = vld [vmem:[#allocation100_spill] sm:$0xff]  ;;  %s211_s22 = scalar_lea.vmem %s12279_s4, %s6406_s29 }
 0x5e6   : > { %v5310_v63 = vmul.f32 %v12971_v29, %v12971_v29  ;;  %v6106_v36 = vsel %vm3609_vm3, %v5309_v47, 0.0 }
 0x5e7   : > { %v4750_v46 = vadd.f32 %v4749_v6, %v4748_v22  ;;  %v6097_v3 = vadd.f32 %v6096_v5, %v6095_v62  ;;  %v4759_v22 = vsel %vm3609_vm3, %v12971_v29, 0.0  ;;  %v12972_v62 = vld [vmem:[#allocation103_spill] sm:$0xff] }
 0x5e8   : > { %v5311_v60 = vmul.f32 %v12972_v62, %v12972_v62  ;;  %v6108_v6 = vsel %vm3609_vm3, %v5310_v63, 0.0  ;;  %v4761_v12 = vsel %vm3609_vm3, %v12972_v62, 0.0 }
 0x5e9   : > { %v4752_v58 = vadd.f32 %v4751_v20, %v4750_v46  ;;  %v6099_v31 = vadd.f32 %v6098_v30, %v6097_v3  ;;  %v5312_v46 = vmul.f32 %v12973_v26, %v12973_v26 }
 0x5ea   : > { %v6110_v20 = vsel %vm3609_vm3, %v5311_v60, 0.0 }
 0x5eb   : > { %v4754_v25 = vadd.f32 %v4753_v59, %v4752_v58  ;;  %v6101_v8 = vadd.f32 %v6100_v53, %v6099_v31  ;;  %v11665_v27 = vpop.f32.mrf.mxu3  ;;  %v5313_v53 = vmul.f32 %v12974_v49, %v12974_v49  ;;  %v12975_v58 = vld [vmem:[#allocation112_spill] sm:$0xff] }
 0x5ec   : > { %4037 = vst.msk [vmem:[%s6817_s8 + $0xd58] sm:$0xff] %vm3609_vm3, %v11665_v27  ;;  %v5314_v31 = vmul.f32 %v12975_v58, %v12975_v58 }
 0x5ed   : > { %v4756_v54 = vadd.f32 %v4755_v14, %v4754_v25  ;;  %v6103_v4 = vadd.f32 %v6102_v23, %v6101_v8  ;;  %v6112_v25 = vsel %vm3609_vm3, %v5312_v46, 0.0  ;;  %v4765_v8 = vsel %vm3609_vm3, %v12974_v49, 0.0 }
 0x5ee   : > { %v1109_v23 = vmul.f32 %v11530_v19, %v659_v28  ;;  %v1110_v14 = vmul.f32 %v11530_v19, %v660_v11  ;;  %v6116_v29 = vsel %vm3609_vm3, %v5314_v31, 0.0 }
 0x5ef   : > { %v4758_v37 = vadd.f32 %v4757_v15, %v4756_v54  ;;  %v6105_v50 = vadd.f32 %v6104_v52, %v6103_v4  ;;  %v6114_v54 = vsel %vm3609_vm3, %v5313_v53, 0.0  ;;  %v4767_v4 = vsel %vm3609_vm3, %v12975_v58, 0.0  ;;  %v12976_v52 = vld [vmem:[#allocation115_spill] sm:$0xff] }
 0x5f0   : > { %6637 = vmatmul.msk.bf16.gmra.mxu3 %vm1800_vm2, %v1783_v51  ;;  %v5315_v15 = vmul.f32 %v12976_v52, %v12976_v52 }
 0x5f1   : > { %v4760_v7 = vadd.f32 %v4759_v22, %v4758_v37  ;;  %v6107_v5 = vadd.f32 %v6106_v36, %v6105_v50  ;;  %v4769_v37 = vsel %vm3609_vm3, %v12976_v52, 0.0  ;;  %v12977_v50 = vld [vmem:[#allocation118_spill] sm:$0xff]  ;;  %v1559_v36 = vadd.f32 %v11480_v10, %v1109_v23 }
 0x5f2   : > { %v5316_v19 = vmul.f32 %v12977_v50, %v12977_v50  ;;  %v1560_v22 = vadd.f32 %v11480_v10, %v1110_v14  ;;  %v12979_v10 = vld [vmem:[#allocation124_spill] sm:$0xff]  ;;  %v12981_v14 = vld [vmem:[#allocation130_spill] sm:$0xff] }
 0x5f3   : > { %v4762_v3 = vadd.f32 %v4761_v12, %v4760_v7  ;;  %v6109_v30 = vadd.f32 %v6108_v6, %v6107_v5  ;;  %v11693_v24 = vpop.f32.mrf.mxu3  ;;  %v6118_v7 = vsel %vm3609_vm3, %v5315_v15, 0.0  ;;  %v4771_v5 = vsel %vm3609_vm3, %v12977_v50, 0.0  ;;  %v12978_v6 = vld [vmem:[#allocation121_spill] sm:$0xff] }
 0x5f4   : > { %4038 = vst.msk [vmem:[%s6817_s8 + $0xd60] sm:$0xff] %vm3609_vm3, %v11693_v24  ;;  %v5317_v12 = vmul.f32 %v12978_v6, %v12978_v6  ;;  %v1784_v49 = vpack.c.bf16 %v1560_v22, %v1559_v36  ;;  %v4779_v52 = vsel %vm3609_vm3, %v12981_v14, 0.0  ;;  %v12982_v15 = vld [vmem:[#allocation133_spill] sm:$0xff]  ;;  %v12983_v36 = vld [vmem:[#allocation136_spill] sm:$0xff] }
 0x5f5   : > { %v4764_v59 = vadd.f32 %v4763_v1, %v4762_v3  ;;  %v6111_v13 = vadd.f32 %v6110_v20, %v6109_v30  ;;  %v6120_v30 = vsel %vm3609_vm3, %v5316_v19, 0.0  ;;  %v4773_v20 = vsel %vm3609_vm3, %v12978_v6, 0.0  ;;  %v12984_v6 = vld [vmem:[#allocation139_spill] sm:$0xff] }
 0x5f6   : > { %v5318_v1 = vmul.f32 %v12979_v10, %v12979_v10  ;;  %v6122_v31 = vsel %vm3609_vm3, %v5317_v12, 0.0  ;;  %v4781_v19 = vsel %vm3609_vm3, %v12982_v15, 0.0  ;;  %v5322_v22 = vmul.f32 %v12983_v36, %v12983_v36 }
 0x5f7   : > { %v4766_v45 = vadd.f32 %v4765_v8, %v4764_v59  ;;  %v6113_v47 = vadd.f32 %v6112_v25, %v6111_v13  ;;  %v4775_v59 = vsel %vm3609_vm3, %v12979_v10, 0.0  ;;  %v12980_v13 = vld [vmem:[#allocation127_spill] sm:$0xff]  ;;  %v5323_v12 = vmul.f32 %v12984_v6, %v12984_v6  ;;  %v12985_v10 = vld [vmem:[#allocation142_spill] sm:$0xff] }
 0x5f8   : > { %v5319_v28 = vmul.f32 %v12980_v13, %v12980_v13  ;;  %v6124_v8 = vsel %vm3609_vm3, %v5318_v1, 0.0  ;;  %v4777_v23 = vsel %vm3609_vm3, %v12980_v13, 0.0  ;;  %v5324_v1 = vmul.f32 %v12985_v10, %v12985_v10 }
 0x5f9   : > { %v4768_v63 = vadd.f32 %v4767_v4, %v4766_v45  ;;  %v6115_v51 = vadd.f32 %v6114_v54, %v6113_v47  ;;  %v5320_v45 = vmul.f32 %v12981_v14, %v12981_v14  ;;  %v12987_v14 = vld [vmem:[#allocation144_spill] sm:$0xff] }
 0x5fa   : > { %v6126_v4 = vsel %vm3609_vm3, %v5319_v28, 0.0 }
 0x5fb   : > { %v4770_v62 = vadd.f32 %v4769_v37, %v4768_v63  ;;  %v6117_v60 = vadd.f32 %v6116_v29, %v6115_v51  ;;  %v11722_v3 = vpop.f32.mrf.mxu3  ;;  %v5321_v29 = vmul.f32 %v12982_v15, %v12982_v15  ;;  %v6128_v50 = vsel %vm3609_vm3, %v5320_v45, 0.0  ;;  %v12988_v15 = vld [vmem:[#allocation145_spill] sm:$0xff] }
 0x5fc   : > { %4039 = vst.msk [vmem:[%s6817_s8 + $0xd68] sm:$0xff] %vm3609_vm3, %v11722_v3  ;;  %v5326_v45 = vmul.f32 %v12987_v14, %v12987_v14 }
 0x5fd   : > { %v4772_v26 = vadd.f32 %v4771_v5, %v4770_v62  ;;  %v6119_v46 = vadd.f32 %v6118_v7, %v6117_v60  ;;  %v6130_v7 = vsel %vm3609_vm3, %v5321_v29, 0.0  ;;  %v4783_v5 = vsel %vm3609_vm3, %v12983_v36, 0.0  ;;  %v12989_v36 = vld [vmem:[#allocation146_spill] sm:$0xff] }
 0x5fe   : > { %v5327_v29 = vmul.f32 %v12988_v15, %v12988_v15 }
 0x5ff   : > { %v4774_v53 = vadd.f32 %v4773_v20, %v4772_v26  ;;  %v6121_v58 = vadd.f32 %v6120_v30, %v6119_v46  ;;  %v6132_v30 = vsel %vm3609_vm3, %v5322_v22, 0.0  ;;  %v4785_v20 = vsel %vm3609_vm3, %v12984_v6, 0.0  ;;  %v12990_v6 = vld [vmem:[#allocation147_spill] sm:$0xff] }
 0x600   : > { %6638 = vmatmul.msk.bf16.gmra.mxu3 %vm1800_vm2, %v1784_v49  ;;  %v5328_v22 = vmul.f32 %v12989_v36, %v12989_v36 }
 0x601   : > { %v4776_v11 = vadd.f32 %v4775_v59, %v4774_v53  ;;  %v6123_v25 = vadd.f32 %v6122_v31, %v6121_v58  ;;  %v6134_v58 = vsel %vm3609_vm3, %v5323_v12, 0.0  ;;  %v4787_v31 = vsel %vm3609_vm3, %v12985_v10, 0.0  ;;  %v12986_v59 = vld [vmem:[#allocation143_spill] sm:$0xff] }
 0x602   : > { %v5325_v13 = vmul.f32 %v12986_v59, %v12986_v59  ;;  %v5329_v12 = vmul.f32 %v12990_v6, %v12990_v6  ;;  %v4797_v10 = vsel %vm3609_vm3, %v12990_v6, 0.0 }
 0x603   : > { %v4778_v47 = vadd.f32 %v4777_v23, %v4776_v11  ;;  %v6125_v54 = vadd.f32 %v6124_v8, %v6123_v25  ;;  %v11748_v37 = vpop.f32.mrf.mxu3  ;;  %v6136_v8 = vsel %vm3609_vm3, %v5324_v1, 0.0  ;;  %v4789_v23 = vsel %vm3609_vm3, %v12986_v59, 0.0  ;;  %v12991_v1 = vld [vmem:[#allocation148_spill] sm:$0xff] }
 0x604   : > { %4040 = vst.msk [vmem:[%s6817_s8 + $0xd70] sm:$0xff] %vm3609_vm3, %v11748_v37  ;;  %v4799_v59 = vsel %vm3609_vm3, %v12991_v1, 0.0 }
 0x605   : > { %v4780_v63 = vadd.f32 %v4779_v52, %v4778_v47  ;;  %v6127_v51 = vadd.f32 %v6126_v4, %v6125_v54  ;;  %v6138_v4 = vsel %vm3609_vm3, %v5325_v13, 0.0  ;;  %v4791_v52 = vsel %vm3609_vm3, %v12987_v14, 0.0  ;;  %v12992_v13 = vld [vmem:[#allocation149_spill] sm:$0xff] }
 0x606   : > { %v4801_v14 = vsel %vm3609_vm3, %v12992_v13, 0.0 }
 0x607   : > { %v4782_v62 = vadd.f32 %v4781_v19, %v4780_v63  ;;  %v6129_v60 = vadd.f32 %v6128_v50, %v6127_v51  ;;  %v6140_v50 = vsel %vm3609_vm3, %v5326_v45, 0.0  ;;  %v4793_v19 = vsel %vm3609_vm3, %v12988_v15, 0.0  ;;  %v12993_v45 = vld [vmem:[#allocation150_spill] sm:$0xff] }
 0x608   : > { %v4803_v15 = vsel %vm3609_vm3, %v12993_v45, 0.0 }
 0x609   : > { %v4784_v26 = vadd.f32 %v4783_v5, %v4782_v62  ;;  %v6131_v46 = vadd.f32 %v6130_v7, %v6129_v60  ;;  %v6142_v7 = vsel %vm3609_vm3, %v5327_v29, 0.0  ;;  %v4795_v5 = vsel %vm3609_vm3, %v12989_v36, 0.0  ;;  %v12994_v29 = vld [vmem:[#allocation151_spill] sm:$0xff] }
 0x60b   : > { %v4786_v49 = vadd.f32 %v4785_v20, %v4784_v26  ;;  %v6133_v53 = vadd.f32 %v6132_v30, %v6131_v46  ;;  %v11773_v25 = vpop.f32.mrf.mxu3  ;;  %v6144_v20 = vsel %vm3609_vm3, %v5328_v22, 0.0  ;;  %v4805_v22 = vsel %vm3609_vm3, %v12994_v29, 0.0 }
 0x60c   : > { %4041 = vst.msk [vmem:[%s6817_s8 + $0xd78] sm:$0xff] %vm3609_vm3, %v11773_v25 }
 0x60d   : > { %v4788_v28 = vadd.f32 %v4787_v31, %v4786_v49  ;;  %v6135_v11 = vadd.f32 %v6134_v58, %v6133_v53  ;;  %v5330_v49 = vmul.f32 %v12991_v1, %v12991_v1  ;;  %v6146_v31 = vsel %vm3609_vm3, %v5329_v12, 0.0 }
 0x60f   : > { %v4790_v47 = vadd.f32 %v4789_v23, %v4788_v28  ;;  %v6137_v54 = vadd.f32 %v6136_v8, %v6135_v11  ;;  %v5331_v28 = vmul.f32 %v12992_v13, %v12992_v13  ;;  %v6148_v23 = vsel %vm3609_vm3, %v5330_v49, 0.0 }
 0x611   : > { %v4792_v63 = vadd.f32 %v4791_v52, %v4790_v47  ;;  %v6139_v51 = vadd.f32 %v6138_v4, %v6137_v54  ;;  %v5332_v47 = vmul.f32 %v12993_v45, %v12993_v45  ;;  %v6150_v52 = vsel %vm3609_vm3, %v5331_v28, 0.0 }
 0x613   : > { %v4794_v62 = vadd.f32 %v4793_v19, %v4792_v63  ;;  %v6141_v60 = vadd.f32 %v6140_v50, %v6139_v51  ;;  %v11798_v30 = vpop.f32.mrf.mxu3  ;;  %v5333_v63 = vmul.f32 %v12994_v29, %v12994_v29  ;;  %v6152_v36 = vsel %vm3609_vm3, %v5332_v47, 0.0 }
 0x614   : > { %4042 = vst.msk [vmem:[%s6817_s8 + $0xd80] sm:$0xff] %vm3609_vm3, %v11798_v30 }
 0x615   : > { %v4796_v26 = vadd.f32 %v4795_v5, %v4794_v62  ;;  %v6143_v46 = vadd.f32 %v6142_v7, %v6141_v60  ;;  %v12995_v62 = vld [vmem:[#allocation152_spill] sm:$0xff]  ;;  %v6154_v6 = vsel %vm3609_vm3, %v5333_v63, 0.0 }
 0x616   : > { %v5334_v60 = vmul.f32 %v12995_v62, %v12995_v62  ;;  %v4807_v12 = vsel %vm3609_vm3, %v12995_v62, 0.0 }
 0x617   : > { %v4798_v53 = vadd.f32 %v4797_v10, %v4796_v26  ;;  %v6145_v58 = vadd.f32 %v6144_v20, %v6143_v46  ;;  %v12996_v26 = vld [vmem:[#allocation7_spill] sm:$0xff] }
 0x618   : > { %v5335_v46 = vmul.f32 %v12996_v26, %v12996_v26  ;;  %v6156_v1 = vsel %vm3609_vm3, %v5334_v60, 0.0  ;;  %v4809_v49 = vsel %vm3609_vm3, %v12996_v26, 0.0 }
 0x619   : > { %v4800_v11 = vadd.f32 %v4799_v59, %v4798_v53  ;;  %v6147_v8 = vadd.f32 %v6146_v31, %v6145_v58  ;;  %v12997_v53 = vld [vmem:[#allocation9_spill] sm:$0xff] }
 0x61a   : > { %v5336_v58 = vmul.f32 %v12997_v53, %v12997_v53  ;;  %v6158_v13 = vsel %vm3609_vm3, %v5335_v46, 0.0  ;;  %v4811_v28 = vsel %vm3609_vm3, %v12997_v53, 0.0 }
 0x61b   : > { %v4802_v54 = vadd.f32 %v4801_v14, %v4800_v11  ;;  %v6149_v4 = vadd.f32 %v6148_v23, %v6147_v8  ;;  %v11823_v19 = vpop.f32.mrf.mxu3  ;;  %v12998_v11 = vld [vmem:[#allocation11_spill] sm:$0xff] }
 0x61c   : > { %4043 = vst.msk [vmem:[%s6817_s8 + $0xd88] sm:$0xff] %vm3609_vm3, %v11823_v19  ;;  %v5337_v8 = vmul.f32 %v12998_v11, %v12998_v11  ;;  %v6160_v47 = vsel %vm3609_vm3, %v5336_v58, 0.0 }
 0x61d   : > { %v4804_v51 = vadd.f32 %v4803_v15, %v4802_v54  ;;  %v6151_v50 = vadd.f32 %v6150_v52, %v6149_v4  ;;  %v4813_v54 = vsel %vm3609_vm3, %v12998_v11, 0.0  ;;  %v12999_v4 = vld [vmem:[#allocation13_spill] sm:$0xff] }
 0x61e   : > { %v5338_v52 = vmul.f32 %v12999_v4, %v12999_v4  ;;  %v6162_v63 = vsel %vm3609_vm3, %v5337_v8, 0.0 }
 0x61f   : > { %v4806_v7 = vadd.f32 %v4805_v22, %v4804_v51  ;;  %v6153_v5 = vadd.f32 %v6152_v36, %v6151_v50  ;;  %v4815_v51 = vsel %vm3609_vm3, %v12999_v4, 0.0  ;;  %v13000_v50 = vld [vmem:[#allocation15_spill] sm:$0xff] }
 0x620   : > { %v5339_v36 = vmul.f32 %v13000_v50, %v13000_v50  ;;  %v6164_v60 = vsel %vm3609_vm3, %v5338_v52, 0.0 }
 0x621   : > { %v4808_v20 = vadd.f32 %v4807_v12, %v4806_v7  ;;  %v6155_v10 = vadd.f32 %v6154_v6, %v6153_v5  ;;  %v4817_v7 = vsel %vm3609_vm3, %v13000_v50, 0.0  ;;  %v13001_v5 = vld [vmem:[#allocation17_spill] sm:$0xff] }
 0x622   : > { %v5340_v6 = vmul.f32 %v13001_v5, %v13001_v5  ;;  %v6166_v46 = vsel %vm3609_vm3, %v5339_v36, 0.0 }
 0x623   : > { %v4810_v31 = vadd.f32 %v4809_v49, %v4808_v20  ;;  %v6157_v59 = vadd.f32 %v6156_v1, %v6155_v10  ;;  %v11848_v45 = vpop.f32.mrf.mxu3  ;;  %v4819_v20 = vsel %vm3609_vm3, %v13001_v5, 0.0  ;;  %v13002_v10 = vld [vmem:[#allocation21_spill] sm:$0xff] }
 0x624   : > { %4044 = vst.msk [vmem:[%s6817_s8 + $0xd90] sm:$0xff] %vm3609_vm3, %v11848_v45  ;;  %v5341_v1 = vmul.f32 %v13002_v10, %v13002_v10 }
 0x625   : > { %v4812_v23 = vadd.f32 %v4811_v28, %v4810_v31  ;;  %v6159_v14 = vadd.f32 %v6158_v13, %v6157_v59  ;;  %v6168_v31 = vsel %vm3609_vm3, %v5340_v6, 0.0  ;;  %v4821_v59 = vsel %vm3609_vm3, %v13002_v10, 0.0  ;;  %v13003_v13 = vld [vmem:[#allocation25_spill] sm:$0xff] }
 0x626   : > { %v5342_v28 = vmul.f32 %v13003_v13, %v13003_v13 }
 0x627   : > { %v6161_v15 = vadd.f32 %v6160_v47, %v6159_v14  ;;  %v4814_v29 = vadd.f32 %v4813_v54, %v4812_v23  ;;  %v6170_v23 = vsel %vm3609_vm3, %v5341_v1, 0.0  ;;  %v4823_v14 = vsel %vm3609_vm3, %v13003_v13, 0.0  ;;  %v13004_v47 = vld [vmem:[#allocation29_spill] sm:$0xff] }
 0x628   : > { %v5343_v54 = vmul.f32 %v13004_v47, %v13004_v47 }
 0x629   : > { %v4816_v22 = vadd.f32 %v4815_v51, %v4814_v29  ;;  %v6163_v62 = vadd.f32 %v6162_v63, %v6161_v15  ;;  %v6172_v15 = vsel %vm3609_vm3, %v5342_v28, 0.0  ;;  %v4825_v29 = vsel %vm3609_vm3, %v13004_v47, 0.0  ;;  %v13005_v63 = vld [vmem:[#allocation33_spill] sm:$0xff] }
 0x62a   : > { %v5344_v51 = vmul.f32 %v13005_v63, %v13005_v63 }
 0x62b   : > { %v4818_v12 = vadd.f32 %v4817_v7, %v4816_v22  ;;  %v6165_v26 = vadd.f32 %v6164_v60, %v6163_v62  ;;  %v11873_v58 = vpop.f32.mrf.mxu3  ;;  %v6174_v22 = vsel %vm3609_vm3, %v5343_v54, 0.0  ;;  %v4827_v62 = vsel %vm3609_vm3, %v13005_v63, 0.0  ;;  %v13006_v60 = vld [vmem:[#allocation37_spill] sm:$0xff] }
 0x62c   : > { %4045 = vst.msk [vmem:[%s6817_s8 + $0xd98] sm:$0xff] %vm3609_vm3, %v11873_v58  ;;  %v5345_v7 = vmul.f32 %v13006_v60, %v13006_v60 }
 0x62d   : > { %v4820_v49 = vadd.f32 %v4819_v20, %v4818_v12  ;;  %v6167_v53 = vadd.f32 %v6166_v46, %v6165_v26  ;;  %v6176_v26 = vsel %vm3609_vm3, %v5344_v51, 0.0  ;;  %v4829_v46 = vsel %vm3609_vm3, %v13006_v60, 0.0  ;;  %v13007_v20 = vld [vmem:[#allocation41_spill] sm:$0xff] }
 0x62e   : > { %v5346_v10 = vmul.f32 %v13007_v20, %v13007_v20 }
 0x62f   : > { %v4822_v11 = vadd.f32 %v4821_v59, %v4820_v49  ;;  %v6169_v8 = vadd.f32 %v6168_v31, %v6167_v53  ;;  %v6178_v53 = vsel %vm3609_vm3, %v5345_v7, 0.0  ;;  %v4831_v31 = vsel %vm3609_vm3, %v13007_v20, 0.0  ;;  %v13008_v59 = vld [vmem:[#allocation45_spill] sm:$0xff] }
 0x630   : > { %v5347_v13 = vmul.f32 %v13008_v59, %v13008_v59  ;;  %v4839_v7 = vsel %vm3609_vm3, %v10443_v21, 0.0  ;;  %v5352_v20 = vmul.f32 %v10517_v17, %v10517_v17 }
 0x631   : > { %v4824_v4 = vadd.f32 %v4823_v14, %v4822_v11  ;;  %v6171_v52 = vadd.f32 %v6170_v23, %v6169_v8  ;;  %v6180_v8 = vsel %vm3609_vm3, %v5346_v10, 0.0  ;;  %v4833_v23 = vsel %vm3609_vm3, %v13008_v59, 0.0 }
 0x632   : > { %v5348_v14 = vmul.f32 %v10359_v57, %v10359_v57 }
 0x633   : > { %v4826_v50 = vadd.f32 %v4825_v29, %v4824_v4  ;;  %v6173_v36 = vadd.f32 %v6172_v15, %v6171_v52  ;;  %v11898_v12 = vpop.f32.mrf.mxu3  ;;  %v6182_v4 = vsel %vm3609_vm3, %v5347_v13, 0.0  ;;  %v4835_v52 = vsel %vm3609_vm3, %v10359_v57, 0.0 }
 0x634   : > { %4046 = vst.msk [vmem:[%s6817_s8 + $0xda0] sm:$0xff] %vm3609_vm3, %v11898_v12  ;;  %v5349_v15 = vmul.f32 %v10398_v39, %v10398_v39 }
 0x635   : > { %v4828_v5 = vadd.f32 %v4827_v62, %v4826_v50  ;;  %v6175_v6 = vadd.f32 %v6174_v22, %v6173_v36  ;;  %v6184_v50 = vsel %vm3609_vm3, %v5348_v14, 0.0  ;;  %v4837_v36 = vsel %vm3609_vm3, %v10398_v39, 0.0 }
 0x636   : > { %v5350_v22 = vmul.f32 %v10443_v21, %v10443_v21  ;;  %v6186_v60 = vsel %vm3609_vm3, %v5349_v15, 0.0  ;;  %v4843_v21 = vsel %vm3609_vm3, %v10517_v17, 0.0 }
 0x637   : > { %v4830_v1 = vadd.f32 %v4829_v46, %v4828_v5  ;;  %v6177_v49 = vadd.f32 %v6176_v26, %v6175_v6  ;;  %v5351_v5 = vmul.f32 %v10478_v38, %v10478_v38  ;;  %v4841_v46 = vsel %vm3609_vm3, %v10478_v38, 0.0 }
 0x638   : > { %v6188_v39 = vsel %vm3609_vm3, %v5350_v22, 0.0 }
 0x639   : > { %v4832_v28 = vadd.f32 %v4831_v31, %v4830_v1  ;;  %v6179_v11 = vadd.f32 %v6178_v53, %v6177_v49  ;;  %v6190_v49 = vsel %vm3609_vm3, %v5351_v5, 0.0  ;;  %v13009_v53 = vld [vmem:[#allocation47_spill] sm:$0xff]  ;;  %v13013_v5 = vld [vmem:[#allocation56_spill] sm:$0xff] }
 0x63a   : > { %v5353_v31 = vmul.f32 %v13009_v53, %v13009_v53  ;;  %v4845_v38 = vsel %vm3609_vm3, %v13009_v53, 0.0 }
 0x63b   : > { %v4834_v47 = vadd.f32 %v4833_v23, %v4832_v28  ;;  %v6181_v54 = vadd.f32 %v6180_v8, %v6179_v11  ;;  %v11923_v51 = vpop.f32.mrf.mxu3  ;;  %v6192_v11 = vsel %vm3609_vm3, %v5352_v20, 0.0  ;;  %v13010_v8 = vld [vmem:[#allocation49_spill] sm:$0xff] }
 0x63c   : > { %4047 = vst.msk [vmem:[%s6817_s8 + $0xda8] sm:$0xff] %vm3609_vm3, %v11923_v51  ;;  %v5354_v23 = vmul.f32 %v13010_v8, %v13010_v8 }
 0x63d   : > { %v4836_v29 = vadd.f32 %v4835_v52, %v4834_v47  ;;  %v6183_v63 = vadd.f32 %v6182_v4, %v6181_v54  ;;  %v6194_v47 = vsel %vm3609_vm3, %v5353_v31, 0.0  ;;  %v4847_v54 = vsel %vm3609_vm3, %v13010_v8, 0.0  ;;  %v13011_v4 = vld [vmem:[#allocation51_spill] sm:$0xff] }
 0x63e   : > { %v5355_v52 = vmul.f32 %v13011_v4, %v13011_v4 }
 0x63f   : > { %v4838_v62 = vadd.f32 %v4837_v36, %v4836_v29  ;;  %v6185_v57 = vadd.f32 %v6184_v50, %v6183_v63  ;;  %v6196_v63 = vsel %vm3609_vm3, %v5354_v23, 0.0  ;;  %v4849_v50 = vsel %vm3609_vm3, %v13011_v4, 0.0  ;;  %v13012_v36 = vld [vmem:[#allocation53_spill] sm:$0xff] }
 0x640   : > { %v5356_v22 = vmul.f32 %v13012_v36, %v13012_v36 }
 0x641   : > { %v4840_v6 = vadd.f32 %v4839_v7, %v4838_v62  ;;  %v6187_v26 = vadd.f32 %v6186_v60, %v6185_v57  ;;  %v6198_v60 = vsel %vm3609_vm3, %v5355_v52, 0.0  ;;  %v4851_v7 = vsel %vm3609_vm3, %v13012_v36, 0.0 }
 0x642   : > { %v6200_v20 = vsel %vm3609_vm3, %v5356_v22, 0.0 }
 0x643   : > { %v4842_v10 = vadd.f32 %v4841_v46, %v4840_v6  ;;  %v6189_v1 = vadd.f32 %v6188_v39, %v6187_v26  ;;  %v11948_v28 = vpop.f32.mrf.mxu3  ;;  %v5357_v6 = vmul.f32 %v13013_v5, %v13013_v5 }
 0x644   : > { %4048 = vst.msk [vmem:[%s6817_s8 + $0xdb0] sm:$0xff] %vm3609_vm3, %v11948_v28 }
 0x645   : > { %v4844_v59 = vadd.f32 %v4843_v21, %v4842_v10  ;;  %v6191_v13 = vadd.f32 %v6190_v49, %v6189_v1  ;;  %v4853_v10 = vsel %vm3609_vm3, %v13013_v5, 0.0  ;;  %v13014_v1 = vld [vmem:[#allocation59_spill] sm:$0xff]  ;;  %v6202_v31 = vsel %vm3609_vm3, %v5357_v6, 0.0 }
 0x646   : > { %v5358_v49 = vmul.f32 %v13014_v1, %v13014_v1 }
 0x647   : > { %v4846_v14 = vadd.f32 %v4845_v38, %v4844_v59  ;;  %v6193_v17 = vadd.f32 %v6192_v11, %v6191_v13  ;;  %v4855_v59 = vsel %vm3609_vm3, %v13014_v1, 0.0  ;;  %v13015_v13 = vld [vmem:[#allocation62_spill] sm:$0xff] }
 0x648   : > { %v5359_v11 = vmul.f32 %v13015_v13, %v13015_v13  ;;  %v6204_v23 = vsel %vm3609_vm3, %v5358_v49, 0.0 }
 0x649   : > { %v4848_v15 = vadd.f32 %v4847_v54, %v4846_v14  ;;  %v6195_v29 = vadd.f32 %v6194_v47, %v6193_v17  ;;  %v4857_v14 = vsel %vm3609_vm3, %v13015_v13, 0.0  ;;  %v13016_v17 = vld [vmem:[#allocation65_spill] sm:$0xff] }
 0x64a   : > { %v5360_v47 = vmul.f32 %v13016_v17, %v13016_v17  ;;  %v6206_v52 = vsel %vm3609_vm3, %v5359_v11, 0.0 }
 0x64b   : > { %v4850_v62 = vadd.f32 %v4849_v50, %v4848_v15  ;;  %v6197_v57 = vadd.f32 %v6196_v63, %v6195_v29  ;;  %v11973_v46 = vpop.f32.mrf.mxu3  ;;  %v4859_v15 = vsel %vm3609_vm3, %v13016_v17, 0.0  ;;  %v13017_v29 = vld [vmem:[#allocation68_spill] sm:$0xff] }
 0x64c   : > { %4049 = vst.msk [vmem:[%s6817_s8 + $0xdb8] sm:$0xff] %vm3609_vm3, %v11973_v46  ;;  %v5361_v63 = vmul.f32 %v13017_v29, %v13017_v29 }
 0x64d   : > { %v4852_v26 = vadd.f32 %v4851_v7, %v4850_v62  ;;  %v6199_v39 = vadd.f32 %v6198_v60, %v6197_v57  ;;  %v6208_v62 = vsel %vm3609_vm3, %v5360_v47, 0.0  ;;  %v4861_v57 = vsel %vm3609_vm3, %v13017_v29, 0.0  ;;  %v13018_v60 = vld [vmem:[#allocation71_spill] sm:$0xff] }
 0x64e   : > { %v5362_v7 = vmul.f32 %v13018_v60, %v13018_v60 }
 0x64f   : > { %v4854_v21 = vadd.f32 %v4853_v10, %v4852_v26  ;;  %v6201_v53 = vadd.f32 %v6200_v20, %v6199_v39  ;;  %v6210_v26 = vsel %vm3609_vm3, %v5361_v63, 0.0  ;;  %v4863_v39 = vsel %vm3609_vm3, %v13018_v60, 0.0  ;;  %v13019_v20 = vld [vmem:[#allocation74_spill] sm:$0xff] }
 0x650   : > { %v5363_v10 = vmul.f32 %v13019_v20, %v13019_v20 }
 0x651   : > { %v4856_v38 = vadd.f32 %v4855_v59, %v4854_v21  ;;  %v6203_v8 = vadd.f32 %v6202_v31, %v6201_v53  ;;  %v6212_v21 = vsel %vm3609_vm3, %v5362_v7, 0.0  ;;  %v4865_v53 = vsel %vm3609_vm3, %v13019_v20, 0.0  ;;  %v13020_v31 = vld [vmem:[#allocation77_spill] sm:$0xff] }
 0x652   : > { %v5364_v59 = vmul.f32 %v13020_v31, %v13020_v31 }
 0x653   : > { %v4858_v54 = vadd.f32 %v4857_v14, %v4856_v38  ;;  %v6205_v4 = vadd.f32 %v6204_v23, %v6203_v8  ;;  %v11998_v22 = vpop.f32.mrf.mxu3  ;;  %v6214_v38 = vsel %vm3609_vm3, %v5363_v10, 0.0  ;;  %v4867_v8 = vsel %vm3609_vm3, %v13020_v31, 0.0  ;;  %v13021_v23 = vld [vmem:[#allocation80_spill] sm:$0xff] }
 0x654   : > { %4050 = vst.msk [vmem:[%s6817_s8 + $0xdc0] sm:$0xff] %vm3609_vm3, %v11998_v22  ;;  %v5365_v14 = vmul.f32 %v13021_v23, %v13021_v23 }
 0x655   : > { %v4860_v50 = vadd.f32 %v4859_v15, %v4858_v54  ;;  %v6207_v36 = vadd.f32 %v6206_v52, %v6205_v4  ;;  %v6216_v4 = vsel %vm3609_vm3, %v5364_v59, 0.0  ;;  %v4869_v52 = vsel %vm3609_vm3, %v13021_v23, 0.0  ;;  %v13022_v15 = vld [vmem:[#allocation83_spill] sm:$0xff] }
 0x656   : > { %v5366_v29 = vmul.f32 %v13022_v15, %v13022_v15 }
 0x657   : > { %v4862_v5 = vadd.f32 %v4861_v57, %v4860_v50  ;;  %v6209_v6 = vadd.f32 %v6208_v62, %v6207_v36  ;;  %v6218_v36 = vsel %vm3609_vm3, %v5365_v14, 0.0  ;;  %v4871_v62 = vsel %vm3609_vm3, %v13022_v15, 0.0  ;;  %v13023_v57 = vld [vmem:[#allocation86_spill] sm:$0xff] }
 0x658   : > { %v5367_v60 = vmul.f32 %v13023_v57, %v13023_v57  ;;  %v4879_v14 = vsel %vm3609_vm3, %v11159_v2, 0.0  ;;  %v5372_v15 = vmul.f32 %v11226_v61, %v11226_v61 }
 0x659   : > { %v4864_v1 = vadd.f32 %v4863_v39, %v4862_v5  ;;  %v6211_v49 = vadd.f32 %v6210_v26, %v6209_v6  ;;  %v6220_v6 = vsel %vm3609_vm3, %v5366_v29, 0.0  ;;  %v4873_v26 = vsel %vm3609_vm3, %v13023_v57, 0.0 }
 0x65a   : > { %v5368_v39 = vmul.f32 %v11092_v42, %v11092_v42 }
 0x65b   : > { %v4866_v13 = vadd.f32 %v4865_v53, %v4864_v1  ;;  %v6213_v11 = vadd.f32 %v6212_v21, %v6211_v49  ;;  %v12023_v54 = vpop.f32.mrf.mxu3  ;;  %v6222_v1 = vsel %vm3609_vm3, %v5367_v60, 0.0  ;;  %v4875_v49 = vsel %vm3609_vm3, %v11092_v42, 0.0 }
 0x65c   : > { %4051 = vst.msk [vmem:[%s6817_s8 + $0xdc8] sm:$0xff] %vm3609_vm3, %v12023_v54  ;;  %v5369_v21 = vmul.f32 %v11125_v43, %v11125_v43 }
 0x65d   : > { %v4868_v17 = vadd.f32 %v4867_v8, %v4866_v13  ;;  %v6215_v47 = vadd.f32 %v6214_v38, %v6213_v11  ;;  %v6224_v13 = vsel %vm3609_vm3, %v5368_v39, 0.0  ;;  %v4877_v11 = vsel %vm3609_vm3, %v11125_v43, 0.0 }
 0x65e   : > { %v5370_v38 = vmul.f32 %v11159_v2, %v11159_v2  ;;  %v6226_v23 = vsel %vm3609_vm3, %v5369_v21, 0.0  ;;  %v4883_v2 = vsel %vm3609_vm3, %v11226_v61, 0.0  ;;  %v4887_v39 = vsel %vm3609_vm3, %v11293_v34, 0.0 }
 0x65f   : > { %v4870_v63 = vadd.f32 %v4869_v52, %v4868_v17  ;;  %v6217_v50 = vadd.f32 %v6216_v4, %v6215_v47  ;;  %v5371_v17 = vmul.f32 %v11192_v16, %v11192_v16  ;;  %v4881_v52 = vsel %vm3609_vm3, %v11192_v16, 0.0 }
 0x660   : > { %v6228_v43 = vsel %vm3609_vm3, %v5370_v38, 0.0  ;;  %v4885_v16 = vsel %vm3609_vm3, %v11259_v9, 0.0  ;;  %v5376_v21 = vmul.f32 %v11360_v44, %v11360_v44 }
 0x661   : > { %v4872_v7 = vadd.f32 %v4871_v62, %v4870_v63  ;;  %v6219_v5 = vadd.f32 %v6218_v36, %v6217_v50  ;;  %v6230_v50 = vsel %vm3609_vm3, %v5371_v17, 0.0  ;;  %v5373_v36 = vmul.f32 %v11259_v9, %v11259_v9 }
 0x663   : > { %v4874_v20 = vadd.f32 %v4873_v26, %v4872_v7  ;;  %v6221_v10 = vadd.f32 %v6220_v6, %v6219_v5  ;;  %v12048_v59 = vpop.f32.mrf.mxu3  ;;  %v6232_v7 = vsel %vm3609_vm3, %v5372_v15, 0.0  ;;  %v5374_v5 = vmul.f32 %v11293_v34, %v11293_v34 }
 0x664   : > { %4052 = vst.msk [vmem:[%s6817_s8 + $0xdd0] sm:$0xff] %vm3609_vm3, %v12048_v59  ;;  %v6234_v26 = vsel %vm3609_vm3, %v5373_v36, 0.0  ;;  %v4891_v34 = vsel %vm3609_vm3, %v11360_v44, 0.0 }
 0x665   : > { %v4876_v53 = vadd.f32 %v4875_v49, %v4874_v20  ;;  %v6223_v31 = vadd.f32 %v6222_v1, %v6221_v10  ;;  %v5375_v20 = vmul.f32 %v11326_v48, %v11326_v48  ;;  %v6236_v9 = vsel %vm3609_vm3, %v5374_v5, 0.0 }
 0x666   : > { %v4889_v49 = vsel %vm3609_vm3, %v11326_v48, 0.0  ;;  %v4893_v48 = vsel %vm3609_vm3, %v11393_v32, 0.0 }
 0x667   : > { %v4878_v8 = vadd.f32 %v4877_v11, %v4876_v53  ;;  %v6225_v42 = vadd.f32 %v6224_v13, %v6223_v31  ;;  %v6238_v13 = vsel %vm3609_vm3, %v5375_v20, 0.0  ;;  %v5377_v11 = vmul.f32 %v11393_v32, %v11393_v32 }
 0x668   : > { %v5383_v20 = vmul.f32 %v11579_v0, %v11579_v0 }
 0x669   : > { %v4880_v47 = vadd.f32 %v4879_v14, %v4878_v8  ;;  %v6227_v4 = vadd.f32 %v6226_v23, %v6225_v42  ;;  %v6240_v23 = vsel %vm3609_vm3, %v5376_v21, 0.0  ;;  %v5378_v14 = vmul.f32 %v11427_v40, %v11427_v40 }
 0x66b   : > { %v4882_v29 = vadd.f32 %v4881_v52, %v4880_v47  ;;  %v6229_v63 = vadd.f32 %v6228_v43, %v6227_v4  ;;  %v12073_v60 = vpop.f32.mrf.mxu3  ;;  %v6242_v47 = vsel %vm3609_vm3, %v5377_v11, 0.0  ;;  %v4895_v4 = vsel %vm3609_vm3, %v11427_v40, 0.0 }
 0x66c   : > { %4053 = vst.msk [vmem:[%s6817_s8 + $0xdd8] sm:$0xff] %vm3609_vm3, %v12073_v60  ;;  %v5379_v43 = vmul.f32 %v11455_v33, %v11455_v33  ;;  %v6244_v32 = vsel %vm3609_vm3, %v5378_v14, 0.0  ;;  %v4899_v40 = vsel %vm3609_vm3, %v11489_v41, 0.0 }
 0x66d   : > { %v4884_v62 = vadd.f32 %v4883_v2, %v4882_v29  ;;  %v6231_v57 = vadd.f32 %v6230_v50, %v6229_v63  ;;  %v4897_v29 = vsel %vm3609_vm3, %v11455_v33, 0.0  ;;  %v5380_v63 = vmul.f32 %v11489_v41, %v11489_v41 }
 0x66e   : > { %v6246_v36 = vsel %vm3609_vm3, %v5379_v43, 0.0  ;;  %v4901_v33 = vsel %vm3609_vm3, %v11517_v56, 0.0  ;;  %v4913_v43 = vsel %vm3609_vm3, %v11693_v24, 0.0 }
 0x66f   : > { %v4886_v6 = vadd.f32 %v4885_v16, %v4884_v62  ;;  %v6233_v61 = vadd.f32 %v6232_v7, %v6231_v57  ;;  %v5381_v62 = vmul.f32 %v11517_v56, %v11517_v56  ;;  %v6248_v5 = vsel %vm3609_vm3, %v5380_v63, 0.0 }
 0x670   : > { %v5389_v63 = vmul.f32 %v11748_v37, %v11748_v37 }
 0x671   : > { %v4888_v10 = vadd.f32 %v4887_v39, %v4886_v6  ;;  %v6235_v1 = vadd.f32 %v6234_v26, %v6233_v61  ;;  %v5382_v6 = vmul.f32 %v11551_v18, %v11551_v18  ;;  %v6250_v26 = vsel %vm3609_vm3, %v5381_v62, 0.0 }
 0x672   : > { %v4903_v39 = vsel %vm3609_vm3, %v11551_v18, 0.0  ;;  %v4907_v18 = vsel %vm3609_vm3, %v11608_v35, 0.0  ;;  %v5390_v62 = vmul.f32 %v11773_v25, %v11773_v25 }
 0x673   : > { %v4890_v53 = vadd.f32 %v4889_v49, %v4888_v10  ;;  %v6237_v31 = vadd.f32 %v6236_v9, %v6235_v1  ;;  %v12098_v42 = vpop.f32.mrf.mxu3  ;;  %v6252_v56 = vsel %vm3609_vm3, %v5382_v6, 0.0  ;;  %v4905_v9 = vsel %vm3609_vm3, %v11579_v0, 0.0 }
 0x674   : > { %4054 = vst.msk [vmem:[%s6817_s8 + $0xde0] sm:$0xff] %vm3609_vm3, %v12098_v42  ;;  %v5384_v49 = vmul.f32 %v11608_v35, %v11608_v35  ;;  %v4909_v0 = vsel %vm3609_vm3, %v11636_v55, 0.0 }
 0x675   : > { %v4892_v38 = vadd.f32 %v4891_v34, %v4890_v53  ;;  %v6239_v8 = vadd.f32 %v6238_v13, %v6237_v31  ;;  %v6254_v31 = vsel %vm3609_vm3, %v5383_v20, 0.0  ;;  %v5385_v13 = vmul.f32 %v11636_v55, %v11636_v55 }
 0x677   : > { %v4894_v17 = vadd.f32 %v4893_v48, %v4892_v38  ;;  %v6241_v44 = vadd.f32 %v6240_v23, %v6239_v8  ;;  %v6256_v8 = vsel %vm3609_vm3, %v5384_v49, 0.0  ;;  %v5386_v23 = vmul.f32 %v11665_v27, %v11665_v27 }
 0x678   : > { %v6258_v14 = vsel %vm3609_vm3, %v5385_v13, 0.0  ;;  %v5395_v13 = vmul.f32 %v11898_v12, %v11898_v12 }
 0x679   : > { %v4896_v52 = vadd.f32 %v4895_v4, %v4894_v17  ;;  %v6243_v15 = vadd.f32 %v6242_v47, %v6241_v44  ;;  %v4911_v17 = vsel %vm3609_vm3, %v11665_v27, 0.0  ;;  %v5387_v44 = vmul.f32 %v11693_v24, %v11693_v24 }
 0x67a   : > { %v6260_v55 = vsel %vm3609_vm3, %v5386_v23, 0.0  ;;  %v4915_v27 = vsel %vm3609_vm3, %v11722_v3, 0.0  ;;  %v4917_v24 = vsel %vm3609_vm3, %v11748_v37, 0.0  ;;  %v6268_v37 = vsel %vm3609_vm3, %v5390_v62, 0.0 }
 0x67b   : > { %v4898_v50 = vadd.f32 %v4897_v29, %v4896_v52  ;;  %v6245_v2 = vadd.f32 %v6244_v32, %v6243_v15  ;;  %v12123_v16 = vpop.f32.mrf.mxu3  ;;  %v5388_v52 = vmul.f32 %v11722_v3, %v11722_v3  ;;  %v6262_v29 = vsel %vm3609_vm3, %v5387_v44, 0.0 }
 0x67c   : > { %4055 = vst.msk [vmem:[%s6817_s8 + $0xde8] sm:$0xff] %vm3609_vm3, %v12123_v16 }
 0x67d   : > { %v6247_v57 = vadd.f32 %v6246_v36, %v6245_v2  ;;  %v4900_v7 = vadd.f32 %v4899_v40, %v4898_v50  ;;  %v6264_v40 = vsel %vm3609_vm3, %v5388_v52, 0.0 }
 0x67f   : > { %v4902_v61 = vadd.f32 %v4901_v33, %v4900_v7  ;;  %v6249_v41 = vadd.f32 %v6248_v5, %v6247_v57  ;;  %v6266_v7 = vsel %vm3609_vm3, %v5389_v63, 0.0  ;;  %v4919_v5 = vsel %vm3609_vm3, %v11773_v25, 0.0 }
 0x680   : > { %v5391_v33 = vmul.f32 %v11798_v30, %v11798_v30  ;;  %v4923_v25 = vsel %vm3609_vm3, %v11823_v19, 0.0  ;;  %v5400_v63 = vmul.f32 %v12023_v54, %v12023_v54 }
 0x681   : > { %v6251_v10 = vadd.f32 %v6250_v26, %v6249_v41  ;;  %v4904_v1 = vadd.f32 %v4903_v39, %v4902_v61  ;;  %v4921_v41 = vsel %vm3609_vm3, %v11798_v30, 0.0  ;;  %v5392_v26 = vmul.f32 %v11823_v19, %v11823_v19 }
 0x682   : > { %v4925_v30 = vsel %vm3609_vm3, %v11848_v45, 0.0  ;;  %v4927_v19 = vsel %vm3609_vm3, %v11873_v58, 0.0 }
 0x683   : > { %v4906_v21 = vadd.f32 %v4905_v9, %v4904_v1  ;;  %v6253_v53 = vadd.f32 %v6252_v56, %v6251_v10  ;;  %v12148_v38 = vpop.f32.mrf.mxu3  ;;  %v6270_v10 = vsel %vm3609_vm3, %v5391_v33, 0.0  ;;  %v5393_v1 = vmul.f32 %v11848_v45, %v11848_v45 }
 0x684   : > { %4056 = vst.msk [vmem:[%s6817_s8 + $0xdf0] sm:$0xff] %vm3609_vm3, %v12148_v38  ;;  %v6272_v49 = vsel %vm3609_vm3, %v5392_v26, 0.0  ;;  %v4929_v45 = vsel %vm3609_vm3, %v11898_v12, 0.0  ;;  %v4933_v12 = vsel %vm3609_vm3, %v11948_v28, 0.0 }
 0x685   : > { %v6255_v34 = vadd.f32 %v6254_v31, %v6253_v53  ;;  %v4908_v11 = vadd.f32 %v4907_v18, %v4906_v21  ;;  %v5394_v21 = vmul.f32 %v11873_v58, %v11873_v58  ;;  %v6274_v18 = vsel %vm3609_vm3, %v5393_v1, 0.0 }
 0x686   : > { %v4931_v58 = vsel %vm3609_vm3, %v11923_v51, 0.0  ;;  %v5405_v1 = vmul.f32 %v12148_v38, %v12148_v38 }
 0x687   : > { %v6257_v48 = vadd.f32 %v6256_v8, %v6255_v34  ;;  %v4910_v35 = vadd.f32 %v4909_v0, %v4908_v11  ;;  %v6276_v8 = vsel %vm3609_vm3, %v5394_v21, 0.0  ;;  %v5396_v0 = vmul.f32 %v11923_v51, %v11923_v51 }
 0x688   : > { %v4935_v51 = vsel %vm3609_vm3, %v11973_v46, 0.0 }
 0x689   : > { %v6259_v47 = vadd.f32 %v6258_v14, %v6257_v48  ;;  %v4912_v4 = vadd.f32 %v4911_v17, %v4910_v35  ;;  %v6278_v35 = vsel %vm3609_vm3, %v5395_v13, 0.0  ;;  %v5397_v14 = vmul.f32 %v11948_v28, %v11948_v28 }
 0x68a   : > { %v4937_v28 = vsel %vm3609_vm3, %v11998_v22, 0.0 }
 0x68b   : > { %v6261_v15 = vadd.f32 %v6260_v55, %v6259_v47  ;;  %v4914_v32 = vadd.f32 %v4913_v43, %v4912_v4  ;;  %v12173_v36 = vpop.f32.mrf.mxu3  ;;  %v6280_v47 = vsel %vm3609_vm3, %v5396_v0, 0.0  ;;  %v5398_v4 = vmul.f32 %v11973_v46, %v11973_v46 }
 0x68c   : > { %4057 = vst.msk [vmem:[%s6817_s8 + $0xdf8] sm:$0xff] %vm3609_vm3, %v12173_v36  ;;  %v6282_v52 = vsel %vm3609_vm3, %v5397_v14, 0.0  ;;  %v4939_v46 = vsel %vm3609_vm3, %v12023_v54, 0.0  ;;  %v4943_v54 = vsel %vm3609_vm3, %v12073_v60, 0.0 }
 0x68d   : > { %v6263_v50 = vadd.f32 %v6262_v29, %v6261_v15  ;;  %v4916_v2 = vadd.f32 %v4915_v27, %v4914_v32  ;;  %v5399_v15 = vmul.f32 %v11998_v22, %v11998_v22  ;;  %v6284_v27 = vsel %vm3609_vm3, %v5398_v4, 0.0 }
 0x68e   : > { %v4941_v22 = vsel %vm3609_vm3, %v12048_v59, 0.0 }
 0x68f   : > { %v6265_v57 = vadd.f32 %v6264_v40, %v6263_v50  ;;  %v4918_v3 = vadd.f32 %v4917_v24, %v4916_v2  ;;  %v6286_v40 = vsel %vm3609_vm3, %v5399_v15, 0.0  ;;  %v5401_v24 = vmul.f32 %v12048_v59, %v12048_v59 }
 0x690   : > { %v4945_v59 = vsel %vm3609_vm3, %v12098_v42, 0.0 }
 0x691   : > { %v6267_v6 = vadd.f32 %v6266_v7, %v6265_v57  ;;  %v4920_v61 = vadd.f32 %v4919_v5, %v4918_v3  ;;  %v6288_v3 = vsel %vm3609_vm3, %v5400_v63, 0.0  ;;  %v5402_v7 = vmul.f32 %v12073_v60, %v12073_v60 }
 0x692   : > { %v4947_v60 = vsel %vm3609_vm3, %v12123_v16, 0.0 }
 0x693   : > { %v6269_v39 = vadd.f32 %v6268_v37, %v6267_v6  ;;  %v4922_v20 = vadd.f32 %v4921_v41, %v4920_v61  ;;  %v6290_v6 = vsel %vm3609_vm3, %v5401_v24, 0.0  ;;  %v5403_v61 = vmul.f32 %v12098_v42, %v12098_v42 }
 0x694   : > { %v6292_v26 = vsel %vm3609_vm3, %v5402_v7, 0.0  ;;  %v4949_v42 = vsel %vm3609_vm3, %v12148_v38, 0.0 }
 0x695   : > { %v6271_v56 = vadd.f32 %v6270_v10, %v6269_v39  ;;  %v4924_v9 = vadd.f32 %v4923_v25, %v4922_v20  ;;  %v5404_v39 = vmul.f32 %v12123_v16, %v12123_v16  ;;  %v6294_v25 = vsel %vm3609_vm3, %v5403_v61, 0.0 }
 0x696   : > { %v4951_v16 = vsel %vm3609_vm3, %v12173_v36, 0.0 }
 0x697   : > { %v6273_v53 = vadd.f32 %v6272_v49, %v6271_v56  ;;  %v4926_v31 = vadd.f32 %v4925_v30, %v4924_v9  ;;  %v6296_v49 = vsel %vm3609_vm3, %v5404_v39, 0.0  ;;  %v5406_v30 = vmul.f32 %v12173_v36, %v12173_v36 }
 0x699   : > { %v6275_v34 = vadd.f32 %v6274_v18, %v6273_v53  ;;  %v4928_v11 = vadd.f32 %v4927_v19, %v4926_v31  ;;  %v6298_v31 = vsel %vm3609_vm3, %v5405_v1, 0.0  ;;  %v6300_v13 = vsel %vm3609_vm3, %v5406_v30, 0.0 }
 0x69b   : > { %v6277_v23 = vadd.f32 %v6276_v8, %v6275_v34  ;;  %v4930_v48 = vadd.f32 %v4929_v45, %v4928_v11 }
 0x69d   : > { %v6279_v17 = vadd.f32 %v6278_v35, %v6277_v23  ;;  %v4932_v44 = vadd.f32 %v4931_v58, %v4930_v48 }
 0x69f   : > { %v6281_v55 = vadd.f32 %v6280_v47, %v6279_v17  ;;  %v4934_v43 = vadd.f32 %v4933_v12, %v4932_v44 }
 0x6a1   : > { %v6283_v32 = vadd.f32 %v6282_v52, %v6281_v55  ;;  %v4936_v29 = vadd.f32 %v4935_v51, %v4934_v43 }
 0x6a3   : > { %v6285_v50 = vadd.f32 %v6284_v27, %v6283_v32  ;;  %v4938_v2 = vadd.f32 %v4937_v28, %v4936_v29 }
 0x6a5   : > { %v6287_v62 = vadd.f32 %v6286_v40, %v6285_v50  ;;  %v4940_v57 = vadd.f32 %v4939_v46, %v4938_v2 }
 0x6a7   : > { %v6289_v5 = vadd.f32 %v6288_v3, %v6287_v62  ;;  %v4942_v33 = vadd.f32 %v4941_v22, %v4940_v57 }
 0x6a9   : > { %v6291_v37 = vadd.f32 %v6290_v6, %v6289_v5  ;;  %v4944_v41 = vadd.f32 %v4943_v54, %v4942_v33 }
 0x6ab   : > { %v6293_v20 = vadd.f32 %v6292_v26, %v6291_v37  ;;  %v4946_v10 = vadd.f32 %v4945_v59, %v4944_v41 }
 0x6ad   : > { %v6295_v56 = vadd.f32 %v6294_v25, %v6293_v20  ;;  %v4948_v9 = vadd.f32 %v4947_v60, %v4946_v10 }
 0x6af   : > { %v6297_v21 = vadd.f32 %v6296_v49, %v6295_v56  ;;  %v4950_v53 = vadd.f32 %v4949_v42, %v4948_v9 }
 0x6b1   : > { %v6299_v18 = vadd.f32 %v6298_v31, %v6297_v21  ;;  %v4952_v19 = vadd.f32 %v4951_v16, %v4950_v53 }
 0x6b3   : > { %v4953_v34 = vrot.slane %v4952_v19, 4  ;;  %v6301_v11 = vadd.f32 %v6300_v13, %v6299_v18 }
 0x6b5   : > { %v4954_v8 = vadd.f32 %v4953_v34, %v4952_v19  ;;  %v6302_v38 = vrot.slane %v6301_v11, 4 }
 0x6b7   : > { %v4955_v45 = vrot.slane %v4954_v8, 2  ;;  %v6303_v0 = vadd.f32 %v6302_v38, %v6301_v11 }
 0x6b9   : > { %v4956_v23 = vadd.f32 %v4955_v45, %v4954_v8  ;;  %v6304_v48 = vrot.slane %v6303_v0, 2 }
 0x6bb   : > { %v4957_v35 = vrot.slane %v4956_v23, 1  ;;  %v6305_v58 = vadd.f32 %v6304_v48, %v6303_v0 }
 0x6bd   : > { %v6306_v14 = vrot.slane %v6305_v58, 1  ;;  %v4958_v36 = vadd.f32 %v4957_v35, %v4956_v23 }
 0x6bf   : > { %v6307_v17 = vadd.f32 %v6306_v14, %v6305_v58 }
 0x6c1   : > { %v6309_v44 = vsel %vm6308_vm4, %v4958_v36, %v6307_v17 }
 0x6c2   : > { %6311 = vst.msk [vmem:[%s211_s22] sm:$0x3] %vm6310_vm5, %v6309_v44 }
 0x6c3 PF: > { %s15_s15 = sadd.s32 1, %s6682_s15  }
 0x6c4   : > { %p12_p5 = scmp.ge.s32.totalorder %s15_s15, 9  }
 0x6c6   :  { %14 = sbr.rel (!%p12_p5) target bundleno = 1 (0x1), region = 74 }

</bundles_post_ra>
